<compile_context>
chip_gen: v6e
topology: v6e:2x2x1
jax: 0.10.0
libtpu: 0.0.40
codegen_flags: <defaults>
</compile_context>

<pallas_src>
import functools
import math

import jax
import jax.numpy as jnp
from jax import lax
from jax.experimental import pallas as pl
from jax.experimental.pallas import tpu as pltpu

# ----------------------------- module hyper-params -----------------------------
BATCH = 2
FEATURE_MAX_LEN = 20
D_MODEL = 32
TGT_MAX_LEN = 8
TGT_VOCAB_SIZE = 40


def get_feature_size(input_size, kernel_size, padding=0, stride=1):
    temp = math.floor((input_size - kernel_size + 2 * padding) / stride) + 1
    return temp if temp > 1 else 1


def _chain3(n):
    for _ in range(3):
        n = get_feature_size(n, 5)
    return n


LENGTH = _chain3(FEATURE_MAX_LEN)   # get_length() -> 8
WIDTH = _chain3(D_MODEL)            # get_width()  -> 20

H0, W0 = FEATURE_MAX_LEN, D_MODEL   # 20, 32 (W0 is also the fixed 32-lane row stride)
H1, H2, H3 = H0 - 4, H0 - 8, H0 - 12        # 16, 12, 8
C1, C2, C3 = 16, 32, 64

ROWS = BATCH * TGT_MAX_LEN          # 16 output rows (b, t)

# lane widths of the flat activations (batch merged, 32 lanes per spatial row)
N0 = BATCH * H0 * W0                # 1280
N1 = BATCH * H1 * W0                # 1024
N2 = BATCH * H2 * W0                # 768
N3 = BATCH * H3 * W0                # 512
A0_LANES = N0 + 128                 # 1408  (tap reads run 132 lanes past the data)
A1_LANES = N1 + 128                 # 1152
A2_LANES = N2 + 128                 # 896

TAPS = [(ki, kj) for ki in range(5) for kj in range(5)]


# --------------------------------- Pallas kernel --------------------------------
def _cnn_kernel(
    scal_ref,                                   # (8,) f32 in SMEM
    enc_ref, ids_ref,
    w1_ref, b1_ref, w2_ref, b2_ref, w3_ref, b3_ref, w4_ref,
    wl2_ref, bl2_ref, wl1_ref, bl1_ref, emb_ref,
    d1w_ref, d1b_ref, d2w_ref, d2b_ref, d3w_ref, d3b_ref, d4w_ref,
    proj_ref,
    out_ref,
    slab1, a1, slab2, a2, slab3, a3, e_s, flat_s, dec_s,
):
    """Whole CNN forward (both batch elements) in one grid step."""
    f32 = jnp.float32
    relu = lambda v: jnp.maximum(v, 0.0)
    dot = functools.partial(jnp.dot, preferred_element_type=f32)

    # scalars from SMEM: [b4, d4b, m0, m1, mb, 0, 0, 0]
    b4 = scal_ref[0]
    d4b = scal_ref[1]
    m0 = scal_ref[2]
    m1 = scal_ref[3]
    mb = scal_ref[4]

    # Zero the lane tails that tap reads may run into, and the unused slab1 rows.
    a1[:, N1:A1_LANES] = jnp.zeros((C1, A1_LANES - N1), f32)
    a2[:, N2:A2_LANES] = jnp.zeros((C2, A2_LANES - N2), f32)
    slab1[24:32, :] = jnp.zeros((8, N1), f32)       # rows 25..31 stay zero (K pad)

    # ---------------- encoder branch: Conv1 (3 x 5x5 conv, each = 1 matmul) -------
    # Layer 1: 1 -> 16.  slab1[tap, b*512 + h*32 + w] = enc[b, h+ki, w+kj]
    for t, (ki, kj) in enumerate(TAPS):
        s = ki * W0 + kj
        for b in range(BATCH):
            src = b * H0 * W0 + s
            slab1[t:t + 1, b * H1 * W0:(b + 1) * H1 * W0] = \
                enc_ref[:, src:src + H1 * W0]
    a1[:, 0:N1] = relu(dot(w1_ref[...], slab1[...]) + b1_ref[...])      # (16, 1024)

    # Layer 2: 16 -> 32.
    for t, (ki, kj) in enumerate(TAPS):
        s = ki * W0 + kj
        for b in range(BATCH):
            src = b * H1 * W0 + s
            slab2[t * C1:(t + 1) * C1, b * H2 * W0:(b + 1) * H2 * W0] = \
                a1[:, src:src + H2 * W0]
    a2[:, 0:N2] = relu(dot(w2_ref[...], slab2[...]) + b2_ref[...])      # (32, 768)

    # Layer 3: 32 -> 64.
    for t, (ki, kj) in enumerate(TAPS):
        s = ki * W0 + kj
        for b in range(BATCH):
            src = b * H2 * W0 + s
            slab3[t * C2:(t + 1) * C2, b * H3 * W0:(b + 1) * H3 * W0] = \
                a2[:, src:src + H3 * W0]
    a3[...] = relu(dot(w3_ref[...], slab3[...]) + b3_ref[...])          # (64, 512)

    # 1x1 conv 64 -> 1 + ReLU, hoisted to a single matmul over the whole grid.
    e0 = relu(dot(w4_ref[...], a3[...]) + b4)                           # (1, 512)

    # Gather the (b, h) rows into (16, 32); cols >= WIDTH are garbage but are
    # zeroed out by the zero-padded Linear2 weight rows.
    for r in range(ROWS):
        e_s[r:r + 1, :] = e0[:, r * W0:(r + 1) * W0]

    # Linear2 (20 -> 32, weight rows >= 20 are zero) then Linear1 with both
    # transposes folded in and both batches handled by a block-diagonal weight.
    e1 = dot(e_s[...], wl2_ref[...]) + bl2_ref[...]                     # (16, 32)
    enc_all = dot(wl1_ref[...], e1) + bl1_ref[...]                      # (16, 32)

    # ---------------- decoder branch: embedding -> Conv2 (1x1 stack, batched) -----
    iota = lax.broadcasted_iota(jnp.int32, (ROWS, TGT_VOCAB_SIZE), 1)
    onehot = (ids_ref[...] == iota).astype(f32)                         # (16, 40)
    demb = dot(onehot, emb_ref[...])                                    # (16, 32)

    # Flatten tokens into the lane dim: one (1, 512) "pixel" row for the 1x1 stack.
    for r in range(ROWS):
        flat_s[0:1, r * D_MODEL:(r + 1) * D_MODEL] = demb[r:r + 1, :]
    x = flat_s[...]                                                     # (1, 512)
    c1 = relu(d1w_ref[...] * x + d1b_ref[...])                          # (16, 512)
    c2 = relu(dot(d2w_ref[...], c1) + d2b_ref[...])                     # (32, 512)
    c3 = relu(dot(d3w_ref[...], c2) + d3b_ref[...])                     # (64, 512)
    dec_flat = relu(dot(d4w_ref[...], c3) + d4b)                        # (1, 512)
    for r in range(ROWS):
        dec_s[r:r + 1, :] = dec_flat[:, r * D_MODEL:(r + 1) * D_MODEL]

    # ---------------- Conv3 merge (1x1, 2ch -> 1ch, scalars from SMEM) + proj ------
    merged = m0 * enc_all + m1 * dec_s[...] + mb                        # (16, 32)
    out_ref[...] = dot(merged, proj_ref[...])                           # (16, 40)


# ------------------------------------ wrapper ------------------------------------
def cnn_forward(params, enc_inputs, dec_inputs):
    f32 = jnp.float32
    B = enc_inputs.shape[0]

    # ---- wrapper-side layout plumbing (cheap XLA ops, no compute hoisting) ----
    enc_flat = enc_inputs.astype(f32).reshape(1, B * H0 * W0)           # (1, 1280)
    enc_flat = jnp.pad(enc_flat, ((0, 0), (0, A0_LANES - B * H0 * W0))) # (1, 1408)
    ids = dec_inputs.reshape(ROWS, 1).astype(jnp.int32)                 # (16, 1)

    w1p = jnp.pad(params["w1"], ((0, 0), (0, 32 - 25)))                 # (16, 32)
    # Linear2: stored (in=20, out=32), zero-padded to 32 rows so the garbage
    # columns 20..31 of the gathered conv rows contribute nothing.
    wl2p = jnp.zeros((D_MODEL, D_MODEL), f32).at[:WIDTH, :].set(params["wl2"])
    # Linear1 (8 -> 8), block-diagonal over the batch so one matmul handles both.
    wl1blk = jnp.zeros((ROWS, ROWS), f32)
    for b in range(B):
        r0 = b * TGT_MAX_LEN
        wl1blk = wl1blk.at[r0:r0 + TGT_MAX_LEN, r0:r0 + TGT_MAX_LEN].set(params["wl1"])
    bl1t = jnp.tile(params["bl1"], (B, 1))                              # (16, 1)

    # (1,1) scalars packed into a single SMEM array: [b4, d4b, m0, m1, mb, 0, 0, 0]
    scalars = jnp.concatenate([
        params["b4"].reshape(-1), params["d4b"].reshape(-1),
        params["m0"].reshape(-1), params["m1"].reshape(-1),
        params["mb"].reshape(-1), jnp.zeros((3,), f32)])                # (8,)

    inputs = [
        scalars, enc_flat, ids,
        w1p, params["b1"], params["w2"], params["b2"], params["w3"], params["b3"],
        params["w4"],
        wl2p, params["bl2"], wl1blk, bl1t, params["emb"],
        params["d1w"], params["d1b"], params["d2w"], params["d2b"],
        params["d3w"], params["d3b"], params["d4w"],
        params["proj"],
    ]

    def vspec(x):
        nd = x.ndim
        return pl.BlockSpec(x.shape, lambda i, nd=nd: (0,) * nd)

    in_specs = ([pl.BlockSpec(memory_space=pltpu.MemorySpace.SMEM)]
                + [vspec(x) for x in inputs[1:]])

    # TODO(synk): on v7x the second TensorCore stays idle; a per-batch "parallel"
    # grid split of the encoder branch could recover part of it (measure first).
    return pl.pallas_call(
        _cnn_kernel,
        out_shape=jax.ShapeDtypeStruct((ROWS, TGT_VOCAB_SIZE), f32),
        grid=(1,),
        in_specs=in_specs,
        out_specs=pl.BlockSpec((ROWS, TGT_VOCAB_SIZE), lambda i: (0, 0)),
        scratch_shapes=[
            pltpu.VMEM((32, N1), f32),           # slab1: layer-1 patches (K padded 25->32)
            pltpu.VMEM((C1, A1_LANES), f32),     # a1:    (16, 1152)
            pltpu.VMEM((25 * C1, N2), f32),      # slab2: (400, 768)
            pltpu.VMEM((C2, A2_LANES), f32),     # a2:    (32, 896)
            pltpu.VMEM((25 * C2, N3), f32),      # slab3: (800, 512)
            pltpu.VMEM((C3, N3), f32),           # a3:    (64, 512)
            pltpu.VMEM((ROWS, D_MODEL), f32),    # e_s:   gathered conv rows
            pltpu.VMEM((1, ROWS * D_MODEL), f32),  # flat_s: decoder pixels (1, 512)
            pltpu.VMEM((ROWS, D_MODEL), f32),    # dec_s: decoder rows
        ],
        compiler_params=pltpu.CompilerParams(dimension_semantics=("arbitrary",)),
    )(*inputs)


# ------------------------------------ params -------------------------------------
def _uniform(key, shape, fan_in):
    bound = 1.0 / math.sqrt(fan_in)
    return jax.random.uniform(key, shape, jnp.float32, -bound, bound)


def init_params(key):
    keys = iter(jax.random.split(key, 32))

    def u(shape, fan_in):
        return _uniform(next(keys), shape, fan_in)

    p = {}
    # Conv1 5x5 stack, stored (C_out, 25*C_in) tap-major / c_in-minor.
    # (If real PyTorch (C_out, C_in, 5, 5) weights are loaded they must be
    #  permuted to (C_out, kh, kw, C_in) before flattening.)
    p["w1"] = u((C1, 25), 25);            p["b1"] = u((C1, 1), 25)
    p["w2"] = u((C2, 25 * C1), 25 * C1);  p["b2"] = u((C2, 1), 25 * C1)
    p["w3"] = u((C3, 25 * C2), 25 * C2);  p["b3"] = u((C3, 1), 25 * C2)
    # Conv1 tail: 1x1 conv 64 -> 1 (+ReLU per the Sequential)
    p["w4"] = u((1, C3), C3);             p["b4"] = u((1, 1), C3)
    # Linear2 (WIDTH -> d_model) stored (in, out); Linear1 (LENGTH -> tgt_max_len)
    # stored (out, in) so the two transposes fold into a left-multiply.
    p["wl2"] = u((WIDTH, D_MODEL), WIDTH);         p["bl2"] = u((1, D_MODEL), WIDTH)
    p["wl1"] = u((TGT_MAX_LEN, LENGTH), LENGTH);   p["bl1"] = u((TGT_MAX_LEN, 1), LENGTH)
    # Embedding table
    p["emb"] = jax.random.normal(next(keys), (TGT_VOCAB_SIZE, D_MODEL), jnp.float32)
    # Conv2: 1x1 convs 1->16->32->64->1 (+ReLU after each), stored (C_out, C_in).
    p["d1w"] = u((16, 1), 1);    p["d1b"] = u((16, 1), 1)
    p["d2w"] = u((32, 16), 16);  p["d2b"] = u((32, 1), 16)
    p["d3w"] = u((64, 32), 32);  p["d3b"] = u((64, 1), 32)
    p["d4w"] = u((1, 64), 64);   p["d4b"] = u((1, 1), 64)
    # Conv3: 1x1 conv, 2 channels (enc, dec) -> 1, bias, no ReLU.
    p["m0"] = u((1, 1), 2); p["m1"] = u((1, 1), 2); p["mb"] = u((1, 1), 2)
    # Projection: Linear(d_model, tgt_vocab_size, bias=False), stored (in, out).
    p["proj"] = u((D_MODEL, TGT_VOCAB_SIZE), D_MODEL)
    return p


if __name__ == "__main__":
    key = jax.random.PRNGKey(0)
    kp, ke, kd = jax.random.split(key, 3)
    params = init_params(kp)
    enc_inputs = jax.random.normal(ke, (BATCH, FEATURE_MAX_LEN, D_MODEL), jnp.float32)
    dec_inputs = jax.random.randint(kd, (BATCH, TGT_MAX_LEN), 0, TGT_VOCAB_SIZE, jnp.int32)

    fwd = jax.jit(cnn_forward)
    out = jax.block_until_ready(fwd(params, enc_inputs, dec_inputs))
    assert out.shape == (BATCH * TGT_MAX_LEN, TGT_VOCAB_SIZE), out.shape
    assert bool(jnp.all(jnp.isfinite(out)))
    print("KERNEL_OK")
</pallas_src>

<mosaic_0001>
module attributes {stable_mosaic.version = 11 : i64} {
  func.func @_cnn_kernel(%arg0: i32, %arg1: memref<8xf32, #tpu.memory_space<smem>>, %arg2: memref<1x1408xf32, #tpu.memory_space<vmem>>, %arg3: memref<16x1xi32, #tpu.memory_space<vmem>>, %arg4: memref<16x32xf32, #tpu.memory_space<vmem>>, %arg5: memref<16x1xf32, #tpu.memory_space<vmem>>, %arg6: memref<32x400xf32, #tpu.memory_space<vmem>>, %arg7: memref<32x1xf32, #tpu.memory_space<vmem>>, %arg8: memref<64x800xf32, #tpu.memory_space<vmem>>, %arg9: memref<64x1xf32, #tpu.memory_space<vmem>>, %arg10: memref<1x64xf32, #tpu.memory_space<vmem>>, %arg11: memref<32x32xf32, #tpu.memory_space<vmem>>, %arg12: memref<1x32xf32, #tpu.memory_space<vmem>>, %arg13: memref<16x16xf32, #tpu.memory_space<vmem>>, %arg14: memref<16x1xf32, #tpu.memory_space<vmem>>, %arg15: memref<40x32xf32, #tpu.memory_space<vmem>>, %arg16: memref<16x1xf32, #tpu.memory_space<vmem>>, %arg17: memref<16x1xf32, #tpu.memory_space<vmem>>, %arg18: memref<32x16xf32, #tpu.memory_space<vmem>>, %arg19: memref<32x1xf32, #tpu.memory_space<vmem>>, %arg20: memref<64x32xf32, #tpu.memory_space<vmem>>, %arg21: memref<64x1xf32, #tpu.memory_space<vmem>>, %arg22: memref<1x64xf32, #tpu.memory_space<vmem>>, %arg23: memref<32x40xf32, #tpu.memory_space<vmem>>, %arg24: memref<16x40xf32, #tpu.memory_space<vmem>>, %arg25: memref<32x1024xf32, #tpu.memory_space<vmem>>, %arg26: memref<16x1152xf32, #tpu.memory_space<vmem>>, %arg27: memref<400x768xf32, #tpu.memory_space<vmem>>, %arg28: memref<32x896xf32, #tpu.memory_space<vmem>>, %arg29: memref<800x512xf32, #tpu.memory_space<vmem>>, %arg30: memref<64x512xf32, #tpu.memory_space<vmem>>, %arg31: memref<16x32xf32, #tpu.memory_space<vmem>>, %arg32: memref<1x512xf32, #tpu.memory_space<vmem>>, %arg33: memref<16x32xf32, #tpu.memory_space<vmem>>) attributes {dimension_semantics = [#tpu.dimension_semantics<arbitrary>], iteration_bounds = array<i64: 1>, scalar_prefetch = 0 : i64, scratch_operands = 9 : i64, tpu.core_type = #tpu.core_type<tc>, window_params = [{transform_indices = @transform_0, window_bounds = array<i64: 8>}, {pipeline_mode = #tpu.pipeline_mode<synchronous>, transform_indices = @transform_1, window_bounds = array<i64: 1, 1408>}, {pipeline_mode = #tpu.pipeline_mode<synchronous>, transform_indices = @transform_2, window_bounds = array<i64: 16, 1>}, {pipeline_mode = #tpu.pipeline_mode<synchronous>, transform_indices = @transform_3, window_bounds = array<i64: 16, 32>}, {pipeline_mode = #tpu.pipeline_mode<synchronous>, transform_indices = @transform_4, window_bounds = array<i64: 16, 1>}, {pipeline_mode = #tpu.pipeline_mode<synchronous>, transform_indices = @transform_5, window_bounds = array<i64: 32, 400>}, {pipeline_mode = #tpu.pipeline_mode<synchronous>, transform_indices = @transform_6, window_bounds = array<i64: 32, 1>}, {pipeline_mode = #tpu.pipeline_mode<synchronous>, transform_indices = @transform_7, window_bounds = array<i64: 64, 800>}, {pipeline_mode = #tpu.pipeline_mode<synchronous>, transform_indices = @transform_8, window_bounds = array<i64: 64, 1>}, {pipeline_mode = #tpu.pipeline_mode<synchronous>, transform_indices = @transform_9, window_bounds = array<i64: 1, 64>}, {pipeline_mode = #tpu.pipeline_mode<synchronous>, transform_indices = @transform_10, window_bounds = array<i64: 32, 32>}, {pipeline_mode = #tpu.pipeline_mode<synchronous>, transform_indices = @transform_11, window_bounds = array<i64: 1, 32>}, {pipeline_mode = #tpu.pipeline_mode<synchronous>, transform_indices = @transform_12, window_bounds = array<i64: 16, 16>}, {pipeline_mode = #tpu.pipeline_mode<synchronous>, transform_indices = @transform_13, window_bounds = array<i64: 16, 1>}, {pipeline_mode = #tpu.pipeline_mode<synchronous>, transform_indices = @transform_14, window_bounds = array<i64: 40, 32>}, {pipeline_mode = #tpu.pipeline_mode<synchronous>, transform_indices = @transform_15, window_bounds = array<i64: 16, 1>}, {pipeline_mode = #tpu.pipeline_mode<synchronous>, transform_indices = @transform_16, window_bounds = array<i64: 16, 1>}, {pipeline_mode = #tpu.pipeline_mode<synchronous>, transform_indices = @transform_17, window_bounds = array<i64: 32, 16>}, {pipeline_mode = #tpu.pipeline_mode<synchronous>, transform_indices = @transform_18, window_bounds = array<i64: 32, 1>}, {pipeline_mode = #tpu.pipeline_mode<synchronous>, transform_indices = @transform_19, window_bounds = array<i64: 64, 32>}, {pipeline_mode = #tpu.pipeline_mode<synchronous>, transform_indices = @transform_20, window_bounds = array<i64: 64, 1>}, {pipeline_mode = #tpu.pipeline_mode<synchronous>, transform_indices = @transform_21, window_bounds = array<i64: 1, 64>}, {pipeline_mode = #tpu.pipeline_mode<synchronous>, transform_indices = @transform_22, window_bounds = array<i64: 32, 40>}, {pipeline_mode = #tpu.pipeline_mode<synchronous>, transform_indices = @transform_23, window_bounds = array<i64: 16, 40>}]} {
    %c0 = arith.constant 0 : index
    %0 = memref.load %arg1[%c0] : memref<8xf32, #tpu.memory_space<smem>>
    %c1 = arith.constant 1 : index
    %1 = memref.load %arg1[%c1] : memref<8xf32, #tpu.memory_space<smem>>
    %c2 = arith.constant 2 : index
    %2 = memref.load %arg1[%c2] : memref<8xf32, #tpu.memory_space<smem>>
    %c3 = arith.constant 3 : index
    %3 = memref.load %arg1[%c3] : memref<8xf32, #tpu.memory_space<smem>>
    %c4 = arith.constant 4 : index
    %4 = memref.load %arg1[%c4] : memref<8xf32, #tpu.memory_space<smem>>
    %cst = arith.constant 0.000000e+00 : f32
    %5 = vector.broadcast %cst : f32 to vector<16x128xf32>
    %c0_0 = arith.constant 0 : index
    %c1024 = arith.constant 1024 : index
    %6 = vector.load %arg26[%c0_0, %c1024] : memref<16x1152xf32, #tpu.memory_space<vmem>>, vector<16x128xf32>
    tpu.vector_store %arg26[%c0_0, %c1024], %5 {strides = array<i32>} : memref<16x1152xf32, #tpu.memory_space<vmem>>, vector<16x128xf32>,
    %cst_1 = arith.constant 0.000000e+00 : f32
    %7 = vector.broadcast %cst_1 : f32 to vector<32x128xf32>
    %c0_2 = arith.constant 0 : index
    %c768 = arith.constant 768 : index
    %8 = vector.load %arg28[%c0_2, %c768] : memref<32x896xf32, #tpu.memory_space<vmem>>, vector<32x128xf32>
    tpu.vector_store %arg28[%c0_2, %c768], %7 {strides = array<i32>} : memref<32x896xf32, #tpu.memory_space<vmem>>, vector<32x128xf32>,
    %cst_3 = arith.constant 0.000000e+00 : f32
    %9 = vector.broadcast %cst_3 : f32 to vector<8x1024xf32>
    %c24 = arith.constant 24 : index
    %c0_4 = arith.constant 0 : index
    %10 = vector.load %arg25[%c24, %c0_4] : memref<32x1024xf32, #tpu.memory_space<vmem>>, vector<8x1024xf32>
    tpu.vector_store %arg25[%c24, %c0_4], %9 {strides = array<i32>} : memref<32x1024xf32, #tpu.memory_space<vmem>>, vector<8x1024xf32>,
    %c0_5 = arith.constant 0 : index
    %c0_6 = arith.constant 0 : index
    %11 = vector.load %arg2[%c0_5, %c0_6] : memref<1x1408xf32, #tpu.memory_space<vmem>>, vector<1x512xf32>
    %c0_7 = arith.constant 0 : index
    %c0_8 = arith.constant 0 : index
    %12 = vector.load %arg25[%c0_7, %c0_8] : memref<32x1024xf32, #tpu.memory_space<vmem>>, vector<1x512xf32>
    tpu.vector_store %arg25[%c0_7, %c0_8], %11 {strides = array<i32>} : memref<32x1024xf32, #tpu.memory_space<vmem>>, vector<1x512xf32>,
    %c0_9 = arith.constant 0 : index
    %c640 = arith.constant 640 : index
    %13 = vector.load %arg2[%c0_9, %c640] : memref<1x1408xf32, #tpu.memory_space<vmem>>, vector<1x512xf32>
    %c0_10 = arith.constant 0 : index
    %c512 = arith.constant 512 : index
    %14 = vector.load %arg25[%c0_10, %c512] : memref<32x1024xf32, #tpu.memory_space<vmem>>, vector<1x512xf32>
    tpu.vector_store %arg25[%c0_10, %c512], %13 {strides = array<i32>} : memref<32x1024xf32, #tpu.memory_space<vmem>>, vector<1x512xf32>,
    %c0_11 = arith.constant 0 : index
    %c1_12 = arith.constant 1 : index
    %15 = vector.load %arg2[%c0_11, %c1_12] : memref<1x1408xf32, #tpu.memory_space<vmem>>, vector<1x512xf32>
    %c1_13 = arith.constant 1 : index
    %c0_14 = arith.constant 0 : index
    %16 = vector.load %arg25[%c1_13, %c0_14] : memref<32x1024xf32, #tpu.memory_space<vmem>>, vector<1x512xf32>
    tpu.vector_store %arg25[%c1_13, %c0_14], %15 {strides = array<i32>} : memref<32x1024xf32, #tpu.memory_space<vmem>>, vector<1x512xf32>,
    %c0_15 = arith.constant 0 : index
    %c641 = arith.constant 641 : index
    %17 = vector.load %arg2[%c0_15, %c641] : memref<1x1408xf32, #tpu.memory_space<vmem>>, vector<1x512xf32>
    %c1_16 = arith.constant 1 : index
    %c512_17 = arith.constant 512 : index
    %18 = vector.load %arg25[%c1_16, %c512_17] : memref<32x1024xf32, #tpu.memory_space<vmem>>, vector<1x512xf32>
    tpu.vector_store %arg25[%c1_16, %c512_17], %17 {strides = array<i32>} : memref<32x1024xf32, #tpu.memory_space<vmem>>, vector<1x512xf32>,
    %c0_18 = arith.constant 0 : index
    %c2_19 = arith.constant 2 : index
    %19 = vector.load %arg2[%c0_18, %c2_19] : memref<1x1408xf32, #tpu.memory_space<vmem>>, vector<1x512xf32>
    %c2_20 = arith.constant 2 : index
    %c0_21 = arith.constant 0 : index
    %20 = vector.load %arg25[%c2_20, %c0_21] : memref<32x1024xf32, #tpu.memory_space<vmem>>, vector<1x512xf32>
    tpu.vector_store %arg25[%c2_20, %c0_21], %19 {strides = array<i32>} : memref<32x1024xf32, #tpu.memory_space<vmem>>, vector<1x512xf32>,
    %c0_22 = arith.constant 0 : index
    %c642 = arith.constant 642 : index
    %21 = vector.load %arg2[%c0_22, %c642] : memref<1x1408xf32, #tpu.memory_space<vmem>>, vector<1x512xf32>
    %c2_23 = arith.constant 2 : index
    %c512_24 = arith.constant 512 : index
    %22 = vector.load %arg25[%c2_23, %c512_24] : memref<32x1024xf32, #tpu.memory_space<vmem>>, vector<1x512xf32>
    tpu.vector_store %arg25[%c2_23, %c512_24], %21 {strides = array<i32>} : memref<32x1024xf32, #tpu.memory_space<vmem>>, vector<1x512xf32>,
    %c0_25 = arith.constant 0 : index
    %c3_26 = arith.constant 3 : index
    %23 = vector.load %arg2[%c0_25, %c3_26] : memref<1x1408xf32, #tpu.memory_space<vmem>>, vector<1x512xf32>
    %c3_27 = arith.constant 3 : index
    %c0_28 = arith.constant 0 : index
    %24 = vector.load %arg25[%c3_27, %c0_28] : memref<32x1024xf32, #tpu.memory_space<vmem>>, vector<1x512xf32>
    tpu.vector_store %arg25[%c3_27, %c0_28], %23 {strides = array<i32>} : memref<32x1024xf32, #tpu.memory_space<vmem>>, vector<1x512xf32>,
    %c0_29 = arith.constant 0 : index
    %c643 = arith.constant 643 : index
    %25 = vector.load %arg2[%c0_29, %c643] : memref<1x1408xf32, #tpu.memory_space<vmem>>, vector<1x512xf32>
    %c3_30 = arith.constant 3 : index
    %c512_31 = arith.constant 512 : index
    %26 = vector.load %arg25[%c3_30, %c512_31] : memref<32x1024xf32, #tpu.memory_space<vmem>>, vector<1x512xf32>
    tpu.vector_store %arg25[%c3_30, %c512_31], %25 {strides = array<i32>} : memref<32x1024xf32, #tpu.memory_space<vmem>>, vector<1x512xf32>,
    %c0_32 = arith.constant 0 : index
    %c4_33 = arith.constant 4 : index
    %27 = vector.load %arg2[%c0_32, %c4_33] : memref<1x1408xf32, #tpu.memory_space<vmem>>, vector<1x512xf32>
    %c4_34 = arith.constant 4 : index
    %c0_35 = arith.constant 0 : index
    %28 = vector.load %arg25[%c4_34, %c0_35] : memref<32x1024xf32, #tpu.memory_space<vmem>>, vector<1x512xf32>
    tpu.vector_store %arg25[%c4_34, %c0_35], %27 {strides = array<i32>} : memref<32x1024xf32, #tpu.memory_space<vmem>>, vector<1x512xf32>,
    %c0_36 = arith.constant 0 : index
    %c644 = arith.constant 644 : index
    %29 = vector.load %arg2[%c0_36, %c644] : memref<1x1408xf32, #tpu.memory_space<vmem>>, vector<1x512xf32>
    %c4_37 = arith.constant 4 : index
    %c512_38 = arith.constant 512 : index
    %30 = vector.load %arg25[%c4_37, %c512_38] : memref<32x1024xf32, #tpu.memory_space<vmem>>, vector<1x512xf32>
    tpu.vector_store %arg25[%c4_37, %c512_38], %29 {strides = array<i32>} : memref<32x1024xf32, #tpu.memory_space<vmem>>, vector<1x512xf32>,
    %c0_39 = arith.constant 0 : index
    %c32 = arith.constant 32 : index
    %31 = vector.load %arg2[%c0_39, %c32] : memref<1x1408xf32, #tpu.memory_space<vmem>>, vector<1x512xf32>
    %c5 = arith.constant 5 : index
    %c0_40 = arith.constant 0 : index
    %32 = vector.load %arg25[%c5, %c0_40] : memref<32x1024xf32, #tpu.memory_space<vmem>>, vector<1x512xf32>
    tpu.vector_store %arg25[%c5, %c0_40], %31 {strides = array<i32>} : memref<32x1024xf32, #tpu.memory_space<vmem>>, vector<1x512xf32>,
    %c0_41 = arith.constant 0 : index
    %c672 = arith.constant 672 : index
    %33 = vector.load %arg2[%c0_41, %c672] : memref<1x1408xf32, #tpu.memory_space<vmem>>, vector<1x512xf32>
    %c5_42 = arith.constant 5 : index
    %c512_43 = arith.constant 512 : index
    %34 = vector.load %arg25[%c5_42, %c512_43] : memref<32x1024xf32, #tpu.memory_space<vmem>>, vector<1x512xf32>
    tpu.vector_store %arg25[%c5_42, %c512_43], %33 {strides = array<i32>} : memref<32x1024xf32, #tpu.memory_space<vmem>>, vector<1x512xf32>,
    %c0_44 = arith.constant 0 : index
    %c33 = arith.constant 33 : index
    %35 = vector.load %arg2[%c0_44, %c33] : memref<1x1408xf32, #tpu.memory_space<vmem>>, vector<1x512xf32>
    %c6 = arith.constant 6 : index
    %c0_45 = arith.constant 0 : index
    %36 = vector.load %arg25[%c6, %c0_45] : memref<32x1024xf32, #tpu.memory_space<vmem>>, vector<1x512xf32>
    tpu.vector_store %arg25[%c6, %c0_45], %35 {strides = array<i32>} : memref<32x1024xf32, #tpu.memory_space<vmem>>, vector<1x512xf32>,
    %c0_46 = arith.constant 0 : index
    %c673 = arith.constant 673 : index
    %37 = vector.load %arg2[%c0_46, %c673] : memref<1x1408xf32, #tpu.memory_space<vmem>>, vector<1x512xf32>
    %c6_47 = arith.constant 6 : index
    %c512_48 = arith.constant 512 : index
    %38 = vector.load %arg25[%c6_47, %c512_48] : memref<32x1024xf32, #tpu.memory_space<vmem>>, vector<1x512xf32>
    tpu.vector_store %arg25[%c6_47, %c512_48], %37 {strides = array<i32>} : memref<32x1024xf32, #tpu.memory_space<vmem>>, vector<1x512xf32>,
    %c0_49 = arith.constant 0 : index
    %c34 = arith.constant 34 : index
    %39 = vector.load %arg2[%c0_49, %c34] : memref<1x1408xf32, #tpu.memory_space<vmem>>, vector<1x512xf32>
    %c7 = arith.constant 7 : index
    %c0_50 = arith.constant 0 : index
    %40 = vector.load %arg25[%c7, %c0_50] : memref<32x1024xf32, #tpu.memory_space<vmem>>, vector<1x512xf32>
    tpu.vector_store %arg25[%c7, %c0_50], %39 {strides = array<i32>} : memref<32x1024xf32, #tpu.memory_space<vmem>>, vector<1x512xf32>,
    %c0_51 = arith.constant 0 : index
    %c674 = arith.constant 674 : index
    %41 = vector.load %arg2[%c0_51, %c674] : memref<1x1408xf32, #tpu.memory_space<vmem>>, vector<1x512xf32>
    %c7_52 = arith.constant 7 : index
    %c512_53 = arith.constant 512 : index
    %42 = vector.load %arg25[%c7_52, %c512_53] : memref<32x1024xf32, #tpu.memory_space<vmem>>, vector<1x512xf32>
    tpu.vector_store %arg25[%c7_52, %c512_53], %41 {strides = array<i32>} : memref<32x1024xf32, #tpu.memory_space<vmem>>, vector<1x512xf32>,
    %c0_54 = arith.constant 0 : index
    %c35 = arith.constant 35 : index
    %43 = vector.load %arg2[%c0_54, %c35] : memref<1x1408xf32, #tpu.memory_space<vmem>>, vector<1x512xf32>
    %c8 = arith.constant 8 : index
    %c0_55 = arith.constant 0 : index
    %44 = vector.load %arg25[%c8, %c0_55] : memref<32x1024xf32, #tpu.memory_space<vmem>>, vector<1x512xf32>
    tpu.vector_store %arg25[%c8, %c0_55], %43 {strides = array<i32>} : memref<32x1024xf32, #tpu.memory_space<vmem>>, vector<1x512xf32>,
    %c0_56 = arith.constant 0 : index
    %c675 = arith.constant 675 : index
    %45 = vector.load %arg2[%c0_56, %c675] : memref<1x1408xf32, #tpu.memory_space<vmem>>, vector<1x512xf32>
    %c8_57 = arith.constant 8 : index
    %c512_58 = arith.constant 512 : index
    %46 = vector.load %arg25[%c8_57, %c512_58] : memref<32x1024xf32, #tpu.memory_space<vmem>>, vector<1x512xf32>
    tpu.vector_store %arg25[%c8_57, %c512_58], %45 {strides = array<i32>} : memref<32x1024xf32, #tpu.memory_space<vmem>>, vector<1x512xf32>,
    %c0_59 = arith.constant 0 : index
    %c36 = arith.constant 36 : index
    %47 = vector.load %arg2[%c0_59, %c36] : memref<1x1408xf32, #tpu.memory_space<vmem>>, vector<1x512xf32>
    %c9 = arith.constant 9 : index
    %c0_60 = arith.constant 0 : index
    %48 = vector.load %arg25[%c9, %c0_60] : memref<32x1024xf32, #tpu.memory_space<vmem>>, vector<1x512xf32>
    tpu.vector_store %arg25[%c9, %c0_60], %47 {strides = array<i32>} : memref<32x1024xf32, #tpu.memory_space<vmem>>, vector<1x512xf32>,
    %c0_61 = arith.constant 0 : index
    %c676 = arith.constant 676 : index
    %49 = vector.load %arg2[%c0_61, %c676] : memref<1x1408xf32, #tpu.memory_space<vmem>>, vector<1x512xf32>
    %c9_62 = arith.constant 9 : index
    %c512_63 = arith.constant 512 : index
    %50 = vector.load %arg25[%c9_62, %c512_63] : memref<32x1024xf32, #tpu.memory_space<vmem>>, vector<1x512xf32>
    tpu.vector_store %arg25[%c9_62, %c512_63], %49 {strides = array<i32>} : memref<32x1024xf32, #tpu.memory_space<vmem>>, vector<1x512xf32>,
    %c0_64 = arith.constant 0 : index
    %c64 = arith.constant 64 : index
    %51 = vector.load %arg2[%c0_64, %c64] : memref<1x1408xf32, #tpu.memory_space<vmem>>, vector<1x512xf32>
    %c10 = arith.constant 10 : index
    %c0_65 = arith.constant 0 : index
    %52 = vector.load %arg25[%c10, %c0_65] : memref<32x1024xf32, #tpu.memory_space<vmem>>, vector<1x512xf32>
    tpu.vector_store %arg25[%c10, %c0_65], %51 {strides = array<i32>} : memref<32x1024xf32, #tpu.memory_space<vmem>>, vector<1x512xf32>,
    %c0_66 = arith.constant 0 : index
    %c704 = arith.constant 704 : index
    %53 = vector.load %arg2[%c0_66, %c704] : memref<1x1408xf32, #tpu.memory_space<vmem>>, vector<1x512xf32>
    %c10_67 = arith.constant 10 : index
    %c512_68 = arith.constant 512 : index
    %54 = vector.load %arg25[%c10_67, %c512_68] : memref<32x1024xf32, #tpu.memory_space<vmem>>, vector<1x512xf32>
    tpu.vector_store %arg25[%c10_67, %c512_68], %53 {strides = array<i32>} : memref<32x1024xf32, #tpu.memory_space<vmem>>, vector<1x512xf32>,
    %c0_69 = arith.constant 0 : index
    %c65 = arith.constant 65 : index
    %55 = vector.load %arg2[%c0_69, %c65] : memref<1x1408xf32, #tpu.memory_space<vmem>>, vector<1x512xf32>
    %c11 = arith.constant 11 : index
    %c0_70 = arith.constant 0 : index
    %56 = vector.load %arg25[%c11, %c0_70] : memref<32x1024xf32, #tpu.memory_space<vmem>>, vector<1x512xf32>
    tpu.vector_store %arg25[%c11, %c0_70], %55 {strides = array<i32>} : memref<32x1024xf32, #tpu.memory_space<vmem>>, vector<1x512xf32>,
    %c0_71 = arith.constant 0 : index
    %c705 = arith.constant 705 : index
    %57 = vector.load %arg2[%c0_71, %c705] : memref<1x1408xf32, #tpu.memory_space<vmem>>, vector<1x512xf32>
    %c11_72 = arith.constant 11 : index
    %c512_73 = arith.constant 512 : index
    %58 = vector.load %arg25[%c11_72, %c512_73] : memref<32x1024xf32, #tpu.memory_space<vmem>>, vector<1x512xf32>
    tpu.vector_store %arg25[%c11_72, %c512_73], %57 {strides = array<i32>} : memref<32x1024xf32, #tpu.memory_space<vmem>>, vector<1x512xf32>,
    %c0_74 = arith.constant 0 : index
    %c66 = arith.constant 66 : index
    %59 = vector.load %arg2[%c0_74, %c66] : memref<1x1408xf32, #tpu.memory_space<vmem>>, vector<1x512xf32>
    %c12 = arith.constant 12 : index
    %c0_75 = arith.constant 0 : index
    %60 = vector.load %arg25[%c12, %c0_75] : memref<32x1024xf32, #tpu.memory_space<vmem>>, vector<1x512xf32>
    tpu.vector_store %arg25[%c12, %c0_75], %59 {strides = array<i32>} : memref<32x1024xf32, #tpu.memory_space<vmem>>, vector<1x512xf32>,
    %c0_76 = arith.constant 0 : index
    %c706 = arith.constant 706 : index
    %61 = vector.load %arg2[%c0_76, %c706] : memref<1x1408xf32, #tpu.memory_space<vmem>>, vector<1x512xf32>
    %c12_77 = arith.constant 12 : index
    %c512_78 = arith.constant 512 : index
    %62 = vector.load %arg25[%c12_77, %c512_78] : memref<32x1024xf32, #tpu.memory_space<vmem>>, vector<1x512xf32>
    tpu.vector_store %arg25[%c12_77, %c512_78], %61 {strides = array<i32>} : memref<32x1024xf32, #tpu.memory_space<vmem>>, vector<1x512xf32>,
    %c0_79 = arith.constant 0 : index
    %c67 = arith.constant 67 : index
    %63 = vector.load %arg2[%c0_79, %c67] : memref<1x1408xf32, #tpu.memory_space<vmem>>, vector<1x512xf32>
    %c13 = arith.constant 13 : index
    %c0_80 = arith.constant 0 : index
    %64 = vector.load %arg25[%c13, %c0_80] : memref<32x1024xf32, #tpu.memory_space<vmem>>, vector<1x512xf32>
    tpu.vector_store %arg25[%c13, %c0_80], %63 {strides = array<i32>} : memref<32x1024xf32, #tpu.memory_space<vmem>>, vector<1x512xf32>,
    %c0_81 = arith.constant 0 : index
    %c707 = arith.constant 707 : index
    %65 = vector.load %arg2[%c0_81, %c707] : memref<1x1408xf32, #tpu.memory_space<vmem>>, vector<1x512xf32>
    %c13_82 = arith.constant 13 : index
    %c512_83 = arith.constant 512 : index
    %66 = vector.load %arg25[%c13_82, %c512_83] : memref<32x1024xf32, #tpu.memory_space<vmem>>, vector<1x512xf32>
    tpu.vector_store %arg25[%c13_82, %c512_83], %65 {strides = array<i32>} : memref<32x1024xf32, #tpu.memory_space<vmem>>, vector<1x512xf32>,
    %c0_84 = arith.constant 0 : index
    %c68 = arith.constant 68 : index
    %67 = vector.load %arg2[%c0_84, %c68] : memref<1x1408xf32, #tpu.memory_space<vmem>>, vector<1x512xf32>
    %c14 = arith.constant 14 : index
    %c0_85 = arith.constant 0 : index
    %68 = vector.load %arg25[%c14, %c0_85] : memref<32x1024xf32, #tpu.memory_space<vmem>>, vector<1x512xf32>
    tpu.vector_store %arg25[%c14, %c0_85], %67 {strides = array<i32>} : memref<32x1024xf32, #tpu.memory_space<vmem>>, vector<1x512xf32>,
    %c0_86 = arith.constant 0 : index
    %c708 = arith.constant 708 : index
    %69 = vector.load %arg2[%c0_86, %c708] : memref<1x1408xf32, #tpu.memory_space<vmem>>, vector<1x512xf32>
    %c14_87 = arith.constant 14 : index
    %c512_88 = arith.constant 512 : index
    %70 = vector.load %arg25[%c14_87, %c512_88] : memref<32x1024xf32, #tpu.memory_space<vmem>>, vector<1x512xf32>
    tpu.vector_store %arg25[%c14_87, %c512_88], %69 {strides = array<i32>} : memref<32x1024xf32, #tpu.memory_space<vmem>>, vector<1x512xf32>,
    %c0_89 = arith.constant 0 : index
    %c96 = arith.constant 96 : index
    %71 = vector.load %arg2[%c0_89, %c96] : memref<1x1408xf32, #tpu.memory_space<vmem>>, vector<1x512xf32>
    %c15 = arith.constant 15 : index
    %c0_90 = arith.constant 0 : index
    %72 = vector.load %arg25[%c15, %c0_90] : memref<32x1024xf32, #tpu.memory_space<vmem>>, vector<1x512xf32>
    tpu.vector_store %arg25[%c15, %c0_90], %71 {strides = array<i32>} : memref<32x1024xf32, #tpu.memory_space<vmem>>, vector<1x512xf32>,
    %c0_91 = arith.constant 0 : index
    %c736 = arith.constant 736 : index
    %73 = vector.load %arg2[%c0_91, %c736] : memref<1x1408xf32, #tpu.memory_space<vmem>>, vector<1x512xf32>
    %c15_92 = arith.constant 15 : index
    %c512_93 = arith.constant 512 : index
    %74 = vector.load %arg25[%c15_92, %c512_93] : memref<32x1024xf32, #tpu.memory_space<vmem>>, vector<1x512xf32>
    tpu.vector_store %arg25[%c15_92, %c512_93], %73 {strides = array<i32>} : memref<32x1024xf32, #tpu.memory_space<vmem>>, vector<1x512xf32>,
    %c0_94 = arith.constant 0 : index
    %c97 = arith.constant 97 : index
    %75 = vector.load %arg2[%c0_94, %c97] : memref<1x1408xf32, #tpu.memory_space<vmem>>, vector<1x512xf32>
    %c16 = arith.constant 16 : index
    %c0_95 = arith.constant 0 : index
    %76 = vector.load %arg25[%c16, %c0_95] : memref<32x1024xf32, #tpu.memory_space<vmem>>, vector<1x512xf32>
    tpu.vector_store %arg25[%c16, %c0_95], %75 {strides = array<i32>} : memref<32x1024xf32, #tpu.memory_space<vmem>>, vector<1x512xf32>,
    %c0_96 = arith.constant 0 : index
    %c737 = arith.constant 737 : index
    %77 = vector.load %arg2[%c0_96, %c737] : memref<1x1408xf32, #tpu.memory_space<vmem>>, vector<1x512xf32>
    %c16_97 = arith.constant 16 : index
    %c512_98 = arith.constant 512 : index
    %78 = vector.load %arg25[%c16_97, %c512_98] : memref<32x1024xf32, #tpu.memory_space<vmem>>, vector<1x512xf32>
    tpu.vector_store %arg25[%c16_97, %c512_98], %77 {strides = array<i32>} : memref<32x1024xf32, #tpu.memory_space<vmem>>, vector<1x512xf32>,
    %c0_99 = arith.constant 0 : index
    %c98 = arith.constant 98 : index
    %79 = vector.load %arg2[%c0_99, %c98] : memref<1x1408xf32, #tpu.memory_space<vmem>>, vector<1x512xf32>
    %c17 = arith.constant 17 : index
    %c0_100 = arith.constant 0 : index
    %80 = vector.load %arg25[%c17, %c0_100] : memref<32x1024xf32, #tpu.memory_space<vmem>>, vector<1x512xf32>
    tpu.vector_store %arg25[%c17, %c0_100], %79 {strides = array<i32>} : memref<32x1024xf32, #tpu.memory_space<vmem>>, vector<1x512xf32>,
    %c0_101 = arith.constant 0 : index
    %c738 = arith.constant 738 : index
    %81 = vector.load %arg2[%c0_101, %c738] : memref<1x1408xf32, #tpu.memory_space<vmem>>, vector<1x512xf32>
    %c17_102 = arith.constant 17 : index
    %c512_103 = arith.constant 512 : index
    %82 = vector.load %arg25[%c17_102, %c512_103] : memref<32x1024xf32, #tpu.memory_space<vmem>>, vector<1x512xf32>
    tpu.vector_store %arg25[%c17_102, %c512_103], %81 {strides = array<i32>} : memref<32x1024xf32, #tpu.memory_space<vmem>>, vector<1x512xf32>,
    %c0_104 = arith.constant 0 : index
    %c99 = arith.constant 99 : index
    %83 = vector.load %arg2[%c0_104, %c99] : memref<1x1408xf32, #tpu.memory_space<vmem>>, vector<1x512xf32>
    %c18 = arith.constant 18 : index
    %c0_105 = arith.constant 0 : index
    %84 = vector.load %arg25[%c18, %c0_105] : memref<32x1024xf32, #tpu.memory_space<vmem>>, vector<1x512xf32>
    tpu.vector_store %arg25[%c18, %c0_105], %83 {strides = array<i32>} : memref<32x1024xf32, #tpu.memory_space<vmem>>, vector<1x512xf32>,
    %c0_106 = arith.constant 0 : index
    %c739 = arith.constant 739 : index
    %85 = vector.load %arg2[%c0_106, %c739] : memref<1x1408xf32, #tpu.memory_space<vmem>>, vector<1x512xf32>
    %c18_107 = arith.constant 18 : index
    %c512_108 = arith.constant 512 : index
    %86 = vector.load %arg25[%c18_107, %c512_108] : memref<32x1024xf32, #tpu.memory_space<vmem>>, vector<1x512xf32>
    tpu.vector_store %arg25[%c18_107, %c512_108], %85 {strides = array<i32>} : memref<32x1024xf32, #tpu.memory_space<vmem>>, vector<1x512xf32>,
    %c0_109 = arith.constant 0 : index
    %c100 = arith.constant 100 : index
    %87 = vector.load %arg2[%c0_109, %c100] : memref<1x1408xf32, #tpu.memory_space<vmem>>, vector<1x512xf32>
    %c19 = arith.constant 19 : index
    %c0_110 = arith.constant 0 : index
    %88 = vector.load %arg25[%c19, %c0_110] : memref<32x1024xf32, #tpu.memory_space<vmem>>, vector<1x512xf32>
    tpu.vector_store %arg25[%c19, %c0_110], %87 {strides = array<i32>} : memref<32x1024xf32, #tpu.memory_space<vmem>>, vector<1x512xf32>,
    %c0_111 = arith.constant 0 : index
    %c740 = arith.constant 740 : index
    %89 = vector.load %arg2[%c0_111, %c740] : memref<1x1408xf32, #tpu.memory_space<vmem>>, vector<1x512xf32>
    %c19_112 = arith.constant 19 : index
    %c512_113 = arith.constant 512 : index
    %90 = vector.load %arg25[%c19_112, %c512_113] : memref<32x1024xf32, #tpu.memory_space<vmem>>, vector<1x512xf32>
    tpu.vector_store %arg25[%c19_112, %c512_113], %89 {strides = array<i32>} : memref<32x1024xf32, #tpu.memory_space<vmem>>, vector<1x512xf32>,
    %c0_114 = arith.constant 0 : index
    %c128 = arith.constant 128 : index
    %91 = vector.load %arg2[%c0_114, %c128] : memref<1x1408xf32, #tpu.memory_space<vmem>>, vector<1x512xf32>
    %c20 = arith.constant 20 : index
    %c0_115 = arith.constant 0 : index
    %92 = vector.load %arg25[%c20, %c0_115] : memref<32x1024xf32, #tpu.memory_space<vmem>>, vector<1x512xf32>
    tpu.vector_store %arg25[%c20, %c0_115], %91 {strides = array<i32>} : memref<32x1024xf32, #tpu.memory_space<vmem>>, vector<1x512xf32>,
    %c0_116 = arith.constant 0 : index
    %c768_117 = arith.constant 768 : index
    %93 = vector.load %arg2[%c0_116, %c768_117] : memref<1x1408xf32, #tpu.memory_space<vmem>>, vector<1x512xf32>
    %c20_118 = arith.constant 20 : index
    %c512_119 = arith.constant 512 : index
    %94 = vector.load %arg25[%c20_118, %c512_119] : memref<32x1024xf32, #tpu.memory_space<vmem>>, vector<1x512xf32>
    tpu.vector_store %arg25[%c20_118, %c512_119], %93 {strides = array<i32>} : memref<32x1024xf32, #tpu.memory_space<vmem>>, vector<1x512xf32>,
    %c0_120 = arith.constant 0 : index
    %c129 = arith.constant 129 : index
    %95 = vector.load %arg2[%c0_120, %c129] : memref<1x1408xf32, #tpu.memory_space<vmem>>, vector<1x512xf32>
    %c21 = arith.constant 21 : index
    %c0_121 = arith.constant 0 : index
    %96 = vector.load %arg25[%c21, %c0_121] : memref<32x1024xf32, #tpu.memory_space<vmem>>, vector<1x512xf32>
    tpu.vector_store %arg25[%c21, %c0_121], %95 {strides = array<i32>} : memref<32x1024xf32, #tpu.memory_space<vmem>>, vector<1x512xf32>,
    %c0_122 = arith.constant 0 : index
    %c769 = arith.constant 769 : index
    %97 = vector.load %arg2[%c0_122, %c769] : memref<1x1408xf32, #tpu.memory_space<vmem>>, vector<1x512xf32>
    %c21_123 = arith.constant 21 : index
    %c512_124 = arith.constant 512 : index
    %98 = vector.load %arg25[%c21_123, %c512_124] : memref<32x1024xf32, #tpu.memory_space<vmem>>, vector<1x512xf32>
    tpu.vector_store %arg25[%c21_123, %c512_124], %97 {strides = array<i32>} : memref<32x1024xf32, #tpu.memory_space<vmem>>, vector<1x512xf32>,
    %c0_125 = arith.constant 0 : index
    %c130 = arith.constant 130 : index
    %99 = vector.load %arg2[%c0_125, %c130] : memref<1x1408xf32, #tpu.memory_space<vmem>>, vector<1x512xf32>
    %c22 = arith.constant 22 : index
    %c0_126 = arith.constant 0 : index
    %100 = vector.load %arg25[%c22, %c0_126] : memref<32x1024xf32, #tpu.memory_space<vmem>>, vector<1x512xf32>
    tpu.vector_store %arg25[%c22, %c0_126], %99 {strides = array<i32>} : memref<32x1024xf32, #tpu.memory_space<vmem>>, vector<1x512xf32>,
    %c0_127 = arith.constant 0 : index
    %c770 = arith.constant 770 : index
    %101 = vector.load %arg2[%c0_127, %c770] : memref<1x1408xf32, #tpu.memory_space<vmem>>, vector<1x512xf32>
    %c22_128 = arith.constant 22 : index
    %c512_129 = arith.constant 512 : index
    %102 = vector.load %arg25[%c22_128, %c512_129] : memref<32x1024xf32, #tpu.memory_space<vmem>>, vector<1x512xf32>
    tpu.vector_store %arg25[%c22_128, %c512_129], %101 {strides = array<i32>} : memref<32x1024xf32, #tpu.memory_space<vmem>>, vector<1x512xf32>,
    %c0_130 = arith.constant 0 : index
    %c131 = arith.constant 131 : index
    %103 = vector.load %arg2[%c0_130, %c131] : memref<1x1408xf32, #tpu.memory_space<vmem>>, vector<1x512xf32>
    %c23 = arith.constant 23 : index
    %c0_131 = arith.constant 0 : index
    %104 = vector.load %arg25[%c23, %c0_131] : memref<32x1024xf32, #tpu.memory_space<vmem>>, vector<1x512xf32>
    tpu.vector_store %arg25[%c23, %c0_131], %103 {strides = array<i32>} : memref<32x1024xf32, #tpu.memory_space<vmem>>, vector<1x512xf32>,
    %c0_132 = arith.constant 0 : index
    %c771 = arith.constant 771 : index
    %105 = vector.load %arg2[%c0_132, %c771] : memref<1x1408xf32, #tpu.memory_space<vmem>>, vector<1x512xf32>
    %c23_133 = arith.constant 23 : index
    %c512_134 = arith.constant 512 : index
    %106 = vector.load %arg25[%c23_133, %c512_134] : memref<32x1024xf32, #tpu.memory_space<vmem>>, vector<1x512xf32>
    tpu.vector_store %arg25[%c23_133, %c512_134], %105 {strides = array<i32>} : memref<32x1024xf32, #tpu.memory_space<vmem>>, vector<1x512xf32>,
    %c0_135 = arith.constant 0 : index
    %c132 = arith.constant 132 : index
    %107 = vector.load %arg2[%c0_135, %c132] : memref<1x1408xf32, #tpu.memory_space<vmem>>, vector<1x512xf32>
    %c24_136 = arith.constant 24 : index
    %c0_137 = arith.constant 0 : index
    %108 = vector.load %arg25[%c24_136, %c0_137] : memref<32x1024xf32, #tpu.memory_space<vmem>>, vector<1x512xf32>
    tpu.vector_store %arg25[%c24_136, %c0_137], %107 {strides = array<i32>} : memref<32x1024xf32, #tpu.memory_space<vmem>>, vector<1x512xf32>,
    %c0_138 = arith.constant 0 : index
    %c772 = arith.constant 772 : index
    %109 = vector.load %arg2[%c0_138, %c772] : memref<1x1408xf32, #tpu.memory_space<vmem>>, vector<1x512xf32>
    %c24_139 = arith.constant 24 : index
    %c512_140 = arith.constant 512 : index
    %110 = vector.load %arg25[%c24_139, %c512_140] : memref<32x1024xf32, #tpu.memory_space<vmem>>, vector<1x512xf32>
    tpu.vector_store %arg25[%c24_139, %c512_140], %109 {strides = array<i32>} : memref<32x1024xf32, #tpu.memory_space<vmem>>, vector<1x512xf32>,
    %c0_141 = arith.constant 0 : index
    %c0_142 = arith.constant 0 : index
    %111 = vector.load %arg4[%c0_141, %c0_142] : memref<16x32xf32, #tpu.memory_space<vmem>>, vector<16x32xf32>
    %c0_143 = arith.constant 0 : index
    %c0_144 = arith.constant 0 : index
    %112 = vector.load %arg25[%c0_143, %c0_144] : memref<32x1024xf32, #tpu.memory_space<vmem>>, vector<32x1024xf32>
    %cst_145 = arith.constant dense<0.000000e+00> : vector<16x1024xf32>
    %113 = tpu.matmul %111, %112, %cst_145 {dimension_numbers = #tpu.dot_dimension_numbers<[1], [0], [0], [1], [0, 0, 1, 1], [], []>} : vector<16x32xf32>, vector<32x1024xf32>, vector<16x1024xf32> -> vector<16x1024xf32>
    %c0_146 = arith.constant 0 : index
    %c0_147 = arith.constant 0 : index
    %114 = vector.load %arg5[%c0_146, %c0_147] : memref<16x1xf32, #tpu.memory_space<vmem>>, vector<16x1xf32>
    %115 = vector.broadcast %114 : vector<16x1xf32> to vector<16x1024xf32>
    %116 = arith.addf %113, %115 : vector<16x1024xf32>
    %cst_148 = arith.constant 0.000000e+00 : f32
    %117 = vector.broadcast %cst_148 : f32 to vector<16x1024xf32>
    %118 = arith.maximumf %116, %117 : vector<16x1024xf32>
    %c0_149 = arith.constant 0 : index
    %c0_150 = arith.constant 0 : index
    %119 = vector.load %arg26[%c0_149, %c0_150] : memref<16x1152xf32, #tpu.memory_space<vmem>>, vector<16x1024xf32>
    tpu.vector_store %arg26[%c0_149, %c0_150], %118 {strides = array<i32>} : memref<16x1152xf32, #tpu.memory_space<vmem>>, vector<16x1024xf32>,
    %c0_151 = arith.constant 0 : index
    %c0_152 = arith.constant 0 : index
    %120 = vector.load %arg26[%c0_151, %c0_152] : memref<16x1152xf32, #tpu.memory_space<vmem>>, vector<16x384xf32>
    %c0_153 = arith.constant 0 : index
    %c0_154 = arith.constant 0 : index
    %121 = vector.load %arg27[%c0_153, %c0_154] : memref<400x768xf32, #tpu.memory_space<vmem>>, vector<16x384xf32>
    tpu.vector_store %arg27[%c0_153, %c0_154], %120 {strides = array<i32>} : memref<400x768xf32, #tpu.memory_space<vmem>>, vector<16x384xf32>,
    %c0_155 = arith.constant 0 : index
    %c512_156 = arith.constant 512 : index
    %122 = vector.load %arg26[%c0_155, %c512_156] : memref<16x1152xf32, #tpu.memory_space<vmem>>, vector<16x384xf32>
    %c0_157 = arith.constant 0 : index
    %c384 = arith.constant 384 : index
    %123 = vector.load %arg27[%c0_157, %c384] : memref<400x768xf32, #tpu.memory_space<vmem>>, vector<16x384xf32>
    tpu.vector_store %arg27[%c0_157, %c384], %122 {strides = array<i32>} : memref<400x768xf32, #tpu.memory_space<vmem>>, vector<16x384xf32>,
    %c0_158 = arith.constant 0 : index
    %c1_159 = arith.constant 1 : index
    %124 = vector.load %arg26[%c0_158, %c1_159] : memref<16x1152xf32, #tpu.memory_space<vmem>>, vector<16x384xf32>
    %c16_160 = arith.constant 16 : index
    %c0_161 = arith.constant 0 : index
    %125 = vector.load %arg27[%c16_160, %c0_161] : memref<400x768xf32, #tpu.memory_space<vmem>>, vector<16x384xf32>
    tpu.vector_store %arg27[%c16_160, %c0_161], %124 {strides = array<i32>} : memref<400x768xf32, #tpu.memory_space<vmem>>, vector<16x384xf32>,
    %c0_162 = arith.constant 0 : index
    %c513 = arith.constant 513 : index
    %126 = vector.load %arg26[%c0_162, %c513] : memref<16x1152xf32, #tpu.memory_space<vmem>>, vector<16x384xf32>
    %c16_163 = arith.constant 16 : index
    %c384_164 = arith.constant 384 : index
    %127 = vector.load %arg27[%c16_163, %c384_164] : memref<400x768xf32, #tpu.memory_space<vmem>>, vector<16x384xf32>
    tpu.vector_store %arg27[%c16_163, %c384_164], %126 {strides = array<i32>} : memref<400x768xf32, #tpu.memory_space<vmem>>, vector<16x384xf32>,
    %c0_165 = arith.constant 0 : index
    %c2_166 = arith.constant 2 : index
    %128 = vector.load %arg26[%c0_165, %c2_166] : memref<16x1152xf32, #tpu.memory_space<vmem>>, vector<16x384xf32>
    %c32_167 = arith.constant 32 : index
    %c0_168 = arith.constant 0 : index
    %129 = vector.load %arg27[%c32_167, %c0_168] : memref<400x768xf32, #tpu.memory_space<vmem>>, vector<16x384xf32>
    tpu.vector_store %arg27[%c32_167, %c0_168], %128 {strides = array<i32>} : memref<400x768xf32, #tpu.memory_space<vmem>>, vector<16x384xf32>,
    %c0_169 = arith.constant 0 : index
    %c514 = arith.constant 514 : index
    %130 = vector.load %arg26[%c0_169, %c514] : memref<16x1152xf32, #tpu.memory_space<vmem>>, vector<16x384xf32>
    %c32_170 = arith.constant 32 : index
    %c384_171 = arith.constant 384 : index
    %131 = vector.load %arg27[%c32_170, %c384_171] : memref<400x768xf32, #tpu.memory_space<vmem>>, vector<16x384xf32>
    tpu.vector_store %arg27[%c32_170, %c384_171], %130 {strides = array<i32>} : memref<400x768xf32, #tpu.memory_space<vmem>>, vector<16x384xf32>,
    %c0_172 = arith.constant 0 : index
    %c3_173 = arith.constant 3 : index
    %132 = vector.load %arg26[%c0_172, %c3_173] : memref<16x1152xf32, #tpu.memory_space<vmem>>, vector<16x384xf32>
    %c48 = arith.constant 48 : index
    %c0_174 = arith.constant 0 : index
    %133 = vector.load %arg27[%c48, %c0_174] : memref<400x768xf32, #tpu.memory_space<vmem>>, vector<16x384xf32>
    tpu.vector_store %arg27[%c48, %c0_174], %132 {strides = array<i32>} : memref<400x768xf32, #tpu.memory_space<vmem>>, vector<16x384xf32>,
    %c0_175 = arith.constant 0 : index
    %c515 = arith.constant 515 : index
    %134 = vector.load %arg26[%c0_175, %c515] : memref<16x1152xf32, #tpu.memory_space<vmem>>, vector<16x384xf32>
    %c48_176 = arith.constant 48 : index
    %c384_177 = arith.constant 384 : index
    %135 = vector.load %arg27[%c48_176, %c384_177] : memref<400x768xf32, #tpu.memory_space<vmem>>, vector<16x384xf32>
    tpu.vector_store %arg27[%c48_176, %c384_177], %134 {strides = array<i32>} : memref<400x768xf32, #tpu.memory_space<vmem>>, vector<16x384xf32>,
    %c0_178 = arith.constant 0 : index
    %c4_179 = arith.constant 4 : index
    %136 = vector.load %arg26[%c0_178, %c4_179] : memref<16x1152xf32, #tpu.memory_space<vmem>>, vector<16x384xf32>
    %c64_180 = arith.constant 64 : index
    %c0_181 = arith.constant 0 : index
    %137 = vector.load %arg27[%c64_180, %c0_181] : memref<400x768xf32, #tpu.memory_space<vmem>>, vector<16x384xf32>
    tpu.vector_store %arg27[%c64_180, %c0_181], %136 {strides = array<i32>} : memref<400x768xf32, #tpu.memory_space<vmem>>, vector<16x384xf32>,
    %c0_182 = arith.constant 0 : index
    %c516 = arith.constant 516 : index
    %138 = vector.load %arg26[%c0_182, %c516] : memref<16x1152xf32, #tpu.memory_space<vmem>>, vector<16x384xf32>
    %c64_183 = arith.constant 64 : index
    %c384_184 = arith.constant 384 : index
    %139 = vector.load %arg27[%c64_183, %c384_184] : memref<400x768xf32, #tpu.memory_space<vmem>>, vector<16x384xf32>
    tpu.vector_store %arg27[%c64_183, %c384_184], %138 {strides = array<i32>} : memref<400x768xf32, #tpu.memory_space<vmem>>, vector<16x384xf32>,
    %c0_185 = arith.constant 0 : index
    %c32_186 = arith.constant 32 : index
    %140 = vector.load %arg26[%c0_185, %c32_186] : memref<16x1152xf32, #tpu.memory_space<vmem>>, vector<16x384xf32>
    %c80 = arith.constant 80 : index
    %c0_187 = arith.constant 0 : index
    %141 = vector.load %arg27[%c80, %c0_187] : memref<400x768xf32, #tpu.memory_space<vmem>>, vector<16x384xf32>
    tpu.vector_store %arg27[%c80, %c0_187], %140 {strides = array<i32>} : memref<400x768xf32, #tpu.memory_space<vmem>>, vector<16x384xf32>,
    %c0_188 = arith.constant 0 : index
    %c544 = arith.constant 544 : index
    %142 = vector.load %arg26[%c0_188, %c544] : memref<16x1152xf32, #tpu.memory_space<vmem>>, vector<16x384xf32>
    %c80_189 = arith.constant 80 : index
    %c384_190 = arith.constant 384 : index
    %143 = vector.load %arg27[%c80_189, %c384_190] : memref<400x768xf32, #tpu.memory_space<vmem>>, vector<16x384xf32>
    tpu.vector_store %arg27[%c80_189, %c384_190], %142 {strides = array<i32>} : memref<400x768xf32, #tpu.memory_space<vmem>>, vector<16x384xf32>,
    %c0_191 = arith.constant 0 : index
    %c33_192 = arith.constant 33 : index
    %144 = vector.load %arg26[%c0_191, %c33_192] : memref<16x1152xf32, #tpu.memory_space<vmem>>, vector<16x384xf32>
    %c96_193 = arith.constant 96 : index
    %c0_194 = arith.constant 0 : index
    %145 = vector.load %arg27[%c96_193, %c0_194] : memref<400x768xf32, #tpu.memory_space<vmem>>, vector<16x384xf32>
    tpu.vector_store %arg27[%c96_193, %c0_194], %144 {strides = array<i32>} : memref<400x768xf32, #tpu.memory_space<vmem>>, vector<16x384xf32>,
    %c0_195 = arith.constant 0 : index
    %c545 = arith.constant 545 : index
    %146 = vector.load %arg26[%c0_195, %c545] : memref<16x1152xf32, #tpu.memory_space<vmem>>, vector<16x384xf32>
    %c96_196 = arith.constant 96 : index
    %c384_197 = arith.constant 384 : index
    %147 = vector.load %arg27[%c96_196, %c384_197] : memref<400x768xf32, #tpu.memory_space<vmem>>, vector<16x384xf32>
    tpu.vector_store %arg27[%c96_196, %c384_197], %146 {strides = array<i32>} : memref<400x768xf32, #tpu.memory_space<vmem>>, vector<16x384xf32>,
    %c0_198 = arith.constant 0 : index
    %c34_199 = arith.constant 34 : index
    %148 = vector.load %arg26[%c0_198, %c34_199] : memref<16x1152xf32, #tpu.memory_space<vmem>>, vector<16x384xf32>
    %c112 = arith.constant 112 : index
    %c0_200 = arith.constant 0 : index
    %149 = vector.load %arg27[%c112, %c0_200] : memref<400x768xf32, #tpu.memory_space<vmem>>, vector<16x384xf32>
    tpu.vector_store %arg27[%c112, %c0_200], %148 {strides = array<i32>} : memref<400x768xf32, #tpu.memory_space<vmem>>, vector<16x384xf32>,
    %c0_201 = arith.constant 0 : index
    %c546 = arith.constant 546 : index
    %150 = vector.load %arg26[%c0_201, %c546] : memref<16x1152xf32, #tpu.memory_space<vmem>>, vector<16x384xf32>
    %c112_202 = arith.constant 112 : index
    %c384_203 = arith.constant 384 : index
    %151 = vector.load %arg27[%c112_202, %c384_203] : memref<400x768xf32, #tpu.memory_space<vmem>>, vector<16x384xf32>
    tpu.vector_store %arg27[%c112_202, %c384_203], %150 {strides = array<i32>} : memref<400x768xf32, #tpu.memory_space<vmem>>, vector<16x384xf32>,
    %c0_204 = arith.constant 0 : index
    %c35_205 = arith.constant 35 : index
    %152 = vector.load %arg26[%c0_204, %c35_205] : memref<16x1152xf32, #tpu.memory_space<vmem>>, vector<16x384xf32>
    %c128_206 = arith.constant 128 : index
    %c0_207 = arith.constant 0 : index
    %153 = vector.load %arg27[%c128_206, %c0_207] : memref<400x768xf32, #tpu.memory_space<vmem>>, vector<16x384xf32>
    tpu.vector_store %arg27[%c128_206, %c0_207], %152 {strides = array<i32>} : memref<400x768xf32, #tpu.memory_space<vmem>>, vector<16x384xf32>,
    %c0_208 = arith.constant 0 : index
    %c547 = arith.constant 547 : index
    %154 = vector.load %arg26[%c0_208, %c547] : memref<16x1152xf32, #tpu.memory_space<vmem>>, vector<16x384xf32>
    %c128_209 = arith.constant 128 : index
    %c384_210 = arith.constant 384 : index
    %155 = vector.load %arg27[%c128_209, %c384_210] : memref<400x768xf32, #tpu.memory_space<vmem>>, vector<16x384xf32>
    tpu.vector_store %arg27[%c128_209, %c384_210], %154 {strides = array<i32>} : memref<400x768xf32, #tpu.memory_space<vmem>>, vector<16x384xf32>,
    %c0_211 = arith.constant 0 : index
    %c36_212 = arith.constant 36 : index
    %156 = vector.load %arg26[%c0_211, %c36_212] : memref<16x1152xf32, #tpu.memory_space<vmem>>, vector<16x384xf32>
    %c144 = arith.constant 144 : index
    %c0_213 = arith.constant 0 : index
    %157 = vector.load %arg27[%c144, %c0_213] : memref<400x768xf32, #tpu.memory_space<vmem>>, vector<16x384xf32>
    tpu.vector_store %arg27[%c144, %c0_213], %156 {strides = array<i32>} : memref<400x768xf32, #tpu.memory_space<vmem>>, vector<16x384xf32>,
    %c0_214 = arith.constant 0 : index
    %c548 = arith.constant 548 : index
    %158 = vector.load %arg26[%c0_214, %c548] : memref<16x1152xf32, #tpu.memory_space<vmem>>, vector<16x384xf32>
    %c144_215 = arith.constant 144 : index
    %c384_216 = arith.constant 384 : index
    %159 = vector.load %arg27[%c144_215, %c384_216] : memref<400x768xf32, #tpu.memory_space<vmem>>, vector<16x384xf32>
    tpu.vector_store %arg27[%c144_215, %c384_216], %158 {strides = array<i32>} : memref<400x768xf32, #tpu.memory_space<vmem>>, vector<16x384xf32>,
    %c0_217 = arith.constant 0 : index
    %c64_218 = arith.constant 64 : index
    %160 = vector.load %arg26[%c0_217, %c64_218] : memref<16x1152xf32, #tpu.memory_space<vmem>>, vector<16x384xf32>
    %c160 = arith.constant 160 : index
    %c0_219 = arith.constant 0 : index
    %161 = vector.load %arg27[%c160, %c0_219] : memref<400x768xf32, #tpu.memory_space<vmem>>, vector<16x384xf32>
    tpu.vector_store %arg27[%c160, %c0_219], %160 {strides = array<i32>} : memref<400x768xf32, #tpu.memory_space<vmem>>, vector<16x384xf32>,
    %c0_220 = arith.constant 0 : index
    %c576 = arith.constant 576 : index
    %162 = vector.load %arg26[%c0_220, %c576] : memref<16x1152xf32, #tpu.memory_space<vmem>>, vector<16x384xf32>
    %c160_221 = arith.constant 160 : index
    %c384_222 = arith.constant 384 : index
    %163 = vector.load %arg27[%c160_221, %c384_222] : memref<400x768xf32, #tpu.memory_space<vmem>>, vector<16x384xf32>
    tpu.vector_store %arg27[%c160_221, %c384_222], %162 {strides = array<i32>} : memref<400x768xf32, #tpu.memory_space<vmem>>, vector<16x384xf32>,
    %c0_223 = arith.constant 0 : index
    %c65_224 = arith.constant 65 : index
    %164 = vector.load %arg26[%c0_223, %c65_224] : memref<16x1152xf32, #tpu.memory_space<vmem>>, vector<16x384xf32>
    %c176 = arith.constant 176 : index
    %c0_225 = arith.constant 0 : index
    %165 = vector.load %arg27[%c176, %c0_225] : memref<400x768xf32, #tpu.memory_space<vmem>>, vector<16x384xf32>
    tpu.vector_store %arg27[%c176, %c0_225], %164 {strides = array<i32>} : memref<400x768xf32, #tpu.memory_space<vmem>>, vector<16x384xf32>,
    %c0_226 = arith.constant 0 : index
    %c577 = arith.constant 577 : index
    %166 = vector.load %arg26[%c0_226, %c577] : memref<16x1152xf32, #tpu.memory_space<vmem>>, vector<16x384xf32>
    %c176_227 = arith.constant 176 : index
    %c384_228 = arith.constant 384 : index
    %167 = vector.load %arg27[%c176_227, %c384_228] : memref<400x768xf32, #tpu.memory_space<vmem>>, vector<16x384xf32>
    tpu.vector_store %arg27[%c176_227, %c384_228], %166 {strides = array<i32>} : memref<400x768xf32, #tpu.memory_space<vmem>>, vector<16x384xf32>,
    %c0_229 = arith.constant 0 : index
    %c66_230 = arith.constant 66 : index
    %168 = vector.load %arg26[%c0_229, %c66_230] : memref<16x1152xf32, #tpu.memory_space<vmem>>, vector<16x384xf32>
    %c192 = arith.constant 192 : index
    %c0_231 = arith.constant 0 : index
    %169 = vector.load %arg27[%c192, %c0_231] : memref<400x768xf32, #tpu.memory_space<vmem>>, vector<16x384xf32>
    tpu.vector_store %arg27[%c192, %c0_231], %168 {strides = array<i32>} : memref<400x768xf32, #tpu.memory_space<vmem>>, vector<16x384xf32>,
    %c0_232 = arith.constant 0 : index
    %c578 = arith.constant 578 : index
    %170 = vector.load %arg26[%c0_232, %c578] : memref<16x1152xf32, #tpu.memory_space<vmem>>, vector<16x384xf32>
    %c192_233 = arith.constant 192 : index
    %c384_234 = arith.constant 384 : index
    %171 = vector.load %arg27[%c192_233, %c384_234] : memref<400x768xf32, #tpu.memory_space<vmem>>, vector<16x384xf32>
    tpu.vector_store %arg27[%c192_233, %c384_234], %170 {strides = array<i32>} : memref<400x768xf32, #tpu.memory_space<vmem>>, vector<16x384xf32>,
    %c0_235 = arith.constant 0 : index
    %c67_236 = arith.constant 67 : index
    %172 = vector.load %arg26[%c0_235, %c67_236] : memref<16x1152xf32, #tpu.memory_space<vmem>>, vector<16x384xf32>
    %c208 = arith.constant 208 : index
    %c0_237 = arith.constant 0 : index
    %173 = vector.load %arg27[%c208, %c0_237] : memref<400x768xf32, #tpu.memory_space<vmem>>, vector<16x384xf32>
    tpu.vector_store %arg27[%c208, %c0_237], %172 {strides = array<i32>} : memref<400x768xf32, #tpu.memory_space<vmem>>, vector<16x384xf32>,
    %c0_238 = arith.constant 0 : index
    %c579 = arith.constant 579 : index
    %174 = vector.load %arg26[%c0_238, %c579] : memref<16x1152xf32, #tpu.memory_space<vmem>>, vector<16x384xf32>
    %c208_239 = arith.constant 208 : index
    %c384_240 = arith.constant 384 : index
    %175 = vector.load %arg27[%c208_239, %c384_240] : memref<400x768xf32, #tpu.memory_space<vmem>>, vector<16x384xf32>
    tpu.vector_store %arg27[%c208_239, %c384_240], %174 {strides = array<i32>} : memref<400x768xf32, #tpu.memory_space<vmem>>, vector<16x384xf32>,
    %c0_241 = arith.constant 0 : index
    %c68_242 = arith.constant 68 : index
    %176 = vector.load %arg26[%c0_241, %c68_242] : memref<16x1152xf32, #tpu.memory_space<vmem>>, vector<16x384xf32>
    %c224 = arith.constant 224 : index
    %c0_243 = arith.constant 0 : index
    %177 = vector.load %arg27[%c224, %c0_243] : memref<400x768xf32, #tpu.memory_space<vmem>>, vector<16x384xf32>
    tpu.vector_store %arg27[%c224, %c0_243], %176 {strides = array<i32>} : memref<400x768xf32, #tpu.memory_space<vmem>>, vector<16x384xf32>,
    %c0_244 = arith.constant 0 : index
    %c580 = arith.constant 580 : index
    %178 = vector.load %arg26[%c0_244, %c580] : memref<16x1152xf32, #tpu.memory_space<vmem>>, vector<16x384xf32>
    %c224_245 = arith.constant 224 : index
    %c384_246 = arith.constant 384 : index
    %179 = vector.load %arg27[%c224_245, %c384_246] : memref<400x768xf32, #tpu.memory_space<vmem>>, vector<16x384xf32>
    tpu.vector_store %arg27[%c224_245, %c384_246], %178 {strides = array<i32>} : memref<400x768xf32, #tpu.memory_space<vmem>>, vector<16x384xf32>,
    %c0_247 = arith.constant 0 : index
    %c96_248 = arith.constant 96 : index
    %180 = vector.load %arg26[%c0_247, %c96_248] : memref<16x1152xf32, #tpu.memory_space<vmem>>, vector<16x384xf32>
    %c240 = arith.constant 240 : index
    %c0_249 = arith.constant 0 : index
    %181 = vector.load %arg27[%c240, %c0_249] : memref<400x768xf32, #tpu.memory_space<vmem>>, vector<16x384xf32>
    tpu.vector_store %arg27[%c240, %c0_249], %180 {strides = array<i32>} : memref<400x768xf32, #tpu.memory_space<vmem>>, vector<16x384xf32>,
    %c0_250 = arith.constant 0 : index
    %c608 = arith.constant 608 : index
    %182 = vector.load %arg26[%c0_250, %c608] : memref<16x1152xf32, #tpu.memory_space<vmem>>, vector<16x384xf32>
    %c240_251 = arith.constant 240 : index
    %c384_252 = arith.constant 384 : index
    %183 = vector.load %arg27[%c240_251, %c384_252] : memref<400x768xf32, #tpu.memory_space<vmem>>, vector<16x384xf32>
    tpu.vector_store %arg27[%c240_251, %c384_252], %182 {strides = array<i32>} : memref<400x768xf32, #tpu.memory_space<vmem>>, vector<16x384xf32>,
    %c0_253 = arith.constant 0 : index
    %c97_254 = arith.constant 97 : index
    %184 = vector.load %arg26[%c0_253, %c97_254] : memref<16x1152xf32, #tpu.memory_space<vmem>>, vector<16x384xf32>
    %c256 = arith.constant 256 : index
    %c0_255 = arith.constant 0 : index
    %185 = vector.load %arg27[%c256, %c0_255] : memref<400x768xf32, #tpu.memory_space<vmem>>, vector<16x384xf32>
    tpu.vector_store %arg27[%c256, %c0_255], %184 {strides = array<i32>} : memref<400x768xf32, #tpu.memory_space<vmem>>, vector<16x384xf32>,
    %c0_256 = arith.constant 0 : index
    %c609 = arith.constant 609 : index
    %186 = vector.load %arg26[%c0_256, %c609] : memref<16x1152xf32, #tpu.memory_space<vmem>>, vector<16x384xf32>
    %c256_257 = arith.constant 256 : index
    %c384_258 = arith.constant 384 : index
    %187 = vector.load %arg27[%c256_257, %c384_258] : memref<400x768xf32, #tpu.memory_space<vmem>>, vector<16x384xf32>
    tpu.vector_store %arg27[%c256_257, %c384_258], %186 {strides = array<i32>} : memref<400x768xf32, #tpu.memory_space<vmem>>, vector<16x384xf32>,
    %c0_259 = arith.constant 0 : index
    %c98_260 = arith.constant 98 : index
    %188 = vector.load %arg26[%c0_259, %c98_260] : memref<16x1152xf32, #tpu.memory_space<vmem>>, vector<16x384xf32>
    %c272 = arith.constant 272 : index
    %c0_261 = arith.constant 0 : index
    %189 = vector.load %arg27[%c272, %c0_261] : memref<400x768xf32, #tpu.memory_space<vmem>>, vector<16x384xf32>
    tpu.vector_store %arg27[%c272, %c0_261], %188 {strides = array<i32>} : memref<400x768xf32, #tpu.memory_space<vmem>>, vector<16x384xf32>,
    %c0_262 = arith.constant 0 : index
    %c610 = arith.constant 610 : index
    %190 = vector.load %arg26[%c0_262, %c610] : memref<16x1152xf32, #tpu.memory_space<vmem>>, vector<16x384xf32>
    %c272_263 = arith.constant 272 : index
    %c384_264 = arith.constant 384 : index
    %191 = vector.load %arg27[%c272_263, %c384_264] : memref<400x768xf32, #tpu.memory_space<vmem>>, vector<16x384xf32>
    tpu.vector_store %arg27[%c272_263, %c384_264], %190 {strides = array<i32>} : memref<400x768xf32, #tpu.memory_space<vmem>>, vector<16x384xf32>,
    %c0_265 = arith.constant 0 : index
    %c99_266 = arith.constant 99 : index
    %192 = vector.load %arg26[%c0_265, %c99_266] : memref<16x1152xf32, #tpu.memory_space<vmem>>, vector<16x384xf32>
    %c288 = arith.constant 288 : index
    %c0_267 = arith.constant 0 : index
    %193 = vector.load %arg27[%c288, %c0_267] : memref<400x768xf32, #tpu.memory_space<vmem>>, vector<16x384xf32>
    tpu.vector_store %arg27[%c288, %c0_267], %192 {strides = array<i32>} : memref<400x768xf32, #tpu.memory_space<vmem>>, vector<16x384xf32>,
    %c0_268 = arith.constant 0 : index
    %c611 = arith.constant 611 : index
    %194 = vector.load %arg26[%c0_268, %c611] : memref<16x1152xf32, #tpu.memory_space<vmem>>, vector<16x384xf32>
    %c288_269 = arith.constant 288 : index
    %c384_270 = arith.constant 384 : index
    %195 = vector.load %arg27[%c288_269, %c384_270] : memref<400x768xf32, #tpu.memory_space<vmem>>, vector<16x384xf32>
    tpu.vector_store %arg27[%c288_269, %c384_270], %194 {strides = array<i32>} : memref<400x768xf32, #tpu.memory_space<vmem>>, vector<16x384xf32>,
    %c0_271 = arith.constant 0 : index
    %c100_272 = arith.constant 100 : index
    %196 = vector.load %arg26[%c0_271, %c100_272] : memref<16x1152xf32, #tpu.memory_space<vmem>>, vector<16x384xf32>
    %c304 = arith.constant 304 : index
    %c0_273 = arith.constant 0 : index
    %197 = vector.load %arg27[%c304, %c0_273] : memref<400x768xf32, #tpu.memory_space<vmem>>, vector<16x384xf32>
    tpu.vector_store %arg27[%c304, %c0_273], %196 {strides = array<i32>} : memref<400x768xf32, #tpu.memory_space<vmem>>, vector<16x384xf32>,
    %c0_274 = arith.constant 0 : index
    %c612 = arith.constant 612 : index
    %198 = vector.load %arg26[%c0_274, %c612] : memref<16x1152xf32, #tpu.memory_space<vmem>>, vector<16x384xf32>
    %c304_275 = arith.constant 304 : index
    %c384_276 = arith.constant 384 : index
    %199 = vector.load %arg27[%c304_275, %c384_276] : memref<400x768xf32, #tpu.memory_space<vmem>>, vector<16x384xf32>
    tpu.vector_store %arg27[%c304_275, %c384_276], %198 {strides = array<i32>} : memref<400x768xf32, #tpu.memory_space<vmem>>, vector<16x384xf32>,
    %c0_277 = arith.constant 0 : index
    %c128_278 = arith.constant 128 : index
    %200 = vector.load %arg26[%c0_277, %c128_278] : memref<16x1152xf32, #tpu.memory_space<vmem>>, vector<16x384xf32>
    %c320 = arith.constant 320 : index
    %c0_279 = arith.constant 0 : index
    %201 = vector.load %arg27[%c320, %c0_279] : memref<400x768xf32, #tpu.memory_space<vmem>>, vector<16x384xf32>
    tpu.vector_store %arg27[%c320, %c0_279], %200 {strides = array<i32>} : memref<400x768xf32, #tpu.memory_space<vmem>>, vector<16x384xf32>,
    %c0_280 = arith.constant 0 : index
    %c640_281 = arith.constant 640 : index
    %202 = vector.load %arg26[%c0_280, %c640_281] : memref<16x1152xf32, #tpu.memory_space<vmem>>, vector<16x384xf32>
    %c320_282 = arith.constant 320 : index
    %c384_283 = arith.constant 384 : index
    %203 = vector.load %arg27[%c320_282, %c384_283] : memref<400x768xf32, #tpu.memory_space<vmem>>, vector<16x384xf32>
    tpu.vector_store %arg27[%c320_282, %c384_283], %202 {strides = array<i32>} : memref<400x768xf32, #tpu.memory_space<vmem>>, vector<16x384xf32>,
    %c0_284 = arith.constant 0 : index
    %c129_285 = arith.constant 129 : index
    %204 = vector.load %arg26[%c0_284, %c129_285] : memref<16x1152xf32, #tpu.memory_space<vmem>>, vector<16x384xf32>
    %c336 = arith.constant 336 : index
    %c0_286 = arith.constant 0 : index
    %205 = vector.load %arg27[%c336, %c0_286] : memref<400x768xf32, #tpu.memory_space<vmem>>, vector<16x384xf32>
    tpu.vector_store %arg27[%c336, %c0_286], %204 {strides = array<i32>} : memref<400x768xf32, #tpu.memory_space<vmem>>, vector<16x384xf32>,
    %c0_287 = arith.constant 0 : index
    %c641_288 = arith.constant 641 : index
    %206 = vector.load %arg26[%c0_287, %c641_288] : memref<16x1152xf32, #tpu.memory_space<vmem>>, vector<16x384xf32>
    %c336_289 = arith.constant 336 : index
    %c384_290 = arith.constant 384 : index
    %207 = vector.load %arg27[%c336_289, %c384_290] : memref<400x768xf32, #tpu.memory_space<vmem>>, vector<16x384xf32>
    tpu.vector_store %arg27[%c336_289, %c384_290], %206 {strides = array<i32>} : memref<400x768xf32, #tpu.memory_space<vmem>>, vector<16x384xf32>,
    %c0_291 = arith.constant 0 : index
    %c130_292 = arith.constant 130 : index
    %208 = vector.load %arg26[%c0_291, %c130_292] : memref<16x1152xf32, #tpu.memory_space<vmem>>, vector<16x384xf32>
    %c352 = arith.constant 352 : index
    %c0_293 = arith.constant 0 : index
    %209 = vector.load %arg27[%c352, %c0_293] : memref<400x768xf32, #tpu.memory_space<vmem>>, vector<16x384xf32>
    tpu.vector_store %arg27[%c352, %c0_293], %208 {strides = array<i32>} : memref<400x768xf32, #tpu.memory_space<vmem>>, vector<16x384xf32>,
    %c0_294 = arith.constant 0 : index
    %c642_295 = arith.constant 642 : index
    %210 = vector.load %arg26[%c0_294, %c642_295] : memref<16x1152xf32, #tpu.memory_space<vmem>>, vector<16x384xf32>
    %c352_296 = arith.constant 352 : index
    %c384_297 = arith.constant 384 : index
    %211 = vector.load %arg27[%c352_296, %c384_297] : memref<400x768xf32, #tpu.memory_space<vmem>>, vector<16x384xf32>
    tpu.vector_store %arg27[%c352_296, %c384_297], %210 {strides = array<i32>} : memref<400x768xf32, #tpu.memory_space<vmem>>, vector<16x384xf32>,
    %c0_298 = arith.constant 0 : index
    %c131_299 = arith.constant 131 : index
    %212 = vector.load %arg26[%c0_298, %c131_299] : memref<16x1152xf32, #tpu.memory_space<vmem>>, vector<16x384xf32>
    %c368 = arith.constant 368 : index
    %c0_300 = arith.constant 0 : index
    %213 = vector.load %arg27[%c368, %c0_300] : memref<400x768xf32, #tpu.memory_space<vmem>>, vector<16x384xf32>
    tpu.vector_store %arg27[%c368, %c0_300], %212 {strides = array<i32>} : memref<400x768xf32, #tpu.memory_space<vmem>>, vector<16x384xf32>,
    %c0_301 = arith.constant 0 : index
    %c643_302 = arith.constant 643 : index
    %214 = vector.load %arg26[%c0_301, %c643_302] : memref<16x1152xf32, #tpu.memory_space<vmem>>, vector<16x384xf32>
    %c368_303 = arith.constant 368 : index
    %c384_304 = arith.constant 384 : index
    %215 = vector.load %arg27[%c368_303, %c384_304] : memref<400x768xf32, #tpu.memory_space<vmem>>, vector<16x384xf32>
    tpu.vector_store %arg27[%c368_303, %c384_304], %214 {strides = array<i32>} : memref<400x768xf32, #tpu.memory_space<vmem>>, vector<16x384xf32>,
    %c0_305 = arith.constant 0 : index
    %c132_306 = arith.constant 132 : index
    %216 = vector.load %arg26[%c0_305, %c132_306] : memref<16x1152xf32, #tpu.memory_space<vmem>>, vector<16x384xf32>
    %c384_307 = arith.constant 384 : index
    %c0_308 = arith.constant 0 : index
    %217 = vector.load %arg27[%c384_307, %c0_308] : memref<400x768xf32, #tpu.memory_space<vmem>>, vector<16x384xf32>
    tpu.vector_store %arg27[%c384_307, %c0_308], %216 {strides = array<i32>} : memref<400x768xf32, #tpu.memory_space<vmem>>, vector<16x384xf32>,
    %c0_309 = arith.constant 0 : index
    %c644_310 = arith.constant 644 : index
    %218 = vector.load %arg26[%c0_309, %c644_310] : memref<16x1152xf32, #tpu.memory_space<vmem>>, vector<16x384xf32>
    %c384_311 = arith.constant 384 : index
    %c384_312 = arith.constant 384 : index
    %219 = vector.load %arg27[%c384_311, %c384_312] : memref<400x768xf32, #tpu.memory_space<vmem>>, vector<16x384xf32>
    tpu.vector_store %arg27[%c384_311, %c384_312], %218 {strides = array<i32>} : memref<400x768xf32, #tpu.memory_space<vmem>>, vector<16x384xf32>,
    %c0_313 = arith.constant 0 : index
    %c0_314 = arith.constant 0 : index
    %220 = vector.load %arg6[%c0_313, %c0_314] : memref<32x400xf32, #tpu.memory_space<vmem>>, vector<32x400xf32>
    %c0_315 = arith.constant 0 : index
    %c0_316 = arith.constant 0 : index
    %221 = vector.load %arg27[%c0_315, %c0_316] : memref<400x768xf32, #tpu.memory_space<vmem>>, vector<400x768xf32>
    %cst_317 = arith.constant dense<0.000000e+00> : vector<32x768xf32>
    %222 = tpu.matmul %220, %221, %cst_317 {dimension_numbers = #tpu.dot_dimension_numbers<[1], [0], [0], [1], [0, 0, 1, 1], [], []>} : vector<32x400xf32>, vector<400x768xf32>, vector<32x768xf32> -> vector<32x768xf32>
    %c0_318 = arith.constant 0 : index
    %c0_319 = arith.constant 0 : index
    %223 = vector.load %arg7[%c0_318, %c0_319] : memref<32x1xf32, #tpu.memory_space<vmem>>, vector<32x1xf32>
    %224 = vector.broadcast %223 : vector<32x1xf32> to vector<32x768xf32>
    %225 = arith.addf %222, %224 : vector<32x768xf32>
    %cst_320 = arith.constant 0.000000e+00 : f32
    %226 = vector.broadcast %cst_320 : f32 to vector<32x768xf32>
    %227 = arith.maximumf %225, %226 : vector<32x768xf32>
    %c0_321 = arith.constant 0 : index
    %c0_322 = arith.constant 0 : index
    %228 = vector.load %arg28[%c0_321, %c0_322] : memref<32x896xf32, #tpu.memory_space<vmem>>, vector<32x768xf32>
    tpu.vector_store %arg28[%c0_321, %c0_322], %227 {strides = array<i32>} : memref<32x896xf32, #tpu.memory_space<vmem>>, vector<32x768xf32>,
    %c0_323 = arith.constant 0 : index
    %c0_324 = arith.constant 0 : index
    %229 = vector.load %arg28[%c0_323, %c0_324] : memref<32x896xf32, #tpu.memory_space<vmem>>, vector<32x256xf32>
    %c0_325 = arith.constant 0 : index
    %c0_326 = arith.constant 0 : index
    %230 = vector.load %arg29[%c0_325, %c0_326] : memref<800x512xf32, #tpu.memory_space<vmem>>, vector<32x256xf32>
    tpu.vector_store %arg29[%c0_325, %c0_326], %229 {strides = array<i32>} : memref<800x512xf32, #tpu.memory_space<vmem>>, vector<32x256xf32>,
    %c0_327 = arith.constant 0 : index
    %c384_328 = arith.constant 384 : index
    %231 = vector.load %arg28[%c0_327, %c384_328] : memref<32x896xf32, #tpu.memory_space<vmem>>, vector<32x256xf32>
    %c0_329 = arith.constant 0 : index
    %c256_330 = arith.constant 256 : index
    %232 = vector.load %arg29[%c0_329, %c256_330] : memref<800x512xf32, #tpu.memory_space<vmem>>, vector<32x256xf32>
    tpu.vector_store %arg29[%c0_329, %c256_330], %231 {strides = array<i32>} : memref<800x512xf32, #tpu.memory_space<vmem>>, vector<32x256xf32>,
    %c0_331 = arith.constant 0 : index
    %c1_332 = arith.constant 1 : index
    %233 = vector.load %arg28[%c0_331, %c1_332] : memref<32x896xf32, #tpu.memory_space<vmem>>, vector<32x256xf32>
    %c32_333 = arith.constant 32 : index
    %c0_334 = arith.constant 0 : index
    %234 = vector.load %arg29[%c32_333, %c0_334] : memref<800x512xf32, #tpu.memory_space<vmem>>, vector<32x256xf32>
    tpu.vector_store %arg29[%c32_333, %c0_334], %233 {strides = array<i32>} : memref<800x512xf32, #tpu.memory_space<vmem>>, vector<32x256xf32>,
    %c0_335 = arith.constant 0 : index
    %c385 = arith.constant 385 : index
    %235 = vector.load %arg28[%c0_335, %c385] : memref<32x896xf32, #tpu.memory_space<vmem>>, vector<32x256xf32>
    %c32_336 = arith.constant 32 : index
    %c256_337 = arith.constant 256 : index
    %236 = vector.load %arg29[%c32_336, %c256_337] : memref<800x512xf32, #tpu.memory_space<vmem>>, vector<32x256xf32>
    tpu.vector_store %arg29[%c32_336, %c256_337], %235 {strides = array<i32>} : memref<800x512xf32, #tpu.memory_space<vmem>>, vector<32x256xf32>,
    %c0_338 = arith.constant 0 : index
    %c2_339 = arith.constant 2 : index
    %237 = vector.load %arg28[%c0_338, %c2_339] : memref<32x896xf32, #tpu.memory_space<vmem>>, vector<32x256xf32>
    %c64_340 = arith.constant 64 : index
    %c0_341 = arith.constant 0 : index
    %238 = vector.load %arg29[%c64_340, %c0_341] : memref<800x512xf32, #tpu.memory_space<vmem>>, vector<32x256xf32>
    tpu.vector_store %arg29[%c64_340, %c0_341], %237 {strides = array<i32>} : memref<800x512xf32, #tpu.memory_space<vmem>>, vector<32x256xf32>,
    %c0_342 = arith.constant 0 : index
    %c386 = arith.constant 386 : index
    %239 = vector.load %arg28[%c0_342, %c386] : memref<32x896xf32, #tpu.memory_space<vmem>>, vector<32x256xf32>
    %c64_343 = arith.constant 64 : index
    %c256_344 = arith.constant 256 : index
    %240 = vector.load %arg29[%c64_343, %c256_344] : memref<800x512xf32, #tpu.memory_space<vmem>>, vector<32x256xf32>
    tpu.vector_store %arg29[%c64_343, %c256_344], %239 {strides = array<i32>} : memref<800x512xf32, #tpu.memory_space<vmem>>, vector<32x256xf32>,
    %c0_345 = arith.constant 0 : index
    %c3_346 = arith.constant 3 : index
    %241 = vector.load %arg28[%c0_345, %c3_346] : memref<32x896xf32, #tpu.memory_space<vmem>>, vector<32x256xf32>
    %c96_347 = arith.constant 96 : index
    %c0_348 = arith.constant 0 : index
    %242 = vector.load %arg29[%c96_347, %c0_348] : memref<800x512xf32, #tpu.memory_space<vmem>>, vector<32x256xf32>
    tpu.vector_store %arg29[%c96_347, %c0_348], %241 {strides = array<i32>} : memref<800x512xf32, #tpu.memory_space<vmem>>, vector<32x256xf32>,
    %c0_349 = arith.constant 0 : index
    %c387 = arith.constant 387 : index
    %243 = vector.load %arg28[%c0_349, %c387] : memref<32x896xf32, #tpu.memory_space<vmem>>, vector<32x256xf32>
    %c96_350 = arith.constant 96 : index
    %c256_351 = arith.constant 256 : index
    %244 = vector.load %arg29[%c96_350, %c256_351] : memref<800x512xf32, #tpu.memory_space<vmem>>, vector<32x256xf32>
    tpu.vector_store %arg29[%c96_350, %c256_351], %243 {strides = array<i32>} : memref<800x512xf32, #tpu.memory_space<vmem>>, vector<32x256xf32>,
    %c0_352 = arith.constant 0 : index
    %c4_353 = arith.constant 4 : index
    %245 = vector.load %arg28[%c0_352, %c4_353] : memref<32x896xf32, #tpu.memory_space<vmem>>, vector<32x256xf32>
    %c128_354 = arith.constant 128 : index
    %c0_355 = arith.constant 0 : index
    %246 = vector.load %arg29[%c128_354, %c0_355] : memref<800x512xf32, #tpu.memory_space<vmem>>, vector<32x256xf32>
    tpu.vector_store %arg29[%c128_354, %c0_355], %245 {strides = array<i32>} : memref<800x512xf32, #tpu.memory_space<vmem>>, vector<32x256xf32>,
    %c0_356 = arith.constant 0 : index
    %c388 = arith.constant 388 : index
    %247 = vector.load %arg28[%c0_356, %c388] : memref<32x896xf32, #tpu.memory_space<vmem>>, vector<32x256xf32>
    %c128_357 = arith.constant 128 : index
    %c256_358 = arith.constant 256 : index
    %248 = vector.load %arg29[%c128_357, %c256_358] : memref<800x512xf32, #tpu.memory_space<vmem>>, vector<32x256xf32>
    tpu.vector_store %arg29[%c128_357, %c256_358], %247 {strides = array<i32>} : memref<800x512xf32, #tpu.memory_space<vmem>>, vector<32x256xf32>,
    %c0_359 = arith.constant 0 : index
    %c32_360 = arith.constant 32 : index
    %249 = vector.load %arg28[%c0_359, %c32_360] : memref<32x896xf32, #tpu.memory_space<vmem>>, vector<32x256xf32>
    %c160_361 = arith.constant 160 : index
    %c0_362 = arith.constant 0 : index
    %250 = vector.load %arg29[%c160_361, %c0_362] : memref<800x512xf32, #tpu.memory_space<vmem>>, vector<32x256xf32>
    tpu.vector_store %arg29[%c160_361, %c0_362], %249 {strides = array<i32>} : memref<800x512xf32, #tpu.memory_space<vmem>>, vector<32x256xf32>,
    %c0_363 = arith.constant 0 : index
    %c416 = arith.constant 416 : index
    %251 = vector.load %arg28[%c0_363, %c416] : memref<32x896xf32, #tpu.memory_space<vmem>>, vector<32x256xf32>
    %c160_364 = arith.constant 160 : index
    %c256_365 = arith.constant 256 : index
    %252 = vector.load %arg29[%c160_364, %c256_365] : memref<800x512xf32, #tpu.memory_space<vmem>>, vector<32x256xf32>
    tpu.vector_store %arg29[%c160_364, %c256_365], %251 {strides = array<i32>} : memref<800x512xf32, #tpu.memory_space<vmem>>, vector<32x256xf32>,
    %c0_366 = arith.constant 0 : index
    %c33_367 = arith.constant 33 : index
    %253 = vector.load %arg28[%c0_366, %c33_367] : memref<32x896xf32, #tpu.memory_space<vmem>>, vector<32x256xf32>
    %c192_368 = arith.constant 192 : index
    %c0_369 = arith.constant 0 : index
    %254 = vector.load %arg29[%c192_368, %c0_369] : memref<800x512xf32, #tpu.memory_space<vmem>>, vector<32x256xf32>
    tpu.vector_store %arg29[%c192_368, %c0_369], %253 {strides = array<i32>} : memref<800x512xf32, #tpu.memory_space<vmem>>, vector<32x256xf32>,
    %c0_370 = arith.constant 0 : index
    %c417 = arith.constant 417 : index
    %255 = vector.load %arg28[%c0_370, %c417] : memref<32x896xf32, #tpu.memory_space<vmem>>, vector<32x256xf32>
    %c192_371 = arith.constant 192 : index
    %c256_372 = arith.constant 256 : index
    %256 = vector.load %arg29[%c192_371, %c256_372] : memref<800x512xf32, #tpu.memory_space<vmem>>, vector<32x256xf32>
    tpu.vector_store %arg29[%c192_371, %c256_372], %255 {strides = array<i32>} : memref<800x512xf32, #tpu.memory_space<vmem>>, vector<32x256xf32>,
    %c0_373 = arith.constant 0 : index
    %c34_374 = arith.constant 34 : index
    %257 = vector.load %arg28[%c0_373, %c34_374] : memref<32x896xf32, #tpu.memory_space<vmem>>, vector<32x256xf32>
    %c224_375 = arith.constant 224 : index
    %c0_376 = arith.constant 0 : index
    %258 = vector.load %arg29[%c224_375, %c0_376] : memref<800x512xf32, #tpu.memory_space<vmem>>, vector<32x256xf32>
    tpu.vector_store %arg29[%c224_375, %c0_376], %257 {strides = array<i32>} : memref<800x512xf32, #tpu.memory_space<vmem>>, vector<32x256xf32>,
    %c0_377 = arith.constant 0 : index
    %c418 = arith.constant 418 : index
    %259 = vector.load %arg28[%c0_377, %c418] : memref<32x896xf32, #tpu.memory_space<vmem>>, vector<32x256xf32>
    %c224_378 = arith.constant 224 : index
    %c256_379 = arith.constant 256 : index
    %260 = vector.load %arg29[%c224_378, %c256_379] : memref<800x512xf32, #tpu.memory_space<vmem>>, vector<32x256xf32>
    tpu.vector_store %arg29[%c224_378, %c256_379], %259 {strides = array<i32>} : memref<800x512xf32, #tpu.memory_space<vmem>>, vector<32x256xf32>,
    %c0_380 = arith.constant 0 : index
    %c35_381 = arith.constant 35 : index
    %261 = vector.load %arg28[%c0_380, %c35_381] : memref<32x896xf32, #tpu.memory_space<vmem>>, vector<32x256xf32>
    %c256_382 = arith.constant 256 : index
    %c0_383 = arith.constant 0 : index
    %262 = vector.load %arg29[%c256_382, %c0_383] : memref<800x512xf32, #tpu.memory_space<vmem>>, vector<32x256xf32>
    tpu.vector_store %arg29[%c256_382, %c0_383], %261 {strides = array<i32>} : memref<800x512xf32, #tpu.memory_space<vmem>>, vector<32x256xf32>,
    %c0_384 = arith.constant 0 : index
    %c419 = arith.constant 419 : index
    %263 = vector.load %arg28[%c0_384, %c419] : memref<32x896xf32, #tpu.memory_space<vmem>>, vector<32x256xf32>
    %c256_385 = arith.constant 256 : index
    %c256_386 = arith.constant 256 : index
    %264 = vector.load %arg29[%c256_385, %c256_386] : memref<800x512xf32, #tpu.memory_space<vmem>>, vector<32x256xf32>
    tpu.vector_store %arg29[%c256_385, %c256_386], %263 {strides = array<i32>} : memref<800x512xf32, #tpu.memory_space<vmem>>, vector<32x256xf32>,
    %c0_387 = arith.constant 0 : index
    %c36_388 = arith.constant 36 : index
    %265 = vector.load %arg28[%c0_387, %c36_388] : memref<32x896xf32, #tpu.memory_space<vmem>>, vector<32x256xf32>
    %c288_389 = arith.constant 288 : index
    %c0_390 = arith.constant 0 : index
    %266 = vector.load %arg29[%c288_389, %c0_390] : memref<800x512xf32, #tpu.memory_space<vmem>>, vector<32x256xf32>
    tpu.vector_store %arg29[%c288_389, %c0_390], %265 {strides = array<i32>} : memref<800x512xf32, #tpu.memory_space<vmem>>, vector<32x256xf32>,
    %c0_391 = arith.constant 0 : index
    %c420 = arith.constant 420 : index
    %267 = vector.load %arg28[%c0_391, %c420] : memref<32x896xf32, #tpu.memory_space<vmem>>, vector<32x256xf32>
    %c288_392 = arith.constant 288 : index
    %c256_393 = arith.constant 256 : index
    %268 = vector.load %arg29[%c288_392, %c256_393] : memref<800x512xf32, #tpu.memory_space<vmem>>, vector<32x256xf32>
    tpu.vector_store %arg29[%c288_392, %c256_393], %267 {strides = array<i32>} : memref<800x512xf32, #tpu.memory_space<vmem>>, vector<32x256xf32>,
    %c0_394 = arith.constant 0 : index
    %c64_395 = arith.constant 64 : index
    %269 = vector.load %arg28[%c0_394, %c64_395] : memref<32x896xf32, #tpu.memory_space<vmem>>, vector<32x256xf32>
    %c320_396 = arith.constant 320 : index
    %c0_397 = arith.constant 0 : index
    %270 = vector.load %arg29[%c320_396, %c0_397] : memref<800x512xf32, #tpu.memory_space<vmem>>, vector<32x256xf32>
    tpu.vector_store %arg29[%c320_396, %c0_397], %269 {strides = array<i32>} : memref<800x512xf32, #tpu.memory_space<vmem>>, vector<32x256xf32>,
    %c0_398 = arith.constant 0 : index
    %c448 = arith.constant 448 : index
    %271 = vector.load %arg28[%c0_398, %c448] : memref<32x896xf32, #tpu.memory_space<vmem>>, vector<32x256xf32>
    %c320_399 = arith.constant 320 : index
    %c256_400 = arith.constant 256 : index
    %272 = vector.load %arg29[%c320_399, %c256_400] : memref<800x512xf32, #tpu.memory_space<vmem>>, vector<32x256xf32>
    tpu.vector_store %arg29[%c320_399, %c256_400], %271 {strides = array<i32>} : memref<800x512xf32, #tpu.memory_space<vmem>>, vector<32x256xf32>,
    %c0_401 = arith.constant 0 : index
    %c65_402 = arith.constant 65 : index
    %273 = vector.load %arg28[%c0_401, %c65_402] : memref<32x896xf32, #tpu.memory_space<vmem>>, vector<32x256xf32>
    %c352_403 = arith.constant 352 : index
    %c0_404 = arith.constant 0 : index
    %274 = vector.load %arg29[%c352_403, %c0_404] : memref<800x512xf32, #tpu.memory_space<vmem>>, vector<32x256xf32>
    tpu.vector_store %arg29[%c352_403, %c0_404], %273 {strides = array<i32>} : memref<800x512xf32, #tpu.memory_space<vmem>>, vector<32x256xf32>,
    %c0_405 = arith.constant 0 : index
    %c449 = arith.constant 449 : index
    %275 = vector.load %arg28[%c0_405, %c449] : memref<32x896xf32, #tpu.memory_space<vmem>>, vector<32x256xf32>
    %c352_406 = arith.constant 352 : index
    %c256_407 = arith.constant 256 : index
    %276 = vector.load %arg29[%c352_406, %c256_407] : memref<800x512xf32, #tpu.memory_space<vmem>>, vector<32x256xf32>
    tpu.vector_store %arg29[%c352_406, %c256_407], %275 {strides = array<i32>} : memref<800x512xf32, #tpu.memory_space<vmem>>, vector<32x256xf32>,
    %c0_408 = arith.constant 0 : index
    %c66_409 = arith.constant 66 : index
    %277 = vector.load %arg28[%c0_408, %c66_409] : memref<32x896xf32, #tpu.memory_space<vmem>>, vector<32x256xf32>
    %c384_410 = arith.constant 384 : index
    %c0_411 = arith.constant 0 : index
    %278 = vector.load %arg29[%c384_410, %c0_411] : memref<800x512xf32, #tpu.memory_space<vmem>>, vector<32x256xf32>
    tpu.vector_store %arg29[%c384_410, %c0_411], %277 {strides = array<i32>} : memref<800x512xf32, #tpu.memory_space<vmem>>, vector<32x256xf32>,
    %c0_412 = arith.constant 0 : index
    %c450 = arith.constant 450 : index
    %279 = vector.load %arg28[%c0_412, %c450] : memref<32x896xf32, #tpu.memory_space<vmem>>, vector<32x256xf32>
    %c384_413 = arith.constant 384 : index
    %c256_414 = arith.constant 256 : index
    %280 = vector.load %arg29[%c384_413, %c256_414] : memref<800x512xf32, #tpu.memory_space<vmem>>, vector<32x256xf32>
    tpu.vector_store %arg29[%c384_413, %c256_414], %279 {strides = array<i32>} : memref<800x512xf32, #tpu.memory_space<vmem>>, vector<32x256xf32>,
    %c0_415 = arith.constant 0 : index
    %c67_416 = arith.constant 67 : index
    %281 = vector.load %arg28[%c0_415, %c67_416] : memref<32x896xf32, #tpu.memory_space<vmem>>, vector<32x256xf32>
    %c416_417 = arith.constant 416 : index
    %c0_418 = arith.constant 0 : index
    %282 = vector.load %arg29[%c416_417, %c0_418] : memref<800x512xf32, #tpu.memory_space<vmem>>, vector<32x256xf32>
    tpu.vector_store %arg29[%c416_417, %c0_418], %281 {strides = array<i32>} : memref<800x512xf32, #tpu.memory_space<vmem>>, vector<32x256xf32>,
    %c0_419 = arith.constant 0 : index
    %c451 = arith.constant 451 : index
    %283 = vector.load %arg28[%c0_419, %c451] : memref<32x896xf32, #tpu.memory_space<vmem>>, vector<32x256xf32>
    %c416_420 = arith.constant 416 : index
    %c256_421 = arith.constant 256 : index
    %284 = vector.load %arg29[%c416_420, %c256_421] : memref<800x512xf32, #tpu.memory_space<vmem>>, vector<32x256xf32>
    tpu.vector_store %arg29[%c416_420, %c256_421], %283 {strides = array<i32>} : memref<800x512xf32, #tpu.memory_space<vmem>>, vector<32x256xf32>,
    %c0_422 = arith.constant 0 : index
    %c68_423 = arith.constant 68 : index
    %285 = vector.load %arg28[%c0_422, %c68_423] : memref<32x896xf32, #tpu.memory_space<vmem>>, vector<32x256xf32>
    %c448_424 = arith.constant 448 : index
    %c0_425 = arith.constant 0 : index
    %286 = vector.load %arg29[%c448_424, %c0_425] : memref<800x512xf32, #tpu.memory_space<vmem>>, vector<32x256xf32>
    tpu.vector_store %arg29[%c448_424, %c0_425], %285 {strides = array<i32>} : memref<800x512xf32, #tpu.memory_space<vmem>>, vector<32x256xf32>,
    %c0_426 = arith.constant 0 : index
    %c452 = arith.constant 452 : index
    %287 = vector.load %arg28[%c0_426, %c452] : memref<32x896xf32, #tpu.memory_space<vmem>>, vector<32x256xf32>
    %c448_427 = arith.constant 448 : index
    %c256_428 = arith.constant 256 : index
    %288 = vector.load %arg29[%c448_427, %c256_428] : memref<800x512xf32, #tpu.memory_space<vmem>>, vector<32x256xf32>
    tpu.vector_store %arg29[%c448_427, %c256_428], %287 {strides = array<i32>} : memref<800x512xf32, #tpu.memory_space<vmem>>, vector<32x256xf32>,
    %c0_429 = arith.constant 0 : index
    %c96_430 = arith.constant 96 : index
    %289 = vector.load %arg28[%c0_429, %c96_430] : memref<32x896xf32, #tpu.memory_space<vmem>>, vector<32x256xf32>
    %c480 = arith.constant 480 : index
    %c0_431 = arith.constant 0 : index
    %290 = vector.load %arg29[%c480, %c0_431] : memref<800x512xf32, #tpu.memory_space<vmem>>, vector<32x256xf32>
    tpu.vector_store %arg29[%c480, %c0_431], %289 {strides = array<i32>} : memref<800x512xf32, #tpu.memory_space<vmem>>, vector<32x256xf32>,
    %c0_432 = arith.constant 0 : index
    %c480_433 = arith.constant 480 : index
    %291 = vector.load %arg28[%c0_432, %c480_433] : memref<32x896xf32, #tpu.memory_space<vmem>>, vector<32x256xf32>
    %c480_434 = arith.constant 480 : index
    %c256_435 = arith.constant 256 : index
    %292 = vector.load %arg29[%c480_434, %c256_435] : memref<800x512xf32, #tpu.memory_space<vmem>>, vector<32x256xf32>
    tpu.vector_store %arg29[%c480_434, %c256_435], %291 {strides = array<i32>} : memref<800x512xf32, #tpu.memory_space<vmem>>, vector<32x256xf32>,
    %c0_436 = arith.constant 0 : index
    %c97_437 = arith.constant 97 : index
    %293 = vector.load %arg28[%c0_436, %c97_437] : memref<32x896xf32, #tpu.memory_space<vmem>>, vector<32x256xf32>
    %c512_438 = arith.constant 512 : index
    %c0_439 = arith.constant 0 : index
    %294 = vector.load %arg29[%c512_438, %c0_439] : memref<800x512xf32, #tpu.memory_space<vmem>>, vector<32x256xf32>
    tpu.vector_store %arg29[%c512_438, %c0_439], %293 {strides = array<i32>} : memref<800x512xf32, #tpu.memory_space<vmem>>, vector<32x256xf32>,
    %c0_440 = arith.constant 0 : index
    %c481 = arith.constant 481 : index
    %295 = vector.load %arg28[%c0_440, %c481] : memref<32x896xf32, #tpu.memory_space<vmem>>, vector<32x256xf32>
    %c512_441 = arith.constant 512 : index
    %c256_442 = arith.constant 256 : index
    %296 = vector.load %arg29[%c512_441, %c256_442] : memref<800x512xf32, #tpu.memory_space<vmem>>, vector<32x256xf32>
    tpu.vector_store %arg29[%c512_441, %c256_442], %295 {strides = array<i32>} : memref<800x512xf32, #tpu.memory_space<vmem>>, vector<32x256xf32>,
    %c0_443 = arith.constant 0 : index
    %c98_444 = arith.constant 98 : index
    %297 = vector.load %arg28[%c0_443, %c98_444] : memref<32x896xf32, #tpu.memory_space<vmem>>, vector<32x256xf32>
    %c544_445 = arith.constant 544 : index
    %c0_446 = arith.constant 0 : index
    %298 = vector.load %arg29[%c544_445, %c0_446] : memref<800x512xf32, #tpu.memory_space<vmem>>, vector<32x256xf32>
    tpu.vector_store %arg29[%c544_445, %c0_446], %297 {strides = array<i32>} : memref<800x512xf32, #tpu.memory_space<vmem>>, vector<32x256xf32>,
    %c0_447 = arith.constant 0 : index
    %c482 = arith.constant 482 : index
    %299 = vector.load %arg28[%c0_447, %c482] : memref<32x896xf32, #tpu.memory_space<vmem>>, vector<32x256xf32>
    %c544_448 = arith.constant 544 : index
    %c256_449 = arith.constant 256 : index
    %300 = vector.load %arg29[%c544_448, %c256_449] : memref<800x512xf32, #tpu.memory_space<vmem>>, vector<32x256xf32>
    tpu.vector_store %arg29[%c544_448, %c256_449], %299 {strides = array<i32>} : memref<800x512xf32, #tpu.memory_space<vmem>>, vector<32x256xf32>,
    %c0_450 = arith.constant 0 : index
    %c99_451 = arith.constant 99 : index
    %301 = vector.load %arg28[%c0_450, %c99_451] : memref<32x896xf32, #tpu.memory_space<vmem>>, vector<32x256xf32>
    %c576_452 = arith.constant 576 : index
    %c0_453 = arith.constant 0 : index
    %302 = vector.load %arg29[%c576_452, %c0_453] : memref<800x512xf32, #tpu.memory_space<vmem>>, vector<32x256xf32>
    tpu.vector_store %arg29[%c576_452, %c0_453], %301 {strides = array<i32>} : memref<800x512xf32, #tpu.memory_space<vmem>>, vector<32x256xf32>,
    %c0_454 = arith.constant 0 : index
    %c483 = arith.constant 483 : index
    %303 = vector.load %arg28[%c0_454, %c483] : memref<32x896xf32, #tpu.memory_space<vmem>>, vector<32x256xf32>
    %c576_455 = arith.constant 576 : index
    %c256_456 = arith.constant 256 : index
    %304 = vector.load %arg29[%c576_455, %c256_456] : memref<800x512xf32, #tpu.memory_space<vmem>>, vector<32x256xf32>
    tpu.vector_store %arg29[%c576_455, %c256_456], %303 {strides = array<i32>} : memref<800x512xf32, #tpu.memory_space<vmem>>, vector<32x256xf32>,
    %c0_457 = arith.constant 0 : index
    %c100_458 = arith.constant 100 : index
    %305 = vector.load %arg28[%c0_457, %c100_458] : memref<32x896xf32, #tpu.memory_space<vmem>>, vector<32x256xf32>
    %c608_459 = arith.constant 608 : index
    %c0_460 = arith.constant 0 : index
    %306 = vector.load %arg29[%c608_459, %c0_460] : memref<800x512xf32, #tpu.memory_space<vmem>>, vector<32x256xf32>
    tpu.vector_store %arg29[%c608_459, %c0_460], %305 {strides = array<i32>} : memref<800x512xf32, #tpu.memory_space<vmem>>, vector<32x256xf32>,
    %c0_461 = arith.constant 0 : index
    %c484 = arith.constant 484 : index
    %307 = vector.load %arg28[%c0_461, %c484] : memref<32x896xf32, #tpu.memory_space<vmem>>, vector<32x256xf32>
    %c608_462 = arith.constant 608 : index
    %c256_463 = arith.constant 256 : index
    %308 = vector.load %arg29[%c608_462, %c256_463] : memref<800x512xf32, #tpu.memory_space<vmem>>, vector<32x256xf32>
    tpu.vector_store %arg29[%c608_462, %c256_463], %307 {strides = array<i32>} : memref<800x512xf32, #tpu.memory_space<vmem>>, vector<32x256xf32>,
    %c0_464 = arith.constant 0 : index
    %c128_465 = arith.constant 128 : index
    %309 = vector.load %arg28[%c0_464, %c128_465] : memref<32x896xf32, #tpu.memory_space<vmem>>, vector<32x256xf32>
    %c640_466 = arith.constant 640 : index
    %c0_467 = arith.constant 0 : index
    %310 = vector.load %arg29[%c640_466, %c0_467] : memref<800x512xf32, #tpu.memory_space<vmem>>, vector<32x256xf32>
    tpu.vector_store %arg29[%c640_466, %c0_467], %309 {strides = array<i32>} : memref<800x512xf32, #tpu.memory_space<vmem>>, vector<32x256xf32>,
    %c0_468 = arith.constant 0 : index
    %c512_469 = arith.constant 512 : index
    %311 = vector.load %arg28[%c0_468, %c512_469] : memref<32x896xf32, #tpu.memory_space<vmem>>, vector<32x256xf32>
    %c640_470 = arith.constant 640 : index
    %c256_471 = arith.constant 256 : index
    %312 = vector.load %arg29[%c640_470, %c256_471] : memref<800x512xf32, #tpu.memory_space<vmem>>, vector<32x256xf32>
    tpu.vector_store %arg29[%c640_470, %c256_471], %311 {strides = array<i32>} : memref<800x512xf32, #tpu.memory_space<vmem>>, vector<32x256xf32>,
    %c0_472 = arith.constant 0 : index
    %c129_473 = arith.constant 129 : index
    %313 = vector.load %arg28[%c0_472, %c129_473] : memref<32x896xf32, #tpu.memory_space<vmem>>, vector<32x256xf32>
    %c672_474 = arith.constant 672 : index
    %c0_475 = arith.constant 0 : index
    %314 = vector.load %arg29[%c672_474, %c0_475] : memref<800x512xf32, #tpu.memory_space<vmem>>, vector<32x256xf32>
    tpu.vector_store %arg29[%c672_474, %c0_475], %313 {strides = array<i32>} : memref<800x512xf32, #tpu.memory_space<vmem>>, vector<32x256xf32>,
    %c0_476 = arith.constant 0 : index
    %c513_477 = arith.constant 513 : index
    %315 = vector.load %arg28[%c0_476, %c513_477] : memref<32x896xf32, #tpu.memory_space<vmem>>, vector<32x256xf32>
    %c672_478 = arith.constant 672 : index
    %c256_479 = arith.constant 256 : index
    %316 = vector.load %arg29[%c672_478, %c256_479] : memref<800x512xf32, #tpu.memory_space<vmem>>, vector<32x256xf32>
    tpu.vector_store %arg29[%c672_478, %c256_479], %315 {strides = array<i32>} : memref<800x512xf32, #tpu.memory_space<vmem>>, vector<32x256xf32>,
    %c0_480 = arith.constant 0 : index
    %c130_481 = arith.constant 130 : index
    %317 = vector.load %arg28[%c0_480, %c130_481] : memref<32x896xf32, #tpu.memory_space<vmem>>, vector<32x256xf32>
    %c704_482 = arith.constant 704 : index
    %c0_483 = arith.constant 0 : index
    %318 = vector.load %arg29[%c704_482, %c0_483] : memref<800x512xf32, #tpu.memory_space<vmem>>, vector<32x256xf32>
    tpu.vector_store %arg29[%c704_482, %c0_483], %317 {strides = array<i32>} : memref<800x512xf32, #tpu.memory_space<vmem>>, vector<32x256xf32>,
    %c0_484 = arith.constant 0 : index
    %c514_485 = arith.constant 514 : index
    %319 = vector.load %arg28[%c0_484, %c514_485] : memref<32x896xf32, #tpu.memory_space<vmem>>, vector<32x256xf32>
    %c704_486 = arith.constant 704 : index
    %c256_487 = arith.constant 256 : index
    %320 = vector.load %arg29[%c704_486, %c256_487] : memref<800x512xf32, #tpu.memory_space<vmem>>, vector<32x256xf32>
    tpu.vector_store %arg29[%c704_486, %c256_487], %319 {strides = array<i32>} : memref<800x512xf32, #tpu.memory_space<vmem>>, vector<32x256xf32>,
    %c0_488 = arith.constant 0 : index
    %c131_489 = arith.constant 131 : index
    %321 = vector.load %arg28[%c0_488, %c131_489] : memref<32x896xf32, #tpu.memory_space<vmem>>, vector<32x256xf32>
    %c736_490 = arith.constant 736 : index
    %c0_491 = arith.constant 0 : index
    %322 = vector.load %arg29[%c736_490, %c0_491] : memref<800x512xf32, #tpu.memory_space<vmem>>, vector<32x256xf32>
    tpu.vector_store %arg29[%c736_490, %c0_491], %321 {strides = array<i32>} : memref<800x512xf32, #tpu.memory_space<vmem>>, vector<32x256xf32>,
    %c0_492 = arith.constant 0 : index
    %c515_493 = arith.constant 515 : index
    %323 = vector.load %arg28[%c0_492, %c515_493] : memref<32x896xf32, #tpu.memory_space<vmem>>, vector<32x256xf32>
    %c736_494 = arith.constant 736 : index
    %c256_495 = arith.constant 256 : index
    %324 = vector.load %arg29[%c736_494, %c256_495] : memref<800x512xf32, #tpu.memory_space<vmem>>, vector<32x256xf32>
    tpu.vector_store %arg29[%c736_494, %c256_495], %323 {strides = array<i32>} : memref<800x512xf32, #tpu.memory_space<vmem>>, vector<32x256xf32>,
    %c0_496 = arith.constant 0 : index
    %c132_497 = arith.constant 132 : index
    %325 = vector.load %arg28[%c0_496, %c132_497] : memref<32x896xf32, #tpu.memory_space<vmem>>, vector<32x256xf32>
    %c768_498 = arith.constant 768 : index
    %c0_499 = arith.constant 0 : index
    %326 = vector.load %arg29[%c768_498, %c0_499] : memref<800x512xf32, #tpu.memory_space<vmem>>, vector<32x256xf32>
    tpu.vector_store %arg29[%c768_498, %c0_499], %325 {strides = array<i32>} : memref<800x512xf32, #tpu.memory_space<vmem>>, vector<32x256xf32>,
    %c0_500 = arith.constant 0 : index
    %c516_501 = arith.constant 516 : index
    %327 = vector.load %arg28[%c0_500, %c516_501] : memref<32x896xf32, #tpu.memory_space<vmem>>, vector<32x256xf32>
    %c768_502 = arith.constant 768 : index
    %c256_503 = arith.constant 256 : index
    %328 = vector.load %arg29[%c768_502, %c256_503] : memref<800x512xf32, #tpu.memory_space<vmem>>, vector<32x256xf32>
    tpu.vector_store %arg29[%c768_502, %c256_503], %327 {strides = array<i32>} : memref<800x512xf32, #tpu.memory_space<vmem>>, vector<32x256xf32>,
    %c0_504 = arith.constant 0 : index
    %c0_505 = arith.constant 0 : index
    %329 = vector.load %arg8[%c0_504, %c0_505] : memref<64x800xf32, #tpu.memory_space<vmem>>, vector<64x800xf32>
    %c0_506 = arith.constant 0 : index
    %c0_507 = arith.constant 0 : index
    %330 = vector.load %arg29[%c0_506, %c0_507] : memref<800x512xf32, #tpu.memory_space<vmem>>, vector<800x512xf32>
    %cst_508 = arith.constant dense<0.000000e+00> : vector<64x512xf32>
    %331 = tpu.matmul %329, %330, %cst_508 {dimension_numbers = #tpu.dot_dimension_numbers<[1], [0], [0], [1], [0, 0, 1, 1], [], []>} : vector<64x800xf32>, vector<800x512xf32>, vector<64x512xf32> -> vector<64x512xf32>
    %c0_509 = arith.constant 0 : index
    %c0_510 = arith.constant 0 : index
    %332 = vector.load %arg9[%c0_509, %c0_510] : memref<64x1xf32, #tpu.memory_space<vmem>>, vector<64x1xf32>
    %333 = vector.broadcast %332 : vector<64x1xf32> to vector<64x512xf32>
    %334 = arith.addf %331, %333 : vector<64x512xf32>
    %cst_511 = arith.constant 0.000000e+00 : f32
    %335 = vector.broadcast %cst_511 : f32 to vector<64x512xf32>
    %336 = arith.maximumf %334, %335 : vector<64x512xf32>
    %c0_512 = arith.constant 0 : index
    %c0_513 = arith.constant 0 : index
    %337 = vector.load %arg30[%c0_512, %c0_513] : memref<64x512xf32, #tpu.memory_space<vmem>>, vector<64x512xf32>
    tpu.vector_store %arg30[%c0_512, %c0_513], %336 {strides = array<i32>} : memref<64x512xf32, #tpu.memory_space<vmem>>, vector<64x512xf32>,
    %c0_514 = arith.constant 0 : index
    %c0_515 = arith.constant 0 : index
    %338 = vector.load %arg10[%c0_514, %c0_515] : memref<1x64xf32, #tpu.memory_space<vmem>>, vector<1x64xf32>
    %c0_516 = arith.constant 0 : index
    %c0_517 = arith.constant 0 : index
    %339 = vector.load %arg30[%c0_516, %c0_517] : memref<64x512xf32, #tpu.memory_space<vmem>>, vector<64x512xf32>
    %cst_518 = arith.constant dense<0.000000e+00> : vector<1x512xf32>
    %340 = tpu.matmul %338, %339, %cst_518 {dimension_numbers = #tpu.dot_dimension_numbers<[1], [0], [0], [1], [0, 0, 1, 1], [], []>} : vector<1x64xf32>, vector<64x512xf32>, vector<1x512xf32> -> vector<1x512xf32>
    %341 = vector.broadcast %0 : f32 to vector<1x512xf32>
    %342 = arith.addf %340, %341 : vector<1x512xf32>
    %cst_519 = arith.constant 0.000000e+00 : f32
    %343 = vector.broadcast %cst_519 : f32 to vector<1x512xf32>
    %344 = arith.maximumf %342, %343 : vector<1x512xf32>
    %345 = vector.extract_strided_slice %344 {offsets = [0, 0], sizes = [1, 32], strides = [1, 1]} : vector<1x512xf32> to vector<1x32xf32>
    %c0_520 = arith.constant 0 : index
    %c0_521 = arith.constant 0 : index
    %346 = vector.load %arg31[%c0_520, %c0_521] : memref<16x32xf32, #tpu.memory_space<vmem>>, vector<1x32xf32>
    tpu.vector_store %arg31[%c0_520, %c0_521], %345 {strides = array<i32>} : memref<16x32xf32, #tpu.memory_space<vmem>>, vector<1x32xf32>,
    %347 = vector.extract_strided_slice %344 {offsets = [0, 32], sizes = [1, 32], strides = [1, 1]} : vector<1x512xf32> to vector<1x32xf32>
    %c1_522 = arith.constant 1 : index
    %c0_523 = arith.constant 0 : index
    %348 = vector.load %arg31[%c1_522, %c0_523] : memref<16x32xf32, #tpu.memory_space<vmem>>, vector<1x32xf32>
    tpu.vector_store %arg31[%c1_522, %c0_523], %347 {strides = array<i32>} : memref<16x32xf32, #tpu.memory_space<vmem>>, vector<1x32xf32>,
    %349 = vector.extract_strided_slice %344 {offsets = [0, 64], sizes = [1, 32], strides = [1, 1]} : vector<1x512xf32> to vector<1x32xf32>
    %c2_524 = arith.constant 2 : index
    %c0_525 = arith.constant 0 : index
    %350 = vector.load %arg31[%c2_524, %c0_525] : memref<16x32xf32, #tpu.memory_space<vmem>>, vector<1x32xf32>
    tpu.vector_store %arg31[%c2_524, %c0_525], %349 {strides = array<i32>} : memref<16x32xf32, #tpu.memory_space<vmem>>, vector<1x32xf32>,
    %351 = vector.extract_strided_slice %344 {offsets = [0, 96], sizes = [1, 32], strides = [1, 1]} : vector<1x512xf32> to vector<1x32xf32>
    %c3_526 = arith.constant 3 : index
    %c0_527 = arith.constant 0 : index
    %352 = vector.load %arg31[%c3_526, %c0_527] : memref<16x32xf32, #tpu.memory_space<vmem>>, vector<1x32xf32>
    tpu.vector_store %arg31[%c3_526, %c0_527], %351 {strides = array<i32>} : memref<16x32xf32, #tpu.memory_space<vmem>>, vector<1x32xf32>,
    %353 = vector.extract_strided_slice %344 {offsets = [0, 128], sizes = [1, 32], strides = [1, 1]} : vector<1x512xf32> to vector<1x32xf32>
    %c4_528 = arith.constant 4 : index
    %c0_529 = arith.constant 0 : index
    %354 = vector.load %arg31[%c4_528, %c0_529] : memref<16x32xf32, #tpu.memory_space<vmem>>, vector<1x32xf32>
    tpu.vector_store %arg31[%c4_528, %c0_529], %353 {strides = array<i32>} : memref<16x32xf32, #tpu.memory_space<vmem>>, vector<1x32xf32>,
    %355 = vector.extract_strided_slice %344 {offsets = [0, 160], sizes = [1, 32], strides = [1, 1]} : vector<1x512xf32> to vector<1x32xf32>
    %c5_530 = arith.constant 5 : index
    %c0_531 = arith.constant 0 : index
    %356 = vector.load %arg31[%c5_530, %c0_531] : memref<16x32xf32, #tpu.memory_space<vmem>>, vector<1x32xf32>
    tpu.vector_store %arg31[%c5_530, %c0_531], %355 {strides = array<i32>} : memref<16x32xf32, #tpu.memory_space<vmem>>, vector<1x32xf32>,
    %357 = vector.extract_strided_slice %344 {offsets = [0, 192], sizes = [1, 32], strides = [1, 1]} : vector<1x512xf32> to vector<1x32xf32>
    %c6_532 = arith.constant 6 : index
    %c0_533 = arith.constant 0 : index
    %358 = vector.load %arg31[%c6_532, %c0_533] : memref<16x32xf32, #tpu.memory_space<vmem>>, vector<1x32xf32>
    tpu.vector_store %arg31[%c6_532, %c0_533], %357 {strides = array<i32>} : memref<16x32xf32, #tpu.memory_space<vmem>>, vector<1x32xf32>,
    %359 = vector.extract_strided_slice %344 {offsets = [0, 224], sizes = [1, 32], strides = [1, 1]} : vector<1x512xf32> to vector<1x32xf32>
    %c7_534 = arith.constant 7 : index
    %c0_535 = arith.constant 0 : index
    %360 = vector.load %arg31[%c7_534, %c0_535] : memref<16x32xf32, #tpu.memory_space<vmem>>, vector<1x32xf32>
    tpu.vector_store %arg31[%c7_534, %c0_535], %359 {strides = array<i32>} : memref<16x32xf32, #tpu.memory_space<vmem>>, vector<1x32xf32>,
    %361 = vector.extract_strided_slice %344 {offsets = [0, 256], sizes = [1, 32], strides = [1, 1]} : vector<1x512xf32> to vector<1x32xf32>
    %c8_536 = arith.constant 8 : index
    %c0_537 = arith.constant 0 : index
    %362 = vector.load %arg31[%c8_536, %c0_537] : memref<16x32xf32, #tpu.memory_space<vmem>>, vector<1x32xf32>
    tpu.vector_store %arg31[%c8_536, %c0_537], %361 {strides = array<i32>} : memref<16x32xf32, #tpu.memory_space<vmem>>, vector<1x32xf32>,
    %363 = vector.extract_strided_slice %344 {offsets = [0, 288], sizes = [1, 32], strides = [1, 1]} : vector<1x512xf32> to vector<1x32xf32>
    %c9_538 = arith.constant 9 : index
    %c0_539 = arith.constant 0 : index
    %364 = vector.load %arg31[%c9_538, %c0_539] : memref<16x32xf32, #tpu.memory_space<vmem>>, vector<1x32xf32>
    tpu.vector_store %arg31[%c9_538, %c0_539], %363 {strides = array<i32>} : memref<16x32xf32, #tpu.memory_space<vmem>>, vector<1x32xf32>,
    %365 = vector.extract_strided_slice %344 {offsets = [0, 320], sizes = [1, 32], strides = [1, 1]} : vector<1x512xf32> to vector<1x32xf32>
    %c10_540 = arith.constant 10 : index
    %c0_541 = arith.constant 0 : index
    %366 = vector.load %arg31[%c10_540, %c0_541] : memref<16x32xf32, #tpu.memory_space<vmem>>, vector<1x32xf32>
    tpu.vector_store %arg31[%c10_540, %c0_541], %365 {strides = array<i32>} : memref<16x32xf32, #tpu.memory_space<vmem>>, vector<1x32xf32>,
    %367 = vector.extract_strided_slice %344 {offsets = [0, 352], sizes = [1, 32], strides = [1, 1]} : vector<1x512xf32> to vector<1x32xf32>
    %c11_542 = arith.constant 11 : index
    %c0_543 = arith.constant 0 : index
    %368 = vector.load %arg31[%c11_542, %c0_543] : memref<16x32xf32, #tpu.memory_space<vmem>>, vector<1x32xf32>
    tpu.vector_store %arg31[%c11_542, %c0_543], %367 {strides = array<i32>} : memref<16x32xf32, #tpu.memory_space<vmem>>, vector<1x32xf32>,
    %369 = vector.extract_strided_slice %344 {offsets = [0, 384], sizes = [1, 32], strides = [1, 1]} : vector<1x512xf32> to vector<1x32xf32>
    %c12_544 = arith.constant 12 : index
    %c0_545 = arith.constant 0 : index
    %370 = vector.load %arg31[%c12_544, %c0_545] : memref<16x32xf32, #tpu.memory_space<vmem>>, vector<1x32xf32>
    tpu.vector_store %arg31[%c12_544, %c0_545], %369 {strides = array<i32>} : memref<16x32xf32, #tpu.memory_space<vmem>>, vector<1x32xf32>,
    %371 = vector.extract_strided_slice %344 {offsets = [0, 416], sizes = [1, 32], strides = [1, 1]} : vector<1x512xf32> to vector<1x32xf32>
    %c13_546 = arith.constant 13 : index
    %c0_547 = arith.constant 0 : index
    %372 = vector.load %arg31[%c13_546, %c0_547] : memref<16x32xf32, #tpu.memory_space<vmem>>, vector<1x32xf32>
    tpu.vector_store %arg31[%c13_546, %c0_547], %371 {strides = array<i32>} : memref<16x32xf32, #tpu.memory_space<vmem>>, vector<1x32xf32>,
    %373 = vector.extract_strided_slice %344 {offsets = [0, 448], sizes = [1, 32], strides = [1, 1]} : vector<1x512xf32> to vector<1x32xf32>
    %c14_548 = arith.constant 14 : index
    %c0_549 = arith.constant 0 : index
    %374 = vector.load %arg31[%c14_548, %c0_549] : memref<16x32xf32, #tpu.memory_space<vmem>>, vector<1x32xf32>
    tpu.vector_store %arg31[%c14_548, %c0_549], %373 {strides = array<i32>} : memref<16x32xf32, #tpu.memory_space<vmem>>, vector<1x32xf32>,
    %375 = vector.extract_strided_slice %344 {offsets = [0, 480], sizes = [1, 32], strides = [1, 1]} : vector<1x512xf32> to vector<1x32xf32>
    %c15_550 = arith.constant 15 : index
    %c0_551 = arith.constant 0 : index
    %376 = vector.load %arg31[%c15_550, %c0_551] : memref<16x32xf32, #tpu.memory_space<vmem>>, vector<1x32xf32>
    tpu.vector_store %arg31[%c15_550, %c0_551], %375 {strides = array<i32>} : memref<16x32xf32, #tpu.memory_space<vmem>>, vector<1x32xf32>,
    %c0_552 = arith.constant 0 : index
    %c0_553 = arith.constant 0 : index
    %377 = vector.load %arg31[%c0_552, %c0_553] : memref<16x32xf32, #tpu.memory_space<vmem>>, vector<16x32xf32>
    %c0_554 = arith.constant 0 : index
    %c0_555 = arith.constant 0 : index
    %378 = vector.load %arg11[%c0_554, %c0_555] : memref<32x32xf32, #tpu.memory_space<vmem>>, vector<32x32xf32>
    %cst_556 = arith.constant dense<0.000000e+00> : vector<16x32xf32>
    %379 = tpu.matmul %377, %378, %cst_556 {dimension_numbers = #tpu.dot_dimension_numbers<[1], [0], [0], [1], [0, 0, 1, 1], [], []>} : vector<16x32xf32>, vector<32x32xf32>, vector<16x32xf32> -> vector<16x32xf32>
    %c0_557 = arith.constant 0 : index
    %c0_558 = arith.constant 0 : index
    %380 = vector.load %arg12[%c0_557, %c0_558] : memref<1x32xf32, #tpu.memory_space<vmem>>, vector<1x32xf32>
    %381 = vector.broadcast %380 : vector<1x32xf32> to vector<16x32xf32>
    %382 = arith.addf %379, %381 : vector<16x32xf32>
    %c0_559 = arith.constant 0 : index
    %c0_560 = arith.constant 0 : index
    %383 = vector.load %arg13[%c0_559, %c0_560] : memref<16x16xf32, #tpu.memory_space<vmem>>, vector<16x16xf32>
    %cst_561 = arith.constant dense<0.000000e+00> : vector<16x32xf32>
    %384 = tpu.matmul %383, %382, %cst_561 {dimension_numbers = #tpu.dot_dimension_numbers<[1], [0], [0], [1], [0, 0, 1, 1], [], []>} : vector<16x16xf32>, vector<16x32xf32>, vector<16x32xf32> -> vector<16x32xf32>
    %c0_562 = arith.constant 0 : index
    %c0_563 = arith.constant 0 : index
    %385 = vector.load %arg14[%c0_562, %c0_563] : memref<16x1xf32, #tpu.memory_space<vmem>>, vector<16x1xf32>
    %386 = vector.broadcast %385 : vector<16x1xf32> to vector<16x32xf32>
    %387 = arith.addf %384, %386 : vector<16x32xf32>
    %388 = tpu.iota {dimensions = array<i32: 1>} : vector<16x40xi32>
    %c0_564 = arith.constant 0 : index
    %c0_565 = arith.constant 0 : index
    %389 = vector.load %arg3[%c0_564, %c0_565] : memref<16x1xi32, #tpu.memory_space<vmem>>, vector<16x1xi32>
    %390 = vector.broadcast %389 : vector<16x1xi32> to vector<16x40xi32>
    %391 = arith.cmpi eq, %390, %388 : vector<16x40xi32>
    %392 = arith.extui %391 : vector<16x40xi1> to vector<16x40xi32>
    %393 = arith.sitofp %392 : vector<16x40xi32> to vector<16x40xf32>
    %c0_566 = arith.constant 0 : index
    %c0_567 = arith.constant 0 : index
    %394 = vector.load %arg15[%c0_566, %c0_567] : memref<40x32xf32, #tpu.memory_space<vmem>>, vector<40x32xf32>
    %cst_568 = arith.constant dense<0.000000e+00> : vector<16x32xf32>
    %395 = tpu.matmul %393, %394, %cst_568 {dimension_numbers = #tpu.dot_dimension_numbers<[1], [0], [0], [1], [0, 0, 1, 1], [], []>} : vector<16x40xf32>, vector<40x32xf32>, vector<16x32xf32> -> vector<16x32xf32>
    %396 = vector.extract_strided_slice %395 {offsets = [0, 0], sizes = [1, 32], strides = [1, 1]} : vector<16x32xf32> to vector<1x32xf32>
    %c0_569 = arith.constant 0 : index
    %c0_570 = arith.constant 0 : index
    %397 = vector.load %arg32[%c0_569, %c0_570] : memref<1x512xf32, #tpu.memory_space<vmem>>, vector<1x32xf32>
    tpu.vector_store %arg32[%c0_569, %c0_570], %396 {strides = array<i32>} : memref<1x512xf32, #tpu.memory_space<vmem>>, vector<1x32xf32>,
    %398 = vector.extract_strided_slice %395 {offsets = [1, 0], sizes = [1, 32], strides = [1, 1]} : vector<16x32xf32> to vector<1x32xf32>
    %c0_571 = arith.constant 0 : index
    %c32_572 = arith.constant 32 : index
    %399 = vector.load %arg32[%c0_571, %c32_572] : memref<1x512xf32, #tpu.memory_space<vmem>>, vector<1x32xf32>
    tpu.vector_store %arg32[%c0_571, %c32_572], %398 {strides = array<i32>} : memref<1x512xf32, #tpu.memory_space<vmem>>, vector<1x32xf32>,
    %400 = vector.extract_strided_slice %395 {offsets = [2, 0], sizes = [1, 32], strides = [1, 1]} : vector<16x32xf32> to vector<1x32xf32>
    %c0_573 = arith.constant 0 : index
    %c64_574 = arith.constant 64 : index
    %401 = vector.load %arg32[%c0_573, %c64_574] : memref<1x512xf32, #tpu.memory_space<vmem>>, vector<1x32xf32>
    tpu.vector_store %arg32[%c0_573, %c64_574], %400 {strides = array<i32>} : memref<1x512xf32, #tpu.memory_space<vmem>>, vector<1x32xf32>,
    %402 = vector.extract_strided_slice %395 {offsets = [3, 0], sizes = [1, 32], strides = [1, 1]} : vector<16x32xf32> to vector<1x32xf32>
    %c0_575 = arith.constant 0 : index
    %c96_576 = arith.constant 96 : index
    %403 = vector.load %arg32[%c0_575, %c96_576] : memref<1x512xf32, #tpu.memory_space<vmem>>, vector<1x32xf32>
    tpu.vector_store %arg32[%c0_575, %c96_576], %402 {strides = array<i32>} : memref<1x512xf32, #tpu.memory_space<vmem>>, vector<1x32xf32>,
    %404 = vector.extract_strided_slice %395 {offsets = [4, 0], sizes = [1, 32], strides = [1, 1]} : vector<16x32xf32> to vector<1x32xf32>
    %c0_577 = arith.constant 0 : index
    %c128_578 = arith.constant 128 : index
    %405 = vector.load %arg32[%c0_577, %c128_578] : memref<1x512xf32, #tpu.memory_space<vmem>>, vector<1x32xf32>
    tpu.vector_store %arg32[%c0_577, %c128_578], %404 {strides = array<i32>} : memref<1x512xf32, #tpu.memory_space<vmem>>, vector<1x32xf32>,
    %406 = vector.extract_strided_slice %395 {offsets = [5, 0], sizes = [1, 32], strides = [1, 1]} : vector<16x32xf32> to vector<1x32xf32>
    %c0_579 = arith.constant 0 : index
    %c160_580 = arith.constant 160 : index
    %407 = vector.load %arg32[%c0_579, %c160_580] : memref<1x512xf32, #tpu.memory_space<vmem>>, vector<1x32xf32>
    tpu.vector_store %arg32[%c0_579, %c160_580], %406 {strides = array<i32>} : memref<1x512xf32, #tpu.memory_space<vmem>>, vector<1x32xf32>,
    %408 = vector.extract_strided_slice %395 {offsets = [6, 0], sizes = [1, 32], strides = [1, 1]} : vector<16x32xf32> to vector<1x32xf32>
    %c0_581 = arith.constant 0 : index
    %c192_582 = arith.constant 192 : index
    %409 = vector.load %arg32[%c0_581, %c192_582] : memref<1x512xf32, #tpu.memory_space<vmem>>, vector<1x32xf32>
    tpu.vector_store %arg32[%c0_581, %c192_582], %408 {strides = array<i32>} : memref<1x512xf32, #tpu.memory_space<vmem>>, vector<1x32xf32>,
    %410 = vector.extract_strided_slice %395 {offsets = [7, 0], sizes = [1, 32], strides = [1, 1]} : vector<16x32xf32> to vector<1x32xf32>
    %c0_583 = arith.constant 0 : index
    %c224_584 = arith.constant 224 : index
    %411 = vector.load %arg32[%c0_583, %c224_584] : memref<1x512xf32, #tpu.memory_space<vmem>>, vector<1x32xf32>
    tpu.vector_store %arg32[%c0_583, %c224_584], %410 {strides = array<i32>} : memref<1x512xf32, #tpu.memory_space<vmem>>, vector<1x32xf32>,
    %412 = vector.extract_strided_slice %395 {offsets = [8, 0], sizes = [1, 32], strides = [1, 1]} : vector<16x32xf32> to vector<1x32xf32>
    %c0_585 = arith.constant 0 : index
    %c256_586 = arith.constant 256 : index
    %413 = vector.load %arg32[%c0_585, %c256_586] : memref<1x512xf32, #tpu.memory_space<vmem>>, vector<1x32xf32>
    tpu.vector_store %arg32[%c0_585, %c256_586], %412 {strides = array<i32>} : memref<1x512xf32, #tpu.memory_space<vmem>>, vector<1x32xf32>,
    %414 = vector.extract_strided_slice %395 {offsets = [9, 0], sizes = [1, 32], strides = [1, 1]} : vector<16x32xf32> to vector<1x32xf32>
    %c0_587 = arith.constant 0 : index
    %c288_588 = arith.constant 288 : index
    %415 = vector.load %arg32[%c0_587, %c288_588] : memref<1x512xf32, #tpu.memory_space<vmem>>, vector<1x32xf32>
    tpu.vector_store %arg32[%c0_587, %c288_588], %414 {strides = array<i32>} : memref<1x512xf32, #tpu.memory_space<vmem>>, vector<1x32xf32>,
    %416 = vector.extract_strided_slice %395 {offsets = [10, 0], sizes = [1, 32], strides = [1, 1]} : vector<16x32xf32> to vector<1x32xf32>
    %c0_589 = arith.constant 0 : index
    %c320_590 = arith.constant 320 : index
    %417 = vector.load %arg32[%c0_589, %c320_590] : memref<1x512xf32, #tpu.memory_space<vmem>>, vector<1x32xf32>
    tpu.vector_store %arg32[%c0_589, %c320_590], %416 {strides = array<i32>} : memref<1x512xf32, #tpu.memory_space<vmem>>, vector<1x32xf32>,
    %418 = vector.extract_strided_slice %395 {offsets = [11, 0], sizes = [1, 32], strides = [1, 1]} : vector<16x32xf32> to vector<1x32xf32>
    %c0_591 = arith.constant 0 : index
    %c352_592 = arith.constant 352 : index
    %419 = vector.load %arg32[%c0_591, %c352_592] : memref<1x512xf32, #tpu.memory_space<vmem>>, vector<1x32xf32>
    tpu.vector_store %arg32[%c0_591, %c352_592], %418 {strides = array<i32>} : memref<1x512xf32, #tpu.memory_space<vmem>>, vector<1x32xf32>,
    %420 = vector.extract_strided_slice %395 {offsets = [12, 0], sizes = [1, 32], strides = [1, 1]} : vector<16x32xf32> to vector<1x32xf32>
    %c0_593 = arith.constant 0 : index
    %c384_594 = arith.constant 384 : index
    %421 = vector.load %arg32[%c0_593, %c384_594] : memref<1x512xf32, #tpu.memory_space<vmem>>, vector<1x32xf32>
    tpu.vector_store %arg32[%c0_593, %c384_594], %420 {strides = array<i32>} : memref<1x512xf32, #tpu.memory_space<vmem>>, vector<1x32xf32>,
    %422 = vector.extract_strided_slice %395 {offsets = [13, 0], sizes = [1, 32], strides = [1, 1]} : vector<16x32xf32> to vector<1x32xf32>
    %c0_595 = arith.constant 0 : index
    %c416_596 = arith.constant 416 : index
    %423 = vector.load %arg32[%c0_595, %c416_596] : memref<1x512xf32, #tpu.memory_space<vmem>>, vector<1x32xf32>
    tpu.vector_store %arg32[%c0_595, %c416_596], %422 {strides = array<i32>} : memref<1x512xf32, #tpu.memory_space<vmem>>, vector<1x32xf32>,
    %424 = vector.extract_strided_slice %395 {offsets = [14, 0], sizes = [1, 32], strides = [1, 1]} : vector<16x32xf32> to vector<1x32xf32>
    %c0_597 = arith.constant 0 : index
    %c448_598 = arith.constant 448 : index
    %425 = vector.load %arg32[%c0_597, %c448_598] : memref<1x512xf32, #tpu.memory_space<vmem>>, vector<1x32xf32>
    tpu.vector_store %arg32[%c0_597, %c448_598], %424 {strides = array<i32>} : memref<1x512xf32, #tpu.memory_space<vmem>>, vector<1x32xf32>,
    %426 = vector.extract_strided_slice %395 {offsets = [15, 0], sizes = [1, 32], strides = [1, 1]} : vector<16x32xf32> to vector<1x32xf32>
    %c0_599 = arith.constant 0 : index
    %c480_600 = arith.constant 480 : index
    %427 = vector.load %arg32[%c0_599, %c480_600] : memref<1x512xf32, #tpu.memory_space<vmem>>, vector<1x32xf32>
    tpu.vector_store %arg32[%c0_599, %c480_600], %426 {strides = array<i32>} : memref<1x512xf32, #tpu.memory_space<vmem>>, vector<1x32xf32>,
    %c0_601 = arith.constant 0 : index
    %c0_602 = arith.constant 0 : index
    %428 = vector.load %arg32[%c0_601, %c0_602] : memref<1x512xf32, #tpu.memory_space<vmem>>, vector<1x512xf32>
    %c0_603 = arith.constant 0 : index
    %c0_604 = arith.constant 0 : index
    %429 = vector.load %arg16[%c0_603, %c0_604] : memref<16x1xf32, #tpu.memory_space<vmem>>, vector<16x1xf32>
    %430 = vector.broadcast %429 : vector<16x1xf32> to vector<16x512xf32>
    %431 = vector.broadcast %428 : vector<1x512xf32> to vector<16x512xf32>
    %432 = arith.mulf %430, %431 : vector<16x512xf32>
    %c0_605 = arith.constant 0 : index
    %c0_606 = arith.constant 0 : index
    %433 = vector.load %arg17[%c0_605, %c0_606] : memref<16x1xf32, #tpu.memory_space<vmem>>, vector<16x1xf32>
    %434 = vector.broadcast %433 : vector<16x1xf32> to vector<16x512xf32>
    %435 = arith.addf %432, %434 : vector<16x512xf32>
    %cst_607 = arith.constant 0.000000e+00 : f32
    %436 = vector.broadcast %cst_607 : f32 to vector<16x512xf32>
    %437 = arith.maximumf %435, %436 : vector<16x512xf32>
    %c0_608 = arith.constant 0 : index
    %c0_609 = arith.constant 0 : index
    %438 = vector.load %arg18[%c0_608, %c0_609] : memref<32x16xf32, #tpu.memory_space<vmem>>, vector<32x16xf32>
    %cst_610 = arith.constant dense<0.000000e+00> : vector<32x512xf32>
    %439 = tpu.matmul %438, %437, %cst_610 {dimension_numbers = #tpu.dot_dimension_numbers<[1], [0], [0], [1], [0, 0, 1, 1], [], []>} : vector<32x16xf32>, vector<16x512xf32>, vector<32x512xf32> -> vector<32x512xf32>
    %c0_611 = arith.constant 0 : index
    %c0_612 = arith.constant 0 : index
    %440 = vector.load %arg19[%c0_611, %c0_612] : memref<32x1xf32, #tpu.memory_space<vmem>>, vector<32x1xf32>
    %441 = vector.broadcast %440 : vector<32x1xf32> to vector<32x512xf32>
    %442 = arith.addf %439, %441 : vector<32x512xf32>
    %cst_613 = arith.constant 0.000000e+00 : f32
    %443 = vector.broadcast %cst_613 : f32 to vector<32x512xf32>
    %444 = arith.maximumf %442, %443 : vector<32x512xf32>
    %c0_614 = arith.constant 0 : index
    %c0_615 = arith.constant 0 : index
    %445 = vector.load %arg20[%c0_614, %c0_615] : memref<64x32xf32, #tpu.memory_space<vmem>>, vector<64x32xf32>
    %cst_616 = arith.constant dense<0.000000e+00> : vector<64x512xf32>
    %446 = tpu.matmul %445, %444, %cst_616 {dimension_numbers = #tpu.dot_dimension_numbers<[1], [0], [0], [1], [0, 0, 1, 1], [], []>} : vector<64x32xf32>, vector<32x512xf32>, vector<64x512xf32> -> vector<64x512xf32>
    %c0_617 = arith.constant 0 : index
    %c0_618 = arith.constant 0 : index
    %447 = vector.load %arg21[%c0_617, %c0_618] : memref<64x1xf32, #tpu.memory_space<vmem>>, vector<64x1xf32>
    %448 = vector.broadcast %447 : vector<64x1xf32> to vector<64x512xf32>
    %449 = arith.addf %446, %448 : vector<64x512xf32>
    %cst_619 = arith.constant 0.000000e+00 : f32
    %450 = vector.broadcast %cst_619 : f32 to vector<64x512xf32>
    %451 = arith.maximumf %449, %450 : vector<64x512xf32>
    %c0_620 = arith.constant 0 : index
    %c0_621 = arith.constant 0 : index
    %452 = vector.load %arg22[%c0_620, %c0_621] : memref<1x64xf32, #tpu.memory_space<vmem>>, vector<1x64xf32>
    %cst_622 = arith.constant dense<0.000000e+00> : vector<1x512xf32>
    %453 = tpu.matmul %452, %451, %cst_622 {dimension_numbers = #tpu.dot_dimension_numbers<[1], [0], [0], [1], [0, 0, 1, 1], [], []>} : vector<1x64xf32>, vector<64x512xf32>, vector<1x512xf32> -> vector<1x512xf32>
    %454 = vector.broadcast %1 : f32 to vector<1x512xf32>
    %455 = arith.addf %453, %454 : vector<1x512xf32>
    %cst_623 = arith.constant 0.000000e+00 : f32
    %456 = vector.broadcast %cst_623 : f32 to vector<1x512xf32>
    %457 = arith.maximumf %455, %456 : vector<1x512xf32>
    %458 = vector.extract_strided_slice %457 {offsets = [0, 0], sizes = [1, 32], strides = [1, 1]} : vector<1x512xf32> to vector<1x32xf32>
    %c0_624 = arith.constant 0 : index
    %c0_625 = arith.constant 0 : index
    %459 = vector.load %arg33[%c0_624, %c0_625] : memref<16x32xf32, #tpu.memory_space<vmem>>, vector<1x32xf32>
    tpu.vector_store %arg33[%c0_624, %c0_625], %458 {strides = array<i32>} : memref<16x32xf32, #tpu.memory_space<vmem>>, vector<1x32xf32>,
    %460 = vector.extract_strided_slice %457 {offsets = [0, 32], sizes = [1, 32], strides = [1, 1]} : vector<1x512xf32> to vector<1x32xf32>
    %c1_626 = arith.constant 1 : index
    %c0_627 = arith.constant 0 : index
    %461 = vector.load %arg33[%c1_626, %c0_627] : memref<16x32xf32, #tpu.memory_space<vmem>>, vector<1x32xf32>
    tpu.vector_store %arg33[%c1_626, %c0_627], %460 {strides = array<i32>} : memref<16x32xf32, #tpu.memory_space<vmem>>, vector<1x32xf32>,
    %462 = vector.extract_strided_slice %457 {offsets = [0, 64], sizes = [1, 32], strides = [1, 1]} : vector<1x512xf32> to vector<1x32xf32>
    %c2_628 = arith.constant 2 : index
    %c0_629 = arith.constant 0 : index
    %463 = vector.load %arg33[%c2_628, %c0_629] : memref<16x32xf32, #tpu.memory_space<vmem>>, vector<1x32xf32>
    tpu.vector_store %arg33[%c2_628, %c0_629], %462 {strides = array<i32>} : memref<16x32xf32, #tpu.memory_space<vmem>>, vector<1x32xf32>,
    %464 = vector.extract_strided_slice %457 {offsets = [0, 96], sizes = [1, 32], strides = [1, 1]} : vector<1x512xf32> to vector<1x32xf32>
    %c3_630 = arith.constant 3 : index
    %c0_631 = arith.constant 0 : index
    %465 = vector.load %arg33[%c3_630, %c0_631] : memref<16x32xf32, #tpu.memory_space<vmem>>, vector<1x32xf32>
    tpu.vector_store %arg33[%c3_630, %c0_631], %464 {strides = array<i32>} : memref<16x32xf32, #tpu.memory_space<vmem>>, vector<1x32xf32>,
    %466 = vector.extract_strided_slice %457 {offsets = [0, 128], sizes = [1, 32], strides = [1, 1]} : vector<1x512xf32> to vector<1x32xf32>
    %c4_632 = arith.constant 4 : index
    %c0_633 = arith.constant 0 : index
    %467 = vector.load %arg33[%c4_632, %c0_633] : memref<16x32xf32, #tpu.memory_space<vmem>>, vector<1x32xf32>
    tpu.vector_store %arg33[%c4_632, %c0_633], %466 {strides = array<i32>} : memref<16x32xf32, #tpu.memory_space<vmem>>, vector<1x32xf32>,
    %468 = vector.extract_strided_slice %457 {offsets = [0, 160], sizes = [1, 32], strides = [1, 1]} : vector<1x512xf32> to vector<1x32xf32>
    %c5_634 = arith.constant 5 : index
    %c0_635 = arith.constant 0 : index
    %469 = vector.load %arg33[%c5_634, %c0_635] : memref<16x32xf32, #tpu.memory_space<vmem>>, vector<1x32xf32>
    tpu.vector_store %arg33[%c5_634, %c0_635], %468 {strides = array<i32>} : memref<16x32xf32, #tpu.memory_space<vmem>>, vector<1x32xf32>,
    %470 = vector.extract_strided_slice %457 {offsets = [0, 192], sizes = [1, 32], strides = [1, 1]} : vector<1x512xf32> to vector<1x32xf32>
    %c6_636 = arith.constant 6 : index
    %c0_637 = arith.constant 0 : index
    %471 = vector.load %arg33[%c6_636, %c0_637] : memref<16x32xf32, #tpu.memory_space<vmem>>, vector<1x32xf32>
    tpu.vector_store %arg33[%c6_636, %c0_637], %470 {strides = array<i32>} : memref<16x32xf32, #tpu.memory_space<vmem>>, vector<1x32xf32>,
    %472 = vector.extract_strided_slice %457 {offsets = [0, 224], sizes = [1, 32], strides = [1, 1]} : vector<1x512xf32> to vector<1x32xf32>
    %c7_638 = arith.constant 7 : index
    %c0_639 = arith.constant 0 : index
    %473 = vector.load %arg33[%c7_638, %c0_639] : memref<16x32xf32, #tpu.memory_space<vmem>>, vector<1x32xf32>
    tpu.vector_store %arg33[%c7_638, %c0_639], %472 {strides = array<i32>} : memref<16x32xf32, #tpu.memory_space<vmem>>, vector<1x32xf32>,
    %474 = vector.extract_strided_slice %457 {offsets = [0, 256], sizes = [1, 32], strides = [1, 1]} : vector<1x512xf32> to vector<1x32xf32>
    %c8_640 = arith.constant 8 : index
    %c0_641 = arith.constant 0 : index
    %475 = vector.load %arg33[%c8_640, %c0_641] : memref<16x32xf32, #tpu.memory_space<vmem>>, vector<1x32xf32>
    tpu.vector_store %arg33[%c8_640, %c0_641], %474 {strides = array<i32>} : memref<16x32xf32, #tpu.memory_space<vmem>>, vector<1x32xf32>,
    %476 = vector.extract_strided_slice %457 {offsets = [0, 288], sizes = [1, 32], strides = [1, 1]} : vector<1x512xf32> to vector<1x32xf32>
    %c9_642 = arith.constant 9 : index
    %c0_643 = arith.constant 0 : index
    %477 = vector.load %arg33[%c9_642, %c0_643] : memref<16x32xf32, #tpu.memory_space<vmem>>, vector<1x32xf32>
    tpu.vector_store %arg33[%c9_642, %c0_643], %476 {strides = array<i32>} : memref<16x32xf32, #tpu.memory_space<vmem>>, vector<1x32xf32>,
    %478 = vector.extract_strided_slice %457 {offsets = [0, 320], sizes = [1, 32], strides = [1, 1]} : vector<1x512xf32> to vector<1x32xf32>
    %c10_644 = arith.constant 10 : index
    %c0_645 = arith.constant 0 : index
    %479 = vector.load %arg33[%c10_644, %c0_645] : memref<16x32xf32, #tpu.memory_space<vmem>>, vector<1x32xf32>
    tpu.vector_store %arg33[%c10_644, %c0_645], %478 {strides = array<i32>} : memref<16x32xf32, #tpu.memory_space<vmem>>, vector<1x32xf32>,
    %480 = vector.extract_strided_slice %457 {offsets = [0, 352], sizes = [1, 32], strides = [1, 1]} : vector<1x512xf32> to vector<1x32xf32>
    %c11_646 = arith.constant 11 : index
    %c0_647 = arith.constant 0 : index
    %481 = vector.load %arg33[%c11_646, %c0_647] : memref<16x32xf32, #tpu.memory_space<vmem>>, vector<1x32xf32>
    tpu.vector_store %arg33[%c11_646, %c0_647], %480 {strides = array<i32>} : memref<16x32xf32, #tpu.memory_space<vmem>>, vector<1x32xf32>,
    %482 = vector.extract_strided_slice %457 {offsets = [0, 384], sizes = [1, 32], strides = [1, 1]} : vector<1x512xf32> to vector<1x32xf32>
    %c12_648 = arith.constant 12 : index
    %c0_649 = arith.constant 0 : index
    %483 = vector.load %arg33[%c12_648, %c0_649] : memref<16x32xf32, #tpu.memory_space<vmem>>, vector<1x32xf32>
    tpu.vector_store %arg33[%c12_648, %c0_649], %482 {strides = array<i32>} : memref<16x32xf32, #tpu.memory_space<vmem>>, vector<1x32xf32>,
    %484 = vector.extract_strided_slice %457 {offsets = [0, 416], sizes = [1, 32], strides = [1, 1]} : vector<1x512xf32> to vector<1x32xf32>
    %c13_650 = arith.constant 13 : index
    %c0_651 = arith.constant 0 : index
    %485 = vector.load %arg33[%c13_650, %c0_651] : memref<16x32xf32, #tpu.memory_space<vmem>>, vector<1x32xf32>
    tpu.vector_store %arg33[%c13_650, %c0_651], %484 {strides = array<i32>} : memref<16x32xf32, #tpu.memory_space<vmem>>, vector<1x32xf32>,
    %486 = vector.extract_strided_slice %457 {offsets = [0, 448], sizes = [1, 32], strides = [1, 1]} : vector<1x512xf32> to vector<1x32xf32>
    %c14_652 = arith.constant 14 : index
    %c0_653 = arith.constant 0 : index
    %487 = vector.load %arg33[%c14_652, %c0_653] : memref<16x32xf32, #tpu.memory_space<vmem>>, vector<1x32xf32>
    tpu.vector_store %arg33[%c14_652, %c0_653], %486 {strides = array<i32>} : memref<16x32xf32, #tpu.memory_space<vmem>>, vector<1x32xf32>,
    %488 = vector.extract_strided_slice %457 {offsets = [0, 480], sizes = [1, 32], strides = [1, 1]} : vector<1x512xf32> to vector<1x32xf32>
    %c15_654 = arith.constant 15 : index
    %c0_655 = arith.constant 0 : index
    %489 = vector.load %arg33[%c15_654, %c0_655] : memref<16x32xf32, #tpu.memory_space<vmem>>, vector<1x32xf32>
    tpu.vector_store %arg33[%c15_654, %c0_655], %488 {strides = array<i32>} : memref<16x32xf32, #tpu.memory_space<vmem>>, vector<1x32xf32>,
    %490 = vector.broadcast %2 : f32 to vector<16x32xf32>
    %491 = arith.mulf %490, %387 : vector<16x32xf32>
    %c0_656 = arith.constant 0 : index
    %c0_657 = arith.constant 0 : index
    %492 = vector.load %arg33[%c0_656, %c0_657] : memref<16x32xf32, #tpu.memory_space<vmem>>, vector<16x32xf32>
    %493 = vector.broadcast %3 : f32 to vector<16x32xf32>
    %494 = arith.mulf %493, %492 : vector<16x32xf32>
    %495 = arith.addf %491, %494 : vector<16x32xf32>
    %496 = vector.broadcast %4 : f32 to vector<16x32xf32>
    %497 = arith.addf %495, %496 : vector<16x32xf32>
    %c0_658 = arith.constant 0 : index
    %c0_659 = arith.constant 0 : index
    %498 = vector.load %arg23[%c0_658, %c0_659] : memref<32x40xf32, #tpu.memory_space<vmem>>, vector<32x40xf32>
    %cst_660 = arith.constant dense<0.000000e+00> : vector<16x40xf32>
    %499 = tpu.matmul %497, %498, %cst_660 {dimension_numbers = #tpu.dot_dimension_numbers<[1], [0], [0], [1], [0, 0, 1, 1], [], []>} : vector<16x32xf32>, vector<32x40xf32>, vector<16x40xf32> -> vector<16x40xf32>
    %c0_661 = arith.constant 0 : index
    %c0_662 = arith.constant 0 : index
    %500 = vector.load %arg24[%c0_661, %c0_662] : memref<16x40xf32, #tpu.memory_space<vmem>>, vector<16x40xf32>
    tpu.vector_store %arg24[%c0_661, %c0_662], %499 {strides = array<i32>} : memref<16x40xf32, #tpu.memory_space<vmem>>, vector<16x40xf32>,
    return
  }
  func.func @transform_0(%arg0: i32) -> i32 {
    %c0_i32 = arith.constant 0 : i32
    %c0_i32_0 = arith.constant 0 : i32
    return %c0_i32 : i32
  }
  func.func @transform_1(%arg0: i32) -> (i32, i32) {
    %c0_i32 = arith.constant 0 : i32
    %c0_i32_0 = arith.constant 0 : i32
    %c0_i32_1 = arith.constant 0 : i32
    return %c0_i32, %c0_i32_0 : i32, i32
  }
  func.func @transform_2(%arg0: i32) -> (i32, i32) {
    %c0_i32 = arith.constant 0 : i32
    %c0_i32_0 = arith.constant 0 : i32
    %c0_i32_1 = arith.constant 0 : i32
    return %c0_i32, %c0_i32_0 : i32, i32
  }
  func.func @transform_3(%arg0: i32) -> (i32, i32) {
    %c0_i32 = arith.constant 0 : i32
    %c0_i32_0 = arith.constant 0 : i32
    %c0_i32_1 = arith.constant 0 : i32
    return %c0_i32, %c0_i32_0 : i32, i32
  }
  func.func @transform_4(%arg0: i32) -> (i32, i32) {
    %c0_i32 = arith.constant 0 : i32
    %c0_i32_0 = arith.constant 0 : i32
    %c0_i32_1 = arith.constant 0 : i32
    return %c0_i32, %c0_i32_0 : i32, i32
  }
  func.func @transform_5(%arg0: i32) -> (i32, i32) {
    %c0_i32 = arith.constant 0 : i32
    %c0_i32_0 = arith.constant 0 : i32
    %c0_i32_1 = arith.constant 0 : i32
    return %c0_i32, %c0_i32_0 : i32, i32
  }
  func.func @transform_6(%arg0: i32) -> (i32, i32) {
    %c0_i32 = arith.constant 0 : i32
    %c0_i32_0 = arith.constant 0 : i32
    %c0_i32_1 = arith.constant 0 : i32
    return %c0_i32, %c0_i32_0 : i32, i32
  }
  func.func @transform_7(%arg0: i32) -> (i32, i32) {
    %c0_i32 = arith.constant 0 : i32
    %c0_i32_0 = arith.constant 0 : i32
    %c0_i32_1 = arith.constant 0 : i32
    return %c0_i32, %c0_i32_0 : i32, i32
  }
  func.func @transform_8(%arg0: i32) -> (i32, i32) {
    %c0_i32 = arith.constant 0 : i32
    %c0_i32_0 = arith.constant 0 : i32
    %c0_i32_1 = arith.constant 0 : i32
    return %c0_i32, %c0_i32_0 : i32, i32
  }
  func.func @transform_9(%arg0: i32) -> (i32, i32) {
    %c0_i32 = arith.constant 0 : i32
    %c0_i32_0 = arith.constant 0 : i32
    %c0_i32_1 = arith.constant 0 : i32
    return %c0_i32, %c0_i32_0 : i32, i32
  }
  func.func @transform_10(%arg0: i32) -> (i32, i32) {
    %c0_i32 = arith.constant 0 : i32
    %c0_i32_0 = arith.constant 0 : i32
    %c0_i32_1 = arith.constant 0 : i32
    return %c0_i32, %c0_i32_0 : i32, i32
  }
  func.func @transform_11(%arg0: i32) -> (i32, i32) {
    %c0_i32 = arith.constant 0 : i32
    %c0_i32_0 = arith.constant 0 : i32
    %c0_i32_1 = arith.constant 0 : i32
    return %c0_i32, %c0_i32_0 : i32, i32
  }
  func.func @transform_12(%arg0: i32) -> (i32, i32) {
    %c0_i32 = arith.constant 0 : i32
    %c0_i32_0 = arith.constant 0 : i32
    %c0_i32_1 = arith.constant 0 : i32
    return %c0_i32, %c0_i32_0 : i32, i32
  }
  func.func @transform_13(%arg0: i32) -> (i32, i32) {
    %c0_i32 = arith.constant 0 : i32
    %c0_i32_0 = arith.constant 0 : i32
    %c0_i32_1 = arith.constant 0 : i32
    return %c0_i32, %c0_i32_0 : i32, i32
  }
  func.func @transform_14(%arg0: i32) -> (i32, i32) {
    %c0_i32 = arith.constant 0 : i32
    %c0_i32_0 = arith.constant 0 : i32
    %c0_i32_1 = arith.constant 0 : i32
    return %c0_i32, %c0_i32_0 : i32, i32
  }
  func.func @transform_15(%arg0: i32) -> (i32, i32) {
    %c0_i32 = arith.constant 0 : i32
    %c0_i32_0 = arith.constant 0 : i32
    %c0_i32_1 = arith.constant 0 : i32
    return %c0_i32, %c0_i32_0 : i32, i32
  }
  func.func @transform_16(%arg0: i32) -> (i32, i32) {
    %c0_i32 = arith.constant 0 : i32
    %c0_i32_0 = arith.constant 0 : i32
    %c0_i32_1 = arith.constant 0 : i32
    return %c0_i32, %c0_i32_0 : i32, i32
  }
  func.func @transform_17(%arg0: i32) -> (i32, i32) {
    %c0_i32 = arith.constant 0 : i32
    %c0_i32_0 = arith.constant 0 : i32
    %c0_i32_1 = arith.constant 0 : i32
    return %c0_i32, %c0_i32_0 : i32, i32
  }
  func.func @transform_18(%arg0: i32) -> (i32, i32) {
    %c0_i32 = arith.constant 0 : i32
    %c0_i32_0 = arith.constant 0 : i32
    %c0_i32_1 = arith.constant 0 : i32
    return %c0_i32, %c0_i32_0 : i32, i32
  }
  func.func @transform_19(%arg0: i32) -> (i32, i32) {
    %c0_i32 = arith.constant 0 : i32
    %c0_i32_0 = arith.constant 0 : i32
    %c0_i32_1 = arith.constant 0 : i32
    return %c0_i32, %c0_i32_0 : i32, i32
  }
  func.func @transform_20(%arg0: i32) -> (i32, i32) {
    %c0_i32 = arith.constant 0 : i32
    %c0_i32_0 = arith.constant 0 : i32
    %c0_i32_1 = arith.constant 0 : i32
    return %c0_i32, %c0_i32_0 : i32, i32
  }
  func.func @transform_21(%arg0: i32) -> (i32, i32) {
    %c0_i32 = arith.constant 0 : i32
    %c0_i32_0 = arith.constant 0 : i32
    %c0_i32_1 = arith.constant 0 : i32
    return %c0_i32, %c0_i32_0 : i32, i32
  }
  func.func @transform_22(%arg0: i32) -> (i32, i32) {
    %c0_i32 = arith.constant 0 : i32
    %c0_i32_0 = arith.constant 0 : i32
    %c0_i32_1 = arith.constant 0 : i32
    return %c0_i32, %c0_i32_0 : i32, i32
  }
  func.func @transform_23(%arg0: i32) -> (i32, i32) {
    %c0_i32 = arith.constant 0 : i32
    %c0_i32_0 = arith.constant 0 : i32
    %c0_i32_1 = arith.constant 0 : i32
    return %c0_i32, %c0_i32_0 : i32, i32
  }
}

</mosaic_0001>

<bundles_post_ra>
// kernel: cnn_forward.1
= control target key start
LH: loop header
LB: loop body
LE: loop exit
PB: predicated region body
PF: predicated region fallthrough
CT: control target
= control target key end

     0   :  { %s16331_s0 = inlined_call_operand.vmem [shape: f32[8], index: 0, kind: input, shape index: {}]   ;;  %s16332_s1 = inlined_call_operand.vmem [shape: f32[1,1408], index: 1, kind: input, shape index: {}]   ;;  %s16333_s2 = inlined_call_operand.vmem [shape: s32[16,1], index: 2, kind: input, shape index: {}]   ;;  %s16334_s3 = inlined_call_operand.vmem [shape: f32[16,32], index: 3, kind: input, shape index: {}]   ;;  %s16335_s4 = inlined_call_operand.vmem [shape: f32[16,1], index: 4, kind: input, shape index: {}]   ;;  %s16336_s5 = inlined_call_operand.vmem [shape: f32[32,400], index: 5, kind: input, shape index: {}]   ;;  %s16337_s6 = inlined_call_operand.vmem [shape: f32[32,1], index: 6, kind: input, shape index: {}]   ;;  %s16338_s7 = inlined_call_operand.vmem [shape: f32[64,800], index: 7, kind: input, shape index: {}]   ;;  %s16339_s8 = inlined_call_operand.vmem [shape: f32[64,1], index: 8, kind: input, shape index: {}]   ;;  %s16340_s9 = inlined_call_operand.vmem [shape: f32[1,64], index: 9, kind: input, shape index: {}]   ;;  %s16341_s10 = inlined_call_operand.vmem [shape: f32[32,32], index: 10, kind: input, shape index: {}]   ;;  %s16342_s11 = inlined_call_operand.vmem [shape: f32[1,32], index: 11, kind: input, shape index: {}]   ;;  %s16343_s12 = inlined_call_operand.vmem [shape: f32[16,16], index: 12, kind: input, shape index: {}]   ;;  %s16344_s13 = inlined_call_operand.vmem [shape: f32[16,1], index: 13, kind: input, shape index: {}]   ;;  %s16345_s14 = inlined_call_operand.vmem [shape: f32[40,32], index: 14, kind: input, shape index: {}]   ;;  %s16346_s15 = inlined_call_operand.vmem [shape: f32[16,1], index: 15, kind: input, shape index: {}]   ;;  %s16347_s16 = inlined_call_operand.vmem [shape: f32[16,1], index: 16, kind: input, shape index: {}]   ;;  %s16348_s17 = inlined_call_operand.vmem [shape: f32[32,16], index: 17, kind: input, shape index: {}]   ;;  %s16349_s18 = inlined_call_operand.vmem [shape: f32[32,1], index: 18, kind: input, shape index: {}]   ;;  %s16350_s19 = inlined_call_operand.vmem [shape: f32[64,32], index: 19, kind: input, shape index: {}]   ;;  %s16351_s20 = inlined_call_operand.vmem [shape: f32[64,1], index: 20, kind: input, shape index: {}]   ;;  %s16352_s21 = inlined_call_operand.vmem [shape: f32[1,64], index: 21, kind: input, shape index: {}]   ;;  %s16353_s22 = inlined_call_operand.vmem [shape: f32[32,40], index: 22, kind: input, shape index: {}]   ;;  %s16354_s23 = inlined_call_operand.hbm [shape: f32[16,40], index: 23, kind: output, shape index: {}]  }
   0x1   :  { %16474 = sst [smem:[#allocation63_spill]] %s16331_s0 }
   0x2   :  { %16475 = sst [smem:[#allocation64_spill]] %s16332_s1 }
   0x3   :  { %16476 = sst [smem:[#allocation65_spill]] %s16333_s2 }
   0x4   :  { %16477 = sst [smem:[#allocation66_spill]] %s16334_s3 }
   0x5   :  { %16478 = sst [smem:[#allocation67_spill]] %s16335_s4 }
   0x6   :  { %16479 = sst [smem:[#allocation68_spill]] %s16336_s5 }
   0x7   :  { %16480 = sst [smem:[#allocation69_spill]] %s16337_s6 }
   0x8   :  { %16481 = sst [smem:[#allocation70_spill]] %s16338_s7 }
   0x9   :  { %16482 = sst [smem:[#allocation71_spill]] %s16341_s10 }
   0xa   :  { %16483 = sst [smem:[#allocation72_spill]] %s16342_s11 }
   0xb   :  { %16484 = sst [smem:[#allocation73_spill]] %s16343_s12 }
   0xc   :  { %16485 = sst [smem:[#allocation74_spill]] %s16344_s13 }
   0xd   :  { %16486 = sst [smem:[#allocation75_spill]] %s16345_s14 }
   0xe   :  { %16487 = sst [smem:[#allocation76_spill]] %s16346_s15 }
   0xf   :  { %16488 = sst [smem:[#allocation77_spill]] %s16347_s16 }
  0x10   :  { %16489 = sst [smem:[#allocation78_spill]] %s16348_s17 }
  0x11   :  { %16490 = sst [smem:[#allocation79_spill]] %s16349_s18 }
  0x12   :  { %16491 = sst [smem:[#allocation80_spill]] %s16350_s19 }
  0x13   :  { %16492 = sst [smem:[#allocation81_spill]] %s16351_s20 }
  0x14   :  { %16493 = sst [smem:[#allocation82_spill]] %s16352_s21 }
  0x15   :  { %16494 = sst [smem:[#allocation83_spill]] %s16353_s22 }
  0x16   :  { %16495 = sst [smem:[#allocation84_spill]] %s16354_s23 }
  0x17   :  { %28 = vsyncpa [#allocation13], 0 }
  0x18   :  { %29 = vsyncpa [#allocation12], 0  ;;  %s16496_s24 = sld [smem:[#allocation63_spill]] }
  0x1e   :  { %s36_s25 = sshll.u32 %s16496_s24, 4  ;;  %s37_s25 = int_to_ptr.vmem [resolvable:$true] %s36_s25 }
  0x1f   :  { %s11119_s5 = scalar_lea.vmem %s37_s25, 16  ;;  %p11124_p1 = scmp.lt.s32.totalorder %s37_s25, %s37_s25 }
  0x20   :  { %p11120_p0 = scmp.ne.s32.totalorder %s37_s25, %s11119_s5  ;;  %p11125_p2 = scmp.lt.s32.totalorder %s11119_s5, %s11119_s5 }
  0x22   :  { %p11126_p3 = por %p11125_p2, %p11124_p1 }
  0x24   :  { %p11127_p4 = pnand %p11126_p3, %p11120_p0 }
  0x26   :  { %11130 = shalt.err (!%p11127_p4)
}
  0x27   :  { %s11155_s1 = smov [#allocation11]  }
  0x28   :  { %39 = dma.vmem_to_smem %s37_s25, 16, %s11155_s1, [#allocation13]  }
  0x29   :  { %11151 = dma.done.wait [#allocation13], 16  }
  0x2a   :  { %11152 = vsyncadd [#allocation13], 4294967280 }
  0x2b   :  { %87 = sfence }
  0x2c   :  { %s16497_s6 = sld [smem:[#allocation64_spill]]  ;;  %s16368_s28 = smov 30   ;;  %v16417_v10 = vlaneseq  ;;  %v16419_v13 = vmov 0.0   ;;  %v11176_v53 = vmov 0   ;;  %vm16453_vm1 = vcmask 244736  }
  0x2d   :  { %s16390_s29 = smov 124   ;;  %s16362_s24 = smov 29   ;;  %99 = vst [vmem:[#allocation2 + $0xc0] sm:$0xff] %v16419_v13  ;;  %100 = vst [vmem:[#allocation2 + $0xc8] sm:$0xff] %v16419_v13  ;;  %721 = vmatprep.mubr.f32.mxu0 %v16419_v13  ;;  %798 = vmatprep.mubr.f32.mxu1 %v16419_v13  ;;  %vm186_vm2 = vcmask 1014784   ;;  %vm480_vm3 = vcmask 236544  }
  0x2e   :  { %s16366_s25 = smov 31   ;;  %s16364_s27 = smov 28   ;;  %101 = vst [vmem:[#allocation2 + $0xd0] sm:$0xff] %v16419_v13  ;;  %102 = vst [vmem:[#allocation2 + $0xd8] sm:$0xff] %v16419_v13  ;;  %vm11361_vm0 = vcmp.lt.s32.totalorder %v16417_v10, 512  ;;  %10986 = vset.pattern.permute.xlu1 %v11176_v53  ;;  %10985 = vset.pattern.permute.xlu0 %v11176_v53  ;;  %vm16416_vm4 = vcmask 252928  }
  0x2f   :  { %s16399_s7 = smov 127   ;;  %s16397_s5 = smov 126   ;;  %103 = vst [vmem:[#allocation2 + $0xe0] sm:$0xff] %v16419_v13  ;;  %104 = vst [vmem:[#allocation2 + $0xe8] sm:$0xff] %v16419_v13  ;;  %vm501_vm5 = vcmask 228352   ;;  %vm123_vm6 = vcmask 1039360  }
  0x30   :  { %s16394_s1 = smov 125   ;;  %s16376_s3 = smov 93   ;;  %105 = vst [vmem:[#allocation2 + $0xf0] sm:$0xff] %v16419_v13  ;;  %106 = vst [vmem:[#allocation2 + $0xf8] sm:$0xff] %v16419_v13  ;;  %vm144_vm7 = vcmask 1031168   ;;  %vm165_vm8 = vcmask 1022976  }
  0x31   :  { %s16370_s0 = smov 92   ;;  %s16384_s26 = smov 60   ;;  %vm16415_vm9 = vcmask 760832   ;;  %vm291_vm10 = vcmask 752640   ;;  %vm312_vm11 = vcmask 523264   ;;  %vm16411_vm12 = vcmask 515072  }
  0x32   :  { %v454_v0 = vld [vmem:[%s16497_s6] sm:$0x1f]  ;;  %s16382_s2 = smov 32   ;;  %v595_v27 = vld [vmem:[%s16497_s6 + $0x6] sm:$0x1f]  ;;  %s16504_s23 = smov 93  }
  0x33   :  { %v585_v1 = vld [vmem:[%s16497_s6 + $0x1] sm:$0x1f]  ;;  %456 = vrot.lane.b32.xlu1 %v454_v0, %s16368_s28  ;;  %s16380_s28 = smov 61   ;;  %v555_v33 = vld [vmem:[%s16497_s6 + $0x6] sm:$0x1f]  ;;  %s16508_s21 = smov 62  }
  0x34   :  { %587 = vrot.lane.b32.xlu0 %v585_v1, %s16390_s29  ;;  %v475_v2 = vld [vmem:[%s16497_s6] sm:$0x1f]  ;;  %v465_v29 = vld [vmem:[%s16497_s6 + $0x5] sm:$0x1f]  ;;  %s16509_s22 = smov 63   ;;  %s16510_s17 = smov 60  }
  0x35   :  { %v433_v3 = vld [vmem:[%s16497_s6] sm:$0x1f]  ;;  %v444_v30 = vld [vmem:[%s16497_s6 + $0x5] sm:$0x1f]  ;;  %s16512_s19 = smov 127   ;;  %s16513_s4 = smov 32  }
  0x36   :  { %v496_v4 = vld [vmem:[%s16497_s6] sm:$0x1f]  ;;  %v507_v31 = vld [vmem:[%s16497_s6 + $0x5] sm:$0x1f]  ;;  %s16514_s18 = smov 126   ;;  %s16515_s13 = smov 96  }
  0x37   :  { %477 = vrot.lane.b32.xlu1 %v475_v2, %s16362_s24  ;;  %v525_v5 = vld [vmem:[%s16497_s6 + $0x1] sm:$0x1f]  ;;  %v535_v34 = vld [vmem:[%s16497_s6 + $0x6] sm:$0x1f]  ;;  %s16517_s12 = smov 94   ;;  %s16518_s16 = smov 95  }
  0x38   :  { %435 = vrot.lane.b32.xlu0 %v433_v3, %s16366_s25  ;;  %v545_v6 = vld [vmem:[%s16497_s6 + $0x1] sm:$0x1f]  ;;  %s16372_s25 = smov 64   ;;  %v575_v36 = vld [vmem:[%s16497_s6 + $0x6] sm:$0x1f]  ;;  %s16519_s30 = sld [smem:[#allocation67_spill]] }
  0x39   :  { %v565_v7 = vld [vmem:[%s16497_s6 + $0x1] sm:$0x1f]  ;;  %v521_v45 = vld [vmem:[%s16497_s6 + $0x6] sm:$0xf]  ;;  %vm16414_vm13 = vcmask 506880   ;;  %vm16412_vm14 = vcmask 498688  }
  0x3a   :  { %v265_v8 = vld [vmem:[%s16497_s6] sm:$0x1f]  ;;  %v486_v32 = vld [vmem:[%s16497_s6 + $0x5] sm:$0x1f]  ;;  %vm16413_vm15 = vcmask 490496   ;;  %s16520_s14 = sld [smem:[#allocation66_spill]] }
  0x3b   :  { %527 = vrot.lane.b32.xlu1 %v525_v5, %s16399_s7  ;;  %v286_v9 = vld [vmem:[%s16497_s6] sm:$0x1f]  ;;  %v276_v35 = vld [vmem:[%s16497_s6 + $0x5] sm:$0x1f]  ;;  %s16561_s20 = sld [smem:[#allocation68_spill]] }
  0x3c   :  { %498 = vrot.lane.b32.xlu0 %v496_v4, %s16364_s27  ;;  %v307_v11 = vld [vmem:[%s16497_s6] sm:$0x1f]  ;;  %s16374_s27 = smov 63   ;;  %v318_v37 = vld [vmem:[%s16497_s6 + $0x5] sm:$0x1f]  ;;  %s16684_s10 = sld [smem:[#allocation69_spill]] }
  0x3d   :  { %v328_v12 = vld [vmem:[%s16497_s6] sm:$0x1f]  ;;  %v297_v38 = vld [vmem:[%s16497_s6 + $0x5] sm:$0x1f] }
  0x3e   :  { %v517_v15 = vld [vmem:[%s16497_s6 + $0x1] sm:$0xf]  ;;  %v360_v39 = vld [vmem:[%s16497_s6 + $0x5] sm:$0x1f] }
  0x3f   :  { %567 = vrot.lane.b32.xlu1 %v565_v7, %s16394_s1  ;;  %519 = vst.msk [vmem:[#allocation2 + $0x84] ss:$8 sm:$0xf] %vm11361_vm0, %v517_v15  ;;  %v349_v16 = vld [vmem:[%s16497_s6] sm:$0x1f]  ;;  %v640_v55 = vld [vmem:[%s16519_s30 + $0x8] sm:$0xff] }
  0x40   :  { %547 = vrot.lane.b32.xlu0 %v545_v6, %s16397_s5  ;;  %v370_v17 = vld [vmem:[%s16497_s6] sm:$0x1f]  ;;  %v339_v40 = vld [vmem:[%s16497_s6 + $0x5] sm:$0x1f] }
  0x41   :  { %v391_v18 = vld [vmem:[%s16497_s6] sm:$0x1f]  ;;  %v402_v41 = vld [vmem:[%s16497_s6 + $0x5] sm:$0x1f] }
  0x42   :  { %v412_v19 = vld [vmem:[%s16497_s6] sm:$0x1f]  ;;  %v381_v42 = vld [vmem:[%s16497_s6 + $0x5] sm:$0x1f] }
  0x43   :  { %288 = vrot.lane.b32.xlu1 %v286_v9, %s16370_s0  ;;  %s16378_s0 = smov 62   ;;  %v139_v20 = vld [vmem:[%s16497_s6] sm:$0x1f]  ;;  %v129_v43 = vld [vmem:[%s16497_s6 + $0x5] sm:$0x1f] }
  0x44   :  { %267 = vrot.lane.b32.xlu0 %v265_v8, %s16376_s3  ;;  %v118_v21 = vld [vmem:[%s16497_s6] sm:$0x1f]  ;;  %s16386_s3 = smov 95   ;;  %v423_v44 = vld [vmem:[%s16497_s6 + $0x5] sm:$0x1f] }
  0x45   :  { %v181_v22 = vld [vmem:[%s16497_s6] sm:$0x1f]  ;;  %523 = vst.msk [vmem:[#allocation2 + $0xa4] ss:$8 sm:$0xf] %vm11361_vm0, %v521_v45 }
  0x46   :  { %v160_v23 = vld [vmem:[%s16497_s6] sm:$0x1f]  ;;  %v171_v46 = vld [vmem:[%s16497_s6 + $0x5] sm:$0x1f] }
  0x47   :  { %330 = vrot.lane.b32.xlu1 %v328_v12, %s16374_s27  ;;  %v107_v24 = vld [vmem:[%s16497_s6] sm:$0xf]  ;;  %v150_v47 = vld [vmem:[%s16497_s6 + $0x5] sm:$0x1f]  ;;  %s16516_s27 = smov 124  }
  0x48   :  { %309 = vrot.lane.b32.xlu0 %v307_v11, %s16372_s25  ;;  %112 = vst.msk [vmem:[#allocation2] ss:$8 sm:$0xf] %vm11361_vm0, %v107_v24  ;;  %v223_v25 = vld [vmem:[%s16497_s6] sm:$0x1f]  ;;  %s16507_s25 = smov 92  }
  0x49   :  { %v202_v26 = vld [vmem:[%s16497_s6] sm:$0x1f]  ;;  %v114_v48 = vld [vmem:[%s16497_s6 + $0x5] sm:$0xf] }
  0x4a   :  { %v244_v28 = vld [vmem:[%s16497_s6] sm:$0x1f]  ;;  %116 = vst.msk [vmem:[#allocation2 + $0x20] ss:$8 sm:$0xf] %vm11361_vm0, %v114_v48 }
  0x4b   :  { %372 = vrot.lane.b32.xlu1 %v370_v17, %s16380_s28  ;;  %s16503_s28 = smov 29   ;;  %v213_v49 = vld [vmem:[%s16497_s6 + $0x5] sm:$0x1f] }
  0x4c   :  { %351 = vrot.lane.b32.xlu0 %v349_v16, %s16378_s0  ;;  %s16392_s0 = smov 94   ;;  %v192_v50 = vld [vmem:[%s16497_s6 + $0x5] sm:$0x1f] }
  0x4d   :  { %v255_v51 = vld [vmem:[%s16497_s6 + $0x5] sm:$0x1f] }
  0x4e   :  { %v234_v52 = vld [vmem:[%s16497_s6 + $0x5] sm:$0x1f] }
  0x4f   :  { %414 = vrot.lane.b32.xlu1 %v412_v19, %s16382_s2  ;;  %s16501_s2 = smov 31   ;;  %v639_v54 = vld [vmem:[%s16519_s30] sm:$0xff] }
  0x50   :  { %393 = vrot.lane.b32.xlu0 %v391_v18, %s16384_s26  ;;  %s16388_s26 = smov 96  }
  0x53   :  { %141 = vrot.lane.b32.xlu1 %v139_v20, %s16397_s5 }
  0x54   :  { %120 = vrot.lane.b32.xlu0 %v118_v21, %s16399_s7 }
  0x57   :  { %183 = vrot.lane.b32.xlu1 %v181_v22, %s16390_s29 }
  0x58   :  { %162 = vrot.lane.b32.xlu0 %v160_v23, %s16394_s1  ;;  %s16505_s1 = smov 125  }
  0x5b   :  { %225 = vrot.lane.b32.xlu1 %v223_v25, %s16386_s3  ;;  %s16743_s3 = sld [smem:[#allocation70_spill]] }
  0x5c   :  { %204 = vrot.lane.b32.xlu0 %v202_v26, %s16388_s26  ;;  %s16500_s26 = smov 30  }
  0x5f   :  { %597 = vrot.lane.b32.xlu1 %v595_v27, %s16390_s29  ;;  %s16920_s29 = sld [smem:[#allocation81_spill]] }
  0x60   :  { %246 = vrot.lane.b32.xlu0 %v244_v28, %s16392_s0  ;;  %s16502_s0 = smov 28  }
  0x63   :  { %467 = vrot.lane.b32.xlu1 %v465_v29, %s16500_s26 }
  0x64   :  { %446 = vrot.lane.b32.xlu0 %v444_v30, %s16501_s2 }
  0x67   :  { %509 = vrot.lane.b32.xlu1 %v507_v31, %s16502_s0 }
  0x68   :  { %488 = vrot.lane.b32.xlu0 %v486_v32, %s16503_s28 }
  0x6b   :  { %557 = vrot.lane.b32.xlu1 %v555_v33, %s16397_s5  ;;  %s16506_s5 = smov 64  }
  0x6c   :  { %537 = vrot.lane.b32.xlu0 %v535_v34, %s16399_s7  ;;  %s16511_s7 = smov 61  }
  0x6f   :  { %278 = vrot.lane.b32.xlu1 %v276_v35, %s16504_s23 }
  0x70   :  { %577 = vrot.lane.b32.xlu0 %v575_v36, %s16505_s1 }
  0x73   :  { %320 = vrot.lane.b32.xlu1 %v318_v37, %s16506_s5 }
  0x74   :  { %299 = vrot.lane.b32.xlu0 %v297_v38, %s16507_s25 }
  0x77   :  { %362 = vrot.lane.b32.xlu1 %v360_v39, %s16508_s21 }
  0x78   :  { %341 = vrot.lane.b32.xlu0 %v339_v40, %s16509_s22 }
  0x7b   :  { %404 = vrot.lane.b32.xlu1 %v402_v41, %s16510_s17 }
  0x7c   :  { %383 = vrot.lane.b32.xlu0 %v381_v42, %s16511_s7 }
  0x7f   :  { %131 = vrot.lane.b32.xlu1 %v129_v43, %s16512_s19 }
  0x80   :  { %425 = vrot.lane.b32.xlu0 %v423_v44, %s16513_s4 }
  0x83   :  { %173 = vrot.lane.b32.xlu1 %v171_v46, %s16505_s1 }
  0x84   :  { %152 = vrot.lane.b32.xlu0 %v150_v47, %s16514_s18 }
  0x87   :  { %215 = vrot.lane.b32.xlu1 %v213_v49, %s16515_s13 }
  0x88   :  { %194 = vrot.lane.b32.xlu0 %v192_v50, %s16516_s27 }
  0x8b   :  { %257 = vrot.lane.b32.xlu1 %v255_v51, %s16517_s12 }
  0x8c   :  { %236 = vrot.lane.b32.xlu0 %v234_v52, %s16518_s16 }
  0x8f   :  { %643 = vperm.xlu1 %10986, %v639_v54  }
  0x90   :  { %648 = vperm.xlu0 %10985, %v640_v55  }
  0xa5   :  { %v457_v56 = vpop.permute.xlu1 %456 }
  0xa6   :  { %v588_v57 = vpop.permute.xlu0 %587  ;;  %v458_v58 = vrot.slane %v457_v56, 1 }
  0xa7   :  { %v589_v59 = vrot.slane %v588_v57, 1 }
  0xa8   :  { %v460_v60 = vsel %vm16453_vm1, %v457_v56, %v458_v58 }
  0xa9   :  { %v590_v61 = vsel %vm186_vm2, %v588_v57, %v589_v59  ;;  %463 = vst.msk [vmem:[#allocation2 + $0x81] ss:$8 sm:$0xf] %vm11361_vm0, %v460_v60  ;;  %v478_v62 = vpop.permute.xlu1 %477 }
  0xaa   :  { %593 = vst.msk [vmem:[#allocation2 + $0xc0] ss:$8 sm:$0xf] %vm11361_vm0, %v590_v61  ;;  %v436_v63 = vpop.permute.xlu0 %435  ;;  %v479_v0 = vrot.slane %v478_v62, 1 }
  0xab   :  { %v437_v1 = vrot.slane %v436_v63, 1 }
  0xac   :  { %v481_v2 = vsel %vm480_vm3, %v478_v62, %v479_v0 }
  0xad   :  { %v439_v3 = vsel %vm16416_vm4, %v436_v63, %v437_v1  ;;  %484 = vst.msk [vmem:[#allocation2 + $0x82] ss:$8 sm:$0xf] %vm11361_vm0, %v481_v2  ;;  %v528_v5 = vpop.permute.xlu1 %527 }
  0xae   :  { %442 = vst.msk [vmem:[#allocation2 + $0x80] ss:$8 sm:$0xf] %vm11361_vm0, %v439_v3  ;;  %v499_v4 = vpop.permute.xlu0 %498  ;;  %v529_v7 = vrot.slane %v528_v5, 1 }
  0xaf   :  { %v500_v6 = vrot.slane %v499_v4, 1 }
  0xb0   :  { %v530_v9 = vsel %vm123_vm6, %v528_v5, %v529_v7 }
  0xb1   :  { %v502_v8 = vsel %vm501_vm5, %v499_v4, %v500_v6  ;;  %v632_v11 = vld [vmem:[#allocation2 + $0xc8] sm:$0xff]  ;;  %v634_v12 = vld [vmem:[#allocation2 + $0xd8] sm:$0xff]  ;;  %v631_v15 = vld [vmem:[#allocation2 + $0xc0] sm:$0xff]  ;;  %533 = vst.msk [vmem:[#allocation2 + $0x85] ss:$8 sm:$0xf] %vm11361_vm0, %v530_v9  ;;  %v568_v17 = vpop.permute.xlu1 %567 }
  0xb2   :  { %505 = vst.msk [vmem:[#allocation2 + $0x83] ss:$8 sm:$0xf] %vm11361_vm0, %v502_v8  ;;  %v548_v16 = vpop.permute.xlu0 %547  ;;  %681 = vmatprep.subr.mxu0 %v632_v11  ;;  %758 = vmatprep.subr.mxu1 %v634_v12  ;;  %v633_v18 = vld [vmem:[#allocation2 + $0xd0] sm:$0xff]  ;;  %v569_v20 = vrot.slane %v568_v17, 1 }
  0xb3   :  { %v549_v19 = vrot.slane %v548_v16, 1  ;;  %682 = vmatpush1.msra.mxu0 %v631_v15  ;;  %759 = vmatpush1.msra.mxu1 %v633_v18 }
  0xb4   :  { %v570_v22 = vsel %vm165_vm8, %v568_v17, %v569_v20 }
  0xb5   :  { %v550_v21 = vsel %vm144_vm7, %v548_v16, %v549_v19  ;;  %573 = vst.msk [vmem:[#allocation2 + $0x87] ss:$8 sm:$0xf] %vm11361_vm0, %v570_v22  ;;  %v289_v24 = vpop.permute.xlu1 %288 }
  0xb6   :  { %553 = vst.msk [vmem:[#allocation2 + $0x86] ss:$8 sm:$0xf] %vm11361_vm0, %v550_v21  ;;  %v268_v23 = vpop.permute.xlu0 %267  ;;  %v290_v26 = vrot.slane %v289_v24, 1 }
  0xb7   :  { %v269_v25 = vrot.slane %v268_v23, 1 }
  0xb8   :  { %v292_v28 = vsel %vm291_vm10, %v289_v24, %v290_v26 }
  0xb9   :  { %v271_v27 = vsel %vm16415_vm9, %v268_v23, %v269_v25  ;;  %295 = vst.msk [vmem:[#allocation2 + $0x41] ss:$8 sm:$0xf] %vm11361_vm0, %v292_v28  ;;  %v331_v30 = vpop.permute.xlu1 %330  ;;  %v11610_v28 = vld [vmem:[%s16520_s14] sm:$0xff] }
  0xba   :  { %274 = vst.msk [vmem:[#allocation2 + $0x40] ss:$8 sm:$0xf] %vm11361_vm0, %v271_v27  ;;  %v310_v29 = vpop.permute.xlu0 %309  ;;  %v332_v32 = vrot.slane %v331_v30, 1 }
  0xbb   :  { %v311_v31 = vrot.slane %v310_v29, 1 }
  0xbc   :  { %v334_v34 = vsel %vm16411_vm12, %v331_v30, %v332_v32  ;;  %vm417_vm12 = vcmask 261120  }
  0xbd   :  { %v313_v33 = vsel %vm312_vm11, %v310_v29, %v311_v31  ;;  %v624_v35 = vld [vmem:[#allocation2 + $0x88] sm:$0xff]  ;;  %v626_v36 = vld [vmem:[#allocation2 + $0x98] sm:$0xff]  ;;  %v623_v37 = vld [vmem:[#allocation2 + $0x80] sm:$0xff]  ;;  %337 = vst.msk [vmem:[#allocation2 + $0x43] ss:$8 sm:$0xf] %vm11361_vm0, %v334_v34  ;;  %v373_v39 = vpop.permute.xlu1 %372 }
  0xbe   :  { %316 = vst.msk [vmem:[#allocation2 + $0x42] ss:$8 sm:$0xf] %vm11361_vm0, %v313_v33  ;;  %v352_v38 = vpop.permute.xlu0 %351  ;;  %683 = vmatprep.subr.mxu0 %v624_v35  ;;  %760 = vmatprep.subr.mxu1 %v626_v36  ;;  %v625_v40 = vld [vmem:[#allocation2 + $0x90] sm:$0xff]  ;;  %v374_v42 = vrot.slane %v373_v39, 1 }
  0xbf   :  { %v353_v41 = vrot.slane %v352_v38, 1  ;;  %684 = vmatpush1.msra.mxu0 %v623_v37  ;;  %761 = vmatpush1.msra.mxu1 %v625_v40 }
  0xc0   :  { %v376_v44 = vsel %vm16412_vm14, %v373_v39, %v374_v42  ;;  %vm16469_vm14 = vcmask 777216  }
  0xc1   :  { %v355_v43 = vsel %vm16414_vm13, %v352_v38, %v353_v41  ;;  %379 = vst.msk [vmem:[#allocation2 + $0x45] ss:$8 sm:$0xf] %vm11361_vm0, %v376_v44  ;;  %v415_v46 = vpop.permute.xlu1 %414  ;;  %vm249_vm13 = vcmask 769024  }
  0xc2   :  { %358 = vst.msk [vmem:[#allocation2 + $0x44] ss:$8 sm:$0xf] %vm11361_vm0, %v355_v43  ;;  %v394_v45 = vpop.permute.xlu0 %393  ;;  %v416_v48 = vrot.slane %v415_v46, 1 }
  0xc3   :  { %v395_v47 = vrot.slane %v394_v45, 1 }
  0xc4   :  { %v418_v50 = vsel %vm417_vm12, %v415_v46, %v416_v48 }
  0xc5   :  { %v397_v49 = vsel %vm16413_vm15, %v394_v45, %v395_v47  ;;  %421 = vst.msk [vmem:[#allocation2 + $0x47] ss:$8 sm:$0xf] %vm11361_vm0, %v418_v50  ;;  %v142_v51 = vpop.permute.xlu1 %141  ;;  %vm16468_vm15 = vcmask 785408   ;;  %v11627_v45 = vld [vmem:[%s16520_s14 + $0x8] sm:$0xff] }
  0xc6   :  { %400 = vst.msk [vmem:[#allocation2 + $0x46] ss:$8 sm:$0xf] %vm11361_vm0, %v397_v49  ;;  %v121_v52 = vpop.permute.xlu0 %120  ;;  %v143_v53 = vrot.slane %v142_v51, 1 }
  0xc7   :  { %v122_v54 = vrot.slane %v121_v52, 1 }
  0xc8   :  { %v145_v55 = vsel %vm144_vm7, %v142_v51, %v143_v53 }
  0xc9   :  { %v124_v56 = vsel %vm123_vm6, %v121_v52, %v122_v54  ;;  %148 = vst.msk [vmem:[#allocation2 + $0x2] ss:$8 sm:$0xf] %vm11361_vm0, %v145_v55  ;;  %v184_v57 = vpop.permute.xlu1 %183 }
  0xca   :  { %127 = vst.msk [vmem:[#allocation2 + $0x1] ss:$8 sm:$0xf] %vm11361_vm0, %v124_v56  ;;  %v163_v58 = vpop.permute.xlu0 %162  ;;  %v185_v59 = vrot.slane %v184_v57, 1 }
  0xcb   :  { %v164_v60 = vrot.slane %v163_v58, 1 }
  0xcc   :  { %v187_v61 = vsel %vm186_vm2, %v184_v57, %v185_v59 }
  0xcd   :  { %v166_v62 = vsel %vm165_vm8, %v163_v58, %v164_v60  ;;  %v616_v63 = vld [vmem:[#allocation2 + $0x48] sm:$0xff]  ;;  %v618_v0 = vld [vmem:[#allocation2 + $0x58] sm:$0xff]  ;;  %v615_v1 = vld [vmem:[#allocation2 + $0x40] sm:$0xff]  ;;  %190 = vst.msk [vmem:[#allocation2 + $0x4] ss:$8 sm:$0xf] %vm11361_vm0, %v187_v61  ;;  %v226_v2 = vpop.permute.xlu1 %225 }
  0xce   :  { %169 = vst.msk [vmem:[#allocation2 + $0x3] ss:$8 sm:$0xf] %vm11361_vm0, %v166_v62  ;;  %v205_v3 = vpop.permute.xlu0 %204  ;;  %685 = vmatprep.subr.mxu0 %v616_v63  ;;  %762 = vmatprep.subr.mxu1 %v618_v0  ;;  %v617_v4 = vld [vmem:[#allocation2 + $0x50] sm:$0xff]  ;;  %v227_v5 = vrot.slane %v226_v2, 1 }
  0xcf   :  { %v206_v6 = vrot.slane %v205_v3, 1  ;;  %686 = vmatpush1.msra.mxu0 %v615_v1  ;;  %763 = vmatpush1.msra.mxu1 %v617_v4 }
  0xd0   :  { %v229_v7 = vsel %vm16469_vm14, %v226_v2, %v227_v5 }
  0xd1   :  { %v208_v8 = vsel %vm16468_vm15, %v205_v3, %v206_v6  ;;  %232 = vst.msk [vmem:[#allocation2 + $0x6] ss:$8 sm:$0xf] %vm11361_vm0, %v229_v7  ;;  %v598_v9 = vpop.permute.xlu1 %597 }
  0xd2   :  { %211 = vst.msk [vmem:[#allocation2 + $0x5] ss:$8 sm:$0xf] %vm11361_vm0, %v208_v8  ;;  %v247_v11 = vpop.permute.xlu0 %246  ;;  %v599_v12 = vrot.slane %v598_v9, 1 }
  0xd3   :  { %v248_v15 = vrot.slane %v247_v11, 1 }
  0xd4   :  { %v600_v16 = vsel %vm186_vm2, %v598_v9, %v599_v12 }
  0xd5   :  { %v250_v17 = vsel %vm249_vm13, %v247_v11, %v248_v15  ;;  %603 = vst.msk [vmem:[#allocation2 + $0xe0] ss:$8 sm:$0xf] %vm11361_vm0, %v600_v16  ;;  %v468_v18 = vpop.permute.xlu1 %467 }
  0xd6   :  { %253 = vst.msk [vmem:[#allocation2 + $0x7] ss:$8 sm:$0xf] %vm11361_vm0, %v250_v17  ;;  %v447_v19 = vpop.permute.xlu0 %446  ;;  %v469_v20 = vrot.slane %v468_v18, 1 }
  0xd7   :  { %v448_v21 = vrot.slane %v447_v19, 1 }
  0xd8   :  { %v470_v22 = vsel %vm16453_vm1, %v468_v18, %v469_v20 }
  0xd9   :  { %v449_v23 = vsel %vm16416_vm4, %v447_v19, %v448_v21  ;;  %473 = vst.msk [vmem:[#allocation2 + $0xa1] ss:$8 sm:$0xf] %vm11361_vm0, %v470_v22  ;;  %v510_v24 = vpop.permute.xlu1 %509  ;;  %vm16522_vm4 = vcmask 515072  }
  0xda   :  { %452 = vst.msk [vmem:[#allocation2 + $0xa0] ss:$8 sm:$0xf] %vm11361_vm0, %v449_v23  ;;  %v489_v25 = vpop.permute.xlu0 %488  ;;  %v511_v26 = vrot.slane %v510_v24, 1 }
  0xdb   :  { %v490_v27 = vrot.slane %v489_v25, 1 }
  0xdc   :  { %v512_v29 = vsel %vm501_vm5, %v510_v24, %v511_v26  ;;  %v636_v37 = vld [vmem:[#allocation2 + $0xe8] sm:$0xff]  ;;  %v638_v38 = vld [vmem:[#allocation2 + $0xf8] sm:$0xff]  ;;  %v635_v41 = vld [vmem:[#allocation2 + $0xe0] sm:$0xff] }
  0xdd   :  { %v491_v30 = vsel %vm480_vm3, %v489_v25, %v490_v27  ;;  %v608_v31 = vld [vmem:[#allocation2 + $0x8] sm:$0xff]  ;;  %v610_v32 = vld [vmem:[#allocation2 + $0x18] sm:$0xff]  ;;  %v607_v33 = vld [vmem:[#allocation2] sm:$0xff]  ;;  %515 = vst.msk [vmem:[#allocation2 + $0xa3] ss:$8 sm:$0xf] %vm11361_vm0, %v512_v29  ;;  %v558_v34 = vpop.permute.xlu1 %557 }
  0xde   :  { %494 = vst.msk [vmem:[#allocation2 + $0xa2] ss:$8 sm:$0xf] %vm11361_vm0, %v491_v30  ;;  %v538_v35 = vpop.permute.xlu0 %537  ;;  %687 = vmatprep.subr.mxu0 %v608_v31  ;;  %764 = vmatprep.subr.mxu1 %v610_v32  ;;  %v609_v36 = vld [vmem:[#allocation2 + $0x10] sm:$0xff]  ;;  %v559_v39 = vrot.slane %v558_v34, 1 }
  0xdf   :  { %v539_v40 = vrot.slane %v538_v35, 1  ;;  %688 = vmatpush1.msra.mxu0 %v607_v33  ;;  %765 = vmatpush1.msra.mxu1 %v609_v36  ;;  %v637_v42 = vld [vmem:[#allocation2 + $0xf0] sm:$0xff] }
  0xe0   :  { %10819 = vmatmul.mubr.msk.f32.vlgmr.msra.gmra.mxu0 %vm417_vm12, %v11610_v28  ;;  %10821 = vmatmul.mubr.msk.f32.vlgmr.msra.gmra.mxu1 %vm417_vm12, %v11610_v28  ;;  %v560_v43 = vsel %vm144_vm7, %v558_v34, %v559_v39 }
  0xe1   :  { %v540_v44 = vsel %vm123_vm6, %v538_v35, %v539_v40  ;;  %835 = vmatprep.subr.mxu0 %v636_v37  ;;  %912 = vmatprep.subr.mxu1 %v638_v38  ;;  %563 = vst.msk [vmem:[#allocation2 + $0xa6] ss:$8 sm:$0xf] %vm11361_vm0, %v560_v43  ;;  %v279_v46 = vpop.permute.xlu1 %278 }
  0xe2   :  { %543 = vst.msk [vmem:[#allocation2 + $0xa5] ss:$8 sm:$0xf] %vm11361_vm0, %v540_v44  ;;  %v578_v47 = vpop.permute.xlu0 %577  ;;  %836 = vmatpush1.msra.mxu0 %v635_v41  ;;  %913 = vmatpush1.msra.mxu1 %v637_v42  ;;  %v280_v48 = vrot.slane %v279_v46, 1 }
  0xe3   :  { %v579_v49 = vrot.slane %v578_v47, 1  ;;  %727 = vmatprep.mubr.f32.mxu0 %v16419_v13  ;;  %804 = vmatprep.mubr.f32.mxu1 %v16419_v13 }
  0xe4   :  { %10820 = vmatmul.mubr.msk.f32.gmra.mxu0 %vm417_vm12, %v11627_v45  ;;  %10822 = vmatmul.mubr.msk.f32.gmra.mxu1 %vm417_vm12, %v11627_v45  ;;  %v281_v50 = vsel %vm16415_vm9, %v279_v46, %v280_v48  ;;  %vm16521_vm9 = vcmask 506880  }
  0xe5   :  { %v580_v51 = vsel %vm165_vm8, %v578_v47, %v579_v49  ;;  %875 = vmatprep.mubr.f32.mxu0 %v16419_v13  ;;  %952 = vmatprep.mubr.f32.mxu1 %v16419_v13  ;;  %284 = vst.msk [vmem:[#allocation2 + $0x60] ss:$8 sm:$0xf] %vm11361_vm0, %v281_v50  ;;  %v321_v52 = vpop.permute.xlu1 %320 }
  0xe6   :  { %583 = vst.msk [vmem:[#allocation2 + $0xa7] ss:$8 sm:$0xf] %vm11361_vm0, %v580_v51  ;;  %v300_v53 = vpop.permute.xlu0 %299  ;;  %v322_v54 = vrot.slane %v321_v52, 1 }
  0xe7   :  { %v301_v55 = vrot.slane %v300_v53, 1 }
  0xe8   :  { %v323_v56 = vsel %vm312_vm11, %v321_v52, %v322_v54 }
  0xe9   :  { %v302_v57 = vsel %vm291_vm10, %v300_v53, %v301_v55  ;;  %326 = vst.msk [vmem:[#allocation2 + $0x62] ss:$8 sm:$0xf] %vm11361_vm0, %v323_v56  ;;  %v363_v58 = vpop.permute.xlu1 %362 }
  0xea   :  { %305 = vst.msk [vmem:[#allocation2 + $0x61] ss:$8 sm:$0xf] %vm11361_vm0, %v302_v57  ;;  %v342_v59 = vpop.permute.xlu0 %341  ;;  %v364_v60 = vrot.slane %v363_v58, 1 }
  0xeb   :  { %v343_v61 = vrot.slane %v342_v59, 1 }
  0xec   :  { %v365_v62 = vsel %vm16521_vm9, %v363_v58, %v364_v60  ;;  %vm16523_vm9 = vcmask 490496  }
  0xed   :  { %v344_v63 = vsel %vm16522_vm4, %v342_v59, %v343_v61  ;;  %v628_v0 = vld [vmem:[#allocation2 + $0xa8] sm:$0xff]  ;;  %v630_v1 = vld [vmem:[#allocation2 + $0xb8] sm:$0xff]  ;;  %v627_v2 = vld [vmem:[#allocation2 + $0xa0] sm:$0xff]  ;;  %368 = vst.msk [vmem:[#allocation2 + $0x64] ss:$8 sm:$0xf] %vm11361_vm0, %v365_v62  ;;  %v405_v3 = vpop.permute.xlu1 %404 }
  0xee   :  { %347 = vst.msk [vmem:[#allocation2 + $0x63] ss:$8 sm:$0xf] %vm11361_vm0, %v344_v63  ;;  %v384_v4 = vpop.permute.xlu0 %383  ;;  %837 = vmatprep.subr.mxu0 %v628_v0  ;;  %914 = vmatprep.subr.mxu1 %v630_v1  ;;  %v629_v5 = vld [vmem:[#allocation2 + $0xb0] sm:$0xff]  ;;  %v406_v6 = vrot.slane %v405_v3, 1  ;;  %vm16524_vm4 = vcmask 498688  }
  0xef   :  { %v385_v7 = vrot.slane %v384_v4, 1  ;;  %838 = vmatpush1.msra.mxu0 %v627_v2  ;;  %915 = vmatpush1.msra.mxu1 %v629_v5 }
  0xf0   :  { %v407_v8 = vsel %vm16523_vm9, %v405_v3, %v406_v6  ;;  %vm16586_vm9 = vcmask 252928  }
  0xf1   :  { %v386_v9 = vsel %vm16524_vm4, %v384_v4, %v385_v7  ;;  %410 = vst.msk [vmem:[#allocation2 + $0x66] ss:$8 sm:$0xf] %vm11361_vm0, %v407_v8  ;;  %v132_v11 = vpop.permute.xlu1 %131  ;;  %vm16588_vm4 = vmmov %vm16586_vm9 }
  0xf2   :  { %389 = vst.msk [vmem:[#allocation2 + $0x65] ss:$8 sm:$0xf] %vm11361_vm0, %v386_v9  ;;  %v426_v12 = vpop.permute.xlu0 %425  ;;  %v133_v15 = vrot.slane %v132_v11, 1 }
  0xf3   :  { %v427_v16 = vrot.slane %v426_v12, 1 }
  0xf4   :  { %v134_v17 = vsel %vm123_vm6, %v132_v11, %v133_v15 }
  0xf5   :  { %v428_v18 = vsel %vm417_vm12, %v426_v12, %v427_v16  ;;  %137 = vst.msk [vmem:[#allocation2 + $0x21] ss:$8 sm:$0xf] %vm11361_vm0, %v134_v17  ;;  %v174_v19 = vpop.permute.xlu1 %173 }
  0xf6   :  { %431 = vst.msk [vmem:[#allocation2 + $0x67] ss:$8 sm:$0xf] %vm11361_vm0, %v428_v18  ;;  %v153_v20 = vpop.permute.xlu0 %152  ;;  %v175_v21 = vrot.slane %v174_v19, 1 }
  0xf7   :  { %v154_v22 = vrot.slane %v153_v20, 1 }
  0xf8   :  { %v176_v23 = vsel %vm165_vm8, %v174_v19, %v175_v21 }
  0xf9   :  { %v155_v24 = vsel %vm144_vm7, %v153_v20, %v154_v22  ;;  %179 = vst.msk [vmem:[#allocation2 + $0x23] ss:$8 sm:$0xf] %vm11361_vm0, %v176_v23  ;;  %v216_v25 = vpop.permute.xlu1 %215 }
  0xfa   :  { %158 = vst.msk [vmem:[#allocation2 + $0x22] ss:$8 sm:$0xf] %vm11361_vm0, %v155_v24  ;;  %v195_v26 = vpop.permute.xlu0 %194  ;;  %v217_v27 = vrot.slane %v216_v25, 1 }
  0xfb   :  { %v196_v29 = vrot.slane %v195_v26, 1 }
  0xfc   :  { %v218_v30 = vsel %vm16468_vm15, %v216_v25, %v217_v27 }
  0xfd   :  { %v197_v31 = vsel %vm186_vm2, %v195_v26, %v196_v29  ;;  %v620_v32 = vld [vmem:[#allocation2 + $0x68] sm:$0xff]  ;;  %v622_v33 = vld [vmem:[#allocation2 + $0x78] sm:$0xff]  ;;  %v619_v34 = vld [vmem:[#allocation2 + $0x60] sm:$0xff]  ;;  %221 = vst.msk [vmem:[#allocation2 + $0x25] ss:$8 sm:$0xf] %vm11361_vm0, %v218_v30  ;;  %v258_v35 = vpop.permute.xlu1 %257 }
  0xfe   :  { %200 = vst.msk [vmem:[#allocation2 + $0x24] ss:$8 sm:$0xf] %vm11361_vm0, %v197_v31  ;;  %v237_v36 = vpop.permute.xlu0 %236  ;;  %839 = vmatprep.subr.mxu0 %v620_v32  ;;  %916 = vmatprep.subr.mxu1 %v622_v33  ;;  %v621_v37 = vld [vmem:[#allocation2 + $0x70] sm:$0xff]  ;;  %v259_v38 = vrot.slane %v258_v35, 1 }
  0xff   :  { %v238_v39 = vrot.slane %v237_v36, 1  ;;  %840 = vmatpush1.msra.mxu0 %v619_v34  ;;  %917 = vmatpush1.msra.mxu1 %v621_v37 }
 0x100   :  { %v260_v40 = vsel %vm249_vm13, %v258_v35, %v259_v38 }
 0x101   :  { %v239_v41 = vsel %vm16469_vm14, %v237_v36, %v238_v39  ;;  %263 = vst.msk [vmem:[#allocation2 + $0x27] ss:$8 sm:$0xf] %vm11361_vm0, %v260_v40 }
 0x102   :  { %242 = vst.msk [vmem:[#allocation2 + $0x26] ss:$8 sm:$0xf] %vm11361_vm0, %v239_v41  ;;  %vm3685_vm0 = vcmask 130048  }
 0x109   :  { %v612_v42 = vld [vmem:[#allocation2 + $0x28] sm:$0xff]  ;;  %v614_v43 = vld [vmem:[#allocation2 + $0x38] sm:$0xff]  ;;  %v611_v44 = vld [vmem:[#allocation2 + $0x20] sm:$0xff] }
 0x10a   :  { %841 = vmatprep.subr.mxu0 %v612_v42  ;;  %918 = vmatprep.subr.mxu1 %v614_v43  ;;  %v613_v46 = vld [vmem:[#allocation2 + $0x30] sm:$0xff]  ;;  %v11699_v14 = vpop.permute.xlu1 %643 }
 0x10b   :  { %842 = vmatpush1.msra.mxu0 %v611_v44  ;;  %919 = vmatpush1.msra.mxu1 %v613_v46  ;;  %16525 = vst [vmem:[#allocation17_spill] sm:$0xff] %v11699_v14  ;;  %v11817_v57 = vpop.permute.xlu0 %648 }
 0x10c   :  { %10823 = vmatmul.mubr.msk.f32.vlgmr.msra.gmra.mxu0 %vm417_vm12, %v11610_v28  ;;  %10825 = vmatmul.mubr.msk.f32.vlgmr.msra.gmra.mxu1 %vm417_vm12, %v11610_v28  ;;  %16526 = vst [vmem:[#allocation18_spill] sm:$0xff] %v11817_v57 }
 0x10d   :  { %881 = vmatprep.mubr.f32.mxu0 %v16419_v13  ;;  %958 = vmatprep.mubr.f32.mxu1 %v16419_v13 }
 0x110   :  { %10824 = vmatmul.mubr.msk.f32.gmra.mxu0 %vm417_vm12, %v11627_v45  ;;  %10826 = vmatmul.mubr.msk.f32.gmra.mxu1 %vm417_vm12, %v11627_v45 }
 0x1a0   :  { %v723_v47 = vpop.f32.mrf.mxu0  ;;  %v800_v48 = vpop.f32.mrf.mxu1 }
 0x1a1   :  { %v801_v49 = vadd.f32 %v800_v48, %v11699_v14  ;;  %v724_v50 = vadd.f32 %v723_v47, %v11699_v14 }
 0x1a2   :  { %v725_v45 = vpop.f32.mrf.mxu0  ;;  %v802_v54 = vpop.f32.mrf.mxu1 }
 0x1a3   :  { %v11703_v51 = vmax.f32 %v801_v49, 0.0  ;;  %v11709_v28 = vmax.f32 %v724_v50, 0.0  ;;  %v726_v52 = vadd.f32 %v725_v45, %v11699_v14  ;;  %v803_v55 = vadd.f32 %v802_v54, %v11699_v14 }
 0x1a4   :  { %v729_v58 = vpop.f32.mrf.mxu0  ;;  %v806_v59 = vpop.f32.mrf.mxu1 }
 0x1a5   :  { %1641 = vrot.lane.b32.xlu1 %v11703_v51, %s16517_s12  ;;  %3163 = vrot.lane.b32.xlu0 %v11703_v51, %s16505_s1  ;;  %v11756_v53 = vmax.f32 %v726_v52, 0.0  ;;  %v11791_v56 = vmax.f32 %v803_v55, 0.0  ;;  %v730_v60 = vadd.f32 %v729_v58, %v11817_v57  ;;  %v807_v61 = vadd.f32 %v806_v59, %v11817_v57 }
 0x1a6   :  { %v808_v19 = vpop.f32.mrf.mxu1  ;;  %v731_v23 = vpop.f32.mrf.mxu0 }
 0x1a7   :  { %v11825_v62 = vmax.f32 %v730_v60, 0.0  ;;  %v11827_v63 = vmax.f32 %v807_v61, 0.0  ;;  %v809_v20 = vadd.f32 %v808_v19, %v11817_v57  ;;  %v732_v24 = vadd.f32 %v731_v23, %v11817_v57 }
 0x1a9   :  { %1541 = vrot.lane.b32.xlu1 %v11703_v51, %s16518_s16  ;;  %1637 = vrot.lane.b32.xlu0 %v11709_v28, %s16517_s12  ;;  %v11911_v25 = vmax.f32 %v809_v20, 0.0  ;;  %v11921_v29 = vmax.f32 %v732_v24, 0.0 }
 0x1ad   :  { %1441 = vrot.lane.b32.xlu1 %v11703_v51, %s16515_s13  ;;  %3063 = vrot.lane.b32.xlu0 %v11703_v51, %s16514_s18 }
 0x1b1   :  { %1341 = vrot.lane.b32.xlu1 %v11703_v51, %s16516_s27  ;;  %1537 = vrot.lane.b32.xlu0 %v11709_v28, %s16518_s16 }
 0x1b5   :  { %2841 = vrot.lane.b32.xlu1 %v11703_v51, %s16502_s0  ;;  %2963 = vrot.lane.b32.xlu0 %v11703_v51, %s16512_s19 }
 0x1b9   :  { %2837 = vrot.lane.b32.xlu1 %v11709_v28, %s16502_s0  ;;  %1437 = vrot.lane.b32.xlu0 %v11709_v28, %s16515_s13 }
 0x1bd   :  { %1241 = vrot.lane.b32.xlu1 %v11703_v51, %s16505_s1  ;;  %1337 = vrot.lane.b32.xlu0 %v11709_v28, %s16516_s27 }
 0x1c1   :  { %2741 = vrot.lane.b32.xlu1 %v11703_v51, %s16503_s28  ;;  %1237 = vrot.lane.b32.xlu0 %v11709_v28, %s16505_s1 }
 0x1c5   :  { %2737 = vrot.lane.b32.xlu1 %v11709_v28, %s16503_s28  ;;  %1137 = vrot.lane.b32.xlu0 %v11709_v28, %s16514_s18 }
 0x1c9   :  { %1141 = vrot.lane.b32.xlu1 %v11703_v51, %s16514_s18  ;;  %1037 = vrot.lane.b32.xlu0 %v11709_v28, %s16512_s19 }
 0x1cc   :  { %v877_v10 = vpop.f32.mrf.mxu0 }
 0x1cd   :  { %2641 = vrot.lane.b32.xlu1 %v11703_v51, %s16500_s26  ;;  %2537 = vrot.lane.b32.xlu0 %v11709_v28, %s16501_s2  ;;  %v878_v13 = vadd.f32 %v877_v10, %v11699_v14 }
 0x1d1   :  { %2637 = vrot.lane.b32.xlu1 %v11709_v28, %s16500_s26  ;;  %3263 = vrot.lane.b32.xlu0 %v11703_v51, %s16516_s27 }
 0x1d5   :  { %1041 = vrot.lane.b32.xlu1 %v11703_v51, %s16512_s19  ;;  %1639 = vrot.lane.b32.xlu0 %v11756_v53, %s16517_s12 }
 0x1d9   :  { %2541 = vrot.lane.b32.xlu1 %v11703_v51, %s16501_s2  ;;  %1539 = vrot.lane.b32.xlu0 %v11756_v53, %s16518_s16 }
 0x1dd   :  { %2441 = vrot.lane.b32.xlu1 %v11703_v51, %s16513_s4  ;;  %1439 = vrot.lane.b32.xlu0 %v11756_v53, %s16515_s13 }
 0x1e1   :  { %2437 = vrot.lane.b32.xlu1 %v11709_v28, %s16513_s4  ;;  %1339 = vrot.lane.b32.xlu0 %v11756_v53, %s16516_s27 }
 0x1e5   :  { %2341 = vrot.lane.b32.xlu1 %v11703_v51, %s16510_s17  ;;  %2839 = vrot.lane.b32.xlu0 %v11756_v53, %s16502_s0 }
 0x1e9   :  { %2337 = vrot.lane.b32.xlu1 %v11709_v28, %s16510_s17  ;;  %1239 = vrot.lane.b32.xlu0 %v11756_v53, %s16505_s1 }
 0x1ed   :  { %2241 = vrot.lane.b32.xlu1 %v11703_v51, %s16511_s7  ;;  %2739 = vrot.lane.b32.xlu0 %v11756_v53, %s16503_s28 }
 0x1f1   :  { %2237 = vrot.lane.b32.xlu1 %v11709_v28, %s16511_s7  ;;  %1139 = vrot.lane.b32.xlu0 %v11756_v53, %s16514_s18 }
 0x1f5   :  { %3165 = vrot.lane.b32.xlu1 %v11791_v56, %s16505_s1  ;;  %2639 = vrot.lane.b32.xlu0 %v11756_v53, %s16500_s26 }
 0x1f9   :  { %3161 = vrot.lane.b32.xlu1 %v11756_v53, %s16505_s1  ;;  %1039 = vrot.lane.b32.xlu0 %v11756_v53, %s16512_s19 }
 0x1fd   :  { %3065 = vrot.lane.b32.xlu1 %v11791_v56, %s16514_s18  ;;  %2539 = vrot.lane.b32.xlu0 %v11756_v53, %s16501_s2 }
 0x201   :  { %3061 = vrot.lane.b32.xlu1 %v11756_v53, %s16514_s18  ;;  %2439 = vrot.lane.b32.xlu0 %v11756_v53, %s16513_s4 }
 0x205   :  { %2965 = vrot.lane.b32.xlu1 %v11791_v56, %s16512_s19  ;;  %1643 = vrot.lane.b32.xlu0 %v11791_v56, %s16517_s12 }
 0x209   :  { %2961 = vrot.lane.b32.xlu1 %v11756_v53, %s16512_s19  ;;  %2339 = vrot.lane.b32.xlu0 %v11756_v53, %s16510_s17 }
 0x20d   :  { %3265 = vrot.lane.b32.xlu1 %v11791_v56, %s16516_s27  ;;  %1543 = vrot.lane.b32.xlu0 %v11791_v56, %s16518_s16 }
 0x211   :  { %3261 = vrot.lane.b32.xlu1 %v11756_v53, %s16516_s27  ;;  %2239 = vrot.lane.b32.xlu0 %v11756_v53, %s16511_s7 }
 0x215   :  { %3171 = vrot.lane.b32.xlu1 %v11827_v63, %s16505_s1  ;;  %1645 = vrot.lane.b32.xlu0 %v11825_v62, %s16517_s12 }
 0x217   :  { %v11837_v0 = vpop.permute.xlu1 %1641  ;;  %v11839_v1 = vpop.permute.xlu0 %3163 }
 0x218   :  { %16527 = vst [vmem:[#allocation19_spill] sm:$0xff] %v11837_v0 }
 0x219   :  { %1649 = vrot.lane.b32.xlu1 %v11827_v63, %s16517_s12  ;;  %3071 = vrot.lane.b32.xlu0 %v11827_v63, %s16514_s18 }
 0x21b   :  { %v11845_v2 = vpop.permute.xlu1 %1541  ;;  %v11847_v3 = vpop.permute.xlu0 %1637 }
 0x21c   :  { %16528 = vst [vmem:[#allocation20_spill] sm:$0xff] %v11845_v2 }
 0x21d   :  { %1549 = vrot.lane.b32.xlu1 %v11827_v63, %s16518_s16  ;;  %1545 = vrot.lane.b32.xlu0 %v11825_v62, %s16518_s16 }
 0x21f   :  { %v11853_v4 = vpop.permute.xlu1 %1441  ;;  %v11855_v5 = vpop.permute.xlu0 %3063 }
 0x220   :  { %16529 = vst [vmem:[#allocation21_spill] sm:$0xff] %v11853_v4 }
 0x221   :  { %1449 = vrot.lane.b32.xlu1 %v11827_v63, %s16515_s13  ;;  %2971 = vrot.lane.b32.xlu0 %v11827_v63, %s16512_s19 }
 0x223   :  { %v11861_v6 = vpop.permute.xlu1 %1341  ;;  %v11863_v7 = vpop.permute.xlu0 %1537 }
 0x225   :  { %1345 = vrot.lane.b32.xlu1 %v11825_v62, %s16516_s27  ;;  %1445 = vrot.lane.b32.xlu0 %v11825_v62, %s16515_s13 }
 0x227   :  { %v11869_v8 = vpop.permute.xlu1 %2841  ;;  %v11871_v9 = vpop.permute.xlu0 %2963 }
 0x229   :  { %2849 = vrot.lane.b32.xlu1 %v11827_v63, %s16502_s0  ;;  %1349 = vrot.lane.b32.xlu0 %v11827_v63, %s16516_s27 }
 0x22b   :  { %v11877_v11 = vpop.permute.xlu1 %2837  ;;  %v11879_v12 = vpop.permute.xlu0 %1437 }
 0x22d   :  { %2845 = vrot.lane.b32.xlu1 %v11825_v62, %s16502_s0  ;;  %1245 = vrot.lane.b32.xlu0 %v11825_v62, %s16505_s1 }
 0x22f   :  { %v11885_v15 = vpop.permute.xlu1 %1241  ;;  %v11887_v16 = vpop.permute.xlu0 %1337 }
 0x231   :  { %1249 = vrot.lane.b32.xlu1 %v11827_v63, %s16505_s1  ;;  %1145 = vrot.lane.b32.xlu0 %v11825_v62, %s16514_s18 }
 0x233   :  { %v11893_v17 = vpop.permute.xlu1 %2741  ;;  %v11895_v18 = vpop.permute.xlu0 %1237 }
 0x234   :  { %16530 = vst [vmem:[#allocation22_spill] sm:$0xff] %v11893_v17 }
 0x235   :  { %2749 = vrot.lane.b32.xlu1 %v11827_v63, %s16503_s28  ;;  %1045 = vrot.lane.b32.xlu0 %v11825_v62, %s16512_s19 }
 0x237   :  { %v11902_v21 = vpop.permute.xlu1 %2737  ;;  %v11904_v22 = vpop.permute.xlu0 %1137 }
 0x238   :  { %16531 = vst [vmem:[#allocation23_spill] sm:$0xff] %v11902_v21  ;;  %16532 = vst [vmem:[#allocation24_spill] sm:$0xff] %v11904_v22 }
 0x239   :  { %2745 = vrot.lane.b32.xlu1 %v11825_v62, %s16503_s28  ;;  %2445 = vrot.lane.b32.xlu0 %v11825_v62, %s16513_s4 }
 0x23b   :  { %v11913_v26 = vpop.permute.xlu1 %1141  ;;  %v11915_v27 = vpop.permute.xlu0 %1037 }
 0x23c   :  { %16533 = vst [vmem:[#allocation25_spill] sm:$0xff] %v11913_v26  ;;  %16534 = vst [vmem:[#allocation26_spill] sm:$0xff] %v11915_v27 }
 0x23d   :  { %1149 = vrot.lane.b32.xlu1 %v11827_v63, %s16514_s18  ;;  %3173 = vrot.lane.b32.xlu0 %v11911_v25, %s16505_s1 }
 0x23f   :  { %v11923_v30 = vpop.permute.xlu1 %2641  ;;  %v11925_v31 = vpop.permute.xlu0 %2537 }
 0x240   :  { %16535 = vst [vmem:[#allocation27_spill] sm:$0xff] %v11923_v30  ;;  %16536 = vst [vmem:[#allocation28_spill] sm:$0xff] %v11925_v31 }
 0x241   :  { %2649 = vrot.lane.b32.xlu1 %v11827_v63, %s16500_s26  ;;  %1647 = vrot.lane.b32.xlu0 %v11921_v29, %s16517_s12 }
 0x243   :  { %v11931_v32 = vpop.permute.xlu1 %2637  ;;  %v11933_v33 = vpop.permute.xlu0 %3263 }
 0x244   :  { %16537 = vst [vmem:[#allocation29_spill] sm:$0xff] %v11931_v32  ;;  %16538 = vst [vmem:[#allocation30_spill] sm:$0xff] %v11933_v33 }
 0x245   :  { %2645 = vrot.lane.b32.xlu1 %v11825_v62, %s16500_s26  ;;  %1547 = vrot.lane.b32.xlu0 %v11921_v29, %s16518_s16 }
 0x247   :  { %v11939_v34 = vpop.permute.xlu1 %1041  ;;  %v11941_v35 = vpop.permute.xlu0 %1639 }
 0x248   :  { %16539 = vst [vmem:[#allocation31_spill] sm:$0xff] %v11939_v34 }
 0x249   :  { %1049 = vrot.lane.b32.xlu1 %v11827_v63, %s16512_s19  ;;  %1447 = vrot.lane.b32.xlu0 %v11921_v29, %s16515_s13 }
 0x24b   :  { %v11947_v36 = vpop.permute.xlu1 %2541  ;;  %v11949_v37 = vpop.permute.xlu0 %1539 }
 0x24c   :  { %16540 = vst [vmem:[#allocation32_spill] sm:$0xff] %v11947_v36 }
 0x24d   :  { %2549 = vrot.lane.b32.xlu1 %v11827_v63, %s16501_s2  ;;  %2847 = vrot.lane.b32.xlu0 %v11921_v29, %s16502_s0 }
 0x24f   :  { %v11955_v38 = vpop.permute.xlu1 %2441  ;;  %v11957_v39 = vpop.permute.xlu0 %1439 }
 0x250   :  { %16541 = vst [vmem:[#allocation33_spill] sm:$0xff] %v11955_v38 }
 0x251   :  { %2545 = vrot.lane.b32.xlu1 %v11825_v62, %s16501_s2  ;;  %1247 = vrot.lane.b32.xlu0 %v11921_v29, %s16505_s1 }
 0x253   :  { %v11963_v40 = vpop.permute.xlu1 %2437  ;;  %v11965_v41 = vpop.permute.xlu0 %1339 }
 0x254   :  { %16542 = vst [vmem:[#allocation34_spill] sm:$0xff] %v11963_v40 }
 0x255   :  { %3271 = vrot.lane.b32.xlu1 %v11827_v63, %s16516_s27  ;;  %2747 = vrot.lane.b32.xlu0 %v11921_v29, %s16503_s28 }
 0x257   :  { %v11971_v42 = vpop.permute.xlu1 %2341  ;;  %v11973_v43 = vpop.permute.xlu0 %2839 }
 0x258   :  { %16543 = vst [vmem:[#allocation35_spill] sm:$0xff] %v11971_v42 }
 0x259   :  { %2449 = vrot.lane.b32.xlu1 %v11827_v63, %s16513_s4  ;;  %1147 = vrot.lane.b32.xlu0 %v11921_v29, %s16514_s18 }
 0x25b   :  { %v11979_v44 = vpop.permute.xlu1 %2337  ;;  %v11981_v46 = vpop.permute.xlu0 %1239 }
 0x25c   :  { %16544 = vst [vmem:[#allocation36_spill] sm:$0xff] %v11979_v44  ;;  %v879_v44 = vpop.f32.mrf.mxu0 }
 0x25d   :  { %2349 = vrot.lane.b32.xlu1 %v11827_v63, %s16510_s17  ;;  %2647 = vrot.lane.b32.xlu0 %v11921_v29, %s16500_s26 }
 0x25e   :  { %v883_v38 = vpop.f32.mrf.mxu0 }
 0x25f   :  { %v11987_v47 = vpop.permute.xlu1 %2241  ;;  %v11989_v48 = vpop.permute.xlu0 %2739 }
 0x260   :  { %16545 = vst [vmem:[#allocation37_spill] sm:$0xff] %v11987_v47  ;;  %16546 = vst [vmem:[#allocation38_spill] sm:$0xff] %v11989_v48 }
 0x261   :  { %2345 = vrot.lane.b32.xlu1 %v11825_v62, %s16510_s17  ;;  %1047 = vrot.lane.b32.xlu0 %v11921_v29, %s16512_s19 }
 0x263   :  { %v11995_v49 = vpop.permute.xlu1 %2237  ;;  %v11997_v50 = vpop.permute.xlu0 %1139 }
 0x264   :  { %16547 = vst [vmem:[#allocation39_spill] sm:$0xff] %v11995_v49  ;;  %16548 = vst [vmem:[#allocation40_spill] sm:$0xff] %v11997_v50 }
 0x265   :  { %2249 = vrot.lane.b32.xlu1 %v11827_v63, %s16511_s7  ;;  %2547 = vrot.lane.b32.xlu0 %v11921_v29, %s16501_s2 }
 0x267   :  { %v12003_v45 = vpop.permute.xlu1 %3165  ;;  %v12005_v52 = vpop.permute.xlu0 %2639 }
 0x268   :  { %16549 = vst [vmem:[#allocation41_spill] sm:$0xff] %v12005_v52 }
 0x269   :  { %2245 = vrot.lane.b32.xlu1 %v11825_v62, %s16511_s7  ;;  %3273 = vrot.lane.b32.xlu0 %v11911_v25, %s16516_s27 }
 0x26b   :  { %v12011_v54 = vpop.permute.xlu1 %3161  ;;  %v12013_v55 = vpop.permute.xlu0 %1039 }
 0x26c   :  { %16550 = vst [vmem:[#allocation42_spill] sm:$0xff] %v12013_v55 }
 0x26d   :  { %3169 = vrot.lane.b32.xlu1 %v11921_v29, %s16505_s1  ;;  %2447 = vrot.lane.b32.xlu0 %v11921_v29, %s16513_s4 }
 0x26f   :  { %v12019_v58 = vpop.permute.xlu1 %3065  ;;  %v12021_v59 = vpop.permute.xlu0 %2539 }
 0x270   :  { %16551 = vst [vmem:[#allocation43_spill] sm:$0xff] %v12021_v59 }
 0x271   :  { %3073 = vrot.lane.b32.xlu1 %v11911_v25, %s16514_s18  ;;  %1651 = vrot.lane.b32.xlu0 %v11911_v25, %s16517_s12 }
 0x273   :  { %v12027_v60 = vpop.permute.xlu1 %3061  ;;  %v12029_v61 = vpop.permute.xlu0 %2439 }
 0x274   :  { %16552 = vst [vmem:[#allocation44_spill] sm:$0xff] %v12029_v61 }
 0x275   :  { %3069 = vrot.lane.b32.xlu1 %v11921_v29, %s16514_s18  ;;  %2347 = vrot.lane.b32.xlu0 %v11921_v29, %s16510_s17 }
 0x277   :  { %v12035_v19 = vpop.permute.xlu1 %2965  ;;  %v12037_v20 = vpop.permute.xlu0 %1643 }
 0x278   :  { %16553 = vst [vmem:[#allocation45_spill] sm:$0xff] %v12037_v20  ;;  %v12060_v20 = vmax.f32 %v878_v13, 0.0  ;;  %v884_v13 = vadd.f32 %v883_v38, %v11817_v57  ;;  %v3348_v38 = vld [vmem:[%s16561_s20 + $0x18] sm:$0xff] }
 0x279   :  { %2973 = vrot.lane.b32.xlu1 %v11911_v25, %s16512_s19  ;;  %1551 = vrot.lane.b32.xlu0 %v11911_v25, %s16518_s16 }
 0x27a   :  { %10827 = vmatprep.mubr.msk.f32.mxu1 %vm3685_vm0, %v3348_v38 }
 0x27b   :  { %v12043_v23 = vpop.permute.xlu1 %2961  ;;  %v12045_v24 = vpop.permute.xlu0 %2339 }
 0x27c   :  { %16554 = vst [vmem:[#allocation46_spill] sm:$0xff] %v12045_v24  ;;  %v880_v24 = vadd.f32 %v879_v44, %v11699_v14  ;;  %v885_v14 = vpop.f32.mrf.mxu0 }
 0x27d   :  { %2969 = vrot.lane.b32.xlu1 %v11921_v29, %s16512_s19  ;;  %2247 = vrot.lane.b32.xlu0 %v11921_v29, %s16511_s7 }
 0x27e   :  { %v12071_v10 = vmax.f32 %v880_v24, 0.0  ;;  %v12088_v24 = vmax.f32 %v884_v13, 0.0 }
 0x27f   :  { %v12052_v49 = vpop.permute.xlu1 %3265  ;;  %v12054_v47 = vpop.permute.xlu0 %1543 }
 0x280   :  { %16555 = vst [vmem:[#allocation47_spill] sm:$0xff] %v12052_v49  ;;  %16556 = vst [vmem:[#allocation48_spill] sm:$0xff] %v12054_v47 }
 0x281   :  { %1347 = vrot.lane.b32.xlu1 %v11921_v29, %s16516_s27  ;;  %1451 = vrot.lane.b32.xlu0 %v11911_v25, %s16515_s13 }
 0x283   :  { %v12063_v42 = vpop.permute.xlu1 %3261  ;;  %v12065_v40 = vpop.permute.xlu0 %2239 }
 0x284   :  { %16557 = vst [vmem:[#allocation49_spill] sm:$0xff] %v12063_v42  ;;  %16558 = vst [vmem:[#allocation50_spill] sm:$0xff] %v12065_v40  ;;  %v886_v42 = vadd.f32 %v885_v14, %v11817_v57 }
 0x285   :  { %3269 = vrot.lane.b32.xlu1 %v11921_v29, %s16516_s27  ;;  %1687 = vrot.lane.b32.xlu0 %v12060_v20, %s16517_s12 }
 0x286   :  { %v12101_v13 = vmax.f32 %v886_v42, 0.0 }
 0x287   :  { %v12073_v47 = vpop.permute.xlu1 %3171  ;;  %v1646_v61 = vpop.permute.xlu0 %1645 }
 0x289   :  { %1689 = vrot.lane.b32.xlu1 %v12071_v10, %s16517_s12  ;;  %1587 = vrot.lane.b32.xlu0 %v12060_v20, %s16518_s16 }
 0x28b   :  { %v12080_v44 = vpop.permute.xlu1 %1649  ;;  %v12082_v40 = vpop.permute.xlu0 %3071 }
 0x28c   :  { %16559 = vst [vmem:[#allocation51_spill] sm:$0xff] %v12080_v44 }
 0x28d   :  { %1589 = vrot.lane.b32.xlu1 %v12071_v10, %s16518_s16  ;;  %1487 = vrot.lane.b32.xlu0 %v12060_v20, %s16515_s13 }
 0x28f   :  { %v12091_v33 = vpop.permute.xlu1 %1549  ;;  %v1546_v49 = vpop.permute.xlu0 %1545 }
 0x290   :  { %16560 = vst [vmem:[#allocation52_spill] sm:$0xff] %v12091_v33 }
 0x291   :  { %1489 = vrot.lane.b32.xlu1 %v12071_v10, %s16515_s13  ;;  %1695 = vrot.lane.b32.xlu0 %v12088_v24, %s16517_s12 }
 0x293   :  { %v12103_v31 = vpop.permute.xlu1 %1449  ;;  %v12105_v14 = vpop.permute.xlu0 %2971 }
 0x294   :  { %16562 = vst [vmem:[#allocation53_spill] sm:$0xff] %v12103_v31 }
 0x295   :  { %1697 = vrot.lane.b32.xlu1 %v12101_v13, %s16517_s12  ;;  %1595 = vrot.lane.b32.xlu0 %v12088_v24, %s16518_s16 }
 0x297   :  { %v12111_v57 = vpop.permute.xlu1 %1345  ;;  %v1446_v59 = vpop.permute.xlu0 %1445 }
 0x299   :  { %1597 = vrot.lane.b32.xlu1 %v12101_v13, %s16518_s16  ;;  %1495 = vrot.lane.b32.xlu0 %v12088_v24, %s16515_s13 }
 0x29b   :  { %v12117_v42 = vpop.permute.xlu1 %2849  ;;  %v12119_v38 = vpop.permute.xlu0 %1349 }
 0x29d   :  { %1497 = vrot.lane.b32.xlu1 %v12101_v13, %s16515_s13  ;;  %2147 = vrot.lane.b32.xlu0 %v11921_v29, %s16508_s21 }
 0x29f   :  { %v12125_v36 = vpop.permute.xlu1 %2845  ;;  %v12127_v27 = vpop.permute.xlu0 %1245 }
 0x2a1   :  { %2149 = vrot.lane.b32.xlu1 %v11827_v63, %s16508_s21  ;;  %1443 = vrot.lane.b32.xlu0 %v11791_v56, %s16515_s13 }
 0x2a3   :  { %v12133_v32 = vpop.permute.xlu1 %1249  ;;  %v12135_v55 = vpop.permute.xlu0 %1145 }
 0x2a5   :  { %2145 = vrot.lane.b32.xlu1 %v11825_v62, %s16508_s21  ;;  %1395 = vrot.lane.b32.xlu0 %v12088_v24, %s16516_s27 }
 0x2a7   :  { %v12141_v34 = vpop.permute.xlu1 %2749  ;;  %v12143_v52 = vpop.permute.xlu0 %1045 }
 0x2a8   :  { %16563 = vst [vmem:[#allocation54_spill] sm:$0xff] %v12143_v52 }
 0x2a9   :  { %1397 = vrot.lane.b32.xlu1 %v12101_v13, %s16516_s27  ;;  %2139 = vrot.lane.b32.xlu0 %v11756_v53, %s16508_s21 }
 0x2ab   :  { %v12149_v30 = vpop.permute.xlu1 %2745  ;;  %v12151_v22 = vpop.permute.xlu0 %2445 }
 0x2ac   :  { %16564 = vst [vmem:[#allocation55_spill] sm:$0xff] %v12151_v22 }
 0x2ad   :  { %2141 = vrot.lane.b32.xlu1 %v11703_v51, %s16508_s21  ;;  %1351 = vrot.lane.b32.xlu0 %v11911_v25, %s16516_s27 }
 0x2af   :  { %v12157_v21 = vpop.permute.xlu1 %1149  ;;  %v12159_v50 = vpop.permute.xlu0 %3173 }
 0x2b0   :  { %16565 = vst [vmem:[#allocation56_spill] sm:$0xff] %v12159_v50  ;;  %v3181_v52 = vsel %vm165_vm8, %v12073_v47, %v12159_v50 }
 0x2b1   :  { %2137 = vrot.lane.b32.xlu1 %v11709_v28, %s16508_s21  ;;  %1387 = vrot.lane.b32.xlu0 %v12060_v20, %s16516_s27 }
 0x2b2   :  { %3787 = vmatprep.subr.mxu1 %v3181_v52  ;;  %v1654_v52 = vsel %vm249_vm13, %v11941_v35, %v11837_v0  ;;  %v3177_v0 = vsel %vm165_vm8, %v12011_v54, %v11839_v1 }
 0x2b3   :  { %v12168_v22 = vpop.permute.xlu1 %2649  ;;  %v1648_v26 = vpop.permute.xlu0 %1647 }
 0x2b4   :  { %16566 = vst [vmem:[#allocation57_spill] sm:$0xff] %v12168_v22  ;;  %v1657_v48 = vsel %vm249_vm13, %v1648_v26, %v12080_v44  ;;  %v1656_v17 = vsel %vm249_vm13, %v1646_v61, %v1648_v26  ;;  %v1653_v26 = vsel %vm249_vm13, %v11847_v3, %v11941_v35  ;;  %v1554_v3 = vsel %vm16469_vm14, %v11949_v37, %v11845_v2 }
 0x2b5   :  { %1389 = vrot.lane.b32.xlu1 %v12071_v10, %s16516_s27  ;;  %2047 = vrot.lane.b32.xlu0 %v11921_v29, %s16509_s22 }
 0x2b6   :  { %3698 = vmatprep.subr.mxu0 %v1657_v48 }
 0x2b7   :  { %3699 = vmatpush1.msra.mxu0 %v1656_v17  ;;  %v12177_v50 = vpop.permute.xlu1 %2645  ;;  %v1548_v22 = vpop.permute.xlu0 %1547 }
 0x2b8   :  { %3700 = vmatprep.subr.mxu0 %v1654_v52  ;;  %v1557_v61 = vsel %vm16469_vm14, %v1548_v22, %v12091_v33  ;;  %v1556_v44 = vsel %vm16469_vm14, %v1546_v49, %v1548_v22  ;;  %v1553_v22 = vsel %vm16469_vm14, %v11863_v7, %v11949_v37  ;;  %v1454_v7 = vsel %vm16468_vm15, %v11957_v39, %v11853_v4 }
 0x2b9   :  { %3701 = vmatpush1.msra.mxu0 %v1653_v26  ;;  %2049 = vrot.lane.b32.xlu1 %v11827_v63, %s16509_s22 }
 0x2ba   :  { %1343 = vrot.lane.b32.xlu0 %v11791_v56, %s16516_s27  ;;  %3702 = vmatprep.subr.mxu0 %v1557_v61 }
 0x2bb   :  { %3703 = vmatpush1.msra.mxu0 %v1556_v44  ;;  %v12192_v17 = vpop.permute.xlu1 %1049  ;;  %v1448_v35 = vpop.permute.xlu0 %1447 }
 0x2bc   :  { %3704 = vmatprep.subr.mxu0 %v1554_v3  ;;  %v1457_v48 = vsel %vm16468_vm15, %v1448_v35, %v12103_v31  ;;  %v1456_v49 = vsel %vm16468_vm15, %v1446_v59, %v1448_v35  ;;  %v1453_v59 = vsel %vm16468_vm15, %v11879_v12, %v11957_v39 }
 0x2bd   :  { %3705 = vmatpush1.msra.mxu0 %v1553_v22  ;;  %2045 = vrot.lane.b32.xlu1 %v11825_v62, %s16509_s22 }
 0x2be   :  { %1295 = vrot.lane.b32.xlu0 %v12088_v24, %s16505_s1  ;;  %3706 = vmatprep.subr.mxu0 %v1457_v48 }
 0x2bf   :  { %3707 = vmatpush1.msra.mxu0 %v1456_v49  ;;  %v12207_v44 = vpop.permute.xlu1 %2549  ;;  %v12212_v37 = vpop.permute.xlu0 %2847 }
 0x2c0   :  { %3708 = vmatprep.subr.mxu0 %v1454_v7 }
 0x2c1   :  { %3709 = vmatpush1.msra.mxu0 %v1453_v59  ;;  %1297 = vrot.lane.b32.xlu1 %v12101_v13, %s16505_s1 }
 0x2c2   :  { %2039 = vrot.lane.b32.xlu0 %v11756_v53, %s16509_s22 }
 0x2c3   :  { %v12221_v52 = vpop.permute.xlu1 %2545  ;;  %v12223_v26 = vpop.permute.xlu0 %1247 }
 0x2c5   :  { %2041 = vrot.lane.b32.xlu1 %v11703_v51, %s16509_s22 }
 0x2c6   :  { %1251 = vrot.lane.b32.xlu0 %v11911_v25, %s16505_s1 }
 0x2c7   :  { %v12229_v61 = vpop.permute.xlu1 %3271  ;;  %v12231_v12 = vpop.permute.xlu0 %2747 }
 0x2c9   :  { %2037 = vrot.lane.b32.xlu1 %v11709_v28, %s16509_s22 }
 0x2ca   :  { %1287 = vrot.lane.b32.xlu0 %v12060_v20, %s16505_s1 }
 0x2cb   :  { %v12237_v39 = vpop.permute.xlu1 %2449  ;;  %v12239_v3 = vpop.permute.xlu0 %1147 }
 0x2cd   :  { %1289 = vrot.lane.b32.xlu1 %v12071_v10, %s16505_s1 }
 0x2ce   :  { %1947 = vrot.lane.b32.xlu0 %v11921_v29, %s16506_s5 }
 0x2cf   :  { %v12245_v35 = vpop.permute.xlu1 %2349  ;;  %v12247_v22 = vpop.permute.xlu0 %2647 }
 0x2d1   :  { %1949 = vrot.lane.b32.xlu1 %v11827_v63, %s16506_s5 }
 0x2d2   :  { %1243 = vrot.lane.b32.xlu0 %v11791_v56, %s16505_s1 }
 0x2d3   :  { %v12253_v48 = vpop.permute.xlu1 %2345  ;;  %v12255_v49 = vpop.permute.xlu0 %1047 }
 0x2d4   :  { %16567 = vst [vmem:[#allocation58_spill] sm:$0xff] %v12253_v48 }
 0x2d5   :  { %1945 = vrot.lane.b32.xlu1 %v11825_v62, %s16506_s5 }
 0x2d6   :  { %1195 = vrot.lane.b32.xlu0 %v12088_v24, %s16514_s18 }
 0x2d7   :  { %v12261_v7 = vpop.permute.xlu1 %2249  ;;  %v12263_v59 = vpop.permute.xlu0 %2547 }
 0x2d8   :  { %16568 = vst [vmem:[#allocation59_spill] sm:$0xff] %v12261_v7 }
 0x2d9   :  { %1197 = vrot.lane.b32.xlu1 %v12101_v13, %s16514_s18 }
 0x2da   :  { %1939 = vrot.lane.b32.xlu0 %v11756_v53, %s16506_s5 }
 0x2db   :  { %v12269_v4 = vpop.permute.xlu1 %2245  ;;  %v12271_v31 = vpop.permute.xlu0 %3273 }
 0x2dc   :  { %16569 = vst [vmem:[#allocation60_spill] sm:$0xff] %v12269_v4  ;;  %16570 = vst [vmem:[#allocation61_spill] sm:$0xff] %v12271_v31  ;;  %v3178_v4 = vsel %vm165_vm8, %v11839_v1, %v12003_v45 }
 0x2dd   :  { %1941 = vrot.lane.b32.xlu1 %v11703_v51, %s16506_s5 }
 0x2de   :  { %1151 = vrot.lane.b32.xlu0 %v11911_v25, %s16514_s18 }
 0x2df   :  { %v3170_v2 = vpop.permute.xlu1 %3169  ;;  %v12277_v33 = vpop.permute.xlu0 %2447 }
 0x2e0   :  { %v3180_v7 = vsel %vm165_vm8, %v3170_v2, %v12073_v47 }
 0x2e1   :  { %1937 = vrot.lane.b32.xlu1 %v11709_v28, %s16506_s5  ;;  %3788 = vmatpush1.msra.mxu1 %v3180_v7  ;;  %v3077_v7 = vsel %vm144_vm7, %v12027_v60, %v11855_v5 }
 0x2e2   :  { %1187 = vrot.lane.b32.xlu0 %v12060_v20, %s16514_s18  ;;  %3789 = vmatprep.subr.mxu1 %v3178_v4 }
 0x2e3   :  { %v12291_v48 = vpop.permute.xlu1 %3073  ;;  %3790 = vmatpush1.msra.mxu1 %v3177_v0  ;;  %v12293_v2 = vpop.permute.xlu0 %1651  ;;  %v3078_v0 = vsel %vm144_vm7, %v11855_v5, %v12019_v58 }
 0x2e4   :  { %v3081_v47 = vsel %vm144_vm7, %v12082_v40, %v12291_v48 }
 0x2e5   :  { %1189 = vrot.lane.b32.xlu1 %v12071_v10, %s16514_s18  ;;  %3791 = vmatprep.subr.mxu1 %v3081_v47 }
 0x2e6   :  { %1847 = vrot.lane.b32.xlu0 %v11921_v29, %s16507_s25 }
 0x2e7   :  { %v3070_v1 = vpop.permute.xlu1 %3069  ;;  %v12302_v54 = vpop.permute.xlu0 %2347 }
 0x2e8   :  { %v3080_v4 = vsel %vm144_vm7, %v3070_v1, %v12082_v40 }
 0x2e9   :  { %1849 = vrot.lane.b32.xlu1 %v11827_v63, %s16507_s25  ;;  %3792 = vmatpush1.msra.mxu1 %v3080_v4 }
 0x2ea   :  { %1143 = vrot.lane.b32.xlu0 %v11791_v56, %s16514_s18  ;;  %3793 = vmatprep.subr.mxu1 %v3078_v0  ;;  %v2978_v0 = vsel %vm123_vm6, %v11871_v9, %v12035_v19 }
 0x2eb   :  { %v12316_v47 = vpop.permute.xlu1 %2973  ;;  %3794 = vmatpush1.msra.mxu1 %v3077_v7  ;;  %v12318_v40 = vpop.permute.xlu0 %1551  ;;  %v2977_v7 = vsel %vm123_vm6, %v12043_v23, %v11871_v9  ;;  %v1354_v23 = vsel %vm186_vm2, %v11965_v41, %v11861_v6 }
 0x2ec   :  { %16571 = vst [vmem:[#allocation62_spill] sm:$0xff] %v12316_v47  ;;  %v2981_v1 = vsel %vm123_vm6, %v12105_v14, %v12316_v47 }
 0x2ed   :  { %1845 = vrot.lane.b32.xlu1 %v11825_v62, %s16507_s25  ;;  %3795 = vmatprep.subr.mxu1 %v2981_v1 }
 0x2ee   :  { %1095 = vrot.lane.b32.xlu0 %v12088_v24, %s16512_s19 }
 0x2ef   :  { %v2970_v5 = vpop.permute.xlu1 %2969  ;;  %v12327_v60 = vpop.permute.xlu0 %2247 }
 0x2f0   :  { %v2980_v4 = vsel %vm123_vm6, %v2970_v5, %v12105_v14 }
 0x2f1   :  { %1097 = vrot.lane.b32.xlu1 %v12101_v13, %s16512_s19  ;;  %3796 = vmatpush1.msra.mxu1 %v2980_v4 }
 0x2f2   :  { %1839 = vrot.lane.b32.xlu0 %v11756_v53, %s16507_s25  ;;  %3797 = vmatprep.subr.mxu1 %v2978_v0  ;;  %v2857_v0 = vsel %vm501_vm5, %v12212_v37, %v12117_v42 }
 0x2f3   :  { %v1348_v1 = vpop.permute.xlu1 %1347  ;;  %3798 = vmatpush1.msra.mxu1 %v2977_v7  ;;  %v12341_v47 = vpop.permute.xlu0 %1451  ;;  %v1257_v7 = vsel %vm165_vm8, %v12223_v26, %v12133_v32 }
 0x2f4   :  { %3799 = vmatprep.subr.mxu1 %v11827_v63  ;;  %v1357_v14 = vsel %vm186_vm2, %v1348_v1, %v12119_v38  ;;  %v1356_v5 = vsel %vm186_vm2, %v12111_v57, %v1348_v1  ;;  %v1353_v57 = vsel %vm186_vm2, %v11887_v16, %v11965_v41  ;;  %v2856_v16 = vsel %vm501_vm5, %v12125_v36, %v12212_v37 }
 0x2f5   :  { %1841 = vrot.lane.b32.xlu1 %v11703_v51, %s16507_s25  ;;  %3710 = vmatprep.subr.mxu0 %v1357_v14  ;;  %v1256_v41 = vsel %vm165_vm8, %v12127_v27, %v12223_v26  ;;  %v2854_v1 = vsel %vm501_vm5, %v11973_v43, %v11869_v8  ;;  %v1254_v36 = vsel %vm165_vm8, %v11981_v46, %v11885_v15 }
 0x2f6   :  { %1051 = vrot.lane.b32.xlu0 %v11911_v25, %s16512_s19  ;;  %3800 = vmatpush1.msra.mxu1 %v11921_v29  ;;  %v2853_v37 = vsel %vm501_vm5, %v11877_v11, %v11973_v43  ;;  %v1253_v27 = vsel %vm165_vm8, %v11895_v18, %v11981_v46  ;;  %v2757_v26 = vsel %vm480_vm3, %v12231_v12, %v12141_v34 }
 0x2f7   :  { %3711 = vmatpush1.msra.mxu0 %v1356_v5  ;;  %3801 = vmatprep.subr.mxu1 %v11703_v51  ;;  %v12354_v9 = vpop.permute.xlu1 %3269  ;;  %v12359_v4 = vpop.permute.xlu0 %1687  ;;  %v1157_v11 = vsel %vm144_vm7, %v12239_v3, %v12157_v21  ;;  %v2756_v18 = vsel %vm480_vm3, %v12149_v30, %v12231_v12  ;;  %v16576_v12 = vld [vmem:[#allocation23_spill] sm:$0xff] }
 0x2f8   :  { %3712 = vmatprep.subr.mxu0 %v1354_v23  ;;  %3802 = vmatpush1.msra.mxu1 %v11756_v53  ;;  %v1156_v23 = vsel %vm144_vm7, %v12135_v55, %v12239_v3  ;;  %v16578_v3 = vld [vmem:[#allocation57_spill] sm:$0xff] }
 0x2f9   :  { %3713 = vmatpush1.msra.mxu0 %v1353_v57  ;;  %3803 = vmatprep.subr.mxu1 %v2857_v0  ;;  %v16572_v57 = vld [vmem:[#allocation22_spill] sm:$0xff] }
 0x2fa   :  { %1837 = vrot.lane.b32.xlu1 %v11709_v28, %s16507_s25  ;;  %1087 = vrot.lane.b32.xlu0 %v12060_v20, %s16512_s19  ;;  %v16573_v0 = vld [vmem:[#allocation38_spill] sm:$0xff] }
 0x2fb   :  { %3714 = vmatprep.subr.mxu0 %v1257_v7  ;;  %3804 = vmatpush1.msra.mxu1 %v2856_v16  ;;  %v12384_v14 = vpop.permute.xlu1 %1689  ;;  %v12386_v5 = vpop.permute.xlu0 %1587  ;;  %v2754_v7 = vsel %vm480_vm3, %v16573_v0, %v16572_v57  ;;  %v16574_v16 = vld [vmem:[#allocation25_spill] sm:$0xff] }
 0x2fc   :  { %3715 = vmatpush1.msra.mxu0 %v1256_v41  ;;  %3805 = vmatprep.subr.mxu1 %v2854_v1  ;;  %v16575_v41 = vld [vmem:[#allocation40_spill] sm:$0xff]  ;;  %v2753_v1 = vsel %vm480_vm3, %v16576_v12, %v16573_v0  ;;  %v12450_v12 = vpop.f32.mrf.mxu1 }
 0x2fd   :  { %3716 = vmatprep.subr.mxu0 %v1254_v36  ;;  %3806 = vmatpush1.msra.mxu1 %v2853_v37  ;;  %v1154_v30 = vsel %vm144_vm7, %v16575_v41, %v16574_v16  ;;  %v16577_v36 = vld [vmem:[#allocation24_spill] sm:$0xff]  ;;  %v2657_v37 = vsel %vm16453_vm1, %v12247_v22, %v16578_v3 }
 0x2fe   :  { %3717 = vmatpush1.msra.mxu0 %v1253_v27  ;;  %3807 = vmatprep.subr.mxu1 %v2757_v26  ;;  %v1153_v55 = vsel %vm144_vm7, %v16577_v36, %v16575_v41  ;;  %v16581_v41 = vld [vmem:[#allocation41_spill] sm:$0xff]  ;;  %v16583_v36 = vld [vmem:[#allocation42_spill] sm:$0xff] }
 0x2ff   :  { %1089 = vrot.lane.b32.xlu1 %v12071_v10, %s16512_s19  ;;  %1747 = vrot.lane.b32.xlu0 %v11921_v29, %s16504_s23  ;;  %v12410_v43 = vpop.permute.xlu1 %1589  ;;  %v12412_v46 = vpop.permute.xlu0 %1487 }
 0x300   :  { %3718 = vmatprep.subr.mxu0 %v1157_v11  ;;  %3808 = vmatpush1.msra.mxu1 %v2756_v18  ;;  %v1057_v11 = vsel %vm123_vm6, %v12255_v49, %v12192_v17  ;;  %v2656_v18 = vsel %vm16453_vm1, %v12177_v50, %v12247_v22  ;;  %v16584_v50 = vld [vmem:[#allocation29_spill] sm:$0xff] }
 0x301   :  { %3719 = vmatpush1.msra.mxu0 %v1156_v23  ;;  %3809 = vmatprep.subr.mxu1 %v2754_v7  ;;  %v16579_v23 = vld [vmem:[#allocation54_spill] sm:$0xff]  ;;  %v16580_v7 = vld [vmem:[#allocation27_spill] sm:$0xff]  ;;  %v2653_v22 = vsel %vm16453_vm1, %v16584_v50, %v16581_v41  ;;  %v16592_v50 = vld [vmem:[#allocation28_spill] sm:$0xff] }
 0x302   :  { %3720 = vmatprep.subr.mxu0 %v1154_v30  ;;  %3810 = vmatpush1.msra.mxu1 %v2753_v1  ;;  %v1056_v0 = vsel %vm123_vm6, %v16579_v23, %v12255_v49  ;;  %v2654_v30 = vsel %vm16453_vm1, %v16581_v41, %v16580_v7  ;;  %v16582_v1 = vld [vmem:[#allocation31_spill] sm:$0xff]  ;;  %v16585_v49 = vld [vmem:[#allocation26_spill] sm:$0xff]  ;;  %v12475_v41 = vpop.f32.mrf.mxu1  ;;  %vm16593_vm1 = vmmov %vm16588_vm4 }
 0x303   :  { %3721 = vmatpush1.msra.mxu0 %v1153_v55  ;;  %3811 = vmatprep.subr.mxu1 %v2657_v37  ;;  %v12432_v27 = vpop.permute.xlu1 %1489  ;;  %v1696_v26 = vpop.permute.xlu0 %1695  ;;  %v1054_v55 = vsel %vm123_vm6, %v16583_v36, %v16582_v1  ;;  %v1053_v37 = vsel %vm123_vm6, %v16585_v49, %v16583_v36  ;;  %v16590_v36 = vld [vmem:[#allocation43_spill] sm:$0xff] }
 0x304   :  { %1749 = vrot.lane.b32.xlu1 %v11827_v63, %s16504_s23  ;;  %1043 = vrot.lane.b32.xlu0 %v11791_v56, %s16512_s19 }
 0x305   :  { %3722 = vmatprep.subr.mxu0 %v1057_v11  ;;  %3812 = vmatpush1.msra.mxu1 %v2656_v18  ;;  %v2557_v11 = vsel %vm16586_vm9, %v12263_v59, %v12207_v44  ;;  %vm16591_vm9 = vmmov %vm16588_vm4 }
 0x306   :  { %3723 = vmatpush1.msra.mxu0 %v1056_v0  ;;  %3813 = vmatprep.subr.mxu1 %v2654_v30  ;;  %v2556_v0 = vsel %vm16588_vm4, %v12221_v52, %v12263_v59  ;;  %v16589_v30 = vld [vmem:[#allocation32_spill] sm:$0xff]  ;;  %v960_v52 = vpop.f32.mrf.mxu1  ;;  %v16594_v59 = vld [vmem:[#allocation18_spill] sm:$0xff] }
 0x307   :  { %3724 = vmatprep.subr.mxu0 %v1054_v55  ;;  %3814 = vmatpush1.msra.mxu1 %v2653_v22  ;;  %v12464_v18 = vpop.permute.xlu1 %1697  ;;  %v12466_v23 = vpop.permute.xlu0 %1595  ;;  %v2554_v55 = vsel %vm16591_vm9, %v16590_v36, %v16589_v30  ;;  %v2553_v22 = vsel %vm16593_vm1, %v16592_v50, %v16590_v36  ;;  %v16597_v50 = vld [vmem:[#allocation30_spill] sm:$0xff]  ;;  %vm16602_vm1 = vcmask 490496   ;;  %v16610_v30 = vld [vmem:[#allocation19_spill] sm:$0xff] }
 0x308   :  { %16587 = vst [vmem:[#allocation22_spill] sm:$0xff] %v12464_v18  ;;  %3725 = vmatpush1.msra.mxu0 %v1053_v37  ;;  %3815 = vmatprep.subr.mxu1 %v2557_v11  ;;  %v961_v11 = vadd.f32 %v960_v52, %v16594_v59  ;;  %v16598_v52 = vld [vmem:[#allocation49_spill] sm:$0xff]  ;;  %vm16605_vm4 = vmmov %vm16602_vm1 }
 0x309   :  { %1745 = vrot.lane.b32.xlu1 %v11825_v62, %s16504_s23  ;;  %1739 = vrot.lane.b32.xlu0 %v11756_v53, %s16504_s23  ;;  %vm16608_vm9 = vmmov %vm16602_vm1 }
 0x30a   :  { %3726 = vmatprep.subr.mxu0 %v11921_v29  ;;  %3816 = vmatpush1.msra.mxu1 %v2556_v0  ;;  %v3281_v29 = vsel %vm186_vm2, %v12229_v61, %v12271_v31  ;;  %v16595_v0 = vld [vmem:[#allocation55_spill] sm:$0xff]  ;;  %v12519_v31 = vmax.f32 %v961_v11, 0.0  ;;  %v2357_v11 = vsel %vm16602_vm1, %v12302_v54, %v12245_v35 }
 0x30b   :  { %3727 = vmatpush1.msra.mxu0 %v11825_v62  ;;  %3817 = vmatprep.subr.mxu1 %v2554_v55  ;;  %v12485_v49 = vpop.permute.xlu1 %1597  ;;  %v12487_v37 = vpop.permute.xlu0 %1495  ;;  %v3280_v62 = vsel %vm186_vm2, %v12354_v9, %v12229_v61  ;;  %v2456_v36 = vsel %vm417_vm12, %v16595_v0, %v12277_v33  ;;  %v16596_v55 = vld [vmem:[#allocation47_spill] sm:$0xff] }
 0x30c   :  { %3728 = vmatprep.subr.mxu0 %v11756_v53  ;;  %3818 = vmatpush1.msra.mxu1 %v2553_v22  ;;  %v2457_v53 = vsel %vm417_vm12, %v12277_v33, %v12237_v39  ;;  %v3278_v61 = vsel %vm186_vm2, %v16597_v50, %v16596_v55  ;;  %v16601_v33 = vld [vmem:[#allocation34_spill] sm:$0xff]  ;;  %v1706_v55 = vsel %vm249_vm13, %v1696_v26, %v12464_v18  ;;  %v16603_v26 = vld [vmem:[#allocation51_spill] sm:$0xff]  ;;  %v16609_v18 = vld [vmem:[#allocation45_spill] sm:$0xff] }
 0x30d   :  { %3729 = vmatpush1.msra.mxu0 %v11709_v28  ;;  %3847 = vmatprep.subr.mxu1 %v3281_v29  ;;  %v16599_v29 = vld [vmem:[#allocation33_spill] sm:$0xff] }
 0x30e   :  { %1741 = vrot.lane.b32.xlu1 %v11703_v51, %s16504_s23  ;;  %1737 = vrot.lane.b32.xlu0 %v11709_v28, %s16504_s23  ;;  %v3277_v28 = vsel %vm186_vm2, %v16598_v52, %v16597_v50  ;;  %v1658_v52 = vsel %vm249_vm13, %v16603_v26, %v12293_v2  ;;  %v1655_v2 = vsel %vm249_vm13, %v16610_v30, %v16609_v18  ;;  %v16614_v30 = vld [vmem:[#allocation52_spill] sm:$0xff] }
 0x30f   :  { %3730 = vmatprep.subr.mxu0 %v2457_v53  ;;  %3848 = vmatpush2.msra.mxu1 %v3280_v62  ;;  %v12511_v9 = vpop.permute.xlu1 %1497  ;;  %v2148_v22 = vpop.permute.xlu0 %2147  ;;  %v16600_v53 = vld [vmem:[#allocation44_spill] sm:$0xff] }
 0x310   :  { %3731 = vmatpush2.msra.mxu0 %v2456_v36  ;;  %3849 = vmatprep.subr.mxu1 %v3278_v61  ;;  %v2454_v62 = vsel %vm417_vm12, %v16600_v53, %v16599_v29  ;;  %v2453_v0 = vsel %vm417_vm12, %v16601_v33, %v16600_v53  ;;  %v3347_v36 = vld [vmem:[%s16561_s20 + $0x10] sm:$0xff]  ;;  %v1703_v53 = vsel %vm249_vm13, %v12359_v4, %v12384_v14  ;;  %v16607_v33 = vld [vmem:[#allocation46_spill] sm:$0xff] }
 0x311   :  { %3732 = vmatprep.subr.mxu0 %v2454_v62  ;;  %3850 = vmatpush2.msra.mxu1 %v3277_v28  ;;  %v16606_v62 = vld [vmem:[#allocation35_spill] sm:$0xff]  ;;  %v1606_v4 = vsel %vm16469_vm14, %v12466_v23, %v12485_v49  ;;  %v16615_v23 = vld [vmem:[#allocation60_spill] sm:$0xff] }
 0x312   :  { %3733 = vmatpush2.msra.mxu0 %v2453_v0  ;;  %3876 = vmatprep.subr.mxu1 %v1706_v55  ;;  %v16604_v55 = vld [vmem:[#allocation58_spill] sm:$0xff]  ;;  %v2354_v0 = vsel %vm16608_vm9, %v16607_v33, %v16606_v62 }
 0x313   :  { %3219 = vrot.lane.b32.xlu1 %v12101_v13, %s16505_s1  ;;  %3221 = vrot.lane.b32.xlu0 %v12519_v31, %s16505_s1  ;;  %v12536_v50 = vpop.permute.xlu1 %2149  ;;  %v1444_v61 = vpop.permute.xlu0 %1443  ;;  %v2356_v28 = vsel %vm16605_vm4, %v16604_v55, %v12302_v54  ;;  %vm16613_vm4 = vcmask 498688   ;;  %v1558_v55 = vsel %vm16469_vm14, %v16614_v30, %v12318_v40 }
 0x314   :  { %3734 = vmatprep.subr.mxu0 %v2357_v11  ;;  %3852 = vmatmul.mubr.f32.vlgmr.msra.gmra.mxu1 %v3347_v36  ;;  %v16611_v36 = vld [vmem:[#allocation36_spill] sm:$0xff]  ;;  %vm16616_vm9 = vmmov %vm16613_vm4 }
 0x315   :  { %3877 = vmatpush1.msra.mxu1 %v1658_v52  ;;  %3735 = vmatpush2.msra.mxu0 %v2356_v28  ;;  %v2353_v54 = vsel %vm16602_vm1, %v16611_v36, %v16607_v33  ;;  %v16612_v52 = vld [vmem:[#allocation59_spill] sm:$0xff]  ;;  %v2256_v28 = vsel %vm16616_vm9, %v16615_v23, %v12327_v60  ;;  %v16619_v36 = vld [vmem:[#allocation50_spill] sm:$0xff]  ;;  %vm16620_vm1 = vmmov %vm16613_vm4  ;;  %vm16625_vm9 = vcmask 506880   ;;  %v1506_v23 = vsel %vm16468_vm15, %v12487_v37, %v12511_v9 }
 0x316   :  { %3878 = vmatprep.subr.mxu1 %v1703_v53  ;;  %3736 = vmatprep.subr.mxu0 %v2354_v0  ;;  %v2257_v18 = vsel %vm16613_vm4, %v12327_v60, %v16612_v52  ;;  %v16617_v53 = vld [vmem:[#allocation17_spill] sm:$0xff]  ;;  %v1603_v0 = vsel %vm16469_vm14, %v12386_v5, %v12410_v43  ;;  %v16623_v60 = vld [vmem:[#allocation39_spill] sm:$0xff]  ;;  %vm16624_vm4 = vmmov %vm16620_vm1  ;;  %v2157_v30 = vsel %vm16625_vm9, %v2148_v22, %v12536_v50 }
 0x317   :  { %3879 = vmatpush1.msra.mxu1 %v1655_v2  ;;  %3737 = vmatpush2.msra.mxu0 %v2353_v54  ;;  %v2146_v11 = vpop.permute.xlu1 %2145  ;;  %v1396_v26 = vpop.permute.xlu0 %1395  ;;  %v955_v33 = vadd.f32 %v12450_v12, %v16617_v53  ;;  %v16618_v2 = vld [vmem:[#allocation37_spill] sm:$0xff]  ;;  %v16621_v54 = vld [vmem:[#allocation48_spill] sm:$0xff]  ;;  %v2253_v12 = vsel %vm16624_vm4, %v16623_v60, %v16619_v36 }
 0x318   :  { %3880 = vmatprep.subr.mxu1 %v1606_v4  ;;  %3175 = vrot.lane.b32.xlu1 %v12088_v24, %s16505_s1  ;;  %v2254_v40 = vsel %vm16620_vm1, %v16619_v36, %v16618_v2  ;;  %v16622_v4 = vld [vmem:[#allocation20_spill] sm:$0xff]  ;;  %vm16626_vm1 = vmmov %vm16625_vm9  ;;  %v16627_v36 = vld [vmem:[#allocation53_spill] sm:$0xff] }
 0x319   :  { %2495 = vrot.lane.b32.xlu0 %v12088_v24, %s16513_s4  ;;  %3738 = vmatprep.subr.mxu0 %v2257_v18  ;;  %v1555_v18 = vsel %vm16469_vm14, %v16622_v4, %v16621_v54  ;;  %v12606_v37 = vmax.f32 %v955_v33, 0.0  ;;  %vm16629_vm4 = vmmov %vm16626_vm1 }
 0x31a   :  { %3881 = vmatpush1.msra.mxu1 %v1558_v55  ;;  %3739 = vmatpush2.msra.mxu0 %v2256_v28  ;;  %v2156_v28 = vsel %vm16626_vm1, %v2146_v11, %v2148_v22  ;;  %v1503_v22 = vsel %vm16468_vm15, %v12412_v46, %v12432_v27  ;;  %vm16630_vm9 = vmmov %vm16626_vm1  ;;  %vm16631_vm1 = vcmask 515072  }
 0x31b   :  { %3882 = vmatprep.subr.mxu1 %v1603_v0  ;;  %3740 = vmatprep.subr.mxu0 %v2254_v40  ;;  %v12588_v55 = vpop.permute.xlu1 %1397  ;;  %v2140_v5 = vpop.permute.xlu0 %2139  ;;  %v12599_v0 = vld [vmem:[%s16561_s20 + $0x8] sm:$0xff]  ;;  %v1458_v40 = vsel %vm16468_vm15, %v16627_v36, %v12341_v47 }
 0x31c   :  { %3883 = vmatpush1.msra.mxu1 %v1555_v18  ;;  %3741 = vmatpush2.msra.mxu0 %v2253_v12  ;;  %v1406_v11 = vsel %vm186_vm2, %v1396_v26, %v12588_v55  ;;  %v16628_v18 = vld [vmem:[#allocation21_spill] sm:$0xff] }
 0x31d   :  { %3884 = vmatprep.subr.mxu1 %v1506_v23  ;;  %2497 = vrot.lane.b32.xlu1 %v12101_v13, %s16513_s4  ;;  %v1455_v47 = vsel %vm16468_vm15, %v16628_v18, %v1444_v61 }
 0x31e   :  { %3211 = vrot.lane.b32.xlu0 %v12071_v10, %s16505_s1  ;;  %3742 = vmatprep.subr.mxu0 %v2157_v30 }
 0x31f   :  { %3885 = vmatpush1.msra.mxu1 %v1458_v40  ;;  %3743 = vmatpush2.msra.mxu0 %v2156_v28  ;;  %v12613_v54 = vpop.permute.xlu1 %2141  ;;  %v1352_v4 = vpop.permute.xlu0 %1351 }
 0x320   :  { %3886 = vmatprep.subr.mxu1 %v1503_v22  ;;  %v1358_v33 = vsel %vm186_vm2, %v12119_v38, %v1352_v4  ;;  %v2154_v60 = vsel %vm16629_vm4, %v2140_v5, %v12613_v54  ;;  %3762 = vmatprep.mubr.f32.mxu0 %v12599_v0  ;;  %vm16632_vm4 = vmmov %vm16631_vm1 }
 0x321   :  { %3887 = vmatpush1.msra.mxu1 %v1455_v47  ;;  %3213 = vrot.lane.b32.xlu1 %v12606_v37, %s16505_s1 }
 0x322   :  { %2451 = vrot.lane.b32.xlu0 %v11911_v25, %s16513_s4  ;;  %3888 = vmatprep.subr.mxu1 %v1406_v11 }
 0x323   :  { %3744 = vmatprep.subr.mxu0 %v2154_v60  ;;  %3889 = vmatpush1.msra.mxu1 %v1358_v33  ;;  %v2138_v46 = vpop.permute.xlu1 %2137  ;;  %v1388_v61 = vpop.permute.xlu0 %1387 }
 0x324   :  { %v2153_v26 = vsel %vm16630_vm9, %v2138_v46, %v2140_v5  ;;  %vm16633_vm9 = vmmov %vm16631_vm1 }
 0x325   :  { %3167 = vrot.lane.b32.xlu1 %v12060_v20, %s16505_s1  ;;  %3745 = vmatpush2.msra.mxu0 %v2153_v26 }
 0x326   :  { %2487 = vrot.lane.b32.xlu0 %v12060_v20, %s16513_s4 }
 0x327   :  { %v12631_v38 = vpop.permute.xlu1 %1389  ;;  %v2048_v12 = vpop.permute.xlu0 %2047 }
 0x328   :  { %v1403_v30 = vsel %vm186_vm2, %v1388_v61, %v12631_v38 }
 0x329   :  { %2489 = vrot.lane.b32.xlu1 %v12071_v10, %s16513_s4  ;;  %3890 = vmatprep.subr.mxu1 %v1403_v30 }
 0x32a   :  { %3119 = vrot.lane.b32.xlu0 %v12101_v13, %s16514_s18 }
 0x32b   :  { %v12639_v5 = vpop.permute.xlu1 %2049 }
 0x32c   :  { %v1344_v23 = vpop.permute.xlu0 %1343  ;;  %v2057_v28 = vsel %vm16631_vm1, %v2048_v12, %v12639_v5 }
 0x32d   :  { %3121 = vrot.lane.b32.xlu1 %v12519_v31, %s16514_s18  ;;  %v1355_v36 = vsel %vm186_vm2, %v11861_v6, %v1344_v23  ;;  %3746 = vmatprep.subr.mxu0 %v2057_v28 }
 0x32e   :  { %2443 = vrot.lane.b32.xlu0 %v11791_v56, %s16513_s4  ;;  %3891 = vmatpush1.msra.mxu1 %v1355_v36 }
 0x32f   :  { %v2046_v40 = vpop.permute.xlu1 %2045 }
 0x330   :  { %v2056_v22 = vsel %vm16632_vm4, %v2046_v40, %v2048_v12  ;;  %v1296_v11 = vpop.permute.xlu0 %1295  ;;  %vm16636_vm4 = vcmask 760832  }
 0x331   :  { %3075 = vrot.lane.b32.xlu1 %v12088_v24, %s16514_s18  ;;  %3747 = vmatpush2.msra.mxu0 %v2056_v22 }
 0x332   :  { %2395 = vrot.lane.b32.xlu0 %v12088_v24, %s16510_s17 }
 0x333   :  { %v12654_v4 = vpop.permute.xlu1 %1297 }
 0x334   :  { %v2040_v18 = vpop.permute.xlu0 %2039  ;;  %v1306_v6 = vsel %vm165_vm8, %v1296_v11, %v12654_v4 }
 0x335   :  { %2397 = vrot.lane.b32.xlu1 %v12101_v13, %s16510_s17  ;;  %3892 = vmatprep.subr.mxu1 %v1306_v6 }
 0x336   :  { %3111 = vrot.lane.b32.xlu0 %v12071_v10, %s16514_s18 }
 0x337   :  { %v12662_v47 = vpop.permute.xlu1 %2041 }
 0x338   :  { %v1252_v33 = vpop.permute.xlu0 %1251  ;;  %v2054_v60 = vsel %vm16633_vm9, %v2040_v18, %v12662_v47  ;;  %vm16637_vm9 = vmmov %vm16636_vm4 }
 0x339   :  { %3113 = vrot.lane.b32.xlu1 %v12606_v37, %s16514_s18  ;;  %v1258_v46 = vsel %vm165_vm8, %v12133_v32, %v1252_v33  ;;  %3748 = vmatprep.subr.mxu0 %v2054_v60 }
 0x33a   :  { %2351 = vrot.lane.b32.xlu0 %v11911_v25, %s16510_s17  ;;  %3893 = vmatpush1.msra.mxu1 %v1258_v46 }
 0x33b   :  { %v2038_v61 = vpop.permute.xlu1 %2037 }
 0x33c   :  { %v2053_v26 = vsel %vm16631_vm1, %v2038_v61, %v2040_v18  ;;  %v1288_v12 = vpop.permute.xlu0 %1287  ;;  %vm16638_vm1 = vmmov %vm16636_vm4 }
 0x33d   :  { %3067 = vrot.lane.b32.xlu1 %v12060_v20, %s16514_s18  ;;  %3749 = vmatpush2.msra.mxu0 %v2053_v26 }
 0x33e   :  { %2387 = vrot.lane.b32.xlu0 %v12060_v20, %s16510_s17 }
 0x33f   :  { %v12677_v30 = vpop.permute.xlu1 %1289 }
 0x340   :  { %v1948_v23 = vpop.permute.xlu0 %1947  ;;  %v1303_v32 = vsel %vm165_vm8, %v1288_v12, %v12677_v30 }
 0x341   :  { %2389 = vrot.lane.b32.xlu1 %v12071_v10, %s16510_s17  ;;  %3894 = vmatprep.subr.mxu1 %v1303_v32 }
 0x342   :  { %3019 = vrot.lane.b32.xlu0 %v12101_v13, %s16512_s19 }
 0x343   :  { %v12685_v28 = vpop.permute.xlu1 %1949 }
 0x344   :  { %v1244_v36 = vpop.permute.xlu0 %1243  ;;  %v1957_v40 = vsel %vm312_vm11, %v1948_v23, %v12685_v28 }
 0x345   :  { %3021 = vrot.lane.b32.xlu1 %v12519_v31, %s16512_s19  ;;  %v1255_v22 = vsel %vm165_vm8, %v11885_v15, %v1244_v36  ;;  %3750 = vmatprep.subr.mxu0 %v1957_v40 }
 0x346   :  { %2343 = vrot.lane.b32.xlu0 %v11791_v56, %s16510_s17  ;;  %3895 = vmatpush1.msra.mxu1 %v1255_v22 }
 0x347   :  { %v1946_v11 = vpop.permute.xlu1 %1945 }
 0x348   :  { %v1956_v18 = vsel %vm312_vm11, %v1946_v11, %v1948_v23  ;;  %v1196_v6 = vpop.permute.xlu0 %1195 }
 0x349   :  { %2975 = vrot.lane.b32.xlu1 %v12088_v24, %s16512_s19  ;;  %3751 = vmatpush2.msra.mxu0 %v1956_v18 }
 0x34a   :  { %2295 = vrot.lane.b32.xlu0 %v12088_v24, %s16511_s7 }
 0x34b   :  { %v12700_v33 = vpop.permute.xlu1 %1197 }
 0x34c   :  { %v1940_v60 = vpop.permute.xlu0 %1939  ;;  %v1206_v15 = vsel %vm144_vm7, %v1196_v6, %v12700_v33 }
 0x34d   :  { %2297 = vrot.lane.b32.xlu1 %v12101_v13, %s16511_s7  ;;  %3896 = vmatprep.subr.mxu1 %v1206_v15 }
 0x34e   :  { %3011 = vrot.lane.b32.xlu0 %v12071_v10, %s16512_s19 }
 0x34f   :  { %v12708_v46 = vpop.permute.xlu1 %1941 }
 0x350   :  { %v1152_v61 = vpop.permute.xlu0 %1151  ;;  %v1954_v26 = vsel %vm312_vm11, %v1940_v60, %v12708_v46 }
 0x351   :  { %3013 = vrot.lane.b32.xlu1 %v12606_v37, %s16512_s19  ;;  %v1158_v12 = vsel %vm144_vm7, %v12157_v21, %v1152_v61  ;;  %3752 = vmatprep.subr.mxu0 %v1954_v26 }
 0x352   :  { %2251 = vrot.lane.b32.xlu0 %v11911_v25, %s16511_s7  ;;  %3897 = vmatpush1.msra.mxu1 %v1158_v12 }
 0x353   :  { %v1938_v23 = vpop.permute.xlu1 %1937 }
 0x354   :  { %v1953_v32 = vsel %vm312_vm11, %v1938_v23, %v1940_v60  ;;  %v1188_v36 = vpop.permute.xlu0 %1187 }
 0x355   :  { %2967 = vrot.lane.b32.xlu1 %v12060_v20, %s16512_s19  ;;  %3753 = vmatpush2.msra.mxu0 %v1953_v32 }
 0x356   :  { %2287 = vrot.lane.b32.xlu0 %v12060_v20, %s16511_s7 }
 0x357   :  { %v12723_v40 = vpop.permute.xlu1 %1189 }
 0x358   :  { %v1848_v22 = vpop.permute.xlu0 %1847  ;;  %v1203_v21 = vsel %vm144_vm7, %v1188_v36, %v12723_v40 }
 0x359   :  { %2289 = vrot.lane.b32.xlu1 %v12071_v10, %s16511_s7  ;;  %3898 = vmatprep.subr.mxu1 %v1203_v21 }
 0x35a   :  { %2243 = vrot.lane.b32.xlu0 %v11791_v56, %s16511_s7 }
 0x35b   :  { %v12731_v11 = vpop.permute.xlu1 %1849 }
 0x35c   :  { %v1144_v18 = vpop.permute.xlu0 %1143  ;;  %v1857_v6 = vsel %vm291_vm10, %v1848_v22, %v12731_v11 }
 0x35d   :  { %2195 = vrot.lane.b32.xlu1 %v12088_v24, %s16508_s21  ;;  %v1155_v60 = vsel %vm144_vm7, %v16574_v16, %v1144_v18  ;;  %3754 = vmatprep.subr.mxu0 %v1857_v6 }
 0x35e   :  { %2197 = vrot.lane.b32.xlu0 %v12101_v13, %s16508_s21  ;;  %3899 = vmatpush1.msra.mxu1 %v1155_v60 }
 0x35f   :  { %v1846_v15 = vpop.permute.xlu1 %1845 }
 0x360   :  { %v1856_v61 = vsel %vm291_vm10, %v1846_v15, %v1848_v22  ;;  %v1096_v26 = vpop.permute.xlu0 %1095 }
 0x361   :  { %2151 = vrot.lane.b32.xlu1 %v11911_v25, %s16508_s21  ;;  %3755 = vmatpush2.msra.mxu0 %v1856_v61 }
 0x362   :  { %2187 = vrot.lane.b32.xlu0 %v12060_v20, %s16508_s21 }
 0x363   :  { %v12746_v12 = vpop.permute.xlu1 %1097 }
 0x364   :  { %16634 = vst [vmem:[#allocation38_spill] sm:$0xff] %v12746_v12  ;;  %v1840_v23 = vpop.permute.xlu0 %1839  ;;  %v1106_v16 = vsel %vm123_vm6, %v1096_v26, %v12746_v12 }
 0x365   :  { %2189 = vrot.lane.b32.xlu1 %v12071_v10, %s16508_s21  ;;  %3900 = vmatprep.subr.mxu1 %v1106_v16 }
 0x366   :  { %2895 = vrot.lane.b32.xlu0 %v12088_v24, %s16502_s0 }
 0x367   :  { %v12754_v32 = vpop.permute.xlu1 %1841 }
 0x368   :  { %v1052_v36 = vpop.permute.xlu0 %1051  ;;  %v1854_v22 = vsel %vm291_vm10, %v1840_v23, %v12754_v32 }
 0x369   :  { %2897 = vrot.lane.b32.xlu1 %v12101_v13, %s16502_s0  ;;  %v1058_v21 = vsel %vm123_vm6, %v12192_v17, %v1052_v36  ;;  %3756 = vmatprep.subr.mxu0 %v1854_v22 }
 0x36a   :  { %2143 = vrot.lane.b32.xlu0 %v11791_v56, %s16508_s21  ;;  %3901 = vmatpush1.msra.mxu1 %v1058_v21 }
 0x36c   :  { %v1838_v18 = vpop.permute.xlu1 %1837  ;;  %v1088_v6 = vpop.permute.xlu0 %1087 }
 0x36d   :  { %2851 = vrot.lane.b32.xlu1 %v11911_v25, %s16502_s0  ;;  %v1853_v60 = vsel %vm291_vm10, %v1838_v18, %v1840_v23 }
 0x36e   :  { %2095 = vrot.lane.b32.xlu0 %v12088_v24, %s16509_s22  ;;  %3757 = vmatpush2.msra.mxu0 %v1853_v60 }
 0x371   :  { %2097 = vrot.lane.b32.xlu1 %v12101_v13, %s16509_s22  ;;  %v12771_v17 = vpop.permute.xlu1 %1089  ;;  %v1748_v15 = vpop.permute.xlu0 %1747 }
 0x372   :  { %16635 = vst [vmem:[#allocation25_spill] sm:$0xff] %v12771_v17  ;;  %2887 = vrot.lane.b32.xlu0 %v12060_v20, %s16502_s0  ;;  %v1103_v61 = vsel %vm123_vm6, %v1088_v6, %v12771_v17 }
 0x373   :  { %3902 = vmatprep.subr.mxu1 %v1103_v61 }
 0x375   :  { %2889 = vrot.lane.b32.xlu1 %v12071_v10, %s16502_s0 }
 0x376   :  { %2051 = vrot.lane.b32.xlu0 %v11911_v25, %s16509_s22  ;;  %v12781_v26 = vpop.permute.xlu1 %1749  ;;  %v1044_v23 = vpop.permute.xlu0 %1043 }
 0x377   :  { %v1055_v16 = vsel %vm123_vm6, %v16582_v1, %v1044_v23  ;;  %v1757_v36 = vsel %vm16636_vm4, %v1748_v15, %v12781_v26  ;;  %vm16639_vm4 = vmmov %vm16638_vm1 }
 0x378   :  { %3758 = vmatprep.subr.mxu0 %v1757_v36  ;;  %3903 = vmatpush1.msra.mxu1 %v1055_v16  ;;  %v16641_v36 = vld [vmem:[#allocation56_spill] sm:$0xff] }
 0x379   :  { %2843 = vrot.lane.b32.xlu1 %v11791_v56, %s16502_s0  ;;  %3904 = vmatprep.subr.mxu1 %v12088_v24 }
 0x37a   :  { %2087 = vrot.lane.b32.xlu0 %v12060_v20, %s16509_s22  ;;  %3905 = vmatpush1.msra.mxu1 %v11827_v63 }
 0x37b   :  { %v1746_v22 = vpop.permute.xlu1 %1745  ;;  %v1740_v21 = vpop.permute.xlu0 %1739  ;;  %3906 = vmatprep.subr.mxu1 %v12060_v20 }
 0x37c   :  { %v1756_v1 = vsel %vm16637_vm9, %v1746_v22, %v1748_v15  ;;  %3907 = vmatpush1.msra.mxu1 %v11703_v51  ;;  %v12810_v51 = vld [vmem:[%s16561_s20] sm:$0xff]  ;;  %vm16647_vm9 = vcmask 490496  }
 0x37d   :  { %2089 = vrot.lane.b32.xlu1 %v12071_v10, %s16509_s22  ;;  %3759 = vmatpush2.msra.mxu0 %v1756_v1 }
 0x37e   :  { %2795 = vrot.lane.b32.xlu0 %v12088_v24, %s16503_s28 }
 0x380   :  { %v12800_v18 = vpop.permute.xlu1 %1741  ;;  %v1738_v6 = vpop.permute.xlu0 %1737 }
 0x381   :  { %2797 = vrot.lane.b32.xlu1 %v12101_v13, %s16503_s28  ;;  %v1753_v63 = vsel %vm16638_vm1, %v1738_v6, %v1740_v21  ;;  %v1754_v60 = vsel %vm16639_vm4, %v1740_v21, %v12800_v18  ;;  %vm16649_vm1 = vmmov %vm16647_vm9 }
 0x382   :  { %2043 = vrot.lane.b32.xlu0 %v11791_v56, %s16509_s22  ;;  %3760 = vmatprep.subr.mxu0 %v1754_v60  ;;  %vm16651_vm4 = vmmov %vm16649_vm1 }
 0x383   :  { %3761 = vmatpush2.msra.mxu0 %v1753_v63 }
 0x384   :  { %3763 = vmatmul.mubr.f32.vlgmr.msra.gmra.mxu0 %v12810_v51 }
 0x385   :  { %2751 = vrot.lane.b32.xlu1 %v11911_v25, %s16503_s28  ;;  %v3220_v15 = vpop.permute.xlu1 %3219  ;;  %v12817_v61 = vpop.permute.xlu0 %3221 }
 0x386   :  { %16640 = vst [vmem:[#allocation40_spill] sm:$0xff] %v12817_v61  ;;  %1995 = vrot.lane.b32.xlu0 %v12088_v24, %s16506_s5  ;;  %v3230_v23 = vsel %vm165_vm8, %v3220_v15, %v12817_v61 }
 0x387   :  { %3965 = vmatprep.subr.mxu0 %v3230_v23 }
 0x389   :  { %1997 = vrot.lane.b32.xlu1 %v12101_v13, %s16506_s5 }
 0x38a   :  { %2787 = vrot.lane.b32.xlu0 %v12060_v20, %s16503_s28  ;;  %v3176_v16 = vpop.permute.xlu1 %3175 }
 0x38b   :  { %v3182_v22 = vsel %vm165_vm8, %v16641_v36, %v3176_v16  ;;  %v2496_v21 = vpop.permute.xlu0 %2495 }
 0x38c   :  { %3966 = vmatpush1.msra.mxu0 %v3182_v22 }
 0x38d   :  { %2789 = vrot.lane.b32.xlu1 %v12071_v10, %s16503_s28 }
 0x38e   :  { %1951 = vrot.lane.b32.xlu0 %v11911_v25, %s16506_s5 }
 0x38f   :  { %v12833_v1 = vpop.permute.xlu1 %2497 }
 0x390   :  { %16642 = vst [vmem:[#allocation23_spill] sm:$0xff] %v12833_v1  ;;  %v3212_v6 = vpop.permute.xlu0 %3211  ;;  %v2506_v63 = vsel %vm417_vm12, %v2496_v21, %v12833_v1  ;;  %v13016_v1 = vld [vmem:[%s16561_s20 + $0x18] sm:$0xff] }
 0x391   :  { %2743 = vrot.lane.b32.xlu1 %v11791_v56, %s16503_s28  ;;  %3908 = vmatprep.subr.mxu1 %v2506_v63 }
 0x392   :  { %1987 = vrot.lane.b32.xlu0 %v12060_v20, %s16506_s5 }
 0x393   :  { %v12841_v60 = vpop.permute.xlu1 %3213 }
 0x394   :  { %16643 = vst [vmem:[#allocation24_spill] sm:$0xff] %v12841_v60  ;;  %v2452_v15 = vpop.permute.xlu0 %2451  ;;  %v3227_v23 = vsel %vm165_vm8, %v3212_v6, %v12841_v60 }
 0x395   :  { %v2458_v16 = vsel %vm417_vm12, %v12237_v39, %v2452_v15  ;;  %1989 = vrot.lane.b32.xlu1 %v12071_v10, %s16506_s5  ;;  %3967 = vmatprep.subr.mxu0 %v3227_v23 }
 0x396   :  { %2695 = vrot.lane.b32.xlu0 %v12088_v24, %s16500_s26  ;;  %3909 = vmatpush2.msra.mxu1 %v2458_v16 }
 0x397   :  { %v3168_v36 = vpop.permute.xlu1 %3167 }
 0x398   :  { %v3179_v22 = vsel %vm165_vm8, %v12003_v45, %v3168_v36  ;;  %v2488_v21 = vpop.permute.xlu0 %2487 }
 0x399   :  { %2697 = vrot.lane.b32.xlu1 %v12101_v13, %s16500_s26  ;;  %3968 = vmatpush1.msra.mxu0 %v3179_v22 }
 0x39a   :  { %1943 = vrot.lane.b32.xlu0 %v11791_v56, %s16506_s5 }
 0x39b   :  { %v12857_v39 = vpop.permute.xlu1 %2489 }
 0x39c   :  { %16644 = vst [vmem:[#allocation57_spill] sm:$0xff] %v12857_v39  ;;  %v3120_v6 = vpop.permute.xlu0 %3119  ;;  %v2503_v63 = vsel %vm417_vm12, %v2488_v21, %v12857_v39  ;;  %v12993_v39 = vld [vmem:[%s16561_s20 + $0x68] sm:$0xff] }
 0x39d   :  { %2651 = vrot.lane.b32.xlu1 %v11911_v25, %s16500_s26  ;;  %3910 = vmatprep.subr.mxu1 %v2503_v63 }
 0x39e   :  { %1895 = vrot.lane.b32.xlu0 %v12088_v24, %s16507_s25 }
 0x39f   :  { %v12865_v45 = vpop.permute.xlu1 %3121 }
 0x3a0   :  { %16645 = vst [vmem:[#allocation54_spill] sm:$0xff] %v12865_v45  ;;  %v2444_v15 = vpop.permute.xlu0 %2443  ;;  %v3130_v23 = vsel %vm144_vm7, %v3120_v6, %v12865_v45  ;;  %v12967_v45 = vld [vmem:[%s16561_s20 + $0x78] sm:$0xff] }
 0x3a1   :  { %v2455_v16 = vsel %vm417_vm12, %v16599_v29, %v2444_v15  ;;  %1897 = vrot.lane.b32.xlu1 %v12101_v13, %s16507_s25  ;;  %3969 = vmatprep.subr.mxu0 %v3130_v23 }
 0x3a2   :  { %2687 = vrot.lane.b32.xlu0 %v12060_v20, %s16500_s26  ;;  %3911 = vmatpush2.msra.mxu1 %v2455_v16 }
 0x3a3   :  { %v3076_v36 = vpop.permute.xlu1 %3075 }
 0x3a4   :  { %v3082_v22 = vsel %vm144_vm7, %v12291_v48, %v3076_v36  ;;  %v2396_v21 = vpop.permute.xlu0 %2395 }
 0x3a5   :  { %2689 = vrot.lane.b32.xlu1 %v12071_v10, %s16500_s26  ;;  %3970 = vmatpush1.msra.mxu0 %v3082_v22 }
 0x3a6   :  { %1851 = vrot.lane.b32.xlu0 %v11911_v25, %s16507_s25 }
 0x3a7   :  { %v12881_v29 = vpop.permute.xlu1 %2397 }
 0x3a8   :  { %16646 = vst [vmem:[#allocation27_spill] sm:$0xff] %v12881_v29  ;;  %v3112_v6 = vpop.permute.xlu0 %3111  ;;  %v2406_v63 = vsel %vm16647_vm9, %v2396_v21, %v12881_v29  ;;  %vm16653_vm9 = vmmov %vm16649_vm1  ;;  %v12962_v29 = vld [vmem:[%s16561_s20 + $0x48] sm:$0xff] }
 0x3a9   :  { %2643 = vrot.lane.b32.xlu1 %v11791_v56, %s16500_s26  ;;  %3912 = vmatprep.subr.mxu1 %v2406_v63 }
 0x3aa   :  { %1887 = vrot.lane.b32.xlu0 %v12060_v20, %s16507_s25 }
 0x3ab   :  { %v12889_v48 = vpop.permute.xlu1 %3113 }
 0x3ac   :  { %16648 = vst [vmem:[#allocation41_spill] sm:$0xff] %v12889_v48  ;;  %v2352_v15 = vpop.permute.xlu0 %2351  ;;  %v3127_v23 = vsel %vm144_vm7, %v3112_v6, %v12889_v48 }
 0x3ad   :  { %v2358_v16 = vsel %vm16649_vm1, %v12245_v35, %v2352_v15  ;;  %1889 = vrot.lane.b32.xlu1 %v12071_v10, %s16507_s25  ;;  %3971 = vmatprep.subr.mxu0 %v3127_v23  ;;  %v12906_v35 = vld [vmem:[%s16561_s20 + $0x38] sm:$0xff]  ;;  %v12927_v23 = vld [vmem:[%s16561_s20 + $0x28] sm:$0xff]  ;;  %vm16656_vm1 = vcmask 498688  }
 0x3ae   :  { %2595 = vrot.lane.b32.xlu0 %v12088_v24, %s16501_s2  ;;  %3913 = vmatpush2.msra.mxu1 %v2358_v16  ;;  %v12932_v16 = vld [vmem:[%s16561_s20 + $0x58] sm:$0xff] }
 0x3af   :  { %v3068_v36 = vpop.permute.xlu1 %3067  ;;  %10828 = vmatprep.mubr.msk.f32.mxu1 %vm3685_vm0, %v12906_v35  ;;  %3768 = vmatprep.mubr.f32.mxu0 %v12927_v23 }
 0x3b0   :  { %v3079_v22 = vsel %vm144_vm7, %v12019_v58, %v3068_v36  ;;  %v2388_v21 = vpop.permute.xlu0 %2387  ;;  %v12915_v58 = vld [vmem:[%s16561_s20 + $0x30] sm:$0xff]  ;;  %v12940_v36 = vld [vmem:[%s16561_s20 + $0x20] sm:$0xff] }
 0x3b1   :  { %2597 = vrot.lane.b32.xlu1 %v12101_v13, %s16501_s2  ;;  %3972 = vmatpush1.msra.mxu0 %v3079_v22  ;;  %v12945_v22 = vld [vmem:[%s16561_s20 + $0x50] sm:$0xff] }
 0x3b2   :  { %1843 = vrot.lane.b32.xlu0 %v11791_v56, %s16507_s25  ;;  %3858 = vmatmul.mubr.f32.gmra.mxu1 %v12915_v58 }
 0x3b3   :  { %v12917_v6 = vpop.permute.xlu1 %2389  ;;  %10829 = vmatprep.mubr.msk.f32.mxu1 %vm3685_vm0, %v12932_v16  ;;  %3769 = vmatmul.mubr.f32.gmra.mxu0 %v12940_v36 }
 0x3b4   :  { %16650 = vst [vmem:[#allocation31_spill] sm:$0xff] %v12917_v6  ;;  %v3020_v63 = vpop.permute.xlu0 %3019  ;;  %v2403_v15 = vsel %vm16651_vm4, %v2388_v21, %v12917_v6  ;;  %3774 = vmatprep.mubr.f32.mxu0 %v12962_v29  ;;  %vm16657_vm4 = vmmov %vm16656_vm1 }
 0x3b5   :  { %2551 = vrot.lane.b32.xlu1 %v11911_v25, %s16501_s2  ;;  %3914 = vmatprep.subr.mxu1 %v2403_v15 }
 0x3b6   :  { %1795 = vrot.lane.b32.xlu0 %v12088_v24, %s16504_s23  ;;  %3864 = vmatmul.mubr.f32.gmra.mxu1 %v12945_v22 }
 0x3b7   :  { %v12947_v21 = vpop.permute.xlu1 %3021  ;;  %10830 = vmatprep.mubr.msk.f32.mxu1 %vm3685_vm0, %v12967_v45 }
 0x3b8   :  { %16652 = vst [vmem:[#allocation42_spill] sm:$0xff] %v12947_v21  ;;  %v2344_v15 = vpop.permute.xlu0 %2343  ;;  %v3030_v6 = vsel %vm123_vm6, %v3020_v63, %v12947_v21 }
 0x3b9   :  { %v2355_v48 = vsel %vm16653_vm9, %v16606_v62, %v2344_v15  ;;  %1797 = vrot.lane.b32.xlu1 %v12101_v13, %s16504_s23  ;;  %3973 = vmatprep.subr.mxu0 %v3030_v6  ;;  %v12974_v62 = vld [vmem:[%s16561_s20 + $0x40] sm:$0xff]  ;;  %v12979_v6 = vld [vmem:[%s16561_s20 + $0x70] sm:$0xff]  ;;  %vm16658_vm9 = vmmov %vm16656_vm1 }
 0x3ba   :  { %2587 = vrot.lane.b32.xlu0 %v12060_v20, %s16501_s2  ;;  %3915 = vmatpush2.msra.mxu1 %v2355_v48  ;;  %v16654_v15 = vld [vmem:[#allocation62_spill] sm:$0xff] }
 0x3bb   :  { %v2976_v63 = vpop.permute.xlu1 %2975  ;;  %3775 = vmatmul.mubr.f32.gmra.mxu0 %v12974_v62  ;;  %3870 = vmatmul.mubr.f32.gmra.mxu1 %v12979_v6 }
 0x3bc   :  { %v2982_v21 = vsel %vm123_vm6, %v16654_v15, %v2976_v63  ;;  %v2296_v48 = vpop.permute.xlu0 %2295  ;;  %3780 = vmatprep.mubr.f32.mxu0 %v12993_v39  ;;  %v13001_v63 = vld [vmem:[%s16561_s20 + $0x60] sm:$0xff]  ;;  %3940 = vmatprep.mubr.f32.mxu1 %v12599_v0 }
 0x3bd   :  { %2589 = vrot.lane.b32.xlu1 %v12071_v10, %s16501_s2  ;;  %3974 = vmatpush1.msra.mxu0 %v2982_v21 }
 0x3be   :  { %1751 = vrot.lane.b32.xlu0 %v11911_v25, %s16504_s23 }
 0x3bf   :  { %v13003_v15 = vpop.permute.xlu1 %2297  ;;  %3781 = vmatmul.mubr.f32.gmra.mxu0 %v13001_v63 }
 0x3c0   :  { %16655 = vst [vmem:[#allocation29_spill] sm:$0xff] %v13003_v15  ;;  %v3012_v21 = vpop.permute.xlu0 %3011  ;;  %v2306_v60 = vsel %vm16656_vm1, %v2296_v48, %v13003_v15  ;;  %10831 = vmatprep.mubr.msk.f32.mxu0 %vm3685_vm0, %v13016_v1 }
 0x3c1   :  { %2543 = vrot.lane.b32.xlu1 %v11791_v56, %s16501_s2  ;;  %3916 = vmatprep.subr.mxu1 %v2306_v60 }
 0x3c2   :  { %1787 = vrot.lane.b32.xlu0 %v12060_v20, %s16504_s23 }
 0x3c3   :  { %v13020_v0 = vpop.permute.xlu1 %3013 }
 0x3c4   :  { %v2252_v48 = vpop.permute.xlu0 %2251  ;;  %v3027_v15 = vsel %vm123_vm6, %v3012_v21, %v13020_v0 }
 0x3c5   :  { %v2258_v60 = vsel %vm16657_vm4, %v16612_v52, %v2252_v48  ;;  %1789 = vrot.lane.b32.xlu1 %v12071_v10, %s16504_s23  ;;  %3975 = vmatprep.subr.mxu0 %v3027_v15  ;;  %vm16659_vm4 = vcmask 506880  }
 0x3c6   :  { %3319 = vrot.lane.b32.xlu0 %v12101_v13, %s16516_s27  ;;  %3917 = vmatpush2.msra.mxu1 %v2258_v60 }
 0x3c7   :  { %v2968_v61 = vpop.permute.xlu1 %2967 }
 0x3c8   :  { %v2979_v17 = vsel %vm123_vm6, %v12035_v19, %v2968_v61  ;;  %v2288_v12 = vpop.permute.xlu0 %2287  ;;  %v962_v61 = vpop.f32.mrf.mxu1 }
 0x3c9   :  { %3321 = vrot.lane.b32.xlu1 %v12519_v31, %s16516_s27  ;;  %3976 = vmatpush1.msra.mxu0 %v2979_v17  ;;  %v963_v17 = vadd.f32 %v962_v61, %v16594_v59 }
 0x3ca   :  { %1743 = vrot.lane.b32.xlu0 %v11791_v56, %s16504_s23  ;;  %3977 = vmatprep.subr.mxu0 %v12101_v13 }
 0x3cb   :  { %v13037_v52 = vpop.permute.xlu1 %2289  ;;  %3978 = vmatpush1.msra.mxu0 %v11911_v25 }
 0x3cc   :  { %v2244_v15 = vpop.permute.xlu0 %2243  ;;  %3979 = vmatprep.subr.mxu0 %v12071_v10  ;;  %v2303_v19 = vsel %vm16658_vm9, %v2288_v12, %v13037_v52  ;;  %v13061_v12 = vmax.f32 %v963_v17, 0.0  ;;  %vm16660_vm9 = vmmov %vm16659_vm4 }
 0x3cd   :  { %v2255_v21 = vsel %vm16656_vm1, %v16618_v2, %v2244_v15  ;;  %3275 = vrot.lane.b32.xlu1 %v12088_v24, %s16516_s27  ;;  %3918 = vmatprep.subr.mxu1 %v2303_v19  ;;  %vm16661_vm1 = vmmov %vm16659_vm4 }
 0x3ce   :  { %3311 = vrot.lane.b32.xlu0 %v12071_v10, %s16516_s27  ;;  %3980 = vmatpush1.msra.mxu0 %v11791_v56  ;;  %v957_v56 = vadd.f32 %v12475_v41, %v16617_v53 }
 0x3cf   :  { %3919 = vmatpush2.msra.mxu1 %v2255_v21  ;;  %v2196_v25 = vpop.permute.xlu1 %2195 }
 0x3d0   :  { %v13051_v48 = vpop.permute.xlu0 %2197 }
 0x3d1   :  { %3313 = vrot.lane.b32.xlu1 %v12606_v37, %s16516_s27  ;;  %v2206_v2 = vsel %vm16659_vm4, %v2196_v25, %v13051_v48  ;;  %vm16662_vm4 = vmmov %vm16661_vm1 }
 0x3d2   :  { %3267 = vrot.lane.b32.xlu0 %v12060_v20, %s16516_s27  ;;  %3920 = vmatprep.subr.mxu1 %v2206_v2  ;;  %v13071_v20 = vmax.f32 %v957_v56, 0.0 }
 0x3d3   :  { %v2152_v24 = vpop.permute.xlu1 %2151 }
 0x3d4   :  { %v2158_v59 = vsel %vm16660_vm9, %v12536_v50, %v2152_v24  ;;  %v2188_v60 = vpop.permute.xlu0 %2187  ;;  %vm16663_vm9 = vcmask 515072  }
 0x3d5   :  { %1699 = vrot.lane.b32.xlu1 %v12519_v31, %s16517_s12  ;;  %3921 = vmatpush2.msra.mxu1 %v2158_v59 }
 0x3d6   :  { %1701 = vrot.lane.b32.xlu0 %v13061_v12, %s16517_s12 }
 0x3d7   :  { %v13069_v15 = vpop.permute.xlu1 %2189 }
 0x3d8   :  { %v2896_v19 = vpop.permute.xlu0 %2895  ;;  %v2203_v41 = vsel %vm16661_vm1, %v2188_v60, %v13069_v15  ;;  %vm16664_vm1 = vmmov %vm16663_vm9 }
 0x3d9   :  { %1691 = vrot.lane.b32.xlu1 %v12606_v37, %s16517_s12  ;;  %3922 = vmatprep.subr.mxu1 %v2203_v41 }
 0x3da   :  { %1693 = vrot.lane.b32.xlu0 %v13071_v20, %s16517_s12 }
 0x3db   :  { %v13079_v50 = vpop.permute.xlu1 %2897 }
 0x3dc   :  { %v2144_v53 = vpop.permute.xlu0 %2143  ;;  %v2906_v61 = vsel %vm501_vm5, %v2896_v19, %v13079_v50 }
 0x3dd   :  { %v2155_v21 = vsel %vm16662_vm4, %v12613_v54, %v2144_v53  ;;  %1599 = vrot.lane.b32.xlu1 %v12519_v31, %s16518_s16  ;;  %3981 = vmatprep.subr.mxu0 %v2906_v61  ;;  %vm16665_vm4 = vmmov %vm16664_vm1 }
 0x3de   :  { %1601 = vrot.lane.b32.xlu0 %v13061_v12, %s16518_s16  ;;  %3923 = vmatpush2.msra.mxu1 %v2155_v21 }
 0x3df   :  { %v2852_v25 = vpop.permute.xlu1 %2851 }
 0x3e0   :  { %v2858_v17 = vsel %vm501_vm5, %v12117_v42, %v2852_v25  ;;  %v2096_v2 = vpop.permute.xlu0 %2095 }
 0x3e1   :  { %1591 = vrot.lane.b32.xlu1 %v12606_v37, %s16518_s16  ;;  %3982 = vmatpush1.msra.mxu0 %v2858_v17 }
 0x3e2   :  { %1593 = vrot.lane.b32.xlu0 %v13071_v20, %s16518_s16 }
 0x3e3   :  { %v13095_v54 = vpop.permute.xlu1 %2097 }
 0x3e4   :  { %v2888_v24 = vpop.permute.xlu0 %2887  ;;  %v2106_v56 = vsel %vm16663_vm9, %v2096_v2, %v13095_v54  ;;  %vm16666_vm9 = vmmov %vm16664_vm1 }
 0x3e5   :  { %1499 = vrot.lane.b32.xlu1 %v12519_v31, %s16515_s13  ;;  %3924 = vmatprep.subr.mxu1 %v2106_v56 }
 0x3e6   :  { %1501 = vrot.lane.b32.xlu0 %v13061_v12, %s16515_s13 }
 0x3e7   :  { %v13103_v42 = vpop.permute.xlu1 %2889 }
 0x3e8   :  { %v2052_v59 = vpop.permute.xlu0 %2051  ;;  %v2903_v60 = vsel %vm501_vm5, %v2888_v24, %v13103_v42 }
 0x3e9   :  { %v2058_v19 = vsel %vm16664_vm1, %v12639_v5, %v2052_v59  ;;  %1491 = vrot.lane.b32.xlu1 %v12606_v37, %s16515_s13  ;;  %3983 = vmatprep.subr.mxu0 %v2903_v60  ;;  %vm16667_vm1 = vcmask 244736  }
 0x3ea   :  { %1493 = vrot.lane.b32.xlu0 %v13071_v20, %s16515_s13  ;;  %3925 = vmatpush2.msra.mxu1 %v2058_v19 }
 0x3eb   :  { %v2844_v41 = vpop.permute.xlu1 %2843 }
 0x3ec   :  { %v2855_v53 = vsel %vm501_vm5, %v11869_v8, %v2844_v41  ;;  %v2088_v61 = vpop.permute.xlu0 %2087 }
 0x3ed   :  { %1399 = vrot.lane.b32.xlu1 %v12519_v31, %s16516_s27  ;;  %3984 = vmatpush1.msra.mxu0 %v2855_v53 }
 0x3ee   :  { %1401 = vrot.lane.b32.xlu0 %v13061_v12, %s16516_s27 }
 0x3ef   :  { %v13119_v5 = vpop.permute.xlu1 %2089 }
 0x3f0   :  { %v2796_v21 = vpop.permute.xlu0 %2795  ;;  %v2103_v25 = vsel %vm16665_vm4, %v2088_v61, %v13119_v5  ;;  %vm16669_vm4 = vmmov %vm16667_vm1 }
 0x3f1   :  { %1391 = vrot.lane.b32.xlu1 %v12606_v37, %s16516_s27  ;;  %3926 = vmatprep.subr.mxu1 %v2103_v25 }
 0x3f2   :  { %1393 = vrot.lane.b32.xlu0 %v13071_v20, %s16516_s27 }
 0x3f3   :  { %v13127_v8 = vpop.permute.xlu1 %2797 }
 0x3f4   :  { %v2044_v17 = vpop.permute.xlu0 %2043  ;;  %v2806_v2 = vsel %vm480_vm3, %v2796_v21, %v13127_v8 }
 0x3f5   :  { %v2055_v24 = vsel %vm16666_vm9, %v12662_v47, %v2044_v17  ;;  %1299 = vrot.lane.b32.xlu1 %v12519_v31, %s16505_s1  ;;  %3985 = vmatprep.subr.mxu0 %v2806_v2  ;;  %vm16670_vm9 = vmmov %vm16667_vm1 }
 0x3f6   :  { %1301 = vrot.lane.b32.xlu0 %v13061_v12, %s16505_s1  ;;  %3927 = vmatpush2.msra.mxu1 %v2055_v24 }
 0x3f7   :  { %v2752_v56 = vpop.permute.xlu1 %2751 }
 0x3f8   :  { %v2758_v59 = vsel %vm480_vm3, %v12141_v34, %v2752_v56  ;;  %v1996_v60 = vpop.permute.xlu0 %1995 }
 0x3f9   :  { %1291 = vrot.lane.b32.xlu1 %v12606_v37, %s16505_s1  ;;  %3986 = vmatpush1.msra.mxu0 %v2758_v59 }
 0x3fa   :  { %1293 = vrot.lane.b32.xlu0 %v13071_v20, %s16505_s1 }
 0x3fb   :  { %v13143_v47 = vpop.permute.xlu1 %1997 }
 0x3fc   :  { %v2788_v19 = vpop.permute.xlu0 %2787  ;;  %v2006_v41 = vsel %vm312_vm11, %v1996_v60, %v13143_v47 }
 0x3fd   :  { %1199 = vrot.lane.b32.xlu1 %v12519_v31, %s16514_s18  ;;  %3928 = vmatprep.subr.mxu1 %v2006_v41  ;;  %v16668_v41 = vmov 0.0  }
 0x3fe   :  { %1201 = vrot.lane.b32.xlu0 %v13061_v12, %s16514_s18 }
 0x3ff   :  { %v13151_v34 = vpop.permute.xlu1 %2789 }
 0x400   :  { %v1952_v53 = vpop.permute.xlu0 %1951  ;;  %v2803_v61 = vsel %vm480_vm3, %v2788_v19, %v13151_v34 }
 0x401   :  { %v1958_v21 = vsel %vm312_vm11, %v12685_v28, %v1952_v53  ;;  %1191 = vrot.lane.b32.xlu1 %v12606_v37, %s16514_s18  ;;  %3987 = vmatprep.subr.mxu0 %v2803_v61 }
 0x402   :  { %1193 = vrot.lane.b32.xlu0 %v13071_v20, %s16514_s18  ;;  %3929 = vmatpush2.msra.mxu1 %v1958_v21 }
 0x403   :  { %v2744_v25 = vpop.permute.xlu1 %2743 }
 0x404   :  { %v2755_v17 = vsel %vm480_vm3, %v16572_v57, %v2744_v25  ;;  %v1988_v2 = vpop.permute.xlu0 %1987 }
 0x405   :  { %1099 = vrot.lane.b32.xlu1 %v12519_v31, %s16512_s19  ;;  %3988 = vmatpush1.msra.mxu0 %v2755_v17 }
 0x406   :  { %1101 = vrot.lane.b32.xlu0 %v13061_v12, %s16512_s19 }
 0x407   :  { %v13167_v28 = vpop.permute.xlu1 %1989 }
 0x408   :  { %v2696_v24 = vpop.permute.xlu0 %2695  ;;  %v2003_v56 = vsel %vm312_vm11, %v1988_v2, %v13167_v28 }
 0x409   :  { %1091 = vrot.lane.b32.xlu1 %v12606_v37, %s16512_s19  ;;  %3930 = vmatprep.subr.mxu1 %v2003_v56 }
 0x40a   :  { %1093 = vrot.lane.b32.xlu0 %v13071_v20, %s16512_s19 }
 0x40b   :  { %v13175_v57 = vpop.permute.xlu1 %2697 }
 0x40c   :  { %v1944_v59 = vpop.permute.xlu0 %1943  ;;  %v2706_v60 = vsel %vm16667_vm1, %v2696_v24, %v13175_v57 }
 0x40d   :  { %v1955_v19 = vsel %vm312_vm11, %v12708_v46, %v1944_v59  ;;  %3223 = vrot.lane.b32.xlu1 %v13061_v12, %s16505_s1  ;;  %3989 = vmatprep.subr.mxu0 %v2706_v60 }
 0x40e   :  { %10988 = vrot.lane.b32.xlu0 %v16668_v41, %s16505_s1  ;;  %3931 = vmatpush2.msra.mxu1 %v1955_v19 }
 0x40f   :  { %v2652_v53 = vpop.permute.xlu1 %2651 }
 0x410   :  { %v2658_v61 = vsel %vm16669_vm4, %v16578_v3, %v2652_v53  ;;  %v1896_v21 = vpop.permute.xlu0 %1895  ;;  %vm16671_vm4 = vcmask 252928  }
 0x411   :  { %2499 = vrot.lane.b32.xlu1 %v12519_v31, %s16513_s4  ;;  %3990 = vmatpush1.msra.mxu0 %v2658_v61 }
 0x412   :  { %2501 = vrot.lane.b32.xlu0 %v13061_v12, %s16513_s4 }
 0x413   :  { %v13191_v46 = vpop.permute.xlu1 %1897 }
 0x414   :  { %v2688_v25 = vpop.permute.xlu0 %2687  ;;  %v1906_v17 = vsel %vm291_vm10, %v1896_v21, %v13191_v46 }
 0x415   :  { %3215 = vrot.lane.b32.xlu1 %v13071_v20, %s16505_s1  ;;  %3932 = vmatprep.subr.mxu1 %v1906_v17 }
 0x416   :  { %2491 = vrot.lane.b32.xlu0 %v12606_v37, %s16513_s4 }
 0x417   :  { %v13199_v3 = vpop.permute.xlu1 %2689 }
 0x418   :  { %v1852_v2 = vpop.permute.xlu0 %1851  ;;  %v2703_v24 = vsel %vm16670_vm9, %v2688_v25, %v13199_v3  ;;  %vm16672_vm9 = vmmov %vm16671_vm4 }
 0x419   :  { %v1858_v56 = vsel %vm291_vm10, %v12731_v11, %v1852_v2  ;;  %2493 = vrot.lane.b32.xlu1 %v13071_v20, %s16513_s4  ;;  %3991 = vmatprep.subr.mxu0 %v2703_v24 }
 0x41a   :  { %3123 = vrot.lane.b32.xlu0 %v13061_v12, %s16514_s18  ;;  %3933 = vmatpush2.msra.mxu1 %v1858_v56 }
 0x41b   :  { %v2644_v59 = vpop.permute.xlu1 %2643 }
 0x41c   :  { %v2655_v60 = vsel %vm16667_vm1, %v16580_v7, %v2644_v59  ;;  %v1888_v19 = vpop.permute.xlu0 %1887  ;;  %vm16673_vm1 = vcmask 760832  }
 0x41d   :  { %10993 = vrot.lane.b32.xlu1 %v16668_v41, %s16514_s18  ;;  %3992 = vmatpush1.msra.mxu0 %v2655_v60 }
 0x41e   :  { %2399 = vrot.lane.b32.xlu0 %v12519_v31, %s16510_s17 }
 0x41f   :  { %v13215_v11 = vpop.permute.xlu1 %1889 }
 0x420   :  { %v2596_v53 = vpop.permute.xlu0 %2595  ;;  %v1903_v61 = vsel %vm291_vm10, %v1888_v19, %v13215_v11 }
 0x421   :  { %2401 = vrot.lane.b32.xlu1 %v13061_v12, %s16510_s17  ;;  %3934 = vmatprep.subr.mxu1 %v1903_v61 }
 0x422   :  { %3115 = vrot.lane.b32.xlu0 %v13071_v20, %s16514_s18 }
 0x423   :  { %v13223_v7 = vpop.permute.xlu1 %2597 }
 0x424   :  { %v1844_v21 = vpop.permute.xlu0 %1843  ;;  %v2606_v25 = vsel %vm16671_vm4, %v2596_v53, %v13223_v7 }
 0x425   :  { %v1855_v17 = vsel %vm291_vm10, %v12754_v32, %v1844_v21  ;;  %2391 = vrot.lane.b32.xlu1 %v12606_v37, %s16510_s17  ;;  %3993 = vmatprep.subr.mxu0 %v2606_v25  ;;  %v16675_v25 = vld [vmem:[#allocation32_spill] sm:$0xff] }
 0x426   :  { %2393 = vrot.lane.b32.xlu0 %v13071_v20, %s16510_s17  ;;  %3935 = vmatpush2.msra.mxu1 %v1855_v17 }
 0x427   :  { %v2552_v2 = vpop.permute.xlu1 %2551 }
 0x428   :  { %v2558_v24 = vsel %vm16672_vm9, %v12207_v44, %v2552_v2  ;;  %v1796_v56 = vpop.permute.xlu0 %1795  ;;  %vm16674_vm9 = vmmov %vm16673_vm1 }
 0x429   :  { %3023 = vrot.lane.b32.xlu1 %v13061_v12, %s16512_s19  ;;  %3994 = vmatpush1.msra.mxu0 %v2558_v24 }
 0x42a   :  { %10998 = vrot.lane.b32.xlu0 %v16668_v41, %s16512_s19 }
 0x42b   :  { %v13239_v32 = vpop.permute.xlu1 %1797 }
 0x42c   :  { %v2588_v59 = vpop.permute.xlu0 %2587  ;;  %v1806_v60 = vsel %vm16673_vm1, %v1796_v56, %v13239_v32  ;;  %vm16676_vm1 = vmmov %vm16671_vm4 }
 0x42d   :  { %2299 = vrot.lane.b32.xlu1 %v12519_v31, %s16511_s7  ;;  %3936 = vmatprep.subr.mxu1 %v1806_v60 }
 0x42e   :  { %2301 = vrot.lane.b32.xlu0 %v13061_v12, %s16511_s7 }
 0x42f   :  { %v13247_v44 = vpop.permute.xlu1 %2589 }
 0x430   :  { %v1752_v19 = vpop.permute.xlu0 %1751  ;;  %v2603_v53 = vsel %vm16671_vm4, %v2588_v59, %v13247_v44  ;;  %vm16677_vm4 = vmmov %vm16674_vm9 }
 0x431   :  { %v1758_v61 = vsel %vm16674_vm9, %v12781_v26, %v1752_v19  ;;  %3015 = vrot.lane.b32.xlu1 %v13071_v20, %s16512_s19  ;;  %3995 = vmatprep.subr.mxu0 %v2603_v53  ;;  %vm16678_vm9 = vmmov %vm16677_vm4 }
 0x432   :  { %2291 = vrot.lane.b32.xlu0 %v12606_v37, %s16511_s7  ;;  %3937 = vmatpush2.msra.mxu1 %v1758_v61 }
 0x433   :  { %v2544_v21 = vpop.permute.xlu1 %2543 }
 0x434   :  { %v2555_v17 = vsel %vm16676_vm1, %v16675_v25, %v2544_v21  ;;  %v1788_v2 = vpop.permute.xlu0 %1787  ;;  %v16679_v21 = vld [vmem:[#allocation61_spill] sm:$0xff]  ;;  %vm16690_vm1 = vcmask 490496  }
 0x435   :  { %2293 = vrot.lane.b32.xlu1 %v13071_v20, %s16511_s7  ;;  %3996 = vmatpush1.msra.mxu0 %v2555_v17 }
 0x436   :  { %2199 = vrot.lane.b32.xlu0 %v12519_v31, %s16508_s21 }
 0x437   :  { %v13263_v26 = vpop.permute.xlu1 %1789 }
 0x438   :  { %v3320_v24 = vpop.permute.xlu0 %3319  ;;  %v1803_v56 = vsel %vm16677_vm4, %v1788_v2, %v13263_v26  ;;  %vm16692_vm4 = vmmov %vm16690_vm1 }
 0x439   :  { %2201 = vrot.lane.b32.xlu1 %v13061_v12, %s16508_s21  ;;  %3938 = vmatprep.subr.mxu1 %v1803_v56 }
 0x43a   :  { %2191 = vrot.lane.b32.xlu0 %v12606_v37, %s16508_s21 }
 0x43b   :  { %v13271_v59 = vpop.permute.xlu1 %3321 }
 0x43c   :  { %v1744_v60 = vpop.permute.xlu0 %1743  ;;  %v3330_v19 = vsel %vm186_vm2, %v3320_v24, %v13271_v59  ;;  %v16680_v24 = vld [vmem:[#allocation47_spill] sm:$0xff] }
 0x43d   :  { %v1755_v53 = vsel %vm16678_vm9, %v12800_v18, %v1744_v60  ;;  %2193 = vrot.lane.b32.xlu1 %v13071_v20, %s16508_s21  ;;  %4025 = vmatprep.subr.mxu0 %v3330_v19  ;;  %v16681_v60 = vld [vmem:[#allocation22_spill] sm:$0xff]  ;;  %vm16695_vm9 = vmmov %vm16690_vm1 }
 0x43e   :  { %2899 = vrot.lane.b32.xlu0 %v12519_v31, %s16502_s0  ;;  %3939 = vmatpush2.msra.mxu1 %v1755_v53 }
 0x43f   :  { %3941 = vmatmul.mubr.f32.vlgmr.msra.gmra.mxu1 %v12810_v51  ;;  %v3276_v61 = vpop.permute.xlu1 %3275 }
 0x440   :  { %v3282_v25 = vsel %vm186_vm2, %v16679_v21, %v3276_v61  ;;  %v3312_v17 = vpop.permute.xlu0 %3311  ;;  %3946 = vmatprep.mubr.f32.mxu1 %v12927_v23 }
 0x441   :  { %2901 = vrot.lane.b32.xlu1 %v13061_v12, %s16502_s0  ;;  %4026 = vmatpush2.msra.mxu0 %v3282_v25 }
 0x442   :  { %2099 = vrot.lane.b32.xlu0 %v12519_v31, %s16509_s22 }
 0x443   :  { %3947 = vmatmul.mubr.f32.gmra.mxu1 %v12940_v36  ;;  %v13290_v18 = vpop.permute.xlu1 %3313 }
 0x444   :  { %v3268_v2 = vpop.permute.xlu0 %3267  ;;  %3952 = vmatprep.mubr.f32.mxu1 %v12962_v29  ;;  %v3327_v51 = vsel %vm186_vm2, %v3312_v17, %v13290_v18  ;;  %v13305_v29 = vld [vmem:[%s16561_s20 + $0x10] sm:$0xff] }
 0x445   :  { %v3279_v23 = vsel %vm186_vm2, %v16680_v24, %v3268_v2  ;;  %2101 = vrot.lane.b32.xlu1 %v13061_v12, %s16509_s22  ;;  %4027 = vmatprep.subr.mxu0 %v3327_v51 }
 0x446   :  { %2891 = vrot.lane.b32.xlu0 %v12606_v37, %s16502_s0  ;;  %4028 = vmatpush2.msra.mxu0 %v3279_v23 }
 0x447   :  { %3953 = vmatmul.mubr.f32.gmra.mxu1 %v12974_v62  ;;  %v1700_v36 = vpop.permute.xlu1 %1699  ;;  %4030 = vmatmul.mubr.f32.vlgmr.msra.gmra.mxu0 %v13305_v29 }
 0x448   :  { %v1702_v56 = vpop.permute.xlu0 %1701  ;;  %3958 = vmatprep.mubr.f32.mxu1 %v12993_v39  ;;  %10832 = vmatprep.mubr.msk.f32.mxu0 %vm3685_vm0, %v12906_v35  ;;  %v1707_v19 = vsel %vm249_vm13, %v16681_v60, %v1700_v36 }
 0x449   :  { %2893 = vrot.lane.b32.xlu1 %v13071_v20, %s16502_s0  ;;  %v1708_v62 = vsel %vm249_vm13, %v1700_v36, %v1702_v56 }
 0x44a   :  { %2091 = vrot.lane.b32.xlu0 %v12606_v37, %s16509_s22  ;;  %4054 = vmatprep.subr.mxu0 %v1708_v62 }
 0x44b   :  { %3959 = vmatmul.mubr.f32.gmra.mxu1 %v13001_v63  ;;  %4055 = vmatpush1.msra.mxu0 %v1707_v19  ;;  %v1692_v53 = vpop.permute.xlu1 %1691 }
 0x44c   :  { %4036 = vmatmul.mubr.f32.gmra.mxu0 %v12915_v58  ;;  %v1694_v39 = vpop.permute.xlu0 %1693  ;;  %v1704_v35 = vsel %vm249_vm13, %v12384_v14, %v1692_v53  ;;  %10835 = vmatprep.mubr.msk.f32.mxu1 %vm3685_vm0, %v13016_v1 }
 0x44d   :  { %2093 = vrot.lane.b32.xlu1 %v13071_v20, %s16509_s22  ;;  %v1705_v61 = vsel %vm249_vm13, %v1692_v53, %v1694_v39  ;;  %10833 = vmatprep.mubr.msk.f32.mxu0 %vm3685_vm0, %v12932_v16 }
 0x44e   :  { %2799 = vrot.lane.b32.xlu0 %v12519_v31, %s16503_s28  ;;  %4056 = vmatprep.subr.mxu0 %v1705_v61 }
 0x44f   :  { %4057 = vmatpush1.msra.mxu0 %v1704_v35  ;;  %v1600_v58 = vpop.permute.xlu1 %1599 }
 0x450   :  { %4042 = vmatmul.mubr.f32.gmra.mxu0 %v12945_v22  ;;  %v1602_v14 = vpop.permute.xlu0 %1601  ;;  %v1607_v1 = vsel %vm16469_vm14, %v12485_v49, %v1600_v58 }
 0x451   :  { %2801 = vrot.lane.b32.xlu1 %v13061_v12, %s16503_s28  ;;  %v1608_v63 = vsel %vm16469_vm14, %v1600_v58, %v1602_v14  ;;  %10834 = vmatprep.mubr.msk.f32.mxu0 %vm3685_vm0, %v12967_v45  ;;  %v11049_v45 = vld [vmem:[%s16561_s20 + $0x8] sm:$0xff] }
 0x452   :  { %1999 = vrot.lane.b32.xlu0 %v12519_v31, %s16506_s5  ;;  %4058 = vmatprep.subr.mxu0 %v1608_v63 }
 0x453   :  { %4059 = vmatpush1.msra.mxu0 %v1607_v1  ;;  %v1592_v16 = vpop.permute.xlu1 %1591 }
 0x454   :  { %4048 = vmatmul.mubr.f32.gmra.mxu0 %v12979_v6  ;;  %v1594_v22 = vpop.permute.xlu0 %1593  ;;  %v1604_v49 = vsel %vm16469_vm14, %v12410_v43, %v1592_v16 }
 0x455   :  { %2001 = vrot.lane.b32.xlu1 %v13061_v12, %s16506_s5  ;;  %v1605_v21 = vsel %vm16469_vm14, %v1592_v16, %v1594_v22  ;;  %4118 = vmatprep.mubr.f32.mxu0 %v11049_v45 }
 0x456   :  { %2791 = vrot.lane.b32.xlu0 %v12606_v37, %s16503_s28  ;;  %4060 = vmatprep.subr.mxu0 %v1605_v21 }
 0x457   :  { %4061 = vmatpush1.msra.mxu0 %v1604_v49  ;;  %v1500_v6 = vpop.permute.xlu1 %1499 }
 0x458   :  { %v1502_v25 = vpop.permute.xlu0 %1501  ;;  %v1507_v43 = vsel %vm16468_vm15, %v12511_v9, %v1500_v6 }
 0x459   :  { %2793 = vrot.lane.b32.xlu1 %v13071_v20, %s16503_s28  ;;  %v1508_v17 = vsel %vm16468_vm15, %v1500_v6, %v1502_v25  ;;  %v16682_v25 = vld [vmem:[#allocation38_spill] sm:$0xff] }
 0x45a   :  { %1991 = vrot.lane.b32.xlu0 %v12606_v37, %s16506_s5  ;;  %4062 = vmatprep.subr.mxu0 %v1508_v17 }
 0x45b   :  { %4063 = vmatpush1.msra.mxu0 %v1507_v43  ;;  %v1492_v2 = vpop.permute.xlu1 %1491 }
 0x45c   :  { %v1494_v51 = vpop.permute.xlu0 %1493  ;;  %v1504_v24 = vsel %vm16468_vm15, %v12432_v27, %v1492_v2 }
 0x45d   :  { %1993 = vrot.lane.b32.xlu1 %v13071_v20, %s16506_s5  ;;  %v1505_v9 = vsel %vm16468_vm15, %v1492_v2, %v1494_v51  ;;  %v16683_v51 = vld [vmem:[#allocation25_spill] sm:$0xff]  ;;  %vm16696_vm15 = vmmov %vm16690_vm1 }
 0x45e   :  { %2699 = vrot.lane.b32.xlu0 %v12519_v31, %s16500_s26  ;;  %4064 = vmatprep.subr.mxu0 %v1505_v9 }
 0x45f   :  { %4065 = vmatpush1.msra.mxu0 %v1504_v24  ;;  %v1400_v23 = vpop.permute.xlu1 %1399 }
 0x460   :  { %v1402_v36 = vpop.permute.xlu0 %1401  ;;  %v1407_v56 = vsel %vm186_vm2, %v12588_v55, %v1400_v23 }
 0x461   :  { %2701 = vrot.lane.b32.xlu1 %v13061_v12, %s16500_s26  ;;  %v1408_v27 = vsel %vm186_vm2, %v1400_v23, %v1402_v36 }
 0x462   :  { %1899 = vrot.lane.b32.xlu0 %v12519_v31, %s16507_s25  ;;  %4066 = vmatprep.subr.mxu0 %v1408_v27  ;;  %v3664_v27 = vld [vmem:[%s16684_s10 + $0x18] sm:$0xff] }
 0x463   :  { %4067 = vmatpush1.msra.mxu0 %v1407_v56  ;;  %v1392_v60 = vpop.permute.xlu1 %1391 }
 0x464   :  { %v1394_v19 = vpop.permute.xlu0 %1393  ;;  %v1404_v62 = vsel %vm186_vm2, %v12631_v38, %v1392_v60 }
 0x465   :  { %1901 = vrot.lane.b32.xlu1 %v13061_v12, %s16507_s25  ;;  %v1405_v55 = vsel %vm186_vm2, %v1392_v60, %v1394_v19 }
 0x466   :  { %2691 = vrot.lane.b32.xlu0 %v12606_v37, %s16500_s26  ;;  %4068 = vmatprep.subr.mxu0 %v1405_v55 }
 0x467   :  { %4069 = vmatpush1.msra.mxu0 %v1404_v62  ;;  %v1300_v53 = vpop.permute.xlu1 %1299 }
 0x468   :  { %v1302_v39 = vpop.permute.xlu0 %1301  ;;  %v1307_v35 = vsel %vm165_vm8, %v12654_v4, %v1300_v53 }
 0x469   :  { %2693 = vrot.lane.b32.xlu1 %v13071_v20, %s16500_s26  ;;  %v1308_v38 = vsel %vm165_vm8, %v1300_v53, %v1302_v39  ;;  %v16685_v53 = vld [vmem:[#allocation40_spill] sm:$0xff] }
 0x46a   :  { %1891 = vrot.lane.b32.xlu0 %v12606_v37, %s16507_s25  ;;  %4070 = vmatprep.subr.mxu0 %v1308_v38 }
 0x46b   :  { %4071 = vmatpush1.msra.mxu0 %v1307_v35  ;;  %v1292_v61 = vpop.permute.xlu1 %1291  ;;  %v16686_v35 = vld [vmem:[#allocation23_spill] sm:$0xff] }
 0x46c   :  { %v1294_v58 = vpop.permute.xlu0 %1293  ;;  %v1304_v14 = vsel %vm165_vm8, %v12677_v30, %v1292_v61 }
 0x46d   :  { %1893 = vrot.lane.b32.xlu1 %v13071_v20, %s16507_s25  ;;  %v1305_v4 = vsel %vm165_vm8, %v1292_v61, %v1294_v58  ;;  %v3662_v61 = vld [vmem:[%s16684_s10 + $0x8] sm:$0xff] }
 0x46e   :  { %2599 = vrot.lane.b32.xlu0 %v12519_v31, %s16501_s2  ;;  %4072 = vmatprep.subr.mxu0 %v1305_v4 }
 0x46f   :  { %4073 = vmatpush1.msra.mxu0 %v1304_v14  ;;  %v1200_v1 = vpop.permute.xlu1 %1199  ;;  %v3661_v14 = vld [vmem:[%s16684_s10] sm:$0xff] }
 0x470   :  { %v1202_v63 = vpop.permute.xlu0 %1201  ;;  %v1207_v16 = vsel %vm144_vm7, %v12700_v33, %v1200_v1 }
 0x471   :  { %2601 = vrot.lane.b32.xlu1 %v13061_v12, %s16501_s2  ;;  %v1208_v30 = vsel %vm144_vm7, %v1200_v1, %v1202_v63  ;;  %v16687_v63 = vld [vmem:[#allocation24_spill] sm:$0xff] }
 0x472   :  { %1799 = vrot.lane.b32.xlu0 %v12519_v31, %s16504_s23  ;;  %4074 = vmatprep.subr.mxu0 %v1208_v30 }
 0x473   :  { %4075 = vmatpush1.msra.mxu0 %v1207_v16  ;;  %v1192_v22 = vpop.permute.xlu1 %1191 }
 0x474   :  { %v1194_v49 = vpop.permute.xlu0 %1193  ;;  %v1204_v21 = vsel %vm144_vm7, %v12723_v40, %v1192_v22 }
 0x475   :  { %1801 = vrot.lane.b32.xlu1 %v13061_v12, %s16504_s23  ;;  %v1205_v33 = vsel %vm144_vm7, %v1192_v22, %v1194_v49 }
 0x476   :  { %2591 = vrot.lane.b32.xlu0 %v12606_v37, %s16501_s2  ;;  %4076 = vmatprep.subr.mxu0 %v1205_v33 }
 0x477   :  { %4077 = vmatpush1.msra.mxu0 %v1204_v21  ;;  %v1100_v45 = vpop.permute.xlu1 %1099  ;;  %v16688_v21 = vld [vmem:[#allocation57_spill] sm:$0xff] }
 0x478   :  { %v1102_v6 = vpop.permute.xlu0 %1101  ;;  %v1107_v43 = vsel %vm123_vm6, %v16682_v25, %v1100_v45 }
 0x479   :  { %2593 = vrot.lane.b32.xlu1 %v13071_v20, %s16501_s2  ;;  %v1108_v40 = vsel %vm123_vm6, %v1100_v45, %v1102_v6 }
 0x47a   :  { %1791 = vrot.lane.b32.xlu0 %v12606_v37, %s16504_s23  ;;  %4078 = vmatprep.subr.mxu0 %v1108_v40 }
 0x47b   :  { %4079 = vmatpush1.msra.mxu0 %v1107_v43  ;;  %v1092_v17 = vpop.permute.xlu1 %1091 }
 0x47c   :  { %v1094_v2 = vpop.permute.xlu0 %1093  ;;  %v1104_v24 = vsel %vm123_vm6, %v16683_v51, %v1092_v17 }
 0x47d   :  { %1793 = vrot.lane.b32.xlu1 %v13071_v20, %s16504_s23  ;;  %v1105_v9 = vsel %vm123_vm6, %v1092_v17, %v1094_v2  ;;  %v16689_v2 = vld [vmem:[#allocation54_spill] sm:$0xff] }
 0x47e   :  { %3323 = vrot.lane.b32.xlu0 %v13061_v12, %s16516_s27  ;;  %4080 = vmatprep.subr.mxu0 %v1105_v9 }
 0x47f   :  { %4081 = vmatpush1.msra.mxu0 %v1104_v24  ;;  %v3224_v23 = vpop.permute.xlu1 %3223 }
 0x480   :  { %4082 = vmatprep.subr.mxu0 %v12519_v31  ;;  %v10989_v36 = vpop.permute.xlu0 %10988  ;;  %v3231_v39 = vsel %vm165_vm8, %v16685_v53, %v3224_v23 }
 0x481   :  { %v10990_v56 = vunpack.i.l.bf16 %v10989_v36  ;;  %4083 = vmatpush1.msra.mxu0 %v12101_v13  ;;  %11003 = vrot.lane.b32.xlu1 %v16668_v41, %s16516_s27  ;;  %v3663_v13 = vld [vmem:[%s16684_s10 + $0x10] sm:$0xff]  ;;  %v10991_v62 = vunpack.i.h.bf16 %v10989_v36  ;;  %v16691_v36 = vld [vmem:[#allocation27_spill] sm:$0xff] }
 0x482   :  { %3315 = vrot.lane.b32.xlu0 %v13071_v20, %s16516_s27  ;;  %4084 = vmatprep.subr.mxu0 %v12606_v37 }
 0x483   :  { %4085 = vmatpush1.msra.mxu0 %v12071_v10  ;;  %v2500_v60 = vpop.permute.xlu1 %2499  ;;  %v3232_v19 = vsel %vm165_vm8, %v3224_v23, %v10990_v56 }
 0x484   :  { %v2502_v55 = vpop.permute.xlu0 %2501  ;;  %4143 = vmatprep.subr.mxu1 %v3232_v19  ;;  %v2507_v38 = vsel %vm417_vm12, %v16686_v35, %v2500_v60 }
 0x485   :  { %4144 = vmatpush1.msra.mxu1 %v3231_v39  ;;  %3682 = vperm.xlu1 %10986, %v3664_v27   ;;  %v2508_v10 = vsel %vm417_vm12, %v2500_v60, %v2502_v55  ;;  %v16693_v27 = vld [vmem:[#allocation41_spill] sm:$0xff] }
 0x486   :  { %3677 = vperm.xlu0 %10985, %v3663_v13   ;;  %4086 = vmatprep.subr.mxu0 %v2508_v10 }
 0x487   :  { %4087 = vmatpush2.msra.mxu0 %v2507_v38  ;;  %v3216_v58 = vpop.permute.xlu1 %3215 }
 0x488   :  { %v2492_v4 = vpop.permute.xlu0 %2491  ;;  %v3229_v1 = vsel %vm165_vm8, %v3216_v58, %v10991_v62  ;;  %v3228_v16 = vsel %vm165_vm8, %v16687_v63, %v3216_v58  ;;  %v16694_v62 = vld [vmem:[#allocation31_spill] sm:$0xff]  ;;  %v16698_v63 = vld [vmem:[#allocation29_spill] sm:$0xff] }
 0x489   :  { %3672 = vperm.xlu1 %10986, %v3662_v61   ;;  %4145 = vmatprep.subr.mxu1 %v3229_v1  ;;  %v2504_v33 = vsel %vm417_vm12, %v16688_v21, %v2492_v4 }
 0x48a   :  { %3667 = vperm.xlu0 %10985, %v3661_v14   ;;  %4146 = vmatpush1.msra.mxu1 %v3228_v16 }
 0x48b   :  { %v2494_v30 = vpop.permute.xlu1 %2493 }
 0x48c   :  { %v3124_v22 = vpop.permute.xlu0 %3123  ;;  %v2505_v49 = vsel %vm417_vm12, %v2492_v4, %v2494_v30  ;;  %v16697_v4 = vld [vmem:[#allocation42_spill] sm:$0xff] }
 0x48d   :  { %4088 = vmatprep.subr.mxu0 %v2505_v49  ;;  %v3131_v51 = vsel %vm144_vm7, %v16689_v2, %v3124_v22 }
 0x48e   :  { %4089 = vmatpush2.msra.mxu0 %v2504_v33 }
 0x48f   :  { %v10994_v45 = vpop.permute.xlu1 %10993 }
 0x490   :  { %v10995_v6 = vunpack.i.l.bf16 %v10994_v45  ;;  %v2400_v25 = vpop.permute.xlu0 %2399  ;;  %v10996_v43 = vunpack.i.h.bf16 %v10994_v45 }
 0x491   :  { %v2407_v56 = vsel %vm16692_vm4, %v16691_v36, %v2400_v25 }
 0x492   :  { %v3132_v40 = vsel %vm144_vm7, %v3124_v22, %v10995_v6 }
 0x493   :  { %v2402_v17 = vpop.permute.xlu1 %2401  ;;  %4147 = vmatprep.subr.mxu1 %v3132_v40 }
 0x494   :  { %v3116_v24 = vpop.permute.xlu0 %3115  ;;  %4148 = vmatpush1.msra.mxu1 %v3131_v51  ;;  %v2408_v9 = vsel %vm16690_vm1, %v2400_v25, %v2402_v17  ;;  %vm16699_vm1 = vcmask 498688  }
 0x495   :  { %4090 = vmatprep.subr.mxu0 %v2408_v9  ;;  %v3129_v23 = vsel %vm144_vm7, %v3116_v24, %v10996_v43  ;;  %v3128_v60 = vsel %vm144_vm7, %v16693_v27, %v3116_v24  ;;  %vm16700_vm4 = vmmov %vm16699_vm1 }
 0x496   :  { %4149 = vmatprep.subr.mxu1 %v3129_v23  ;;  %4091 = vmatpush2.msra.mxu0 %v2407_v56 }
 0x497   :  { %4150 = vmatpush1.msra.mxu1 %v3128_v60  ;;  %v2392_v19 = vpop.permute.xlu1 %2391 }
 0x498   :  { %v2394_v13 = vpop.permute.xlu0 %2393  ;;  %v2404_v55 = vsel %vm16695_vm9, %v16694_v62, %v2392_v19  ;;  %vm16702_vm9 = vmmov %vm16699_vm1 }
 0x499   :  { %v2405_v53 = vsel %vm16696_vm15, %v2392_v19, %v2394_v13  ;;  %vm16701_vm15 = vmmov %vm16699_vm1 }
 0x49a   :  { %4092 = vmatprep.subr.mxu0 %v2405_v53 }
 0x49b   :  { %4093 = vmatpush2.msra.mxu0 %v2404_v55  ;;  %v3024_v39 = vpop.permute.xlu1 %3023 }
 0x49c   :  { %v10999_v35 = vpop.permute.xlu0 %10998  ;;  %v3031_v1 = vsel %vm123_vm6, %v16697_v4, %v3024_v39 }
 0x49d   :  { %v11000_v38 = vunpack.i.l.bf16 %v10999_v35  ;;  %v11001_v58 = vunpack.i.h.bf16 %v10999_v35 }
 0x49f   :  { %v2300_v10 = vpop.permute.xlu1 %2299  ;;  %v3032_v61 = vsel %vm123_vm6, %v3024_v39, %v11000_v38 }
 0x4a0   :  { %v2302_v14 = vpop.permute.xlu0 %2301  ;;  %4151 = vmatprep.subr.mxu1 %v3032_v61  ;;  %v2307_v16 = vsel %vm16699_vm1, %v16698_v63, %v2300_v10  ;;  %vm16703_vm1 = vcmask 506880  }
 0x4a1   :  { %4152 = vmatpush1.msra.mxu1 %v3031_v1  ;;  %v2308_v30 = vsel %vm16700_vm4, %v2300_v10, %v2302_v14  ;;  %vm16704_vm4 = vmmov %vm16703_vm1 }
 0x4a2   :  { %4094 = vmatprep.subr.mxu0 %v2308_v30  ;;  %vm16706_vm14 = vmmov %vm16703_vm1 }
 0x4a3   :  { %4095 = vmatpush2.msra.mxu0 %v2307_v16  ;;  %v3016_v22 = vpop.permute.xlu1 %3015 }
 0x4a4   :  { %v2292_v49 = vpop.permute.xlu0 %2291  ;;  %v3029_v21 = vsel %vm123_vm6, %v3016_v22, %v11001_v58  ;;  %v3028_v33 = vsel %vm123_vm6, %v13020_v0, %v3016_v22 }
 0x4a5   :  { %4153 = vmatprep.subr.mxu1 %v3029_v21  ;;  %v2304_v43 = vsel %vm16702_vm9, %v13037_v52, %v2292_v49  ;;  %vm16707_vm9 = vcmask 515072  }
 0x4a6   :  { %4154 = vmatpush1.msra.mxu1 %v3028_v33 }
 0x4a7   :  { %v2294_v45 = vpop.permute.xlu1 %2293  ;;  %4155 = vmatprep.subr.mxu1 %v13061_v12 }
 0x4a8   :  { %v2200_v6 = vpop.permute.xlu0 %2199  ;;  %4156 = vmatpush1.msra.mxu1 %v12519_v31  ;;  %v2305_v25 = vsel %vm16701_vm15, %v2292_v49, %v2294_v45  ;;  %vm16705_vm15 = vmmov %vm16703_vm1 }
 0x4a9   :  { %4096 = vmatprep.subr.mxu0 %v2305_v25  ;;  %4157 = vmatprep.subr.mxu1 %v13071_v20  ;;  %v2207_v12 = vsel %vm16704_vm4, %v13051_v48, %v2200_v6 }
 0x4aa   :  { %4097 = vmatpush2.msra.mxu0 %v2304_v43  ;;  %4158 = vmatpush1.msra.mxu1 %v12606_v37 }
 0x4ab   :  { %v2202_v0 = vpop.permute.xlu1 %2201 }
 0x4ac   :  { %v2192_v40 = vpop.permute.xlu0 %2191  ;;  %v2208_v17 = vsel %vm16703_vm1, %v2200_v6, %v2202_v0  ;;  %vm16708_vm1 = vmmov %vm16707_vm9 }
 0x4ad   :  { %4098 = vmatprep.subr.mxu0 %v2208_v17  ;;  %v2204_v52 = vsel %vm16706_vm14, %v13069_v15, %v2192_v40  ;;  %vm16709_vm14 = vmmov %vm16708_vm1  ;;  %v13522_v17 = vpop.f32.mrf.mxu1 }
 0x4ae   :  { %4099 = vmatpush2.msra.mxu0 %v2207_v12  ;;  %vm16710_vm4 = vmmov %vm16708_vm1 }
 0x4af   :  { %v2194_v31 = vpop.permute.xlu1 %2193 }
 0x4b0   :  { %v2900_v2 = vpop.permute.xlu0 %2899  ;;  %v2205_v51 = vsel %vm16705_vm15, %v2192_v40, %v2194_v31  ;;  %vm16711_vm15 = vcmask 244736   ;;  %v13526_v31 = vpop.f32.mrf.mxu0 }
 0x4b1   :  { %4100 = vmatprep.subr.mxu0 %v2205_v51  ;;  %v2907_v9 = vsel %vm501_vm5, %v13079_v50, %v2900_v2 }
 0x4b2   :  { %4101 = vmatpush2.msra.mxu0 %v2204_v52  ;;  %v13529_v52 = vpop.f32.mrf.mxu1 }
 0x4b3   :  { %v2902_v20 = vpop.permute.xlu1 %2901 }
 0x4b4   :  { %v2100_v37 = vpop.permute.xlu0 %2099  ;;  %v2908_v24 = vsel %vm501_vm5, %v2900_v2, %v2902_v20 }
 0x4b5   :  { %4159 = vmatprep.subr.mxu1 %v2908_v24  ;;  %v2107_v56 = vsel %vm16708_vm1, %v13095_v54, %v2100_v37  ;;  %v13535_v24 = vpop.f32.mrf.mxu0 }
 0x4b6   :  { %4160 = vmatpush1.msra.mxu1 %v2907_v9 }
 0x4b7   :  { %v2102_v48 = vpop.permute.xlu1 %2101 }
 0x4b8   :  { %v2892_v23 = vpop.permute.xlu0 %2891  ;;  %v2108_v36 = vsel %vm16707_vm9, %v2100_v37, %v2102_v48  ;;  %vm16712_vm9 = vmmov %vm16711_vm15  ;;  %v13533_v37 = vpop.f32.mrf.mxu1 }
 0x4b9   :  { %4102 = vmatprep.subr.mxu0 %v2108_v36  ;;  %v2904_v19 = vsel %vm501_vm5, %v13103_v42, %v2892_v23  ;;  %vm16713_vm1 = vmmov %vm16712_vm9 }
 0x4ba   :  { %4103 = vmatpush2.msra.mxu0 %v2107_v56  ;;  %v13542_v56 = vpop.f32.mrf.mxu1 }
 0x4bb   :  { %v2894_v15 = vpop.permute.xlu1 %2893 }
 0x4bc   :  { %v2092_v27 = vpop.permute.xlu0 %2091  ;;  %v2905_v60 = vsel %vm501_vm5, %v2892_v23, %v2894_v15  ;;  %v13540_v23 = vpop.f32.mrf.mxu0 }
 0x4bd   :  { %4161 = vmatprep.subr.mxu1 %v2905_v60  ;;  %v2104_v55 = vsel %vm16710_vm4, %v13119_v5, %v2092_v27  ;;  %vm16715_vm4 = vcmask 252928  }
 0x4be   :  { %4162 = vmatpush1.msra.mxu1 %v2904_v19  ;;  %v13547_v60 = vpop.f32.mrf.mxu0 }
 0x4bf   :  { %v2094_v50 = vpop.permute.xlu1 %2093 }
 0x4c0   :  { %v2800_v13 = vpop.permute.xlu0 %2799  ;;  %v2105_v62 = vsel %vm16709_vm14, %v2092_v27, %v2094_v50  ;;  %vm16714_vm14 = vmmov %vm16713_vm1  ;;  %v13549_v50 = vpop.f32.mrf.mxu1 }
 0x4c1   :  { %4104 = vmatprep.subr.mxu0 %v2105_v62  ;;  %v2807_v35 = vsel %vm480_vm3, %v13127_v8, %v2800_v13 }
 0x4c2   :  { %4105 = vmatpush2.msra.mxu0 %v2104_v55  ;;  %v13554_v55 = vpop.f32.mrf.mxu0 }
 0x4c3   :  { %v2802_v54 = vpop.permute.xlu1 %2801 }
 0x4c4   :  { %v2000_v53 = vpop.permute.xlu0 %1999  ;;  %v2808_v39 = vsel %vm480_vm3, %v2800_v13, %v2802_v54 }
 0x4c5   :  { %4163 = vmatprep.subr.mxu1 %v2808_v39  ;;  %v2007_v61 = vsel %vm312_vm11, %v13143_v47, %v2000_v53 }
 0x4c6   :  { %4164 = vmatpush1.msra.mxu1 %v2807_v35 }
 0x4c7   :  { %v2002_v42 = vpop.permute.xlu1 %2001 }
 0x4c8   :  { %v2792_v38 = vpop.permute.xlu0 %2791  ;;  %v2008_v10 = vsel %vm312_vm11, %v2000_v53, %v2002_v42  ;;  %v13559_v53 = vpop.f32.mrf.mxu1  ;;  %v11051_v42 = vld [vmem:[%s16561_s20 + $0x28] sm:$0xff] }
 0x4c9   :  { %4106 = vmatprep.subr.mxu0 %v2008_v10  ;;  %v2804_v4 = vsel %vm480_vm3, %v13151_v34, %v2792_v38  ;;  %v3778_v10 = vpop.f32.mrf.mxu0 }
 0x4ca   :  { %4107 = vmatpush2.msra.mxu0 %v2007_v61  ;;  %v11052_v61 = vld [vmem:[%s16561_s20 + $0x20] sm:$0xff] }
 0x4cb   :  { %v2794_v5 = vpop.permute.xlu1 %2793 }
 0x4cc   :  { %v1992_v58 = vpop.permute.xlu0 %1991  ;;  %v2805_v14 = vsel %vm480_vm3, %v2792_v38, %v2794_v5 }
 0x4cd   :  { %4165 = vmatprep.subr.mxu1 %v2805_v14  ;;  %v2004_v16 = vsel %vm312_vm11, %v13167_v28, %v1992_v58 }
 0x4ce   :  { %4166 = vmatpush1.msra.mxu1 %v2804_v4  ;;  %v11053_v4 = vld [vmem:[%s16561_s20 + $0x48] sm:$0xff] }
 0x4cf   :  { %v1994_v8 = vpop.permute.xlu1 %1993 }
 0x4d0   :  { %v2700_v1 = vpop.permute.xlu0 %2699  ;;  %v2005_v63 = vsel %vm312_vm11, %v1992_v58, %v1994_v8  ;;  %v3871_v58 = vpop.f32.mrf.mxu1 }
 0x4d1   :  { %4108 = vmatprep.subr.mxu0 %v2005_v63  ;;  %v2707_v49 = vsel %vm16712_vm9, %v13175_v57, %v2700_v1  ;;  %vm16717_vm9 = vcmask 760832   ;;  %v11054_v63 = vld [vmem:[%s16561_s20 + $0x40] sm:$0xff] }
 0x4d2   :  { %4109 = vmatpush2.msra.mxu0 %v2004_v16  ;;  %v11055_v16 = vld [vmem:[%s16561_s20 + $0x68] sm:$0xff] }
 0x4d3   :  { %v2702_v47 = vpop.permute.xlu1 %2701 }
 0x4d4   :  { %v1900_v30 = vpop.permute.xlu0 %1899  ;;  %v2708_v22 = vsel %vm16711_vm15, %v2700_v1, %v2702_v47  ;;  %vm16716_vm15 = vmmov %vm16715_vm4  ;;  %v3782_v1 = vpop.f32.mrf.mxu0  ;;  %v11056_v47 = vld [vmem:[%s16561_s20 + $0x38] sm:$0xff] }
 0x4d5   :  { %4167 = vmatprep.subr.mxu1 %v2708_v22  ;;  %v1907_v45 = vsel %vm291_vm10, %v13191_v46, %v1900_v30  ;;  %v11057_v22 = vld [vmem:[%s16561_s20 + $0x60] sm:$0xff] }
 0x4d6   :  { %4168 = vmatpush1.msra.mxu1 %v2707_v49 }
 0x4d7   :  { %v1902_v34 = vpop.permute.xlu1 %1901 }
 0x4d8   :  { %v2692_v21 = vpop.permute.xlu0 %2691  ;;  %v1908_v33 = vsel %vm291_vm10, %v1900_v30, %v1902_v34  ;;  %v11059_v34 = vld [vmem:[%s16561_s20 + $0x58] sm:$0xff] }
 0x4d9   :  { %4110 = vmatprep.subr.mxu0 %v1908_v33  ;;  %v2704_v43 = vsel %vm16714_vm14, %v13199_v3, %v2692_v21  ;;  %vm16719_vm14 = vmmov %vm16715_vm4 }
 0x4da   :  { %4111 = vmatpush2.msra.mxu0 %v1907_v45 }
 0x4db   :  { %v2694_v28 = vpop.permute.xlu1 %2693 }
 0x4dc   :  { %v1892_v6 = vpop.permute.xlu0 %1891  ;;  %v2705_v25 = vsel %vm16713_vm1, %v2692_v21, %v2694_v28  ;;  %vm16718_vm1 = vmmov %vm16717_vm9 }
 0x4dd   :  { %4169 = vmatprep.subr.mxu1 %v2705_v25  ;;  %v1904_v46 = vsel %vm291_vm10, %v13215_v11, %v1892_v6  ;;  %v11061_v25 = vld [vmem:[%s16561_s20 + $0x78] sm:$0xff] }
 0x4de   :  { %4170 = vmatpush1.msra.mxu1 %v2704_v43 }
 0x4df   :  { %v1894_v57 = vpop.permute.xlu1 %1893 }
 0x4e0   :  { %v2600_v0 = vpop.permute.xlu0 %2599  ;;  %v1905_v40 = vsel %vm291_vm10, %v1892_v6, %v1894_v57  ;;  %v11060_v6 = vld [vmem:[%s16561_s20 + $0x50] sm:$0xff] }
 0x4e1   :  { %4112 = vmatprep.subr.mxu0 %v1905_v40  ;;  %v2607_v3 = vsel %vm16716_vm15, %v13223_v7, %v2600_v0  ;;  %vm16720_vm15 = vmmov %vm16718_vm1 }
 0x4e2   :  { %4113 = vmatpush2.msra.mxu0 %v1904_v46 }
 0x4e3   :  { %v2602_v12 = vpop.permute.xlu1 %2601 }
 0x4e4   :  { %v1800_v2 = vpop.permute.xlu0 %1799  ;;  %v2608_v51 = vsel %vm16715_vm4, %v2600_v0, %v2602_v12 }
 0x4e5   :  { %4171 = vmatprep.subr.mxu1 %v2608_v51  ;;  %v1807_v48 = vsel %vm16718_vm1, %v13239_v32, %v1800_v2 }
 0x4e6   :  { %4172 = vmatpush1.msra.mxu1 %v2607_v3 }
 0x4e7   :  { %v1802_v20 = vpop.permute.xlu1 %1801 }
 0x4e8   :  { %v2592_v11 = vpop.permute.xlu0 %2591  ;;  %v1808_v9 = vsel %vm16717_vm9, %v1800_v2, %v1802_v20  ;;  %vm16721_vm9 = vmmov %vm16718_vm1  ;;  %v11062_v2 = vld [vmem:[%s16561_s20 + $0x70] sm:$0xff]  ;;  %vm16722_vm1 = vcmask 515072  }
 0x4e9   :  { %4114 = vmatprep.subr.mxu0 %v1808_v9  ;;  %v2604_v27 = vsel %vm16715_vm4, %v13247_v44, %v2592_v11  ;;  %v11050_v44 = vld [vmem:[%s16561_s20] sm:$0xff]  ;;  %vm16724_vm4 = vmmov %vm16722_vm1 }
 0x4ea   :  { %4115 = vmatpush2.msra.mxu0 %v1807_v48 }
 0x4eb   :  { %v2594_v36 = vpop.permute.xlu1 %2593 }
 0x4ec   :  { %v1792_v7 = vpop.permute.xlu0 %1791  ;;  %v2605_v15 = vsel %vm16719_vm14, %v2592_v11, %v2594_v36  ;;  %vm16723_vm14 = vmmov %vm16722_vm1 }
 0x4ed   :  { %4173 = vmatprep.subr.mxu1 %v2605_v15  ;;  %v1804_v62 = vsel %vm16721_vm9, %v13263_v26, %v1792_v7  ;;  %vm16726_vm9 = vmmov %vm16722_vm1 }
 0x4ee   :  { %4174 = vmatpush1.msra.mxu1 %v2604_v27 }
 0x4ef   :  { %v1794_v19 = vpop.permute.xlu1 %1793 }
 0x4f0   :  { %v3324_v32 = vpop.permute.xlu0 %3323  ;;  %v1805_v13 = vsel %vm16720_vm15, %v1792_v7, %v1794_v19  ;;  %vm16725_vm15 = vmmov %vm16722_vm1 }
 0x4f1   :  { %4116 = vmatprep.subr.mxu0 %v1805_v13  ;;  %v3331_v5 = vsel %vm186_vm2, %v13271_v59, %v3324_v32  ;;  %v3873_v59 = vpop.f32.mrf.mxu1 }
 0x4f2   :  { %4117 = vmatpush2.msra.mxu0 %v1804_v62 }
 0x4f3   :  { %v11004_v54 = vpop.permute.xlu1 %11003  ;;  %4119 = vmatmul.mubr.f32.vlgmr.msra.gmra.mxu0 %v11050_v44 }
 0x4f4   :  { %v11006_v39 = vunpack.i.h.bf16 %v11004_v54  ;;  %v11005_v35 = vunpack.i.l.bf16 %v11004_v54  ;;  %4124 = vmatprep.mubr.f32.mxu0 %v11051_v42  ;;  %v3316_v38 = vpop.permute.xlu0 %3315 }
 0x4f5   :  { %v3328_v8 = vsel %vm186_vm2, %v13290_v18, %v3316_v38  ;;  %v3784_v18 = vpop.f32.mrf.mxu0 }
 0x4f6   :  { %v3332_v26 = vsel %vm186_vm2, %v3324_v32, %v11005_v35  ;;  %v3329_v14 = vsel %vm186_vm2, %v3316_v38, %v11006_v39 }
 0x4f7   :  { %4125 = vmatmul.mubr.f32.gmra.mxu0 %v11052_v61  ;;  %4203 = vmatprep.subr.mxu1 %v3332_v26 }
 0x4f8   :  { %4204 = vmatpush2.msra.mxu1 %v3331_v5  ;;  %4130 = vmatprep.mubr.f32.mxu0 %v11053_v4 }
 0x4f9   :  { %4205 = vmatprep.subr.mxu1 %v3329_v14 }
 0x4fa   :  { %4206 = vmatpush2.msra.mxu1 %v3328_v8 }
 0x4fb   :  { %4131 = vmatmul.mubr.f32.gmra.mxu0 %v11054_v63  ;;  %4208 = vmatmul.mubr.f32.vlgmr.msra.gmra.mxu1 %v13305_v29  ;;  %v11058_v29 = vld [vmem:[%s16561_s20 + $0x30] sm:$0xff] }
 0x4fc   :  { %4136 = vmatprep.mubr.f32.mxu0 %v11055_v16  ;;  %10836 = vmatprep.mubr.msk.f32.mxu1 %vm3685_vm0, %v11056_v47 }
 0x4ff   :  { %v13587_v30 = vpop.f32.mrf.mxu1  ;;  %4137 = vmatmul.mubr.f32.gmra.mxu0 %v11057_v22  ;;  %4214 = vmatmul.mubr.f32.gmra.mxu1 %v11058_v29 }
 0x500   :  { %v13595_v49 = vpop.permute.xlu1 %3682  ;;  %10837 = vmatprep.mubr.msk.f32.mxu1 %vm3685_vm0, %v11059_v34 }
 0x501   :  { %v3785_v21 = vadd.f32 %v3784_v18, %v13595_v49  ;;  %v13602_v33 = vpop.f32.mrf.mxu1  ;;  %v3783_v43 = vadd.f32 %v3782_v1, %v13595_v49  ;;  %v13616_v40 = vpop.permute.xlu0 %3677 }
 0x502   :  { %v3779_v3 = vadd.f32 %v3778_v10, %v13616_v40  ;;  %v3777_v62 = vadd.f32 %v13554_v55, %v13616_v40 }
 0x503   :  { %v3874_v45 = vadd.f32 %v3873_v59, %v3785_v21  ;;  %v13604_v28 = vpop.f32.mrf.mxu1  ;;  %4220 = vmatmul.mubr.f32.gmra.mxu1 %v11060_v6  ;;  %v3872_v51 = vadd.f32 %v3871_v58, %v3783_v43 }
 0x504   :  { %10838 = vmatprep.mubr.msk.f32.mxu1 %vm3685_vm0, %v11061_v25  ;;  %v13628_v11 = vpop.permute.xlu1 %3672  ;;  %v3868_v7 = vadd.f32 %v13559_v53, %v3779_v3  ;;  %v3866_v38 = vadd.f32 %v13549_v50, %v3777_v62 }
 0x505   :  { %v13614_v57 = vmax.f32 %v3874_v45, 0.0  ;;  %v3950_v0 = vpop.f32.mrf.mxu1  ;;  %v13632_v36 = vmax.f32 %v3872_v51, 0.0  ;;  %v3773_v26 = vadd.f32 %v13547_v60, %v13628_v11  ;;  %v3771_v50 = vadd.f32 %v13540_v23, %v13628_v11  ;;  %v13671_v14 = vpop.permute.xlu0 %3667 }
 0x506   :  { %v3951_v15 = vadd.f32 %v3950_v0, %v13628_v11  ;;  %v13642_v54 = vmax.f32 %v3868_v7, 0.0  ;;  %v13657_v61 = vmax.f32 %v3866_v38, 0.0  ;;  %v3767_v8 = vadd.f32 %v13535_v24, %v13671_v14 }
 0x507   :  { %5796 = vrot.lane.b32.xlu1 %v13614_v57, %s16509_s22  ;;  %v13620_v46 = vpop.f32.mrf.mxu0  ;;  %v3954_v12 = vpop.f32.mrf.mxu1  ;;  %4226 = vmatmul.mubr.f32.gmra.mxu1 %v11062_v2  ;;  %v3862_v5 = vadd.f32 %v13542_v56, %v3773_v26  ;;  %v3860_v56 = vadd.f32 %v13533_v37, %v3771_v50  ;;  %v3765_v37 = vadd.f32 %v13526_v31, %v13671_v14 }
 0x508   :  { %v3955_v58 = vadd.f32 %v3954_v12, %v13616_v40  ;;  %v3856_v63 = vadd.f32 %v13529_v52, %v3767_v8  ;;  %v3949_v59 = vadd.f32 %v13604_v28, %v13628_v11  ;;  %v3943_v18 = vadd.f32 %v13587_v30, %v13671_v14 }
 0x509   :  { %v13626_v20 = vpop.f32.mrf.mxu0  ;;  %v3956_v9 = vpop.f32.mrf.mxu1  ;;  %v13666_v60 = vmax.f32 %v3862_v5, 0.0  ;;  %v13684_v1 = vmax.f32 %v3860_v56, 0.0  ;;  %v3854_v52 = vadd.f32 %v13522_v17, %v3765_v37 }
 0x50a   :  { %v3957_v44 = vadd.f32 %v3956_v9, %v13616_v40  ;;  %v13693_v24 = vmax.f32 %v3856_v63, 0.0  ;;  %v4032_v17 = vadd.f32 %v13620_v46, %v3943_v18 }
 0x50b   :  { %4644 = vrot.lane.b32.xlu1 %v13614_v57, %s16505_s1  ;;  %v3960_v32 = vpop.f32.mrf.mxu1  ;;  %v13708_v31 = vmax.f32 %v3854_v52, 0.0 }
 0x50c   :  { %v4037_v48 = vpop.f32.mrf.mxu0  ;;  %v3961_v53 = vadd.f32 %v3960_v32, %v13595_v49  ;;  %v13723_v22 = vmax.f32 %v4032_v17, 0.0 }
 0x50d   :  { %v4038_v16 = vadd.f32 %v4037_v48, %v3949_v59 }
 0x50e   :  { %v4039_v27 = vpop.f32.mrf.mxu0 }
 0x50f   :  { %v13636_v19 = vadd.f32 %v4039_v27, %v3951_v15  ;;  %5794 = vrot.lane.b32.xlu1 %v13632_v36, %s16509_s22  ;;  %v13704_v47 = vmax.f32 %v4038_v16, 0.0 }
 0x510   :  { %v4043_v13 = vpop.f32.mrf.mxu0 }
 0x511   :  { %v4044_v4 = vadd.f32 %v4043_v13, %v3955_v58 }
 0x512   :  { %v4045_v39 = vpop.f32.mrf.mxu0 }
 0x513   :  { %v13646_v35 = vadd.f32 %v4045_v39, %v3957_v44  ;;  %5790 = vrot.lane.b32.xlu1 %v13642_v54, %s16509_s22  ;;  %v13680_v23 = vmax.f32 %v4044_v4, 0.0 }
 0x514   :  { %v4049_v42 = vpop.f32.mrf.mxu0 }
 0x515   :  { %v4050_v10 = vadd.f32 %v4049_v42, %v3961_v53 }
 0x517   :  { %v13653_v55 = vmax.f32 %v4050_v10, 0.0  ;;  %4638 = vrot.lane.b32.xlu1 %v13642_v54, %s16505_s1 }
 0x519   :  { %5798 = vrot.lane.b32.xlu0 %v13653_v55, %s16509_s22 }
 0x51b   :  { %5788 = vrot.lane.b32.xlu1 %v13657_v61, %s16509_s22 }
 0x51d   :  { %4646 = vrot.lane.b32.xlu0 %v13653_v55, %s16505_s1 }
 0x51f   :  { %5784 = vrot.lane.b32.xlu1 %v13666_v60, %s16509_s22 }
 0x521   :  { %4642 = vrot.lane.b32.xlu0 %v13632_v36, %s16505_s1 }
 0x523   :  { %4632 = vrot.lane.b32.xlu1 %v13666_v60, %s16505_s1 }
 0x525   :  { %5792 = vrot.lane.b32.xlu0 %v13680_v23, %s16509_s22 }
 0x527   :  { %5782 = vrot.lane.b32.xlu1 %v13684_v1, %s16509_s22 }
 0x529   :  { %4640 = vrot.lane.b32.xlu0 %v13680_v23, %s16505_s1 }
 0x52b   :  { %5778 = vrot.lane.b32.xlu1 %v13693_v24, %s16509_s22 }
 0x52d   :  { %4636 = vrot.lane.b32.xlu0 %v13657_v61, %s16505_s1 }
 0x52f   :  { %4626 = vrot.lane.b32.xlu1 %v13693_v24, %s16505_s1 }
 0x531   :  { %5786 = vrot.lane.b32.xlu0 %v13704_v47, %s16509_s22 }
 0x533   :  { %5776 = vrot.lane.b32.xlu1 %v13708_v31, %s16509_s22 }
 0x535   :  { %4634 = vrot.lane.b32.xlu0 %v13704_v47, %s16505_s1 }
 0x537   :  { %5652 = vrot.lane.b32.xlu1 %v13614_v57, %s16506_s5 }
 0x539   :  { %4630 = vrot.lane.b32.xlu0 %v13684_v1, %s16505_s1 }
 0x53b   :  { %4500 = vrot.lane.b32.xlu1 %v13614_v57, %s16514_s18 }
 0x53d   :  { %5780 = vrot.lane.b32.xlu0 %v13723_v22, %s16509_s22 }
 0x53f   :  { %5650 = vrot.lane.b32.xlu1 %v13632_v36, %s16506_s5 }
 0x541   :  { %4628 = vrot.lane.b32.xlu0 %v13723_v22, %s16505_s1 }
 0x543   :  { %5646 = vrot.lane.b32.xlu1 %v13642_v54, %s16506_s5 }
 0x545   :  { %4624 = vrot.lane.b32.xlu0 %v13708_v31, %s16505_s1 }
 0x547   :  { %4494 = vrot.lane.b32.xlu1 %v13642_v54, %s16514_s18 }
 0x549   :  { %5654 = vrot.lane.b32.xlu0 %v13653_v55, %s16506_s5 }
 0x54b   :  { %5644 = vrot.lane.b32.xlu1 %v13657_v61, %s16506_s5 }
 0x54d   :  { %4502 = vrot.lane.b32.xlu0 %v13653_v55, %s16514_s18 }
 0x54f   :  { %5640 = vrot.lane.b32.xlu1 %v13666_v60, %s16506_s5 }
 0x551   :  { %4498 = vrot.lane.b32.xlu0 %v13632_v36, %s16514_s18 }
 0x553   :  { %4488 = vrot.lane.b32.xlu1 %v13666_v60, %s16514_s18 }
 0x555   :  { %5648 = vrot.lane.b32.xlu0 %v13680_v23, %s16506_s5 }
 0x557   :  { %5638 = vrot.lane.b32.xlu1 %v13684_v1, %s16506_s5 }
 0x559   :  { %4496 = vrot.lane.b32.xlu0 %v13680_v23, %s16514_s18 }
 0x55b   :  { %5634 = vrot.lane.b32.xlu1 %v13693_v24, %s16506_s5 }
 0x55d   :  { %4492 = vrot.lane.b32.xlu0 %v13657_v61, %s16514_s18 }
 0x55f   :  { %4482 = vrot.lane.b32.xlu1 %v13693_v24, %s16514_s18 }
 0x561   :  { %5642 = vrot.lane.b32.xlu0 %v13704_v47, %s16506_s5 }
 0x563   :  { %5632 = vrot.lane.b32.xlu1 %v13708_v31, %s16506_s5 }
 0x565   :  { %4490 = vrot.lane.b32.xlu0 %v13704_v47, %s16514_s18 }
 0x567   :  { %5508 = vrot.lane.b32.xlu1 %v13614_v57, %s16507_s25 }
 0x569   :  { %4486 = vrot.lane.b32.xlu0 %v13684_v1, %s16514_s18 }
 0x56b   :  { %4356 = vrot.lane.b32.xlu1 %v13614_v57, %s16512_s19 }
 0x56d   :  { %5636 = vrot.lane.b32.xlu0 %v13723_v22, %s16506_s5 }
 0x56f   :  { %5506 = vrot.lane.b32.xlu1 %v13632_v36, %s16507_s25 }
 0x571   :  { %4484 = vrot.lane.b32.xlu0 %v13723_v22, %s16514_s18 }
 0x573   :  { %5502 = vrot.lane.b32.xlu1 %v13642_v54, %s16507_s25 }
 0x575   :  { %4480 = vrot.lane.b32.xlu0 %v13708_v31, %s16514_s18 }
 0x577   :  { %4350 = vrot.lane.b32.xlu1 %v13642_v54, %s16512_s19 }
 0x579   :  { %5510 = vrot.lane.b32.xlu0 %v13653_v55, %s16507_s25  ;;  %v5797_v30 = vpop.permute.xlu1 %5796 }
 0x57b   :  { %5500 = vrot.lane.b32.xlu1 %v13657_v61, %s16507_s25 }
 0x57d   :  { %4358 = vrot.lane.b32.xlu0 %v13653_v55, %s16512_s19  ;;  %v4645_v29 = vpop.permute.xlu1 %4644 }
 0x57f   :  { %5496 = vrot.lane.b32.xlu1 %v13666_v60, %s16507_s25 }
 0x581   :  { %4354 = vrot.lane.b32.xlu0 %v13632_v36, %s16512_s19  ;;  %v5795_v34 = vpop.permute.xlu1 %5794 }
 0x582   :  { %v5806_v25 = vsel %vm16723_vm14, %v5795_v34, %v5797_v30  ;;  %vm16727_vm14 = vmmov %vm16722_vm1 }
 0x583   :  { %4344 = vrot.lane.b32.xlu1 %v13666_v60, %s16512_s19 }
 0x585   :  { %5504 = vrot.lane.b32.xlu0 %v13680_v23, %s16507_s25  ;;  %v5791_v21 = vpop.permute.xlu1 %5790 }
 0x587   :  { %5494 = vrot.lane.b32.xlu1 %v13684_v1, %s16507_s25 }
 0x589   :  { %4352 = vrot.lane.b32.xlu0 %v13680_v23, %s16512_s19  ;;  %v4639_v45 = vpop.permute.xlu1 %4638 }
 0x58b   :  { %v5799_v28 = vpop.permute.xlu0 %5798  ;;  %5490 = vrot.lane.b32.xlu1 %v13693_v24, %s16507_s25 }
 0x58c   :  { %v5807_v6 = vsel %vm16722_vm1, %v5797_v30, %v5799_v28 }
 0x58d   :  { %4348 = vrot.lane.b32.xlu0 %v13657_v61, %s16512_s19  ;;  %8297 = vmatprep.subr.mxu0 %v5807_v6  ;;  %v5789_v43 = vpop.permute.xlu1 %5788 }
 0x58e   :  { %8298 = vmatpush1.msra.mxu0 %v5806_v25  ;;  %v5804_v7 = vsel %vm16725_vm15, %v5789_v43, %v5791_v21  ;;  %vm16729_vm15 = vcmask 760832  }
 0x58f   :  { %v4647_v0 = vpop.permute.xlu0 %4646  ;;  %4338 = vrot.lane.b32.xlu1 %v13693_v24, %s16512_s19 }
 0x590   :  { %v4655_v46 = vsel %vm165_vm8, %v4645_v29, %v4647_v0 }
 0x591   :  { %5498 = vrot.lane.b32.xlu0 %v13704_v47, %s16507_s25  ;;  %8184 = vmatprep.subr.mxu1 %v4655_v46  ;;  %v5785_v12 = vpop.permute.xlu1 %5784 }
 0x593   :  { %v4643_v2 = vpop.permute.xlu0 %4642  ;;  %5488 = vrot.lane.b32.xlu1 %v13708_v31, %s16507_s25 }
 0x594   :  { %v4654_v51 = vsel %vm165_vm8, %v4643_v2, %v4645_v29 }
 0x595   :  { %4346 = vrot.lane.b32.xlu0 %v13704_v47, %s16512_s19  ;;  %8185 = vmatpush1.msra.mxu1 %v4654_v51  ;;  %v4633_v3 = vpop.permute.xlu1 %4632 }
 0x597   :  { %v5793_v9 = vpop.permute.xlu0 %5792  ;;  %5364 = vrot.lane.b32.xlu1 %v13614_v57, %s16504_s23 }
 0x598   :  { %v5805_v48 = vsel %vm16724_vm4, %v5791_v21, %v5793_v9  ;;  %vm16728_vm4 = vmmov %vm16722_vm1 }
 0x599   :  { %4342 = vrot.lane.b32.xlu0 %v13684_v1, %s16512_s19  ;;  %8299 = vmatprep.subr.mxu0 %v5805_v48  ;;  %v5783_v15 = vpop.permute.xlu1 %5782 }
 0x59a   :  { %8300 = vmatpush1.msra.mxu0 %v5804_v7  ;;  %v5802_v38 = vsel %vm16722_vm1, %v5783_v15, %v5785_v12 }
 0x59b   :  { %v4641_v27 = vpop.permute.xlu0 %4640  ;;  %5362 = vrot.lane.b32.xlu1 %v13632_v36, %s16504_s23 }
 0x59c   :  { %v4653_v32 = vsel %vm165_vm8, %v4639_v45, %v4641_v27 }
 0x59d   :  { %5492 = vrot.lane.b32.xlu0 %v13723_v22, %s16507_s25  ;;  %8186 = vmatprep.subr.mxu1 %v4653_v32  ;;  %v5779_v13 = vpop.permute.xlu1 %5778 }
 0x59f   :  { %v4637_v62 = vpop.permute.xlu0 %4636  ;;  %5360 = vrot.lane.b32.xlu1 %v13680_v23, %s16504_s23 }
 0x5a0   :  { %v4652_v44 = vsel %vm165_vm8, %v4637_v62, %v4639_v45 }
 0x5a1   :  { %4340 = vrot.lane.b32.xlu0 %v13723_v22, %s16512_s19  ;;  %8187 = vmatpush1.msra.mxu1 %v4652_v44  ;;  %v4627_v39 = vpop.permute.xlu1 %4626 }
 0x5a3   :  { %v5787_v53 = vpop.permute.xlu0 %5786  ;;  %5352 = vrot.lane.b32.xlu1 %v13666_v60, %s16504_s23 }
 0x5a4   :  { %v5803_v42 = vsel %vm16726_vm9, %v5785_v12, %v5787_v53  ;;  %vm16730_vm9 = vmmov %vm16729_vm15 }
 0x5a5   :  { %4336 = vrot.lane.b32.xlu0 %v13708_v31, %s16512_s19  ;;  %8301 = vmatprep.subr.mxu0 %v5803_v42  ;;  %v5777_v26 = vpop.permute.xlu1 %5776  ;;  %vm16731_vm1 = vmmov %vm16730_vm9 }
 0x5a6   :  { %8302 = vmatpush1.msra.mxu0 %v5802_v38  ;;  %v5800_v37 = vsel %vm16728_vm4, %v5777_v26, %v5779_v13  ;;  %vm16733_vm4 = vmmov %vm16731_vm1 }
 0x5a7   :  { %v4635_v10 = vpop.permute.xlu0 %4634  ;;  %5350 = vrot.lane.b32.xlu1 %v13684_v1, %s16504_s23 }
 0x5a8   :  { %v4651_v5 = vsel %vm165_vm8, %v4633_v3, %v4635_v10 }
 0x5a9   :  { %5366 = vrot.lane.b32.xlu0 %v13653_v55, %s16504_s23  ;;  %8188 = vmatprep.subr.mxu1 %v4651_v5  ;;  %v5653_v50 = vpop.permute.xlu1 %5652 }
 0x5ab   :  { %v4631_v58 = vpop.permute.xlu0 %4630  ;;  %5348 = vrot.lane.b32.xlu1 %v13723_v22, %s16504_s23 }
 0x5ac   :  { %v4650_v4 = vsel %vm165_vm8, %v4631_v58, %v4633_v3 }
 0x5ad   :  { %5358 = vrot.lane.b32.xlu0 %v13642_v54, %s16504_s23  ;;  %8189 = vmatpush1.msra.mxu1 %v4650_v4  ;;  %v4501_v56 = vpop.permute.xlu1 %4500 }
 0x5af   :  { %v5781_v8 = vpop.permute.xlu0 %5780  ;;  %6372 = vrot.lane.b32.xlu1 %v13614_v57, %s16513_s4 }
 0x5b0   :  { %v5801_v63 = vsel %vm16727_vm14, %v5779_v13, %v5781_v8  ;;  %vm16732_vm14 = vmmov %vm16731_vm1 }
 0x5b1   :  { %5356 = vrot.lane.b32.xlu0 %v13657_v61, %s16504_s23  ;;  %8303 = vmatprep.subr.mxu0 %v5801_v63  ;;  %v5651_v59 = vpop.permute.xlu1 %5650 }
 0x5b2   :  { %8304 = vmatpush1.msra.mxu0 %v5800_v37  ;;  %v5662_v45 = vsel %vm312_vm11, %v5651_v59, %v5653_v50 }
 0x5b3   :  { %v4629_v16 = vpop.permute.xlu0 %4628  ;;  %5220 = vrot.lane.b32.xlu1 %v13614_v57, %s16517_s12 }
 0x5b4   :  { %v4649_v52 = vsel %vm165_vm8, %v4627_v39, %v4629_v16 }
 0x5b5   :  { %5354 = vrot.lane.b32.xlu0 %v13704_v47, %s16504_s23  ;;  %8190 = vmatprep.subr.mxu1 %v4649_v52  ;;  %v5647_v18 = vpop.permute.xlu1 %5646 }
 0x5b7   :  { %v4625_v17 = vpop.permute.xlu0 %4624  ;;  %6370 = vrot.lane.b32.xlu1 %v13632_v36, %s16513_s4 }
 0x5b8   :  { %v4648_v30 = vsel %vm165_vm8, %v4625_v17, %v4627_v39 }
 0x5b9   :  { %5346 = vrot.lane.b32.xlu0 %v13693_v24, %s16504_s23  ;;  %8191 = vmatpush1.msra.mxu1 %v4648_v30  ;;  %v4495_v29 = vpop.permute.xlu1 %4494 }
 0x5bb   :  { %v5655_v34 = vpop.permute.xlu0 %5654  ;;  %6366 = vrot.lane.b32.xlu1 %v13642_v54, %s16513_s4 }
 0x5bc   :  { %v5663_v21 = vsel %vm312_vm11, %v5653_v50, %v5655_v34 }
 0x5bd   :  { %5344 = vrot.lane.b32.xlu0 %v13708_v31, %s16504_s23  ;;  %8305 = vmatprep.subr.mxu0 %v5663_v21  ;;  %v5645_v28 = vpop.permute.xlu1 %5644 }
 0x5be   :  { %8306 = vmatpush1.msra.mxu0 %v5662_v45  ;;  %v5660_v3 = vsel %vm312_vm11, %v5645_v28, %v5647_v18 }
 0x5bf   :  { %v4503_v6 = vpop.permute.xlu0 %4502  ;;  %5214 = vrot.lane.b32.xlu1 %v13642_v54, %s16517_s12 }
 0x5c0   :  { %v4511_v25 = vsel %vm144_vm7, %v4501_v56, %v4503_v6 }
 0x5c1   :  { %6374 = vrot.lane.b32.xlu0 %v13653_v55, %s16513_s4  ;;  %8192 = vmatprep.subr.mxu1 %v4511_v25  ;;  %v5641_v43 = vpop.permute.xlu1 %5640 }
 0x5c3   :  { %v4499_v0 = vpop.permute.xlu0 %4498  ;;  %6364 = vrot.lane.b32.xlu1 %v13657_v61, %s16513_s4 }
 0x5c4   :  { %v4510_v46 = vsel %vm144_vm7, %v4499_v0, %v4501_v56 }
 0x5c5   :  { %5222 = vrot.lane.b32.xlu0 %v13653_v55, %s16517_s12  ;;  %8193 = vmatpush1.msra.mxu1 %v4510_v46  ;;  %v4489_v12 = vpop.permute.xlu1 %4488 }
 0x5c7   :  { %v5649_v2 = vpop.permute.xlu0 %5648  ;;  %6360 = vrot.lane.b32.xlu1 %v13666_v60, %s16513_s4 }
 0x5c8   :  { %v5661_v51 = vsel %vm312_vm11, %v5647_v18, %v5649_v2 }
 0x5c9   :  { %5218 = vrot.lane.b32.xlu0 %v13632_v36, %s16517_s12  ;;  %8307 = vmatprep.subr.mxu0 %v5661_v51  ;;  %v5639_v9 = vpop.permute.xlu1 %5638 }
 0x5ca   :  { %8308 = vmatpush1.msra.mxu0 %v5660_v3  ;;  %v5658_v39 = vsel %vm312_vm11, %v5639_v9, %v5641_v43 }
 0x5cb   :  { %v4497_v48 = vpop.permute.xlu0 %4496  ;;  %5208 = vrot.lane.b32.xlu1 %v13666_v60, %s16517_s12 }
 0x5cc   :  { %v4509_v7 = vsel %vm144_vm7, %v4495_v29, %v4497_v48 }
 0x5cd   :  { %6368 = vrot.lane.b32.xlu0 %v13680_v23, %s16513_s4  ;;  %8194 = vmatprep.subr.mxu1 %v4509_v7  ;;  %v5635_v15 = vpop.permute.xlu1 %5634 }
 0x5cf   :  { %v4493_v27 = vpop.permute.xlu0 %4492  ;;  %6358 = vrot.lane.b32.xlu1 %v13684_v1, %s16513_s4 }
 0x5d0   :  { %v4508_v32 = vsel %vm144_vm7, %v4493_v27, %v4495_v29 }
 0x5d1   :  { %5216 = vrot.lane.b32.xlu0 %v13680_v23, %s16517_s12  ;;  %8195 = vmatpush1.msra.mxu1 %v4508_v32  ;;  %v4483_v13 = vpop.permute.xlu1 %4482 }
 0x5d3   :  { %v5643_v62 = vpop.permute.xlu0 %5642  ;;  %6354 = vrot.lane.b32.xlu1 %v13693_v24, %s16513_s4 }
 0x5d4   :  { %v5659_v44 = vsel %vm312_vm11, %v5641_v43, %v5643_v62 }
 0x5d5   :  { %5212 = vrot.lane.b32.xlu0 %v13657_v61, %s16517_s12  ;;  %8309 = vmatprep.subr.mxu0 %v5659_v44  ;;  %v5633_v53 = vpop.permute.xlu1 %5632 }
 0x5d6   :  { %8310 = vmatpush1.msra.mxu0 %v5658_v39  ;;  %v5656_v56 = vsel %vm312_vm11, %v5633_v53, %v5635_v15 }
 0x5d7   :  { %v4491_v42 = vpop.permute.xlu0 %4490  ;;  %5202 = vrot.lane.b32.xlu1 %v13693_v24, %s16517_s12 }
 0x5d8   :  { %v4507_v38 = vsel %vm144_vm7, %v4489_v12, %v4491_v42 }
 0x5d9   :  { %6362 = vrot.lane.b32.xlu0 %v13704_v47, %s16513_s4  ;;  %8196 = vmatprep.subr.mxu1 %v4507_v38  ;;  %v5509_v26 = vpop.permute.xlu1 %5508 }
 0x5db   :  { %v4487_v10 = vpop.permute.xlu0 %4486  ;;  %6352 = vrot.lane.b32.xlu1 %v13708_v31, %s16513_s4 }
 0x5dc   :  { %v4506_v5 = vsel %vm144_vm7, %v4487_v10, %v4489_v12 }
 0x5dd   :  { %5210 = vrot.lane.b32.xlu0 %v13704_v47, %s16517_s12  ;;  %8197 = vmatpush1.msra.mxu1 %v4506_v5  ;;  %v4357_v50 = vpop.permute.xlu1 %4356 }
 0x5df   :  { %v5637_v58 = vpop.permute.xlu0 %5636  ;;  %6228 = vrot.lane.b32.xlu1 %v13614_v57, %s16510_s17 }
 0x5e0   :  { %v5657_v4 = vsel %vm312_vm11, %v5635_v15, %v5637_v58 }
 0x5e1   :  { %5206 = vrot.lane.b32.xlu0 %v13684_v1, %s16517_s12  ;;  %8311 = vmatprep.subr.mxu0 %v5657_v4  ;;  %v5507_v8 = vpop.permute.xlu1 %5506 }
 0x5e2   :  { %8312 = vmatpush1.msra.mxu0 %v5656_v56  ;;  %v5518_v29 = vsel %vm291_vm10, %v5507_v8, %v5509_v26 }
 0x5e3   :  { %v4485_v63 = vpop.permute.xlu0 %4484  ;;  %5076 = vrot.lane.b32.xlu1 %v13614_v57, %s16518_s16 }
 0x5e4   :  { %v4505_v37 = vsel %vm144_vm7, %v4483_v13, %v4485_v63 }
 0x5e5   :  { %6356 = vrot.lane.b32.xlu0 %v13723_v22, %s16513_s4  ;;  %8198 = vmatprep.subr.mxu1 %v4505_v37  ;;  %v5503_v59 = vpop.permute.xlu1 %5502 }
 0x5e7   :  { %v4481_v16 = vpop.permute.xlu0 %4480  ;;  %6226 = vrot.lane.b32.xlu1 %v13632_v36, %s16510_s17 }
 0x5e8   :  { %v4504_v52 = vsel %vm144_vm7, %v4481_v16, %v4483_v13 }
 0x5e9   :  { %5204 = vrot.lane.b32.xlu0 %v13723_v22, %s16517_s12  ;;  %8199 = vmatpush1.msra.mxu1 %v4504_v52  ;;  %v4351_v18 = vpop.permute.xlu1 %4350 }
 0x5eb   :  { %v5511_v17 = vpop.permute.xlu0 %5510  ;;  %6222 = vrot.lane.b32.xlu1 %v13642_v54, %s16510_s17 }
 0x5ec   :  { %v5519_v30 = vsel %vm291_vm10, %v5509_v26, %v5511_v17 }
 0x5ed   :  { %5200 = vrot.lane.b32.xlu0 %v13708_v31, %s16517_s12  ;;  %8313 = vmatprep.subr.mxu0 %v5519_v30  ;;  %v5501_v34 = vpop.permute.xlu1 %5500 }
 0x5ee   :  { %8314 = vmatpush1.msra.mxu0 %v5518_v29  ;;  %v5516_v12 = vsel %vm291_vm10, %v5501_v34, %v5503_v59 }
 0x5ef   :  { %v4359_v21 = vpop.permute.xlu0 %4358  ;;  %5070 = vrot.lane.b32.xlu1 %v13642_v54, %s16518_s16 }
 0x5f0   :  { %v4367_v45 = vsel %vm123_vm6, %v4357_v50, %v4359_v21 }
 0x5f1   :  { %6230 = vrot.lane.b32.xlu0 %v13653_v55, %s16510_s17  ;;  %8200 = vmatprep.subr.mxu1 %v4367_v45  ;;  %v5497_v28 = vpop.permute.xlu1 %5496 }
 0x5f3   :  { %v4355_v6 = vpop.permute.xlu0 %4354  ;;  %6220 = vrot.lane.b32.xlu1 %v13657_v61, %s16510_s17 }
 0x5f4   :  { %v4366_v25 = vsel %vm123_vm6, %v4355_v6, %v4357_v50 }
 0x5f5   :  { %5078 = vrot.lane.b32.xlu0 %v13653_v55, %s16518_s16  ;;  %8201 = vmatpush1.msra.mxu1 %v4366_v25  ;;  %v4345_v43 = vpop.permute.xlu1 %4344 }
 0x5f7   :  { %v5505_v0 = vpop.permute.xlu0 %5504  ;;  %6216 = vrot.lane.b32.xlu1 %v13666_v60, %s16510_s17 }
 0x5f8   :  { %v5517_v46 = vsel %vm291_vm10, %v5503_v59, %v5505_v0 }
 0x5f9   :  { %5074 = vrot.lane.b32.xlu0 %v13632_v36, %s16518_s16  ;;  %8315 = vmatprep.subr.mxu0 %v5517_v46  ;;  %v5495_v2 = vpop.permute.xlu1 %5494 }
 0x5fa   :  { %8316 = vmatpush1.msra.mxu0 %v5516_v12  ;;  %v5514_v13 = vsel %vm291_vm10, %v5495_v2, %v5497_v28 }
 0x5fb   :  { %v4353_v51 = vpop.permute.xlu0 %4352  ;;  %5064 = vrot.lane.b32.xlu1 %v13666_v60, %s16518_s16 }
 0x5fc   :  { %v4365_v3 = vsel %vm123_vm6, %v4351_v18, %v4353_v51 }
 0x5fd   :  { %6224 = vrot.lane.b32.xlu0 %v13680_v23, %s16510_s17  ;;  %8202 = vmatprep.subr.mxu1 %v4365_v3  ;;  %v5491_v9 = vpop.permute.xlu1 %5490 }
 0x5ff   :  { %v4349_v48 = vpop.permute.xlu0 %4348  ;;  %6214 = vrot.lane.b32.xlu1 %v13684_v1, %s16510_s17 }
 0x600   :  { %v4364_v7 = vsel %vm123_vm6, %v4349_v48, %v4351_v18 }
 0x601   :  { %5072 = vrot.lane.b32.xlu0 %v13680_v23, %s16518_s16  ;;  %8203 = vmatpush1.msra.mxu1 %v4364_v7  ;;  %v4339_v15 = vpop.permute.xlu1 %4338 }
 0x603   :  { %v5499_v27 = vpop.permute.xlu0 %5498  ;;  %6210 = vrot.lane.b32.xlu1 %v13693_v24, %s16510_s17 }
 0x604   :  { %v5515_v32 = vsel %vm291_vm10, %v5497_v28, %v5499_v27 }
 0x605   :  { %5068 = vrot.lane.b32.xlu0 %v13657_v61, %s16518_s16  ;;  %8317 = vmatprep.subr.mxu0 %v5515_v32  ;;  %v5489_v62 = vpop.permute.xlu1 %5488 }
 0x606   :  { %8318 = vmatpush1.msra.mxu0 %v5514_v13  ;;  %v5512_v50 = vsel %vm291_vm10, %v5489_v62, %v5491_v9 }
 0x607   :  { %v4347_v44 = vpop.permute.xlu0 %4346  ;;  %5058 = vrot.lane.b32.xlu1 %v13693_v24, %s16518_s16 }
 0x608   :  { %v4363_v39 = vsel %vm123_vm6, %v4345_v43, %v4347_v44 }
 0x609   :  { %6218 = vrot.lane.b32.xlu0 %v13704_v47, %s16510_s17  ;;  %8204 = vmatprep.subr.mxu1 %v4363_v39  ;;  %v5365_v53 = vpop.permute.xlu1 %5364 }
 0x60b   :  { %v4343_v42 = vpop.permute.xlu0 %4342  ;;  %6208 = vrot.lane.b32.xlu1 %v13708_v31, %s16510_s17 }
 0x60c   :  { %v4362_v38 = vsel %vm123_vm6, %v4343_v42, %v4345_v43 }
 0x60d   :  { %5066 = vrot.lane.b32.xlu0 %v13704_v47, %s16518_s16  ;;  %8205 = vmatpush1.msra.mxu1 %v4362_v38  ;;  %v5363_v26 = vpop.permute.xlu1 %5362 }
 0x60e   :  { %v5374_v17 = vsel %vm16730_vm9, %v5363_v26, %v5365_v53  ;;  %vm16735_vm9 = vmmov %vm16731_vm1 }
 0x60f   :  { %v5493_v10 = vpop.permute.xlu0 %5492  ;;  %6084 = vrot.lane.b32.xlu1 %v13614_v57, %s16511_s7 }
 0x610   :  { %v5513_v5 = vsel %vm291_vm10, %v5491_v9, %v5493_v10 }
 0x611   :  { %5062 = vrot.lane.b32.xlu0 %v13684_v1, %s16518_s16  ;;  %8319 = vmatprep.subr.mxu0 %v5513_v5  ;;  %v5361_v58 = vpop.permute.xlu1 %5360 }
 0x612   :  { %8320 = vmatpush1.msra.mxu0 %v5512_v50 }
 0x613   :  { %v4341_v4 = vpop.permute.xlu0 %4340  ;;  %4932 = vrot.lane.b32.xlu1 %v13614_v57, %s16515_s13 }
 0x614   :  { %v4361_v56 = vsel %vm123_vm6, %v4339_v15, %v4341_v4 }
 0x615   :  { %6212 = vrot.lane.b32.xlu0 %v13723_v22, %s16510_s17  ;;  %8206 = vmatprep.subr.mxu1 %v4361_v56  ;;  %v5353_v8 = vpop.permute.xlu1 %5352 }
 0x617   :  { %v4337_v63 = vpop.permute.xlu0 %4336  ;;  %6082 = vrot.lane.b32.xlu1 %v13632_v36, %s16511_s7 }
 0x618   :  { %v4360_v37 = vsel %vm123_vm6, %v4337_v63, %v4339_v15 }
 0x619   :  { %5060 = vrot.lane.b32.xlu0 %v13723_v22, %s16518_s16  ;;  %8207 = vmatpush1.msra.mxu1 %v4360_v37  ;;  %v5351_v59 = vpop.permute.xlu1 %5350 }
 0x61a   :  { %8208 = vmatprep.subr.mxu1 %v13614_v57 }
 0x61b   :  { %v5367_v16 = vpop.permute.xlu0 %5366  ;;  %8209 = vmatpush1.msra.mxu1 %v13632_v36  ;;  %6078 = vrot.lane.b32.xlu1 %v13642_v54, %s16511_s7 }
 0x61c   :  { %8210 = vmatprep.subr.mxu1 %v13642_v54  ;;  %v5375_v52 = vsel %vm16729_vm15, %v5365_v53, %v5367_v16  ;;  %vm16734_vm15 = vmmov %vm16731_vm1 }
 0x61d   :  { %5056 = vrot.lane.b32.xlu0 %v13708_v31, %s16518_s16  ;;  %8211 = vmatpush1.msra.mxu1 %v13657_v61  ;;  %v5349_v18 = vpop.permute.xlu1 %5348  ;;  %v5370_v43 = vsel %vm16734_vm15, %v5351_v59, %v5353_v8  ;;  %vm16738_vm15 = vcmask 777216  }
 0x61e   :  { %8321 = vmatprep.subr.mxu0 %v5375_v52  ;;  %8212 = vmatprep.subr.mxu1 %v13666_v60 }
 0x61f   :  { %8322 = vmatpush1.msra.mxu0 %v5374_v17  ;;  %v5359_v30 = vpop.permute.xlu0 %5358  ;;  %8213 = vmatpush1.msra.mxu1 %v13684_v1 }
 0x620   :  { %4926 = vrot.lane.b32.xlu1 %v13642_v54, %s16515_s13  ;;  %8214 = vmatprep.subr.mxu1 %v13693_v24  ;;  %v5373_v29 = vsel %vm16731_vm1, %v5359_v30, %v5361_v58 }
 0x621   :  { %6086 = vrot.lane.b32.xlu0 %v13653_v55, %s16511_s7  ;;  %8215 = vmatpush1.msra.mxu1 %v13708_v31  ;;  %v6373_v34 = vpop.permute.xlu1 %6372 }
 0x622   :  { %8323 = vmatprep.subr.mxu0 %v5373_v29 }
 0x623   :  { %v5357_v21 = vpop.permute.xlu0 %5356 }
 0x624   :  { %v5372_v45 = vsel %vm16732_vm14, %v5357_v21, %v5359_v30  ;;  %6076 = vrot.lane.b32.xlu1 %v13657_v61, %s16511_s7  ;;  %vm16736_vm14 = vcmask 490496  }
 0x625   :  { %4934 = vrot.lane.b32.xlu0 %v13653_v55, %s16515_s13  ;;  %8324 = vmatpush1.msra.mxu0 %v5372_v45  ;;  %v5221_v28 = vpop.permute.xlu1 %5220 }
 0x627   :  { %v5355_v6 = vpop.permute.xlu0 %5354 }
 0x628   :  { %6072 = vrot.lane.b32.xlu1 %v13666_v60, %s16511_s7  ;;  %v5371_v25 = vsel %vm16733_vm4, %v5353_v8, %v5355_v6  ;;  %vm16737_vm4 = vmmov %vm16736_vm14 }
 0x629   :  { %4930 = vrot.lane.b32.xlu0 %v13632_v36, %s16515_s13  ;;  %8325 = vmatprep.subr.mxu0 %v5371_v25  ;;  %v6371_v0 = vpop.permute.xlu1 %6370 }
 0x62a   :  { %8326 = vmatpush1.msra.mxu0 %v5370_v43  ;;  %v6382_v15 = vsel %vm417_vm12, %v6371_v0, %v6373_v34 }
 0x62b   :  { %v5347_v46 = vpop.permute.xlu0 %5346 }
 0x62c   :  { %4920 = vrot.lane.b32.xlu1 %v13666_v60, %s16515_s13  ;;  %v5369_v12 = vsel %vm16735_vm9, %v5347_v46, %v5349_v18  ;;  %vm16739_vm9 = vmmov %vm16738_vm15 }
 0x62d   :  { %6080 = vrot.lane.b32.xlu0 %v13680_v23, %s16511_s7  ;;  %8327 = vmatprep.subr.mxu0 %v5369_v12  ;;  %v6367_v2 = vpop.permute.xlu1 %6366 }
 0x62f   :  { %v5345_v51 = vpop.permute.xlu0 %5344 }
 0x630   :  { %v5368_v3 = vsel %vm16731_vm1, %v5345_v51, %v5347_v46  ;;  %6070 = vrot.lane.b32.xlu1 %v13684_v1, %s16511_s7  ;;  %vm16740_vm1 = vmmov %vm16737_vm4 }
 0x631   :  { %4928 = vrot.lane.b32.xlu0 %v13680_v23, %s16515_s13  ;;  %8328 = vmatpush1.msra.mxu0 %v5368_v3  ;;  %v5215_v9 = vpop.permute.xlu1 %5214 }
 0x633   :  { %v6375_v48 = vpop.permute.xlu0 %6374 }
 0x634   :  { %6066 = vrot.lane.b32.xlu1 %v13693_v24, %s16511_s7  ;;  %v6383_v7 = vsel %vm417_vm12, %v6373_v34, %v6375_v48 }
 0x635   :  { %4924 = vrot.lane.b32.xlu0 %v13657_v61, %s16515_s13  ;;  %8329 = vmatprep.subr.mxu0 %v6383_v7  ;;  %v6365_v27 = vpop.permute.xlu1 %6364 }
 0x636   :  { %8330 = vmatpush2.msra.mxu0 %v6382_v15  ;;  %v6380_v26 = vsel %vm417_vm12, %v6365_v27, %v6367_v2 }
 0x637   :  { %v5223_v32 = vpop.permute.xlu0 %5222 }
 0x638   :  { %4914 = vrot.lane.b32.xlu1 %v13693_v24, %s16515_s13  ;;  %v5231_v13 = vsel %vm249_vm13, %v5221_v28, %v5223_v32 }
 0x639   :  { %6074 = vrot.lane.b32.xlu0 %v13704_v47, %s16511_s7  ;;  %8216 = vmatprep.subr.mxu1 %v5231_v13  ;;  %v6361_v62 = vpop.permute.xlu1 %6360 }
 0x63b   :  { %v5219_v44 = vpop.permute.xlu0 %5218 }
 0x63c   :  { %v5230_v39 = vsel %vm249_vm13, %v5219_v44, %v5221_v28  ;;  %6064 = vrot.lane.b32.xlu1 %v13708_v31, %s16511_s7 }
 0x63d   :  { %4922 = vrot.lane.b32.xlu0 %v13704_v47, %s16515_s13  ;;  %8217 = vmatpush2.msra.mxu1 %v5230_v39  ;;  %v5209_v53 = vpop.permute.xlu1 %5208 }
 0x63f   :  { %v6369_v42 = vpop.permute.xlu0 %6368 }
 0x640   :  { %5940 = vrot.lane.b32.xlu1 %v13614_v57, %s16508_s21  ;;  %v6381_v38 = vsel %vm417_vm12, %v6367_v2, %v6369_v42 }
 0x641   :  { %4918 = vrot.lane.b32.xlu0 %v13684_v1, %s16515_s13  ;;  %8331 = vmatprep.subr.mxu0 %v6381_v38  ;;  %v6359_v10 = vpop.permute.xlu1 %6358 }
 0x642   :  { %8332 = vmatpush2.msra.mxu0 %v6380_v26  ;;  %v6378_v59 = vsel %vm417_vm12, %v6359_v10, %v6361_v62  ;;  %v7657_v10 = vld [vmem:[%s16743_s3 + $0x8] sm:$0xff] }
 0x643   :  { %v5217_v5 = vpop.permute.xlu0 %5216  ;;  %8248 = vmatprep.mubr.f32.mxu1 %v7657_v10 }
 0x644   :  { %4788 = vrot.lane.b32.xlu1 %v13614_v57, %s16516_s27  ;;  %v5229_v50 = vsel %vm249_vm13, %v5215_v9, %v5217_v5 }
 0x645   :  { %6068 = vrot.lane.b32.xlu0 %v13723_v22, %s16511_s7  ;;  %8218 = vmatprep.subr.mxu1 %v5229_v50  ;;  %v6355_v58 = vpop.permute.xlu1 %6354 }
 0x647   :  { %v5213_v4 = vpop.permute.xlu0 %5212 }
 0x648   :  { %v5228_v56 = vsel %vm249_vm13, %v5213_v4, %v5215_v9  ;;  %5938 = vrot.lane.b32.xlu1 %v13632_v36, %s16508_s21 }
 0x649   :  { %4916 = vrot.lane.b32.xlu0 %v13723_v22, %s16515_s13  ;;  %8219 = vmatpush2.msra.mxu1 %v5228_v56  ;;  %v5203_v8 = vpop.permute.xlu1 %5202 }
 0x64b   :  { %v6363_v63 = vpop.permute.xlu0 %6362 }
 0x64c   :  { %5934 = vrot.lane.b32.xlu1 %v13642_v54, %s16508_s21  ;;  %v6379_v37 = vsel %vm417_vm12, %v6361_v62, %v6363_v63 }
 0x64d   :  { %4912 = vrot.lane.b32.xlu0 %v13708_v31, %s16515_s13  ;;  %8333 = vmatprep.subr.mxu0 %v6379_v37  ;;  %v6353_v16 = vpop.permute.xlu1 %6352 }
 0x64e   :  { %8334 = vmatpush2.msra.mxu0 %v6378_v59  ;;  %v6376_v28 = vsel %vm417_vm12, %v6353_v16, %v6355_v58 }
 0x64f   :  { %v5211_v52 = vpop.permute.xlu0 %5210 }
 0x650   :  { %4782 = vrot.lane.b32.xlu1 %v13642_v54, %s16516_s27  ;;  %v5227_v18 = vsel %vm249_vm13, %v5209_v53, %v5211_v52 }
 0x651   :  { %5942 = vrot.lane.b32.xlu0 %v13653_v55, %s16508_s21  ;;  %8220 = vmatprep.subr.mxu1 %v5227_v18  ;;  %v6229_v17 = vpop.permute.xlu1 %6228 }
 0x653   :  { %v5207_v30 = vpop.permute.xlu0 %5206 }
 0x654   :  { %v5226_v29 = vsel %vm249_vm13, %v5207_v30, %v5209_v53  ;;  %5932 = vrot.lane.b32.xlu1 %v13657_v61, %s16508_s21 }
 0x655   :  { %4790 = vrot.lane.b32.xlu0 %v13653_v55, %s16516_s27  ;;  %8221 = vmatpush2.msra.mxu1 %v5226_v29  ;;  %v5077_v34 = vpop.permute.xlu1 %5076 }
 0x657   :  { %v6357_v21 = vpop.permute.xlu0 %6356 }
 0x658   :  { %5928 = vrot.lane.b32.xlu1 %v13666_v60, %s16508_s21  ;;  %v6377_v45 = vsel %vm417_vm12, %v6355_v58, %v6357_v21 }
 0x659   :  { %4786 = vrot.lane.b32.xlu0 %v13632_v36, %s16516_s27  ;;  %8335 = vmatprep.subr.mxu0 %v6377_v45  ;;  %v6227_v6 = vpop.permute.xlu1 %6226 }
 0x65a   :  { %8336 = vmatpush2.msra.mxu0 %v6376_v28  ;;  %v6238_v9 = vsel %vm16737_vm4, %v6227_v6, %v6229_v17  ;;  %vm16742_vm4 = vmmov %vm16739_vm9 }
 0x65b   :  { %v5205_v25 = vpop.permute.xlu0 %5204 }
 0x65c   :  { %4776 = vrot.lane.b32.xlu1 %v13666_v60, %s16516_s27  ;;  %v5225_v43 = vsel %vm249_vm13, %v5203_v8, %v5205_v25 }
 0x65d   :  { %5936 = vrot.lane.b32.xlu0 %v13680_v23, %s16508_s21  ;;  %8222 = vmatprep.subr.mxu1 %v5225_v43  ;;  %v6223_v0 = vpop.permute.xlu1 %6222 }
 0x65f   :  { %v5201_v46 = vpop.permute.xlu0 %5200 }
 0x660   :  { %v5224_v12 = vsel %vm249_vm13, %v5201_v46, %v5203_v8  ;;  %5926 = vrot.lane.b32.xlu1 %v13684_v1, %s16508_s21 }
 0x661   :  { %4784 = vrot.lane.b32.xlu0 %v13680_v23, %s16516_s27  ;;  %8223 = vmatpush2.msra.mxu1 %v5224_v12  ;;  %v5071_v2 = vpop.permute.xlu1 %5070 }
 0x663   :  { %v6231_v51 = vpop.permute.xlu0 %6230 }
 0x664   :  { %5922 = vrot.lane.b32.xlu1 %v13693_v24, %s16508_s21  ;;  %v6239_v3 = vsel %vm16736_vm14, %v6229_v17, %v6231_v51  ;;  %vm16741_vm14 = vmmov %vm16740_vm1 }
 0x665   :  { %4780 = vrot.lane.b32.xlu0 %v13657_v61, %s16516_s27  ;;  %8337 = vmatprep.subr.mxu0 %v6239_v3  ;;  %v6221_v48 = vpop.permute.xlu1 %6220 }
 0x666   :  { %8338 = vmatpush2.msra.mxu0 %v6238_v9  ;;  %v6236_v53 = vsel %vm16741_vm14, %v6221_v48, %v6223_v0  ;;  %vm16746_vm14 = vmmov %vm16742_vm4 }
 0x667   :  { %v5079_v7 = vpop.permute.xlu0 %5078 }
 0x668   :  { %4770 = vrot.lane.b32.xlu1 %v13693_v24, %s16516_s27  ;;  %v5087_v15 = vsel %vm16738_vm15, %v5077_v34, %v5079_v7  ;;  %vm16744_vm15 = vmmov %vm16742_vm4 }
 0x669   :  { %5930 = vrot.lane.b32.xlu0 %v13704_v47, %s16508_s21  ;;  %8224 = vmatprep.subr.mxu1 %v5087_v15  ;;  %v6217_v27 = vpop.permute.xlu1 %6216 }
 0x66b   :  { %v5075_v32 = vpop.permute.xlu0 %5074 }
 0x66c   :  { %v5086_v13 = vsel %vm16739_vm9, %v5075_v32, %v5077_v34  ;;  %5920 = vrot.lane.b32.xlu1 %v13708_v31, %s16508_s21  ;;  %vm16745_vm9 = vmmov %vm16740_vm1 }
 0x66d   :  { %4778 = vrot.lane.b32.xlu0 %v13704_v47, %s16516_s27  ;;  %8225 = vmatpush2.msra.mxu1 %v5086_v13  ;;  %v5065_v62 = vpop.permute.xlu1 %5064 }
 0x66f   :  { %v6225_v44 = vpop.permute.xlu0 %6224 }
 0x670   :  { %6948 = vrot.lane.b32.xlu1 %v13614_v57, %s16502_s0  ;;  %v6237_v39 = vsel %vm16740_vm1, %v6223_v0, %v6225_v44 }
 0x671   :  { %4774 = vrot.lane.b32.xlu0 %v13684_v1, %s16516_s27  ;;  %8339 = vmatprep.subr.mxu0 %v6237_v39  ;;  %v6215_v42 = vpop.permute.xlu1 %6214 }
 0x672   :  { %8340 = vmatpush2.msra.mxu0 %v6236_v53  ;;  %v6234_v63 = vsel %vm16740_vm1, %v6215_v42, %v6217_v27 }
 0x673   :  { %v5073_v38 = vpop.permute.xlu0 %5072 }
 0x674   :  { %6946 = vrot.lane.b32.xlu1 %v13632_v36, %s16502_s0  ;;  %v5085_v26 = vsel %vm16742_vm4, %v5071_v2, %v5073_v38 }
 0x675   :  { %5924 = vrot.lane.b32.xlu0 %v13723_v22, %s16508_s21  ;;  %8226 = vmatprep.subr.mxu1 %v5085_v26  ;;  %v6211_v5 = vpop.permute.xlu1 %6210 }
 0x677   :  { %v5069_v50 = vpop.permute.xlu0 %5068 }
 0x678   :  { %v5084_v58 = vsel %vm16744_vm15, %v5069_v50, %v5071_v2  ;;  %6944 = vrot.lane.b32.xlu1 %v13680_v23, %s16502_s0  ;;  %vm16747_vm15 = vmmov %vm16740_vm1 }
 0x679   :  { %4772 = vrot.lane.b32.xlu0 %v13723_v22, %s16516_s27  ;;  %8227 = vmatpush2.msra.mxu1 %v5084_v58  ;;  %v5059_v4 = vpop.permute.xlu1 %5058 }
 0x67b   :  { %v6219_v56 = vpop.permute.xlu0 %6218 }
 0x67c   :  { %6936 = vrot.lane.b32.xlu1 %v13666_v60, %s16502_s0  ;;  %v6235_v8 = vsel %vm16745_vm9, %v6217_v27, %v6219_v56  ;;  %vm16748_vm9 = vmmov %vm16740_vm1 }
 0x67d   :  { %4768 = vrot.lane.b32.xlu0 %v13708_v31, %s16516_s27  ;;  %8341 = vmatprep.subr.mxu0 %v6235_v8  ;;  %v6209_v37 = vpop.permute.xlu1 %6208  ;;  %vm16749_vm1 = vmmov %vm16742_vm4 }
 0x67e   :  { %8342 = vmatpush2.msra.mxu0 %v6234_v63  ;;  %v6232_v21 = vsel %vm16748_vm9, %v6209_v37, %v6211_v5  ;;  %vm16753_vm9 = vcmask 785408   ;;  %v4051_v63 = vpop.f32.mrf.mxu0 }
 0x67f   :  { %v5067_v59 = vpop.permute.xlu0 %5066 }
 0x680   :  { %6934 = vrot.lane.b32.xlu1 %v13684_v1, %s16502_s0  ;;  %v5083_v16 = vsel %vm16746_vm14, %v5065_v62, %v5067_v59  ;;  %vm16750_vm14 = vmmov %vm16749_vm1 }
 0x681   :  { %6950 = vrot.lane.b32.xlu0 %v13653_v55, %s16502_s0  ;;  %8228 = vmatprep.subr.mxu1 %v5083_v16  ;;  %v6085_v52 = vpop.permute.xlu1 %6084 }
 0x683   :  { %v5063_v18 = vpop.permute.xlu0 %5062 }
 0x684   :  { %v5082_v17 = vsel %vm16742_vm4, %v5063_v18, %v5065_v62  ;;  %6932 = vrot.lane.b32.xlu1 %v13723_v22, %s16502_s0  ;;  %vm16751_vm4 = vcmask 498688  }
 0x685   :  { %6942 = vrot.lane.b32.xlu0 %v13642_v54, %s16502_s0  ;;  %8229 = vmatpush2.msra.mxu1 %v5082_v17  ;;  %v4933_v30 = vpop.permute.xlu1 %4932 }
 0x687   :  { %v6213_v29 = vpop.permute.xlu0 %6212 }
 0x688   :  { %6804 = vrot.lane.b32.xlu1 %v13614_v57, %s16503_s28  ;;  %v6233_v34 = vsel %vm16747_vm15, %v6211_v5, %v6213_v29  ;;  %vm16752_vm15 = vmmov %vm16751_vm4 }
 0x689   :  { %6940 = vrot.lane.b32.xlu0 %v13657_v61, %s16502_s0  ;;  %8343 = vmatprep.subr.mxu0 %v6233_v34  ;;  %v6083_v45 = vpop.permute.xlu1 %6082 }
 0x68a   :  { %8344 = vmatpush2.msra.mxu0 %v6232_v21  ;;  %v6094_v51 = vsel %vm16752_vm15, %v6083_v45, %v6085_v52 }
 0x68b   :  { %v5061_v28 = vpop.permute.xlu0 %5060 }
 0x68c   :  { %6802 = vrot.lane.b32.xlu1 %v13632_v36, %s16503_s28  ;;  %v5081_v6 = vsel %vm16749_vm1, %v5059_v4, %v5061_v28  ;;  %vm16754_vm1 = vmmov %vm16753_vm9  ;;  %v7659_v28 = vld [vmem:[%s16743_s3 + $0x18] sm:$0xff] }
 0x68d   :  { %6938 = vrot.lane.b32.xlu0 %v13704_v47, %s16502_s0  ;;  %8230 = vmatprep.subr.mxu1 %v5081_v6  ;;  %v6079_v25 = vpop.permute.xlu1 %6078  ;;  %vm16756_vm15 = vmmov %vm16754_vm1 }
 0x68e   :  { %8361 = vmatprep.mubr.f32.mxu0 %v7659_v28 }
 0x68f   :  { %v5057_v43 = vpop.permute.xlu0 %5056 }
 0x690   :  { %v5080_v0 = vsel %vm16750_vm14, %v5057_v43, %v5059_v4  ;;  %6800 = vrot.lane.b32.xlu1 %v13680_v23, %s16503_s28  ;;  %vm16755_vm14 = vmmov %vm16751_vm4  ;;  %v3962_v4 = vpop.f32.mrf.mxu1 }
 0x691   :  { %6930 = vrot.lane.b32.xlu0 %v13693_v24, %s16502_s0  ;;  %8231 = vmatpush2.msra.mxu1 %v5080_v0  ;;  %v3963_v59 = vadd.f32 %v3962_v4, %v13595_v49 }
 0x692   :  { %v4927_v46 = vpop.permute.xlu1 %4926 }
 0x693   :  { %v6087_v12 = vpop.permute.xlu0 %6086 }
 0x694   :  { %6792 = vrot.lane.b32.xlu1 %v13666_v60, %s16503_s28  ;;  %v6095_v2 = vsel %vm16751_vm4, %v6085_v52, %v6087_v12  ;;  %v4052_v52 = vadd.f32 %v4051_v63, %v3963_v59 }
 0x695   :  { %6928 = vrot.lane.b32.xlu0 %v13708_v31, %s16502_s0  ;;  %8345 = vmatprep.subr.mxu0 %v6095_v2  ;;  %v14235_v2 = vpop.f32.mrf.mxu1 }
 0x696   :  { %v6077_v3 = vpop.permute.xlu1 %6076  ;;  %8346 = vmatpush2.msra.mxu0 %v6094_v51  ;;  %v14217_v29 = vmax.f32 %v4052_v52, 0.0 }
 0x697   :  { %v4935_v9 = vpop.permute.xlu0 %4934  ;;  %v6092_v44 = vsel %vm16751_vm4, %v6077_v3, %v6079_v25 }
 0x698   :  { %6790 = vrot.lane.b32.xlu1 %v13684_v1, %s16503_s28  ;;  %v4943_v48 = vsel %vm16753_vm9, %v4933_v30, %v4935_v9  ;;  %vm16757_vm9 = vmmov %vm16754_vm1 }
 0x699   :  { %6806 = vrot.lane.b32.xlu0 %v13653_v55, %s16503_s28  ;;  %8232 = vmatprep.subr.mxu1 %v4943_v48  ;;  %v14245_v48 = vmax.f32 %v13646_v35, 0.0 }
 0x69a   :  { %v6073_v7 = vpop.permute.xlu1 %6072 }
 0x69b   :  { %v4931_v15 = vpop.permute.xlu0 %4930 }
 0x69c   :  { %v4942_v27 = vsel %vm16754_vm1, %v4931_v15, %v4933_v30  ;;  %6788 = vrot.lane.b32.xlu1 %v13723_v22, %s16503_s28  ;;  %vm16758_vm1 = vmmov %vm16751_vm4  ;;  %v14247_v15 = vpop.f32.mrf.mxu1 }
 0x69d   :  { %6798 = vrot.lane.b32.xlu0 %v13642_v54, %s16503_s28  ;;  %8233 = vmatpush2.msra.mxu1 %v4942_v27  ;;  %vm16760_vm4 = vmmov %vm16757_vm9 }
 0x69e   :  { %v4921_v32 = vpop.permute.xlu1 %4920  ;;  %v14257_v35 = vpop.f32.mrf.mxu1 }
 0x69f   :  { %v6081_v13 = vpop.permute.xlu0 %6080 }
 0x6a0   :  { %6660 = vrot.lane.b32.xlu1 %v13614_v57, %s16500_s26  ;;  %v6093_v62 = vsel %vm16755_vm14, %v6079_v25, %v6081_v13  ;;  %vm16759_vm14 = vmmov %vm16758_vm1 }
 0x6a1   :  { %6796 = vrot.lane.b32.xlu0 %v13657_v61, %s16503_s28  ;;  %8347 = vmatprep.subr.mxu0 %v6093_v62 }
 0x6a2   :  { %v6071_v39 = vpop.permute.xlu1 %6070  ;;  %8348 = vmatpush2.msra.mxu0 %v6092_v44 }
 0x6a3   :  { %v4929_v53 = vpop.permute.xlu0 %4928  ;;  %v6090_v56 = vsel %vm16759_vm14, %v6071_v39, %v6073_v7  ;;  %vm16763_vm14 = vmmov %vm16760_vm4 }
 0x6a4   :  { %6658 = vrot.lane.b32.xlu1 %v13632_v36, %s16500_s26  ;;  %v4941_v42 = vsel %vm16756_vm15, %v4927_v46, %v4929_v53  ;;  %vm16761_vm15 = vmmov %vm16760_vm4 }
 0x6a5   :  { %6794 = vrot.lane.b32.xlu0 %v13704_v47, %s16503_s28  ;;  %8234 = vmatprep.subr.mxu1 %v4941_v42 }
 0x6a6   :  { %v6067_v38 = vpop.permute.xlu1 %6066 }
 0x6a7   :  { %v4925_v26 = vpop.permute.xlu0 %4924 }
 0x6a8   :  { %v4940_v10 = vsel %vm16757_vm9, %v4925_v26, %v4927_v46  ;;  %6656 = vrot.lane.b32.xlu1 %v13680_v23, %s16500_s26  ;;  %vm16762_vm9 = vmmov %vm16758_vm1  ;;  %v14231_v46 = vpop.f32.mrf.mxu0  ;;  %v14266_v26 = vpop.f32.mrf.mxu1 }
 0x6a9   :  { %6786 = vrot.lane.b32.xlu0 %v13693_v24, %s16503_s28  ;;  %8235 = vmatpush2.msra.mxu1 %v4940_v10 }
 0x6aa   :  { %v4915_v5 = vpop.permute.xlu1 %4914  ;;  %v14240_v9 = vpop.f32.mrf.mxu0 }
 0x6ab   :  { %v6075_v50 = vpop.permute.xlu0 %6074 }
 0x6ac   :  { %6648 = vrot.lane.b32.xlu1 %v13666_v60, %s16500_s26  ;;  %v6091_v58 = vsel %vm16758_vm1, %v6073_v7, %v6075_v50  ;;  %v14252_v13 = vpop.f32.mrf.mxu0 }
 0x6ad   :  { %6784 = vrot.lane.b32.xlu0 %v13708_v31, %s16503_s28  ;;  %8349 = vmatprep.subr.mxu0 %v6091_v58  ;;  %v14276_v58 = vmax.f32 %v13636_v19, 0.0 }
 0x6ae   :  { %v6065_v8 = vpop.permute.xlu1 %6064  ;;  %8350 = vmatpush2.msra.mxu0 %v6090_v56  ;;  %v14262_v42 = vpop.f32.mrf.mxu0 }
 0x6af   :  { %v4923_v37 = vpop.permute.xlu0 %4922  ;;  %v6088_v6 = vsel %vm16758_vm1, %v6065_v8, %v6067_v38  ;;  %v14278_v56 = vpop.f32.mrf.mxu1 }
 0x6b0   :  { %6646 = vrot.lane.b32.xlu1 %v13684_v1, %s16500_s26  ;;  %v4939_v16 = vsel %vm16760_vm4, %v4921_v32, %v4923_v37  ;;  %v14271_v50 = vpop.f32.mrf.mxu0 }
 0x6b1   :  { %6662 = vrot.lane.b32.xlu0 %v13653_v55, %s16500_s26  ;;  %8236 = vmatprep.subr.mxu1 %v4939_v16  ;;  %v4223_v19 = vpop.f32.mrf.mxu1 }
 0x6b2   :  { %v5941_v18 = vpop.permute.xlu1 %5940  ;;  %v4134_v37 = vpop.f32.mrf.mxu0 }
 0x6b3   :  { %v4919_v17 = vpop.permute.xlu0 %4918 }
 0x6b4   :  { %v4938_v30 = vsel %vm16761_vm15, %v4919_v17, %v4921_v32  ;;  %6644 = vrot.lane.b32.xlu1 %v13723_v22, %s16500_s26  ;;  %vm16764_vm15 = vcmask 506880  }
 0x6b5   :  { %6654 = vrot.lane.b32.xlu0 %v13642_v54, %s16500_s26  ;;  %8237 = vmatpush2.msra.mxu1 %v4938_v30  ;;  %v4138_v30 = vpop.f32.mrf.mxu0 }
 0x6b6   :  { %v4789_v34 = vpop.permute.xlu1 %4788 }
 0x6b7   :  { %v6069_v21 = vpop.permute.xlu0 %6068 }
 0x6b8   :  { %7558 = vrot.lane.b32.xlu1 %v14217_v29, %s16516_s27  ;;  %v6089_v45 = vsel %vm16762_vm9, %v6067_v38, %v6069_v21  ;;  %vm16765_vm9 = vmmov %vm16764_vm15 }
 0x6b9   :  { %6652 = vrot.lane.b32.xlu0 %v13657_v61, %s16500_s26  ;;  %8351 = vmatprep.subr.mxu0 %v6089_v45  ;;  %vm16766_vm1 = vmmov %vm16765_vm9  ;;  %v4227_v45 = vpop.f32.mrf.mxu1 }
 0x6ba   :  { %v5939_v25 = vpop.permute.xlu1 %5938  ;;  %8352 = vmatpush2.msra.mxu0 %v6088_v6 }
 0x6bb   :  { %v4917_v43 = vpop.permute.xlu0 %4916  ;;  %v5950_v62 = vsel %vm16765_vm9, %v5939_v25, %v5941_v18  ;;  %vm16770_vm9 = vmmov %vm16766_vm1 }
 0x6bc   :  { %7554 = vrot.lane.b32.xlu1 %v13614_v57, %s16516_s27  ;;  %v4937_v0 = vsel %vm16763_vm14, %v4915_v5, %v4917_v43  ;;  %vm16767_vm14 = vmmov %vm16766_vm1 }
 0x6bd   :  { %6650 = vrot.lane.b32.xlu0 %v13704_v47, %s16500_s26  ;;  %8238 = vmatprep.subr.mxu1 %v4937_v0 }
 0x6be   :  { %v5935_v12 = vpop.permute.xlu1 %5934 }
 0x6bf   :  { %v4913_v51 = vpop.permute.xlu0 %4912 }
 0x6c0   :  { %v4936_v3 = vsel %vm16760_vm4, %v4913_v51, %v4915_v5  ;;  %6518 = vrot.lane.b32.xlu1 %v13653_v55, %s16501_s2  ;;  %vm16768_vm4 = vmmov %vm16766_vm1 }
 0x6c1   :  { %6642 = vrot.lane.b32.xlu0 %v13693_v24, %s16500_s26  ;;  %8239 = vmatpush2.msra.mxu1 %v4936_v3 }
 0x6c2   :  { %v4783_v7 = vpop.permute.xlu1 %4782 }
 0x6c3   :  { %v5943_v27 = vpop.permute.xlu0 %5942 }
 0x6c4   :  { %7552 = vrot.lane.b32.xlu1 %v14245_v48, %s16516_s27  ;;  %v5951_v32 = vsel %vm16764_vm15, %v5941_v18, %v5943_v27  ;;  %v3945_v18 = vadd.f32 %v13602_v33, %v13671_v14  ;;  %v4140_v33 = vpop.f32.mrf.mxu0  ;;  %vm16769_vm15 = vmmov %vm16766_vm1 }
 0x6c5   :  { %7556 = vrot.lane.b32.xlu0 %v13653_v55, %s16516_s27  ;;  %8353 = vmatprep.subr.mxu0 %v5951_v32 }
 0x6c6   :  { %v5933_v44 = vpop.permute.xlu1 %5932  ;;  %8354 = vmatpush2.msra.mxu0 %v5950_v62 }
 0x6c7   :  { %v4791_v39 = vpop.permute.xlu0 %4790  ;;  %v5948_v59 = vsel %vm16767_vm14, %v5933_v44, %v5935_v12  ;;  %vm16771_vm14 = vcmask 244736  }
 0x6c8   :  { %7548 = vrot.lane.b32.xlu1 %v13642_v54, %s16516_s27  ;;  %v4799_v53 = vsel %vm186_vm2, %v4789_v34, %v4791_v39 }
 0x6c9   :  { %6640 = vrot.lane.b32.xlu0 %v13708_v31, %s16500_s26  ;;  %8240 = vmatprep.subr.mxu1 %v4799_v53 }
 0x6ca   :  { %v5929_v38 = vpop.permute.xlu1 %5928 }
 0x6cb   :  { %v4787_v10 = vpop.permute.xlu0 %4786 }
 0x6cc   :  { %v4798_v5 = vsel %vm186_vm2, %v4787_v10, %v4789_v34  ;;  %6512 = vrot.lane.b32.xlu1 %v13680_v23, %s16501_s2  ;;  %v4034_v34 = vadd.f32 %v13626_v20, %v3945_v18  ;;  %v4141_v20 = vadd.f32 %v4140_v33, %v13595_v49 }
 0x6cd   :  { %6516 = vrot.lane.b32.xlu0 %v13614_v57, %s16501_s2  ;;  %8241 = vmatpush2.msra.mxu1 %v4798_v5  ;;  %v4135_v5 = vadd.f32 %v4134_v37, %v13616_v40  ;;  %v7666_v37 = vld [vmem:[%s16743_s3 + $0x50] sm:$0xff] }
 0x6ce   :  { %v4777_v4 = vpop.permute.xlu1 %4776  ;;  %v14299_v25 = vmax.f32 %v4034_v34, 0.0 }
 0x6cf   :  { %v5937_v8 = vpop.permute.xlu0 %5936 }
 0x6d0   :  { %7546 = vrot.lane.b32.xlu1 %v14276_v58, %s16516_s27  ;;  %v5949_v63 = vsel %vm16766_vm1, %v5935_v12, %v5937_v8  ;;  %v4139_v8 = vadd.f32 %v4138_v30, %v13595_v49 }
 0x6d1   :  { %7550 = vrot.lane.b32.xlu0 %v13680_v23, %s16516_s27  ;;  %8355 = vmatprep.subr.mxu0 %v5949_v63 }
 0x6d2   :  { %v5927_v16 = vpop.permute.xlu1 %5926  ;;  %8356 = vmatpush2.msra.mxu0 %v5948_v59  ;;  %v4224_v59 = vadd.f32 %v4223_v19, %v4135_v5  ;;  %v7673_v19 = vld [vmem:[%s16743_s3 + $0x88] sm:$0xff] }
 0x6d3   :  { %v4785_v52 = vpop.permute.xlu0 %4784  ;;  %v5946_v51 = vsel %vm16769_vm15, %v5927_v16, %v5929_v38  ;;  %v7701_v5 = vld [vmem:[%s16743_s3 + $0x168] sm:$0xff] }
 0x6d4   :  { %7542 = vrot.lane.b32.xlu1 %v13666_v60, %s16516_s27  ;;  %v4797_v17 = vsel %vm186_vm2, %v4783_v7, %v4785_v52  ;;  %v4228_v52 = vadd.f32 %v4227_v45, %v4139_v8  ;;  %v14345_v30 = vmax.f32 %v4224_v59, 0.0  ;;  %v7656_v45 = vld [vmem:[%s16743_s3] sm:$0xff]  ;;  %v4123_v8 = vadd.f32 %v14240_v9, %v13671_v14 }
 0x6d5   :  { %6514 = vrot.lane.b32.xlu0 %v13632_v36, %s16501_s2  ;;  %8242 = vmatprep.subr.mxu1 %v4797_v17  ;;  %v4229_v36 = vpop.f32.mrf.mxu1  ;;  %v7665_v17 = vld [vmem:[%s16743_s3 + $0x48] sm:$0xff]  ;;  %v4127_v59 = vadd.f32 %v14252_v13, %v13628_v11  ;;  %v7708_v9 = vld [vmem:[%s16743_s3 + $0x1a0] sm:$0xff]  ;;  %v7707_v13 = vld [vmem:[%s16743_s3 + $0x198] sm:$0xff] }
 0x6d6   :  { %v5923_v21 = vpop.permute.xlu1 %5922  ;;  %v4230_v3 = vadd.f32 %v4229_v36, %v4141_v20  ;;  %v7679_v20 = vld [vmem:[%s16743_s3 + $0xb8] sm:$0xff] }
 0x6d7   :  { %v4781_v28 = vpop.permute.xlu0 %4780 }
 0x6d8   :  { %v4796_v6 = vsel %vm186_vm2, %v4781_v28, %v4783_v7  ;;  %6506 = vrot.lane.b32.xlu1 %v13704_v47, %s16501_s2  ;;  %v14313_v62 = vmax.f32 %v4230_v3, 0.0 }
 0x6d9   :  { %6510 = vrot.lane.b32.xlu0 %v13642_v54, %s16501_s2  ;;  %8243 = vmatpush2.msra.mxu1 %v4796_v6  ;;  %v7680_v6 = vld [vmem:[%s16743_s3 + $0xc0] sm:$0xff] }
 0x6da   :  { %v4771_v43 = vpop.permute.xlu1 %4770 }
 0x6db   :  { %v5931_v0 = vpop.permute.xlu0 %5930 }
 0x6dc   :  { %7540 = vrot.lane.b32.xlu1 %v14299_v25, %s16516_s27  ;;  %v5947_v12 = vsel %vm16768_vm4, %v5929_v38, %v5931_v0  ;;  %vm16772_vm4 = vmmov %vm16771_vm14 }
 0x6dd   :  { %7544 = vrot.lane.b32.xlu0 %v13704_v47, %s16516_s27  ;;  %8357 = vmatprep.subr.mxu0 %v5947_v12  ;;  %v4133_v12 = vadd.f32 %v14271_v50, %v13616_v40  ;;  %v7686_v50 = vld [vmem:[%s16743_s3 + $0xf0] sm:$0xff]  ;;  %vm16773_vm15 = vmmov %vm16772_vm4 }
 0x6de   :  { %v5921_v7 = vpop.permute.xlu1 %5920  ;;  %8358 = vmatpush2.msra.mxu0 %v5946_v51 }
 0x6df   :  { %v4779_v27 = vpop.permute.xlu0 %4778  ;;  %v5944_v63 = vsel %vm16766_vm1, %v5921_v7, %v5923_v21  ;;  %vm16775_vm1 = vmmov %vm16772_vm4 }
 0x6e0   :  { %7536 = vrot.lane.b32.xlu1 %v13693_v24, %s16516_s27  ;;  %v4795_v32 = vsel %vm186_vm2, %v4777_v4, %v4779_v27  ;;  %v4222_v27 = vadd.f32 %v14278_v56, %v4133_v12 }
 0x6e1   :  { %6508 = vrot.lane.b32.xlu0 %v13657_v61, %s16501_s2  ;;  %8244 = vmatprep.subr.mxu1 %v4795_v32 }
 0x6e2   :  { %v6949_v44 = vpop.permute.xlu1 %6948 }
 0x6e3   :  { %v4775_v39 = vpop.permute.xlu0 %4774 }
 0x6e4   :  { %v4794_v53 = vsel %vm186_vm2, %v4775_v39, %v4777_v4  ;;  %4718 = vrot.lane.b32.xlu1 %v14313_v62, %s16505_s1  ;;  %v7658_v4 = vld [vmem:[%s16743_s3 + $0x10] sm:$0xff]  ;;  %v14394_v39 = vmax.f32 %v4222_v27, 0.0 }
 0x6e5   :  { %6504 = vrot.lane.b32.xlu0 %v13666_v60, %s16501_s2  ;;  %8245 = vmatpush2.msra.mxu1 %v4794_v53 }
 0x6e6   :  { %v6947_v38 = vpop.permute.xlu1 %6946 }
 0x6e7   :  { %v5925_v10 = vpop.permute.xlu0 %5924  ;;  %v6958_v51 = vsel %vm501_vm5, %v6947_v38, %v6949_v44 }
 0x6e8   :  { %6500 = vrot.lane.b32.xlu1 %v13723_v22, %s16501_s2  ;;  %v5945_v61 = vsel %vm16770_vm9, %v5923_v21, %v5925_v10  ;;  %v14347_v21 = vmax.f32 %v4228_v52, 0.0  ;;  %v7693_v10 = vld [vmem:[%s16743_s3 + $0x128] sm:$0xff]  ;;  %v4212_v52 = vadd.f32 %v14247_v15, %v4123_v8  ;;  %vm16774_vm9 = vmmov %vm16772_vm4 }
 0x6e9   :  { %7538 = vrot.lane.b32.xlu0 %v13723_v22, %s16516_s27  ;;  %8359 = vmatprep.subr.mxu0 %v5945_v61 }
 0x6ea   :  { %v6945_v16 = vpop.permute.xlu1 %6944  ;;  %8360 = vmatpush2.msra.mxu0 %v5944_v63  ;;  %v14433_v15 = vmax.f32 %v4212_v52, 0.0 }
 0x6eb   :  { %v4773_v18 = vpop.permute.xlu0 %4772  ;;  %8362 = vmatmul.mubr.f32.vlgmr.msra.gmra.mxu0 %v7658_v4 }
 0x6ec   :  { %6496 = vrot.lane.b32.xlu1 %v13708_v31, %s16501_s2  ;;  %v4793_v49 = vsel %vm186_vm2, %v4771_v43, %v4773_v18  ;;  %8367 = vmatprep.mubr.f32.mxu0 %v7666_v37  ;;  %v7700_v37 = vld [vmem:[%s16743_s3 + $0x160] sm:$0xff] }
 0x6ed   :  { %6502 = vrot.lane.b32.xlu0 %v13684_v1, %s16501_s2  ;;  %8246 = vmatprep.subr.mxu1 %v4793_v49  ;;  %v7672_v1 = vld [vmem:[%s16743_s3 + $0x80] sm:$0xff]  ;;  %v4216_v49 = vadd.f32 %v14257_v35, %v4127_v59 }
 0x6ee   :  { %v6937_v34 = vpop.permute.xlu1 %6936 }
 0x6ef   :  { %v4769_v31 = vpop.permute.xlu0 %4768  ;;  %8368 = vmatmul.mubr.f32.gmra.mxu0 %v7665_v17  ;;  %v14435_v35 = vmax.f32 %v4216_v49, 0.0 }
 0x6f0   :  { %v4792_v28 = vsel %vm186_vm2, %v4769_v31, %v4771_v43  ;;  %4712 = vrot.lane.b32.xlu1 %v14345_v30, %s16505_s1  ;;  %8373 = vmatprep.mubr.f32.mxu0 %v7673_v19  ;;  %v4129_v43 = vadd.f32 %v14262_v42, %v13628_v11  ;;  %v7687_v42 = vld [vmem:[%s16743_s3 + $0xf8] sm:$0xff] }
 0x6f1   :  { %8247 = vmatpush2.msra.mxu1 %v4792_v28  ;;  %4716 = vrot.lane.b32.xlu0 %v14347_v21, %s16505_s1 }
 0x6f2   :  { %v6935_v33 = vpop.permute.xlu1 %6934  ;;  %8249 = vmatmul.mubr.f32.vlgmr.msra.gmra.mxu1 %v7656_v45  ;;  %v4218_v3 = vadd.f32 %v14266_v26, %v4129_v43  ;;  %v7694_v26 = vld [vmem:[%s16743_s3 + $0x130] sm:$0xff] }
 0x6f3   :  { %v6951_v36 = vpop.permute.xlu0 %6950  ;;  %8374 = vmatmul.mubr.f32.gmra.mxu0 %v7672_v1 }
 0x6f4   :  { %7414 = vrot.lane.b32.xlu1 %v14217_v29, %s16505_s1  ;;  %v6959_v0 = vsel %vm501_vm5, %v6949_v44, %v6951_v36  ;;  %8379 = vmatprep.mubr.f32.mxu0 %v7680_v6  ;;  %v14392_v56 = vmax.f32 %v4218_v3, 0.0  ;;  %v4121_v6 = vadd.f32 %v14231_v46, %v13671_v14 }
 0x6f5   :  { %8410 = vmatprep.subr.mxu1 %v6959_v0  ;;  %6498 = vrot.lane.b32.xlu0 %v13693_v24, %s16501_s2 }
 0x6f6   :  { %v6933_v7 = vpop.permute.xlu1 %6932  ;;  %8411 = vmatpush1.msra.mxu1 %v6958_v51  ;;  %v4210_v43 = vadd.f32 %v14235_v2, %v4121_v6 }
 0x6f7   :  { %v6943_v32 = vpop.permute.xlu0 %6942  ;;  %8380 = vmatmul.mubr.f32.gmra.mxu0 %v7679_v20 }
 0x6f8   :  { %7410 = vrot.lane.b32.xlu1 %v13614_v57, %s16505_s1  ;;  %v6957_v40 = vsel %vm501_vm5, %v6943_v32, %v6945_v16  ;;  %8385 = vmatprep.mubr.f32.mxu0 %v7687_v42  ;;  %v6954_v16 = vsel %vm501_vm5, %v6935_v33, %v6937_v34  ;;  %v14457_v46 = vmax.f32 %v4210_v43, 0.0 }
 0x6f9   :  { %8412 = vmatprep.subr.mxu1 %v6957_v40  ;;  %4714 = vrot.lane.b32.xlu0 %v14217_v29, %s16505_s1 }
 0x6fa   :  { %v6805_v44 = vpop.permute.xlu1 %6804 }
 0x6fb   :  { %v6941_v53 = vpop.permute.xlu0 %6940  ;;  %8386 = vmatmul.mubr.f32.gmra.mxu0 %v7686_v50 }
 0x6fc   :  { %v6956_v38 = vsel %vm501_vm5, %v6941_v53, %v6943_v32  ;;  %4706 = vrot.lane.b32.xlu1 %v14392_v56, %s16505_s1  ;;  %8391 = vmatprep.mubr.f32.mxu0 %v7694_v26 }
 0x6fd   :  { %8413 = vmatpush1.msra.mxu1 %v6956_v38  ;;  %4710 = vrot.lane.b32.xlu0 %v14394_v39, %s16505_s1 }
 0x6fe   :  { %v6803_v61 = vpop.permute.xlu1 %6802 }
 0x6ff   :  { %v6939_v4 = vpop.permute.xlu0 %6938  ;;  %8392 = vmatmul.mubr.f32.gmra.mxu0 %v7693_v10  ;;  %v6814_v33 = vsel %vm480_vm3, %v6803_v61, %v6805_v44 }
 0x700   :  { %7408 = vrot.lane.b32.xlu1 %v14245_v48, %s16505_s1  ;;  %v6955_v63 = vsel %vm501_vm5, %v6937_v34, %v6939_v4  ;;  %8397 = vmatprep.mubr.f32.mxu0 %v7701_v5 }
 0x701   :  { %8414 = vmatprep.subr.mxu1 %v6955_v63  ;;  %7412 = vrot.lane.b32.xlu0 %v13653_v55, %s16505_s1 }
 0x702   :  { %v6801_v18 = vpop.permute.xlu1 %6800  ;;  %8415 = vmatpush1.msra.mxu1 %v6954_v16 }
 0x703   :  { %v6931_v17 = vpop.permute.xlu0 %6930  ;;  %8398 = vmatmul.mubr.f32.gmra.mxu0 %v7700_v37 }
 0x704   :  { %7404 = vrot.lane.b32.xlu1 %v13642_v54, %s16505_s1  ;;  %v6953_v11 = vsel %vm501_vm5, %v6931_v17, %v6933_v7  ;;  %8403 = vmatprep.mubr.f32.mxu0 %v7708_v9 }
 0x705   :  { %8416 = vmatprep.subr.mxu1 %v6953_v11  ;;  %4708 = vrot.lane.b32.xlu0 %v14245_v48, %s16505_s1 }
 0x706   :  { %v6793_v19 = vpop.permute.xlu1 %6792 }
 0x707   :  { %v6929_v34 = vpop.permute.xlu0 %6928  ;;  %8404 = vmatmul.mubr.f32.gmra.mxu0 %v7707_v13 }
 0x708   :  { %v6952_v31 = vsel %vm501_vm5, %v6929_v34, %v6931_v17  ;;  %4700 = vrot.lane.b32.xlu1 %v14433_v15, %s16505_s1  ;;  %8587 = vmatprep.mubr.f32.mxu0 %v16668_v41 }
 0x709   :  { %8417 = vmatpush1.msra.mxu1 %v6952_v31  ;;  %4704 = vrot.lane.b32.xlu0 %v14435_v35, %s16505_s1 }
 0x70a   :  { %v6791_v45 = vpop.permute.xlu1 %6790 }
 0x70b   :  { %v6807_v28 = vpop.permute.xlu0 %6806  ;;  %v6810_v7 = vsel %vm480_vm3, %v6791_v45, %v6793_v19 }
 0x70c   :  { %7402 = vrot.lane.b32.xlu1 %v14276_v58, %s16505_s1  ;;  %v6815_v1 = vsel %vm480_vm3, %v6805_v44, %v6807_v28 }
 0x70d   :  { %8418 = vmatprep.subr.mxu1 %v6815_v1  ;;  %7406 = vrot.lane.b32.xlu0 %v13680_v23, %s16505_s1 }
 0x70e   :  { %v6789_v36 = vpop.permute.xlu1 %6788  ;;  %8419 = vmatpush1.msra.mxu1 %v6814_v33 }
 0x70f   :  { %v6799_v0 = vpop.permute.xlu0 %6798 }
 0x710   :  { %7398 = vrot.lane.b32.xlu1 %v13666_v60, %s16505_s1  ;;  %v6813_v20 = vsel %vm480_vm3, %v6799_v0, %v6801_v18 }
 0x711   :  { %8420 = vmatprep.subr.mxu1 %v6813_v20  ;;  %4702 = vrot.lane.b32.xlu0 %v14276_v58, %s16505_s1 }
 0x712   :  { %v6661_v14 = vpop.permute.xlu1 %6660 }
 0x713   :  { %v6797_v12 = vpop.permute.xlu0 %6796 }
 0x714   :  { %v6812_v51 = vsel %vm480_vm3, %v6797_v12, %v6799_v0  ;;  %4574 = vrot.lane.b32.xlu1 %v14313_v62, %s16514_s18 }
 0x715   :  { %8421 = vmatpush1.msra.mxu1 %v6812_v51  ;;  %4698 = vrot.lane.b32.xlu0 %v14457_v46, %s16505_s1 }
 0x716   :  { %v6659_v2 = vpop.permute.xlu1 %6658 }
 0x717   :  { %v6795_v42 = vpop.permute.xlu0 %6794  ;;  %v6670_v5 = vsel %vm16772_vm4, %v6659_v2, %v6661_v14  ;;  %vm16777_vm4 = vmmov %vm16775_vm1 }
 0x718   :  { %7396 = vrot.lane.b32.xlu1 %v14299_v25, %s16505_s1  ;;  %v6811_v3 = vsel %vm480_vm3, %v6793_v19, %v6795_v42 }
 0x719   :  { %8422 = vmatprep.subr.mxu1 %v6811_v3  ;;  %7400 = vrot.lane.b32.xlu0 %v13704_v47, %s16505_s1 }
 0x71a   :  { %v6657_v27 = vpop.permute.xlu1 %6656  ;;  %8423 = vmatpush1.msra.mxu1 %v6810_v7 }
 0x71b   :  { %v6787_v32 = vpop.permute.xlu0 %6786 }
 0x71c   :  { %7392 = vrot.lane.b32.xlu1 %v13693_v24, %s16505_s1  ;;  %v6809_v40 = vsel %vm480_vm3, %v6787_v32, %v6789_v36 }
 0x71d   :  { %8424 = vmatprep.subr.mxu1 %v6809_v40  ;;  %4696 = vrot.lane.b32.xlu0 %v14299_v25, %s16505_s1 }
 0x71e   :  { %v6649_v50 = vpop.permute.xlu1 %6648 }
 0x71f   :  { %v6785_v26 = vpop.permute.xlu0 %6784 }
 0x720   :  { %v6808_v44 = vsel %vm480_vm3, %v6785_v26, %v6787_v32  ;;  %4568 = vrot.lane.b32.xlu1 %v14345_v30, %s16514_s18 }
 0x721   :  { %8425 = vmatpush1.msra.mxu1 %v6808_v44  ;;  %4572 = vrot.lane.b32.xlu0 %v14347_v21, %s16514_s18 }
 0x722   :  { %v6647_v53 = vpop.permute.xlu1 %6646 }
 0x723   :  { %v6663_v38 = vpop.permute.xlu0 %6662 }
 0x724   :  { %7270 = vrot.lane.b32.xlu1 %v14217_v29, %s16514_s18  ;;  %v6671_v10 = vsel %vm16771_vm14, %v6661_v14, %v6663_v38  ;;  %vm16776_vm14 = vmmov %vm16775_vm1 }
 0x725   :  { %8426 = vmatprep.subr.mxu1 %v6671_v10  ;;  %7394 = vrot.lane.b32.xlu0 %v13723_v22, %s16505_s1  ;;  %v6666_v18 = vsel %vm16776_vm14, %v6647_v53, %v6649_v50 }
 0x726   :  { %v6645_v61 = vpop.permute.xlu1 %6644  ;;  %8427 = vmatpush1.msra.mxu1 %v6670_v5 }
 0x727   :  { %v6655_v4 = vpop.permute.xlu0 %6654 }
 0x728   :  { %7266 = vrot.lane.b32.xlu1 %v13614_v57, %s16514_s18  ;;  %v6669_v8 = vsel %vm16773_vm15, %v6655_v4, %v6657_v27  ;;  %vm16778_vm15 = vmmov %vm16775_vm1 }
 0x729   :  { %8428 = vmatprep.subr.mxu1 %v6669_v8  ;;  %4570 = vrot.lane.b32.xlu0 %v14217_v29, %s16514_s18 }
 0x72a   :  { %v7559_v63 = vpop.permute.xlu1 %7558 }
 0x72b   :  { %v6653_v37 = vpop.permute.xlu0 %6652 }
 0x72c   :  { %v6668_v59 = vsel %vm16774_vm9, %v6653_v37, %v6655_v4  ;;  %4562 = vrot.lane.b32.xlu1 %v14392_v56, %s16514_s18  ;;  %vm16779_vm9 = vcmask 252928   ;;  %v7662_v37 = vld [vmem:[%s16743_s3 + $0x30] sm:$0xff] }
 0x72d   :  { %8429 = vmatpush1.msra.mxu1 %v6668_v59  ;;  %4566 = vrot.lane.b32.xlu0 %v14394_v39, %s16514_s18 }
 0x72e   :  { %v7555_v16 = vpop.permute.xlu1 %7554 }
 0x72f   :  { %v6651_v9 = vpop.permute.xlu0 %6650 }
 0x730   :  { %7264 = vrot.lane.b32.xlu1 %v14245_v48, %s16514_s18  ;;  %v6667_v52 = vsel %vm16775_vm1, %v6649_v50, %v6651_v9  ;;  %vm16780_vm1 = vmmov %vm16779_vm9 }
 0x731   :  { %8430 = vmatprep.subr.mxu1 %v6667_v52  ;;  %7268 = vrot.lane.b32.xlu0 %v13653_v55, %s16514_s18  ;;  %vm16781_vm14 = vmmov %vm16780_vm1 }
 0x732   :  { %v6519_v49 = vpop.permute.xlu1 %6518  ;;  %8431 = vmatpush1.msra.mxu1 %v6666_v18 }
 0x733   :  { %v6643_v17 = vpop.permute.xlu0 %6642 }
 0x734   :  { %7260 = vrot.lane.b32.xlu1 %v13642_v54, %s16514_s18  ;;  %v6665_v11 = vsel %vm16777_vm4, %v6643_v17, %v6645_v61  ;;  %vm16782_vm4 = vmmov %vm16780_vm1 }
 0x735   :  { %8432 = vmatprep.subr.mxu1 %v6665_v11  ;;  %4564 = vrot.lane.b32.xlu0 %v14245_v48, %s16514_s18 }
 0x736   :  { %v7553_v13 = vpop.permute.xlu1 %7552 }
 0x737   :  { %v7557_v19 = vpop.permute.xlu0 %7556 }
 0x738   :  { %4556 = vrot.lane.b32.xlu1 %v14433_v15, %s16514_s18  ;;  %v7567_v34 = vsel %vm186_vm2, %v7557_v19, %v7559_v63  ;;  %v7566_v31 = vsel %vm186_vm2, %v7555_v16, %v7557_v19 }
 0x739   :  { %8547 = vmatprep.subr.mxu0 %v7567_v34  ;;  %4560 = vrot.lane.b32.xlu0 %v14435_v35, %s16514_s18  ;;  %v7664_v34 = vld [vmem:[%s16743_s3 + $0x40] sm:$0xff] }
 0x73a   :  { %v7549_v45 = vpop.permute.xlu1 %7548  ;;  %8548 = vmatpush1.msra.mxu0 %v7566_v31  ;;  %v7663_v31 = vld [vmem:[%s16743_s3 + $0x38] sm:$0xff]  ;;  %8254 = vmatprep.mubr.f32.mxu1 %v7664_v34 }
 0x73b   :  { %v6641_v28 = vpop.permute.xlu0 %6640  ;;  %8255 = vmatmul.mubr.f32.gmra.mxu1 %v7663_v31 }
 0x73c   :  { %v6664_v1 = vsel %vm16778_vm15, %v6641_v28, %v6643_v17  ;;  %7258 = vrot.lane.b32.xlu1 %v14276_v58, %s16514_s18  ;;  %vm16783_vm15 = vmmov %vm16780_vm1 }
 0x73d   :  { %8433 = vmatpush1.msra.mxu1 %v6664_v1  ;;  %7262 = vrot.lane.b32.xlu0 %v13680_v23, %s16514_s18 }
 0x73e   :  { %v6513_v6 = vpop.permute.xlu1 %6512 }
 0x73f   :  { %v6517_v33 = vpop.permute.xlu0 %6516 }
 0x740   :  { %7254 = vrot.lane.b32.xlu1 %v13666_v60, %s16514_s18  ;;  %v6527_v36 = vsel %vm16779_vm9, %v6517_v33, %v6519_v49  ;;  %vm16784_vm9 = vmmov %vm16780_vm1 }
 0x741   :  { %8434 = vmatprep.subr.mxu1 %v6527_v36  ;;  %4558 = vrot.lane.b32.xlu0 %v14276_v58, %s16514_s18 }
 0x742   :  { %v7547_v43 = vpop.permute.xlu1 %7546 }
 0x743   :  { %v7551_v0 = vpop.permute.xlu0 %7550 }
 0x744   :  { %4430 = vrot.lane.b32.xlu1 %v14313_v62, %s16512_s19  ;;  %v7565_v20 = vsel %vm186_vm2, %v7551_v0, %v7553_v13  ;;  %v7564_v14 = vsel %vm186_vm2, %v7549_v45, %v7551_v0 }
 0x745   :  { %8549 = vmatprep.subr.mxu0 %v7565_v20  ;;  %4554 = vrot.lane.b32.xlu0 %v14457_v46, %s16514_s18  ;;  %v7678_v20 = vld [vmem:[%s16743_s3 + $0xb0] sm:$0xff] }
 0x746   :  { %v7543_v12 = vpop.permute.xlu1 %7542  ;;  %8550 = vmatpush1.msra.mxu0 %v7564_v14  ;;  %v7677_v14 = vld [vmem:[%s16743_s3 + $0xa8] sm:$0xff] }
 0x747   :  { %v6515_v51 = vpop.permute.xlu0 %6514 }
 0x748   :  { %v6526_v2 = vsel %vm16780_vm1, %v6515_v51, %v6517_v33  ;;  %7252 = vrot.lane.b32.xlu1 %v14299_v25, %s16514_s18  ;;  %v7670_v33 = vld [vmem:[%s16743_s3 + $0x70] sm:$0xff] }
 0x749   :  { %8435 = vmatpush1.msra.mxu1 %v6526_v2  ;;  %7256 = vrot.lane.b32.xlu0 %v13704_v47, %s16514_s18 }
 0x74a   :  { %v6507_v42 = vpop.permute.xlu1 %6506 }
 0x74b   :  { %v6511_v3 = vpop.permute.xlu0 %6510 }
 0x74c   :  { %7248 = vrot.lane.b32.xlu1 %v13693_v24, %s16514_s18  ;;  %v6525_v7 = vsel %vm16781_vm14, %v6511_v3, %v6513_v6  ;;  %vm16785_vm14 = vmmov %vm16780_vm1  ;;  %v7671_v6 = vld [vmem:[%s16743_s3 + $0x78] sm:$0xff] }
 0x74d   :  { %8436 = vmatprep.subr.mxu1 %v6525_v7  ;;  %4552 = vrot.lane.b32.xlu0 %v14299_v25, %s16514_s18 }
 0x74e   :  { %v7541_v27 = vpop.permute.xlu1 %7540  ;;  %8260 = vmatprep.mubr.f32.mxu1 %v7671_v6 }
 0x74f   :  { %v7545_v32 = vpop.permute.xlu0 %7544  ;;  %8261 = vmatmul.mubr.f32.gmra.mxu1 %v7670_v33 }
 0x750   :  { %4424 = vrot.lane.b32.xlu1 %v14345_v30, %s16512_s19  ;;  %v7563_v40 = vsel %vm186_vm2, %v7545_v32, %v7547_v43  ;;  %v7562_v50 = vsel %vm186_vm2, %v7543_v12, %v7545_v32  ;;  %8266 = vmatprep.mubr.f32.mxu1 %v7678_v20 }
 0x751   :  { %8551 = vmatprep.subr.mxu0 %v7563_v40  ;;  %4428 = vrot.lane.b32.xlu0 %v14347_v21, %s16512_s19 }
 0x752   :  { %v7537_v26 = vpop.permute.xlu1 %7536  ;;  %8552 = vmatpush1.msra.mxu0 %v7562_v50  ;;  %v7692_v50 = vld [vmem:[%s16743_s3 + $0x120] sm:$0xff] }
 0x753   :  { %v6509_v44 = vpop.permute.xlu0 %6508  ;;  %8267 = vmatmul.mubr.f32.gmra.mxu1 %v7677_v14 }
 0x754   :  { %v6524_v53 = vsel %vm16782_vm4, %v6509_v44, %v6511_v3  ;;  %7126 = vrot.lane.b32.xlu1 %v14217_v29, %s16512_s19  ;;  %v7685_v3 = vld [vmem:[%s16743_s3 + $0xe8] sm:$0xff]  ;;  %v7691_v44 = vld [vmem:[%s16743_s3 + $0x118] sm:$0xff]  ;;  %vm16786_vm4 = vcmask 515072  }
 0x755   :  { %8437 = vmatpush1.msra.mxu1 %v6524_v53  ;;  %7250 = vrot.lane.b32.xlu0 %v13723_v22, %s16514_s18 }
 0x756   :  { %v4719_v38 = vpop.permute.xlu1 %4718  ;;  %8272 = vmatprep.mubr.f32.mxu1 %v7685_v3 }
 0x757   :  { %v6505_v10 = vpop.permute.xlu0 %6504 }
 0x758   :  { %7122 = vrot.lane.b32.xlu1 %v13614_v57, %s16512_s19  ;;  %v6523_v5 = vsel %vm16783_vm15, %v6505_v10, %v6507_v42  ;;  %vm16787_vm15 = vmmov %vm16786_vm4 }
 0x759   :  { %8438 = vmatprep.subr.mxu1 %v6523_v5  ;;  %4426 = vrot.lane.b32.xlu0 %v14217_v29, %s16512_s19 }
 0x75a   :  { %v6501_v61 = vpop.permute.xlu1 %6500 }
 0x75b   :  { %v7539_v4 = vpop.permute.xlu0 %7538 }
 0x75c   :  { %4418 = vrot.lane.b32.xlu1 %v14392_v56, %s16512_s19  ;;  %v7561_v8 = vsel %vm186_vm2, %v7539_v4, %v7541_v27  ;;  %v7560_v63 = vsel %vm186_vm2, %v7537_v26, %v7539_v4  ;;  %v7684_v27 = vld [vmem:[%s16743_s3 + $0xe0] sm:$0xff] }
 0x75d   :  { %8553 = vmatprep.subr.mxu0 %v7561_v8  ;;  %4422 = vrot.lane.b32.xlu0 %v14394_v39, %s16512_s19 }
 0x75e   :  { %8554 = vmatpush1.msra.mxu0 %v7560_v63  ;;  %v6497_v59 = vpop.permute.xlu1 %6496  ;;  %8273 = vmatmul.mubr.f32.gmra.mxu1 %v7684_v27 }
 0x75f   :  { %v6503_v16 = vpop.permute.xlu0 %6502  ;;  %10839 = vmatmul.mubr.msk.f32.vlgmr.msra.gmra.mxu0 %vm417_vm12, %v7662_v37  ;;  %8278 = vmatprep.mubr.f32.mxu1 %v7692_v50  ;;  %v7706_v37 = vld [vmem:[%s16743_s3 + $0x190] sm:$0xff] }
 0x760   :  { %v6522_v9 = vsel %vm16784_vm9, %v6503_v16, %v6505_v10  ;;  %7120 = vrot.lane.b32.xlu1 %v14245_v48, %s16512_s19  ;;  %8593 = vmatprep.mubr.f32.mxu0 %v16668_v41  ;;  %v7699_v10 = vld [vmem:[%s16743_s3 + $0x158] sm:$0xff]  ;;  %v7705_v16 = vld [vmem:[%s16743_s3 + $0x188] sm:$0xff]  ;;  %vm16788_vm9 = vmmov %vm16786_vm4 }
 0x761   :  { %8439 = vmatpush1.msra.mxu1 %v6522_v9  ;;  %7124 = vrot.lane.b32.xlu0 %v13653_v55, %s16512_s19 }
 0x762   :  { %v4713_v52 = vpop.permute.xlu1 %4712  ;;  %8279 = vmatmul.mubr.f32.gmra.mxu1 %v7691_v44 }
 0x763   :  { %v4717_v18 = vpop.permute.xlu0 %4716  ;;  %8284 = vmatprep.mubr.f32.mxu1 %v7699_v10 }
 0x764   :  { %7116 = vrot.lane.b32.xlu1 %v13642_v54, %s16512_s19  ;;  %v4727_v49 = vsel %vm165_vm8, %v4717_v18, %v4719_v38 }
 0x765   :  { %8636 = vmatprep.subr.mxu0 %v4727_v49  ;;  %4420 = vrot.lane.b32.xlu0 %v14245_v48, %s16512_s19 }
 0x766   :  { %v7415_v17 = vpop.permute.xlu1 %7414 }
 0x767   :  { %v6499_v11 = vpop.permute.xlu0 %6498 }
 0x768   :  { %4412 = vrot.lane.b32.xlu1 %v14433_v15, %s16512_s19  ;;  %v6521_v13 = vsel %vm16780_vm1, %v6499_v11, %v6501_v61  ;;  %v6520_v19 = vsel %vm16785_vm14, %v6497_v59, %v6499_v11  ;;  %v7698_v61 = vld [vmem:[%s16743_s3 + $0x150] sm:$0xff]  ;;  %vm16789_vm1 = vmmov %vm16786_vm4 }
 0x769   :  { %8440 = vmatprep.subr.mxu1 %v6521_v13  ;;  %4416 = vrot.lane.b32.xlu0 %v14435_v35, %s16512_s19  ;;  %vm16790_vm14 = vmmov %vm16789_vm1 }
 0x76a   :  { %8441 = vmatpush1.msra.mxu1 %v6520_v19  ;;  %v7411_v45 = vpop.permute.xlu1 %7410 }
 0x76b   :  { %v4715_v28 = vpop.permute.xlu0 %4714  ;;  %8285 = vmatmul.mubr.f32.gmra.mxu1 %v7698_v61 }
 0x76c   :  { %v4726_v1 = vsel %vm165_vm8, %v4715_v28, %v4717_v18  ;;  %7114 = vrot.lane.b32.xlu1 %v14276_v58, %s16512_s19  ;;  %8290 = vmatprep.mubr.f32.mxu1 %v7706_v37  ;;  %v7661_v18 = vld [vmem:[%s16743_s3 + $0x28] sm:$0xff] }
 0x76d   :  { %8637 = vmatpush1.msra.mxu0 %v4726_v1  ;;  %7118 = vrot.lane.b32.xlu0 %v13680_v23, %s16512_s19 }
 0x76e   :  { %v4707_v36 = vpop.permute.xlu1 %4706 }
 0x76f   :  { %v4711_v43 = vpop.permute.xlu0 %4710  ;;  %8291 = vmatmul.mubr.f32.gmra.mxu1 %v7705_v16 }
 0x770   :  { %7110 = vrot.lane.b32.xlu1 %v13666_v60, %s16512_s19  ;;  %v4725_v0 = vsel %vm165_vm8, %v4711_v43, %v4713_v52  ;;  %8474 = vmatprep.mubr.f32.mxu1 %v7661_v18 }
 0x771   :  { %8638 = vmatprep.subr.mxu0 %v4725_v0  ;;  %4414 = vrot.lane.b32.xlu0 %v14276_v58, %s16512_s19 }
 0x772   :  { %v7409_v12 = vpop.permute.xlu1 %7408 }
 0x773   :  { %v7413_v51 = vpop.permute.xlu0 %7412 }
 0x774   :  { %7108 = vrot.lane.b32.xlu1 %v14299_v25, %s16512_s19  ;;  %v7423_v2 = vsel %vm165_vm8, %v7413_v51, %v7415_v17  ;;  %v7422_v42 = vsel %vm165_vm8, %v7411_v45, %v7413_v51 }
 0x775   :  { %8442 = vmatprep.subr.mxu1 %v7423_v2  ;;  %4410 = vrot.lane.b32.xlu0 %v14457_v46, %s16512_s19 }
 0x776   :  { %8443 = vmatpush2.msra.mxu1 %v7422_v42  ;;  %v7405_v7 = vpop.permute.xlu1 %7404 }
 0x777   :  { %v4709_v32 = vpop.permute.xlu0 %4708 }
 0x778   :  { %v4724_v40 = vsel %vm165_vm8, %v4709_v32, %v4711_v43  ;;  %5292 = vrot.lane.b32.xlu1 %v14347_v21, %s16517_s12 }
 0x779   :  { %8639 = vmatpush1.msra.mxu0 %v4724_v40  ;;  %7112 = vrot.lane.b32.xlu0 %v13704_v47, %s16512_s19 }
 0x77a   :  { %v4701_v26 = vpop.permute.xlu1 %4700 }
 0x77b   :  { %v4705_v53 = vpop.permute.xlu0 %4704 }
 0x77c   :  { %5290 = vrot.lane.b32.xlu1 %v14217_v29, %s16517_s12  ;;  %v4723_v38 = vsel %vm165_vm8, %v4705_v53, %v4707_v36 }
 0x77d   :  { %8640 = vmatprep.subr.mxu0 %v4723_v38  ;;  %4408 = vrot.lane.b32.xlu0 %v14299_v25, %s16512_s19 }
 0x77e   :  { %v7403_v5 = vpop.permute.xlu1 %7402 }
 0x77f   :  { %v7407_v4 = vpop.permute.xlu0 %7406 }
 0x780   :  { %5288 = vrot.lane.b32.xlu1 %v14345_v30, %s16517_s12  ;;  %v7421_v8 = vsel %vm165_vm8, %v7407_v4, %v7409_v12  ;;  %v7420_v63 = vsel %vm165_vm8, %v7405_v7, %v7407_v4 }
 0x781   :  { %8444 = vmatprep.subr.mxu1 %v7421_v8  ;;  %7106 = vrot.lane.b32.xlu0 %v13723_v22, %s16512_s19 }
 0x782   :  { %8445 = vmatpush2.msra.mxu1 %v7420_v63  ;;  %v7399_v59 = vpop.permute.xlu1 %7398 }
 0x783   :  { %v4703_v9 = vpop.permute.xlu0 %4702 }
 0x784   :  { %v4722_v52 = vsel %vm165_vm8, %v4703_v9, %v4705_v53  ;;  %5870 = vrot.lane.b32.xlu1 %v14313_v62, %s16509_s22 }
 0x785   :  { %8641 = vmatpush1.msra.mxu0 %v4722_v52  ;;  %7104 = vrot.lane.b32.xlu0 %v13693_v24, %s16512_s19 }
 0x786   :  { %v4575_v49 = vpop.permute.xlu1 %4574 }
 0x787   :  { %v4699_v17 = vpop.permute.xlu0 %4698 }
 0x788   :  { %5866 = vrot.lane.b32.xlu1 %v14217_v29, %s16509_s22  ;;  %v4721_v11 = vsel %vm165_vm8, %v4699_v17, %v4701_v26 }
 0x789   :  { %5294 = vrot.lane.b32.xlu0 %v14313_v62, %s16517_s12  ;;  %8642 = vmatprep.subr.mxu0 %v4721_v11 }
 0x78a   :  { %v7397_v13 = vpop.permute.xlu1 %7396 }
 0x78b   :  { %v7401_v19 = vpop.permute.xlu0 %7400 }
 0x78c   :  { %5282 = vrot.lane.b32.xlu1 %v14392_v56, %s16517_s12  ;;  %v7419_v34 = vsel %vm165_vm8, %v7401_v19, %v7403_v5  ;;  %v7418_v31 = vsel %vm165_vm8, %v7399_v59, %v7401_v19 }
 0x78d   :  { %5286 = vrot.lane.b32.xlu0 %v14394_v39, %s16517_s12  ;;  %8446 = vmatprep.subr.mxu1 %v7419_v34 }
 0x78e   :  { %v7393_v45 = vpop.permute.xlu1 %7392  ;;  %8447 = vmatpush2.msra.mxu1 %v7418_v31 }
 0x78f   :  { %v4697_v28 = vpop.permute.xlu0 %4696 }
 0x790   :  { %v4720_v1 = vsel %vm165_vm8, %v4697_v28, %v4699_v17  ;;  %5864 = vrot.lane.b32.xlu1 %v14345_v30, %s16509_s22 }
 0x791   :  { %5868 = vrot.lane.b32.xlu0 %v14347_v21, %s16509_s22  ;;  %8643 = vmatpush1.msra.mxu0 %v4720_v1 }
 0x792   :  { %v4569_v6 = vpop.permute.xlu1 %4568 }
 0x793   :  { %v4573_v33 = vpop.permute.xlu0 %4572 }
 0x794   :  { %5860 = vrot.lane.b32.xlu1 %v14245_v48, %s16509_s22  ;;  %v4583_v36 = vsel %vm144_vm7, %v4573_v33, %v4575_v49 }
 0x795   :  { %5284 = vrot.lane.b32.xlu0 %v14245_v48, %s16517_s12  ;;  %8644 = vmatprep.subr.mxu0 %v4583_v36 }
 0x796   :  { %v7271_v43 = vpop.permute.xlu1 %7270 }
 0x797   :  { %v7395_v0 = vpop.permute.xlu0 %7394 }
 0x798   :  { %5276 = vrot.lane.b32.xlu1 %v14433_v15, %s16517_s12  ;;  %v7417_v20 = vsel %vm165_vm8, %v7395_v0, %v7397_v13  ;;  %v7416_v14 = vsel %vm165_vm8, %v7393_v45, %v7395_v0 }
 0x799   :  { %5280 = vrot.lane.b32.xlu0 %v14435_v35, %s16517_s12  ;;  %8448 = vmatprep.subr.mxu1 %v7417_v20 }
 0x79a   :  { %v7267_v12 = vpop.permute.xlu1 %7266  ;;  %8449 = vmatpush2.msra.mxu1 %v7416_v14 }
 0x79b   :  { %v4571_v51 = vpop.permute.xlu0 %4570 }
 0x79c   :  { %v4582_v2 = vsel %vm144_vm7, %v4571_v51, %v4573_v33  ;;  %5858 = vrot.lane.b32.xlu1 %v14392_v56, %s16509_s22 }
 0x79d   :  { %5862 = vrot.lane.b32.xlu0 %v14394_v39, %s16509_s22  ;;  %8645 = vmatpush1.msra.mxu0 %v4582_v2 }
 0x79e   :  { %v4563_v42 = vpop.permute.xlu1 %4562 }
 0x79f   :  { %v4567_v3 = vpop.permute.xlu0 %4566 }
 0x7a0   :  { %5854 = vrot.lane.b32.xlu1 %v14276_v58, %s16509_s22  ;;  %v4581_v7 = vsel %vm144_vm7, %v4567_v3, %v4569_v6 }
 0x7a1   :  { %5278 = vrot.lane.b32.xlu0 %v14276_v58, %s16517_s12  ;;  %8646 = vmatprep.subr.mxu0 %v4581_v7 }
 0x7a2   :  { %v7265_v27 = vpop.permute.xlu1 %7264 }
 0x7a3   :  { %v7269_v32 = vpop.permute.xlu0 %7268 }
 0x7a4   :  { %5150 = vrot.lane.b32.xlu1 %v14313_v62, %s16518_s16  ;;  %v7279_v40 = vsel %vm144_vm7, %v7269_v32, %v7271_v43  ;;  %v7278_v50 = vsel %vm144_vm7, %v7267_v12, %v7269_v32 }
 0x7a5   :  { %5274 = vrot.lane.b32.xlu0 %v14457_v46, %s16517_s12  ;;  %8450 = vmatprep.subr.mxu1 %v7279_v40 }
 0x7a6   :  { %v7261_v26 = vpop.permute.xlu1 %7260  ;;  %8451 = vmatpush2.msra.mxu1 %v7278_v50 }
 0x7a7   :  { %v4565_v44 = vpop.permute.xlu0 %4564 }
 0x7a8   :  { %v4580_v53 = vsel %vm144_vm7, %v4565_v44, %v4567_v3  ;;  %5852 = vrot.lane.b32.xlu1 %v14433_v15, %s16509_s22 }
 0x7a9   :  { %5856 = vrot.lane.b32.xlu0 %v14435_v35, %s16509_s22  ;;  %8647 = vmatpush1.msra.mxu0 %v4580_v53 }
 0x7aa   :  { %v4557_v38 = vpop.permute.xlu1 %4556 }
 0x7ab   :  { %v4561_v10 = vpop.permute.xlu0 %4560 }
 0x7ac   :  { %5848 = vrot.lane.b32.xlu1 %v14299_v25, %s16509_s22  ;;  %v4579_v5 = vsel %vm144_vm7, %v4561_v10, %v4563_v42 }
 0x7ad   :  { %5272 = vrot.lane.b32.xlu0 %v14299_v25, %s16517_s12  ;;  %8648 = vmatprep.subr.mxu0 %v4579_v5 }
 0x7ae   :  { %v7259_v61 = vpop.permute.xlu1 %7258 }
 0x7af   :  { %v7263_v4 = vpop.permute.xlu0 %7262 }
 0x7b0   :  { %5144 = vrot.lane.b32.xlu1 %v14345_v30, %s16518_s16  ;;  %v7277_v8 = vsel %vm144_vm7, %v7263_v4, %v7265_v27  ;;  %v7276_v63 = vsel %vm144_vm7, %v7261_v26, %v7263_v4 }
 0x7b1   :  { %5148 = vrot.lane.b32.xlu0 %v14347_v21, %s16518_s16  ;;  %8452 = vmatprep.subr.mxu1 %v7277_v8 }
 0x7b2   :  { %v7255_v37 = vpop.permute.xlu1 %7254  ;;  %8453 = vmatpush2.msra.mxu1 %v7276_v63 }
 0x7b3   :  { %v4559_v59 = vpop.permute.xlu0 %4558 }
 0x7b4   :  { %v4578_v16 = vsel %vm144_vm7, %v4559_v59, %v4561_v10  ;;  %5726 = vrot.lane.b32.xlu1 %v14313_v62, %s16506_s5 }
 0x7b5   :  { %5850 = vrot.lane.b32.xlu0 %v14457_v46, %s16509_s22  ;;  %8649 = vmatpush1.msra.mxu0 %v4578_v16 }
 0x7b6   :  { %v4431_v9 = vpop.permute.xlu1 %4430 }
 0x7b7   :  { %v4555_v52 = vpop.permute.xlu0 %4554 }
 0x7b8   :  { %5722 = vrot.lane.b32.xlu1 %v14217_v29, %s16506_s5  ;;  %v4577_v18 = vsel %vm144_vm7, %v4555_v52, %v4557_v38 }
 0x7b9   :  { %5146 = vrot.lane.b32.xlu0 %v14217_v29, %s16518_s16  ;;  %8650 = vmatprep.subr.mxu0 %v4577_v18 }
 0x7ba   :  { %v7253_v49 = vpop.permute.xlu1 %7252 }
 0x7bb   :  { %v7257_v17 = vpop.permute.xlu0 %7256 }
 0x7bc   :  { %5138 = vrot.lane.b32.xlu1 %v14392_v56, %s16518_s16  ;;  %v7275_v11 = vsel %vm144_vm7, %v7257_v17, %v7259_v61  ;;  %v7274_v13 = vsel %vm144_vm7, %v7255_v37, %v7257_v17 }
 0x7bd   :  { %5142 = vrot.lane.b32.xlu0 %v14394_v39, %s16518_s16  ;;  %8454 = vmatprep.subr.mxu1 %v7275_v11 }
 0x7be   :  { %v7249_v19 = vpop.permute.xlu1 %7248  ;;  %8455 = vmatpush2.msra.mxu1 %v7274_v13 }
 0x7bf   :  { %v4553_v34 = vpop.permute.xlu0 %4552 }
 0x7c0   :  { %v4576_v31 = vsel %vm144_vm7, %v4553_v34, %v4555_v52  ;;  %5720 = vrot.lane.b32.xlu1 %v14345_v30, %s16506_s5 }
 0x7c1   :  { %5724 = vrot.lane.b32.xlu0 %v14347_v21, %s16506_s5  ;;  %8651 = vmatpush1.msra.mxu0 %v4576_v31 }
 0x7c2   :  { %v4425_v45 = vpop.permute.xlu1 %4424 }
 0x7c3   :  { %v4429_v28 = vpop.permute.xlu0 %4428 }
 0x7c4   :  { %5716 = vrot.lane.b32.xlu1 %v14245_v48, %s16506_s5  ;;  %v4439_v1 = vsel %vm123_vm6, %v4429_v28, %v4431_v9 }
 0x7c5   :  { %5140 = vrot.lane.b32.xlu0 %v14245_v48, %s16518_s16  ;;  %8652 = vmatprep.subr.mxu0 %v4439_v1 }
 0x7c6   :  { %v7127_v6 = vpop.permute.xlu1 %7126 }
 0x7c7   :  { %v7251_v33 = vpop.permute.xlu0 %7250 }
 0x7c8   :  { %5132 = vrot.lane.b32.xlu1 %v14433_v15, %s16518_s16  ;;  %v7273_v36 = vsel %vm144_vm7, %v7251_v33, %v7253_v49  ;;  %v7272_v43 = vsel %vm144_vm7, %v7249_v19, %v7251_v33 }
 0x7c9   :  { %5136 = vrot.lane.b32.xlu0 %v14435_v35, %s16518_s16  ;;  %8456 = vmatprep.subr.mxu1 %v7273_v36 }
 0x7ca   :  { %v7123_v0 = vpop.permute.xlu1 %7122  ;;  %8457 = vmatpush2.msra.mxu1 %v7272_v43 }
 0x7cb   :  { %v4427_v20 = vpop.permute.xlu0 %4426 }
 0x7cc   :  { %v4438_v14 = vsel %vm123_vm6, %v4427_v20, %v4429_v28  ;;  %5714 = vrot.lane.b32.xlu1 %v14392_v56, %s16506_s5 }
 0x7cd   :  { %5718 = vrot.lane.b32.xlu0 %v14394_v39, %s16506_s5  ;;  %8653 = vmatpush1.msra.mxu0 %v4438_v14 }
 0x7ce   :  { %v4419_v12 = vpop.permute.xlu1 %4418 }
 0x7cf   :  { %v4423_v51 = vpop.permute.xlu0 %4422 }
 0x7d0   :  { %5710 = vrot.lane.b32.xlu1 %v14276_v58, %s16506_s5  ;;  %v4437_v2 = vsel %vm123_vm6, %v4423_v51, %v4425_v45 }
 0x7d1   :  { %5134 = vrot.lane.b32.xlu0 %v14276_v58, %s16518_s16  ;;  %8654 = vmatprep.subr.mxu0 %v4437_v2 }
 0x7d2   :  { %v7121_v42 = vpop.permute.xlu1 %7120 }
 0x7d3   :  { %v7125_v3 = vpop.permute.xlu0 %7124 }
 0x7d4   :  { %5006 = vrot.lane.b32.xlu1 %v14313_v62, %s16515_s13  ;;  %v7135_v7 = vsel %vm123_vm6, %v7125_v3, %v7127_v6  ;;  %v7134_v27 = vsel %vm123_vm6, %v7123_v0, %v7125_v3 }
 0x7d5   :  { %5130 = vrot.lane.b32.xlu0 %v14457_v46, %s16518_s16  ;;  %8458 = vmatprep.subr.mxu1 %v7135_v7 }
 0x7d6   :  { %v7117_v32 = vpop.permute.xlu1 %7116  ;;  %8459 = vmatpush2.msra.mxu1 %v7134_v27 }
 0x7d7   :  { %v4421_v40 = vpop.permute.xlu0 %4420 }
 0x7d8   :  { %v4436_v50 = vsel %vm123_vm6, %v4421_v40, %v4423_v51  ;;  %5708 = vrot.lane.b32.xlu1 %v14433_v15, %s16506_s5 }
 0x7d9   :  { %5712 = vrot.lane.b32.xlu0 %v14435_v35, %s16506_s5  ;;  %8655 = vmatpush1.msra.mxu0 %v4436_v50 }
 0x7da   :  { %v4413_v26 = vpop.permute.xlu1 %4412 }
 0x7db   :  { %v4417_v44 = vpop.permute.xlu0 %4416 }
 0x7dc   :  { %5704 = vrot.lane.b32.xlu1 %v14299_v25, %s16506_s5  ;;  %v4435_v53 = vsel %vm123_vm6, %v4417_v44, %v4419_v12 }
 0x7dd   :  { %5128 = vrot.lane.b32.xlu0 %v14299_v25, %s16518_s16  ;;  %8656 = vmatprep.subr.mxu0 %v4435_v53  ;;  %s16922_s16 = sld [smem:[#allocation78_spill]] }
 0x7de   :  { %v7115_v38 = vpop.permute.xlu1 %7114 }
 0x7df   :  { %v7119_v10 = vpop.permute.xlu0 %7118 }
 0x7e0   :  { %5000 = vrot.lane.b32.xlu1 %v14345_v30, %s16515_s13  ;;  %v7133_v5 = vsel %vm123_vm6, %v7119_v10, %v7121_v42  ;;  %v7132_v61 = vsel %vm123_vm6, %v7117_v32, %v7119_v10 }
 0x7e1   :  { %5004 = vrot.lane.b32.xlu0 %v14347_v21, %s16515_s13  ;;  %8460 = vmatprep.subr.mxu1 %v7133_v5 }
 0x7e2   :  { %v7111_v4 = vpop.permute.xlu1 %7110  ;;  %8461 = vmatpush2.msra.mxu1 %v7132_v61 }
 0x7e3   :  { %v4415_v8 = vpop.permute.xlu0 %4414 }
 0x7e4   :  { %v4434_v63 = vsel %vm123_vm6, %v4415_v8, %v4417_v44  ;;  %5582 = vrot.lane.b32.xlu1 %v14313_v62, %s16507_s25 }
 0x7e5   :  { %5706 = vrot.lane.b32.xlu0 %v14457_v46, %s16506_s5  ;;  %8657 = vmatpush1.msra.mxu0 %v4434_v63 }
 0x7e6   :  { %v7109_v37 = vpop.permute.xlu1 %7108 }
 0x7e7   :  { %v4411_v59 = vpop.permute.xlu0 %4410 }
 0x7e8   :  { %5578 = vrot.lane.b32.xlu1 %v14217_v29, %s16507_s25  ;;  %v4433_v16 = vsel %vm123_vm6, %v4411_v59, %v4413_v26 }
 0x7e9   :  { %5002 = vrot.lane.b32.xlu0 %v14217_v29, %s16515_s13  ;;  %8658 = vmatprep.subr.mxu0 %v4433_v16 }
 0x7ea   :  { %v5293_v9 = vpop.permute.xlu1 %5292 }
 0x7eb   :  { %v7113_v52 = vpop.permute.xlu0 %7112 }
 0x7ec   :  { %4994 = vrot.lane.b32.xlu1 %v14392_v56, %s16515_s13  ;;  %v7131_v18 = vsel %vm123_vm6, %v7113_v52, %v7115_v38  ;;  %v7130_v49 = vsel %vm123_vm6, %v7111_v4, %v7113_v52  ;;  %v7669_v4 = vld [vmem:[%s16743_s3 + $0x68] sm:$0xff] }
 0x7ed   :  { %4998 = vrot.lane.b32.xlu0 %v14394_v39, %s16515_s13  ;;  %8462 = vmatprep.subr.mxu1 %v7131_v18  ;;  %v7683_v18 = vld [vmem:[%s16743_s3 + $0xd8] sm:$0xff] }
 0x7ee   :  { %v5291_v17 = vpop.permute.xlu1 %5290  ;;  %8463 = vmatpush2.msra.mxu1 %v7130_v49  ;;  %10840 = vmatmul.mubr.msk.f32.gmra.mxu0 %vm417_vm12, %v7669_v4 }
 0x7ef   :  { %v4409_v11 = vpop.permute.xlu0 %4408  ;;  %v5302_v43 = vsel %vm249_vm13, %v5291_v17, %v5293_v9  ;;  %8599 = vmatprep.mubr.f32.mxu0 %v16668_v41 }
 0x7f0   :  { %v4432_v13 = vsel %vm123_vm6, %v4409_v11, %v4411_v59  ;;  %5576 = vrot.lane.b32.xlu1 %v14345_v30, %s16507_s25  ;;  %v7676_v59 = vld [vmem:[%s16743_s3 + $0xa0] sm:$0xff] }
 0x7f1   :  { %5580 = vrot.lane.b32.xlu0 %v14347_v21, %s16507_s25  ;;  %8659 = vmatpush1.msra.mxu0 %v4432_v13 }
 0x7f2   :  { %v5289_v19 = vpop.permute.xlu1 %5288  ;;  %8660 = vmatprep.subr.mxu0 %v14347_v21  ;;  %10841 = vmatmul.mubr.msk.f32.gmra.mxu0 %vm417_vm12, %v7676_v59 }
 0x7f3   :  { %8661 = vmatpush1.msra.mxu0 %v14217_v29  ;;  %v7107_v34 = vpop.permute.xlu0 %7106  ;;  %8605 = vmatprep.mubr.f32.mxu0 %v16668_v41 }
 0x7f4   :  { %5572 = vrot.lane.b32.xlu1 %v14245_v48, %s16507_s25  ;;  %8662 = vmatprep.subr.mxu0 %v14394_v39  ;;  %v7129_v31 = vsel %vm123_vm6, %v7107_v34, %v7109_v37 }
 0x7f5   :  { %4996 = vrot.lane.b32.xlu0 %v14245_v48, %s16515_s13  ;;  %8464 = vmatprep.subr.mxu1 %v7129_v31 }
 0x7f6   :  { %8663 = vmatpush1.msra.mxu0 %v14245_v48  ;;  %v5871_v45 = vpop.permute.xlu1 %5870 }
 0x7f7   :  { %8664 = vmatprep.subr.mxu0 %v14435_v35  ;;  %v7105_v28 = vpop.permute.xlu0 %7104  ;;  %10842 = vmatmul.mubr.msk.f32.gmra.mxu0 %vm417_vm12, %v7683_v18 }
 0x7f8   :  { %8665 = vmatpush1.msra.mxu0 %v14276_v58  ;;  %v7128_v1 = vsel %vm123_vm6, %v7105_v28, %v7107_v34  ;;  %4988 = vrot.lane.b32.xlu1 %v14433_v15, %s16515_s13  ;;  %v7697_v28 = vld [vmem:[%s16743_s3 + $0x148] sm:$0xff] }
 0x7f9   :  { %8666 = vmatprep.subr.mxu0 %v14457_v46  ;;  %4992 = vrot.lane.b32.xlu0 %v14435_v35, %s16515_s13 }
 0x7fa   :  { %8465 = vmatpush2.msra.mxu1 %v7128_v1  ;;  %8667 = vmatpush1.msra.mxu0 %v14299_v25  ;;  %v5867_v6 = vpop.permute.xlu1 %5866 }
 0x7fb   :  { %8466 = vmatprep.subr.mxu1 %v13653_v55  ;;  %v5295_v33 = vpop.permute.xlu0 %5294  ;;  %8611 = vmatprep.mubr.f32.mxu0 %v16668_v41 }
 0x7fc   :  { %8467 = vmatpush2.msra.mxu1 %v13614_v57  ;;  %5570 = vrot.lane.b32.xlu1 %v14392_v56, %s16507_s25  ;;  %v5303_v36 = vsel %vm249_vm13, %v5293_v9, %v5295_v33 }
 0x7fd   :  { %8468 = vmatprep.subr.mxu1 %v13680_v23  ;;  %5574 = vrot.lane.b32.xlu0 %v14394_v39, %s16507_s25  ;;  %v7660_v23 = vld [vmem:[%s16743_s3 + $0x20] sm:$0xff] }
 0x7fe   :  { %8469 = vmatpush2.msra.mxu1 %v13642_v54  ;;  %8668 = vmatprep.subr.mxu0 %v5303_v36  ;;  %v5283_v0 = vpop.permute.xlu1 %5282  ;;  %v7704_v36 = vld [vmem:[%s16743_s3 + $0x180] sm:$0xff] }
 0x7ff   :  { %8470 = vmatprep.subr.mxu1 %v13704_v47  ;;  %8669 = vmatpush2.msra.mxu0 %v5302_v43  ;;  %v5287_v57 = vpop.permute.xlu0 %5286 }
 0x800   :  { %8471 = vmatpush2.msra.mxu1 %v13666_v60  ;;  %5566 = vrot.lane.b32.xlu1 %v14276_v58, %s16507_s25  ;;  %v5301_v55 = vsel %vm249_vm13, %v5287_v57, %v5289_v19  ;;  %v7690_v19 = vld [vmem:[%s16743_s3 + $0x110] sm:$0xff] }
 0x801   :  { %8472 = vmatprep.subr.mxu1 %v13723_v22  ;;  %4990 = vrot.lane.b32.xlu0 %v14276_v58, %s16515_s13 }
 0x802   :  { %8473 = vmatpush2.msra.mxu1 %v13693_v24  ;;  %8670 = vmatprep.subr.mxu0 %v5301_v55  ;;  %v5865_v54 = vpop.permute.xlu1 %5864 }
 0x803   :  { %v5869_v47 = vpop.permute.xlu0 %5868  ;;  %8475 = vmatmul.mubr.f32.vlgmr.msra.gmra.mxu1 %v7660_v23  ;;  %10843 = vmatmul.mubr.msk.f32.gmra.mxu0 %vm417_vm12, %v7690_v19  ;;  %v7711_v23 = vld [vmem:[%s16743_s3 + $0x1b8] sm:$0xff] }
 0x804   :  { %4862 = vrot.lane.b32.xlu1 %v14313_v62, %s16516_s27  ;;  %v5879_v60 = vsel %vm16786_vm4, %v5869_v47, %v5871_v45  ;;  %v5878_v20 = vsel %vm16787_vm15, %v5867_v6, %v5869_v47  ;;  %vm16791_vm4 = vmmov %vm16789_vm1  ;;  %8617 = vmatprep.mubr.f32.mxu0 %v16668_v41 }
 0x805   :  { %4986 = vrot.lane.b32.xlu0 %v14457_v46, %s16515_s13  ;;  %8749 = vmatprep.subr.mxu1 %v5879_v60  ;;  %vm16793_vm15 = vmmov %vm16789_vm1  ;;  %v11063_v60 = vld [vmem:[%s16743_s3 + $0x8] sm:$0xff] }
 0x806   :  { %v5861_v22 = vpop.permute.xlu1 %5860  ;;  %8750 = vmatpush1.msra.mxu1 %v5878_v20 }
 0x807   :  { %v5285_v14 = vpop.permute.xlu0 %5284  ;;  %10844 = vmatmul.mubr.msk.f32.gmra.mxu0 %vm417_vm12, %v7697_v28 }
 0x808   :  { %v5300_v24 = vsel %vm249_vm13, %v5285_v14, %v5287_v57  ;;  %5564 = vrot.lane.b32.xlu1 %v14433_v15, %s16507_s25  ;;  %8623 = vmatprep.mubr.f32.mxu0 %v16668_v41 }
 0x809   :  { %5568 = vrot.lane.b32.xlu0 %v14435_v35, %s16507_s25  ;;  %8671 = vmatpush2.msra.mxu0 %v5300_v24 }
 0x80a   :  { %v5277_v12 = vpop.permute.xlu1 %5276 }
 0x80b   :  { %v5281_v51 = vpop.permute.xlu0 %5280  ;;  %10845 = vmatmul.mubr.msk.f32.gmra.mxu0 %vm417_vm12, %v7704_v36 }
 0x80c   :  { %5560 = vrot.lane.b32.xlu1 %v14299_v25, %s16507_s25  ;;  %v5299_v2 = vsel %vm249_vm13, %v5281_v51, %v5283_v0  ;;  %8629 = vmatprep.mubr.f32.mxu0 %v16668_v41 }
 0x80d   :  { %4984 = vrot.lane.b32.xlu0 %v14299_v25, %s16515_s13  ;;  %8672 = vmatprep.subr.mxu0 %v5299_v2 }
 0x80e   :  { %v5859_v42 = vpop.permute.xlu1 %5858 }
 0x80f   :  { %v5863_v3 = vpop.permute.xlu0 %5862  ;;  %10846 = vmatmul.mubr.msk.f32.gmra.mxu0 %vm417_vm12, %v7711_v23 }
 0x810   :  { %4856 = vrot.lane.b32.xlu1 %v14345_v30, %s16516_s27  ;;  %v5877_v7 = vsel %vm16788_vm9, %v5863_v3, %v5865_v54  ;;  %v5876_v27 = vsel %vm16789_vm1, %v5861_v22, %v5863_v3  ;;  %vm16794_vm9 = vmmov %vm16789_vm1  ;;  %8700 = vmatprep.mubr.f32.mxu0 %v11063_v60  ;;  %v7675_v60 = vld [vmem:[%s16743_s3 + $0x98] sm:$0xff] }
 0x811   :  { %4860 = vrot.lane.b32.xlu0 %v14347_v21, %s16516_s27  ;;  %8751 = vmatprep.subr.mxu1 %v5877_v7 }
 0x812   :  { %v5855_v32 = vpop.permute.xlu1 %5854  ;;  %8752 = vmatpush1.msra.mxu1 %v5876_v27 }
 0x813   :  { %v5279_v40 = vpop.permute.xlu0 %5278 }
 0x814   :  { %v5298_v50 = vsel %vm249_vm13, %v5279_v40, %v5281_v51  ;;  %5438 = vrot.lane.b32.xlu1 %v14313_v62, %s16504_s23 }
 0x815   :  { %5562 = vrot.lane.b32.xlu0 %v14457_v46, %s16507_s25  ;;  %8673 = vmatpush2.msra.mxu0 %v5298_v50  ;;  %s16919_s25 = sld [smem:[#allocation79_spill]] }
 0x816   :  { %v5151_v26 = vpop.permute.xlu1 %5150 }
 0x817   :  { %v5275_v44 = vpop.permute.xlu0 %5274 }
 0x818   :  { %5434 = vrot.lane.b32.xlu1 %v14217_v29, %s16504_s23  ;;  %v5297_v53 = vsel %vm249_vm13, %v5275_v44, %v5277_v12 }
 0x819   :  { %4858 = vrot.lane.b32.xlu0 %v14217_v29, %s16516_s27  ;;  %8674 = vmatprep.subr.mxu0 %v5297_v53 }
 0x81a   :  { %v5853_v38 = vpop.permute.xlu1 %5852 }
 0x81b   :  { %v5857_v10 = vpop.permute.xlu0 %5856 }
 0x81c   :  { %4850 = vrot.lane.b32.xlu1 %v14392_v56, %s16516_s27  ;;  %v5875_v5 = vsel %vm16790_vm14, %v5857_v10, %v5859_v42  ;;  %v5874_v61 = vsel %vm16791_vm4, %v5855_v32, %v5857_v10 }
 0x81d   :  { %4854 = vrot.lane.b32.xlu0 %v14394_v39, %s16516_s27  ;;  %8753 = vmatprep.subr.mxu1 %v5875_v5 }
 0x81e   :  { %v5849_v8 = vpop.permute.xlu1 %5848  ;;  %8754 = vmatpush1.msra.mxu1 %v5874_v61 }
 0x81f   :  { %v5273_v63 = vpop.permute.xlu0 %5272 }
 0x820   :  { %v5296_v37 = vsel %vm249_vm13, %v5273_v63, %v5275_v44  ;;  %5432 = vrot.lane.b32.xlu1 %v14345_v30, %s16504_s23  ;;  %vm16792_vm13 = vcmask 777216  }
 0x821   :  { %5436 = vrot.lane.b32.xlu0 %v14347_v21, %s16504_s23  ;;  %8675 = vmatpush2.msra.mxu0 %v5296_v37  ;;  %vm16795_vm1 = vmmov %vm16792_vm13 }
 0x822   :  { %v5145_v16 = vpop.permute.xlu1 %5144  ;;  %vm16796_vm14 = vmmov %vm16795_vm1 }
 0x823   :  { %v5149_v9 = vpop.permute.xlu0 %5148  ;;  %vm16797_vm4 = vmmov %vm16795_vm1 }
 0x824   :  { %5428 = vrot.lane.b32.xlu1 %v14245_v48, %s16504_s23  ;;  %v5159_v52 = vsel %vm16792_vm13, %v5149_v9, %v5151_v26  ;;  %vm16798_vm13 = vmmov %vm16795_vm1 }
 0x825   :  { %4852 = vrot.lane.b32.xlu0 %v14245_v48, %s16516_s27  ;;  %8676 = vmatprep.subr.mxu0 %v5159_v52 }
 0x826   :  { %v5727_v49 = vpop.permute.xlu1 %5726 }
 0x827   :  { %v5851_v17 = vpop.permute.xlu0 %5850 }
 0x828   :  { %4844 = vrot.lane.b32.xlu1 %v14433_v15, %s16516_s27  ;;  %v5873_v11 = vsel %vm16793_vm15, %v5851_v17, %v5853_v38  ;;  %v5872_v13 = vsel %vm16794_vm9, %v5849_v8, %v5851_v17  ;;  %vm16799_vm15 = vmmov %vm16795_vm1 }
 0x829   :  { %4848 = vrot.lane.b32.xlu0 %v14435_v35, %s16516_s27  ;;  %8755 = vmatprep.subr.mxu1 %v5873_v11  ;;  %vm16800_vm9 = vmmov %vm16795_vm1 }
 0x82a   :  { %v5723_v34 = vpop.permute.xlu1 %5722  ;;  %8756 = vmatpush1.msra.mxu1 %v5872_v13 }
 0x82b   :  { %v5147_v31 = vpop.permute.xlu0 %5146 }
 0x82c   :  { %v5158_v45 = vsel %vm16795_vm1, %v5147_v31, %v5149_v9  ;;  %5426 = vrot.lane.b32.xlu1 %v14392_v56, %s16504_s23 }
 0x82d   :  { %5430 = vrot.lane.b32.xlu0 %v14394_v39, %s16504_s23  ;;  %8677 = vmatpush2.msra.mxu0 %v5158_v45 }
 0x82e   :  { %v5139_v1 = vpop.permute.xlu1 %5138 }
 0x82f   :  { %v5143_v6 = vpop.permute.xlu0 %5142 }
 0x830   :  { %5422 = vrot.lane.b32.xlu1 %v14276_v58, %s16504_s23  ;;  %v5157_v33 = vsel %vm16796_vm14, %v5143_v6, %v5145_v16  ;;  %vm16801_vm14 = vcmask 785408  }
 0x831   :  { %4846 = vrot.lane.b32.xlu0 %v14276_v58, %s16516_s27  ;;  %8678 = vmatprep.subr.mxu0 %v5157_v33 }
 0x832   :  { %v5721_v43 = vpop.permute.xlu1 %5720 }
 0x833   :  { %v5725_v0 = vpop.permute.xlu0 %5724 }
 0x834   :  { %5420 = vrot.lane.b32.xlu1 %v14433_v15, %s16504_s23  ;;  %v5735_v57 = vsel %vm312_vm11, %v5725_v0, %v5727_v49  ;;  %v5734_v55 = vsel %vm312_vm11, %v5723_v34, %v5725_v0  ;;  %v7668_v0 = vld [vmem:[%s16743_s3 + $0x60] sm:$0xff] }
 0x835   :  { %4842 = vrot.lane.b32.xlu0 %v14457_v46, %s16516_s27  ;;  %8757 = vmatprep.subr.mxu1 %v5735_v57  ;;  %v7667_v57 = vld [vmem:[%s16743_s3 + $0x58] sm:$0xff] }
 0x836   :  { %v5717_v54 = vpop.permute.xlu1 %5716  ;;  %8758 = vmatpush1.msra.mxu1 %v5734_v55  ;;  %8480 = vmatprep.mubr.f32.mxu1 %v7668_v0 }
 0x837   :  { %v5141_v47 = vpop.permute.xlu0 %5140  ;;  %8481 = vmatmul.mubr.f32.gmra.mxu1 %v7667_v57 }
 0x838   :  { %v5156_v20 = vsel %vm16797_vm4, %v5141_v47, %v5143_v6  ;;  %7022 = vrot.lane.b32.xlu1 %v14313_v62, %s16502_s0  ;;  %vm16802_vm4 = vmmov %vm16801_vm14  ;;  %8486 = vmatprep.mubr.f32.mxu1 %v7675_v60 }
 0x839   :  { %5424 = vrot.lane.b32.xlu0 %v14435_v35, %s16504_s23  ;;  %8679 = vmatpush2.msra.mxu0 %v5156_v20  ;;  %v7674_v20 = vld [vmem:[%s16743_s3 + $0x90] sm:$0xff] }
 0x83a   :  { %v5133_v22 = vpop.permute.xlu1 %5132 }
 0x83b   :  { %v5137_v14 = vpop.permute.xlu0 %5136  ;;  %8487 = vmatmul.mubr.f32.gmra.mxu1 %v7674_v20 }
 0x83c   :  { %7018 = vrot.lane.b32.xlu1 %v14217_v29, %s16502_s0  ;;  %v5155_v24 = vsel %vm16798_vm13, %v5137_v14, %v5139_v1  ;;  %vm16803_vm13 = vmmov %vm16802_vm4 }
 0x83d   :  { %4840 = vrot.lane.b32.xlu0 %v14299_v25, %s16516_s27  ;;  %8680 = vmatprep.subr.mxu0 %v5155_v24 }
 0x83e   :  { %v5715_v12 = vpop.permute.xlu1 %5714 }
 0x83f   :  { %v5719_v51 = vpop.permute.xlu0 %5718 }
 0x840   :  { %6446 = vrot.lane.b32.xlu1 %v14313_v62, %s16513_s4  ;;  %v5733_v2 = vsel %vm312_vm11, %v5719_v51, %v5721_v43  ;;  %v5732_v42 = vsel %vm312_vm11, %v5717_v54, %v5719_v51  ;;  %v7681_v51 = vld [vmem:[%s16743_s3 + $0xc8] sm:$0xff] }
 0x841   :  { %5418 = vrot.lane.b32.xlu0 %v14457_v46, %s16504_s23  ;;  %8759 = vmatprep.subr.mxu1 %v5733_v2 }
 0x842   :  { %v5711_v3 = vpop.permute.xlu1 %5710  ;;  %8760 = vmatpush1.msra.mxu1 %v5732_v42 }
 0x843   :  { %v5135_v7 = vpop.permute.xlu0 %5134 }
 0x844   :  { %v5154_v27 = vsel %vm16799_vm15, %v5135_v7, %v5137_v14  ;;  %7016 = vrot.lane.b32.xlu1 %v14345_v30, %s16502_s0  ;;  %vm16804_vm15 = vmmov %vm16802_vm4  ;;  %v7689_v7 = vld [vmem:[%s16743_s3 + $0x108] sm:$0xff] }
 0x845   :  { %7020 = vrot.lane.b32.xlu0 %v14347_v21, %s16502_s0  ;;  %8681 = vmatpush2.msra.mxu0 %v5154_v27  ;;  %v7688_v27 = vld [vmem:[%s16743_s3 + $0x100] sm:$0xff] }
 0x846   :  { %v5007_v32 = vpop.permute.xlu1 %5006 }
 0x847   :  { %v5131_v40 = vpop.permute.xlu0 %5130 }
 0x848   :  { %7012 = vrot.lane.b32.xlu1 %v14245_v48, %s16502_s0  ;;  %v5153_v50 = vsel %vm16800_vm9, %v5131_v40, %v5133_v22  ;;  %vm16805_vm9 = vmmov %vm16802_vm4 }
 0x849   :  { %5416 = vrot.lane.b32.xlu0 %v14299_v25, %s16504_s23  ;;  %8682 = vmatprep.subr.mxu0 %v5153_v50 }
 0x84a   :  { %v5709_v26 = vpop.permute.xlu1 %5708 }
 0x84b   :  { %v5713_v44 = vpop.permute.xlu0 %5712 }
 0x84c   :  { %6440 = vrot.lane.b32.xlu1 %v14345_v30, %s16513_s4  ;;  %v5731_v53 = vsel %vm312_vm11, %v5713_v44, %v5715_v12  ;;  %v5730_v38 = vsel %vm312_vm11, %v5711_v3, %v5713_v44  ;;  %v7682_v12 = vld [vmem:[%s16743_s3 + $0xd0] sm:$0xff]  ;;  %v7696_v44 = vld [vmem:[%s16743_s3 + $0x140] sm:$0xff] }
 0x84d   :  { %6444 = vrot.lane.b32.xlu0 %v14347_v21, %s16513_s4  ;;  %8761 = vmatprep.subr.mxu1 %v5731_v53  ;;  %v7695_v53 = vld [vmem:[%s16743_s3 + $0x138] sm:$0xff] }
 0x84e   :  { %v5705_v10 = vpop.permute.xlu1 %5704  ;;  %8762 = vmatpush1.msra.mxu1 %v5730_v38  ;;  %8492 = vmatprep.mubr.f32.mxu1 %v7682_v12 }
 0x84f   :  { %v5129_v5 = vpop.permute.xlu0 %5128  ;;  %8493 = vmatmul.mubr.f32.gmra.mxu1 %v7681_v51 }
 0x850   :  { %v5152_v61 = vsel %vm16795_vm1, %v5129_v5, %v5131_v40  ;;  %7010 = vrot.lane.b32.xlu1 %v14392_v56, %s16502_s0  ;;  %vm16806_vm1 = vmmov %vm16802_vm4  ;;  %8498 = vmatprep.mubr.f32.mxu1 %v7689_v7 }
 0x851   :  { %7014 = vrot.lane.b32.xlu0 %v14394_v39, %s16502_s0  ;;  %8683 = vmatpush2.msra.mxu0 %v5152_v61  ;;  %v7703_v61 = vld [vmem:[%s16743_s3 + $0x178] sm:$0xff] }
 0x852   :  { %v5001_v4 = vpop.permute.xlu1 %5000 }
 0x853   :  { %v5005_v8 = vpop.permute.xlu0 %5004  ;;  %8499 = vmatmul.mubr.f32.gmra.mxu1 %v7688_v27 }
 0x854   :  { %7006 = vrot.lane.b32.xlu1 %v14276_v58, %s16502_s0  ;;  %v5015_v63 = vsel %vm16801_vm14, %v5005_v8, %v5007_v32  ;;  %vm16807_vm14 = vmmov %vm16806_vm1  ;;  %8504 = vmatprep.mubr.f32.mxu1 %v7696_v44  ;;  %v11065_v44 = vld [vmem:[%s16743_s3] sm:$0xff] }
 0x855   :  { %6442 = vrot.lane.b32.xlu0 %v14217_v29, %s16513_s4  ;;  %8684 = vmatprep.subr.mxu0 %v5015_v63 }
 0x856   :  { %v5583_v37 = vpop.permute.xlu1 %5582 }
 0x857   :  { %v5707_v59 = vpop.permute.xlu0 %5706  ;;  %8505 = vmatmul.mubr.f32.gmra.mxu1 %v7695_v53 }
 0x858   :  { %6434 = vrot.lane.b32.xlu1 %v14392_v56, %s16513_s4  ;;  %v5729_v16 = vsel %vm312_vm11, %v5707_v59, %v5709_v26  ;;  %v5728_v9 = vsel %vm312_vm11, %v5705_v10, %v5707_v59  ;;  %8510 = vmatprep.mubr.f32.mxu1 %v7703_v61  ;;  %v7710_v59 = vld [vmem:[%s16743_s3 + $0x1b0] sm:$0xff]  ;;  %v11067_v61 = vld [vmem:[%s16743_s3 + $0x38] sm:$0xff] }
 0x859   :  { %6438 = vrot.lane.b32.xlu0 %v14394_v39, %s16513_s4  ;;  %8763 = vmatprep.subr.mxu1 %v5729_v16  ;;  %v7709_v16 = vld [vmem:[%s16743_s3 + $0x1a8] sm:$0xff] }
 0x85a   :  { %v5579_v52 = vpop.permute.xlu1 %5578  ;;  %8764 = vmatpush1.msra.mxu1 %v5728_v9 }
 0x85b   :  { %v5003_v18 = vpop.permute.xlu0 %5002 }
 0x85c   :  { %v5014_v49 = vsel %vm16802_vm4, %v5003_v18, %v5005_v8  ;;  %7004 = vrot.lane.b32.xlu1 %v14433_v15, %s16502_s0  ;;  %vm16808_vm4 = vmmov %vm16806_vm1 }
 0x85d   :  { %7008 = vrot.lane.b32.xlu0 %v14435_v35, %s16502_s0  ;;  %8685 = vmatpush2.msra.mxu0 %v5014_v49 }
 0x85e   :  { %v4995_v17 = vpop.permute.xlu1 %4994 }
 0x85f   :  { %v4999_v11 = vpop.permute.xlu0 %4998 }
 0x860   :  { %7000 = vrot.lane.b32.xlu1 %v14299_v25, %s16502_s0  ;;  %v5013_v13 = vsel %vm16803_vm13, %v4999_v11, %v5001_v4  ;;  %v7702_v4 = vld [vmem:[%s16743_s3 + $0x170] sm:$0xff] }
 0x861   :  { %6436 = vrot.lane.b32.xlu0 %v14245_v48, %s16513_s4  ;;  %8686 = vmatprep.subr.mxu0 %v5013_v13 }
 0x862   :  { %v5577_v19 = vpop.permute.xlu1 %5576  ;;  %8511 = vmatmul.mubr.f32.gmra.mxu1 %v7702_v4 }
 0x863   :  { %v5581_v34 = vpop.permute.xlu0 %5580  ;;  %8516 = vmatprep.mubr.f32.mxu1 %v7710_v59 }
 0x864   :  { %6428 = vrot.lane.b32.xlu1 %v14433_v15, %s16513_s4  ;;  %v5591_v31 = vsel %vm291_vm10, %v5581_v34, %v5583_v37  ;;  %v5590_v45 = vsel %vm291_vm10, %v5579_v52, %v5581_v34 }
 0x865   :  { %6432 = vrot.lane.b32.xlu0 %v14435_v35, %s16513_s4  ;;  %8765 = vmatprep.subr.mxu1 %v5591_v31 }
 0x866   :  { %v5573_v28 = vpop.permute.xlu1 %5572  ;;  %8766 = vmatpush1.msra.mxu1 %v5590_v45 }
 0x867   :  { %v4997_v1 = vpop.permute.xlu0 %4996  ;;  %8517 = vmatmul.mubr.f32.gmra.mxu1 %v7709_v16 }
 0x868   :  { %v5012_v6 = vsel %vm16804_vm15, %v4997_v1, %v4999_v11  ;;  %6878 = vrot.lane.b32.xlu1 %v14313_v62, %s16503_s28 }
 0x869   :  { %7002 = vrot.lane.b32.xlu0 %v14457_v46, %s16502_s0  ;;  %8687 = vmatpush2.msra.mxu0 %v5012_v6  ;;  %s16908_s0 = sld [smem:[#allocation71_spill]] }
 0x86a   :  { %v4989_v33 = vpop.permute.xlu1 %4988 }
 0x86b   :  { %v4993_v36 = vpop.permute.xlu0 %4992 }
 0x86c   :  { %6874 = vrot.lane.b32.xlu1 %v14217_v29, %s16503_s28  ;;  %v5011_v43 = vsel %vm16805_vm9, %v4993_v36, %v4995_v17  ;;  %v11064_v17 = vld [vmem:[%s16743_s3 + $0x18] sm:$0xff] }
 0x86d   :  { %6430 = vrot.lane.b32.xlu0 %v14276_v58, %s16513_s4  ;;  %8688 = vmatprep.subr.mxu0 %v5011_v43 }
 0x86e   :  { %v5571_v55 = vpop.permute.xlu1 %5570  ;;  %8813 = vmatprep.mubr.f32.mxu1 %v11064_v17 }
 0x86f   :  { %v5575_v23 = vpop.permute.xlu0 %5574 }
 0x870   :  { %6302 = vrot.lane.b32.xlu1 %v14313_v62, %s16510_s17  ;;  %v5589_v54 = vsel %vm291_vm10, %v5575_v23, %v5577_v19  ;;  %v5588_v47 = vsel %vm291_vm10, %v5573_v28, %v5575_v23 }
 0x871   :  { %6426 = vrot.lane.b32.xlu0 %v14457_v46, %s16513_s4  ;;  %8767 = vmatprep.subr.mxu1 %v5589_v54 }
 0x872   :  { %v5567_v22 = vpop.permute.xlu1 %5566  ;;  %8768 = vmatpush1.msra.mxu1 %v5588_v47 }
 0x873   :  { %v4991_v14 = vpop.permute.xlu0 %4990 }
 0x874   :  { %v5010_v24 = vsel %vm16806_vm1, %v4991_v14, %v4993_v36  ;;  %6872 = vrot.lane.b32.xlu1 %v14345_v30, %s16503_s28 }
 0x875   :  { %6876 = vrot.lane.b32.xlu0 %v14347_v21, %s16503_s28  ;;  %8689 = vmatpush2.msra.mxu0 %v5010_v24 }
 0x876   :  { %v4863_v2 = vpop.permute.xlu1 %4862 }
 0x877   :  { %v4987_v42 = vpop.permute.xlu0 %4986 }
 0x878   :  { %6868 = vrot.lane.b32.xlu1 %v14245_v48, %s16503_s28  ;;  %v5009_v3 = vsel %vm16807_vm14, %v4987_v42, %v4989_v33 }
 0x879   :  { %6424 = vrot.lane.b32.xlu0 %v14299_v25, %s16513_s4  ;;  %8690 = vmatprep.subr.mxu0 %v5009_v3 }
 0x87a   :  { %v5565_v32 = vpop.permute.xlu1 %5564 }
 0x87b   :  { %v5569_v40 = vpop.permute.xlu0 %5568 }
 0x87c   :  { %6296 = vrot.lane.b32.xlu1 %v14345_v30, %s16510_s17  ;;  %v5587_v50 = vsel %vm291_vm10, %v5569_v40, %v5571_v55  ;;  %v5586_v26 = vsel %vm291_vm10, %v5567_v22, %v5569_v40 }
 0x87d   :  { %6300 = vrot.lane.b32.xlu0 %v14347_v21, %s16510_s17  ;;  %8769 = vmatprep.subr.mxu1 %v5587_v50 }
 0x87e   :  { %v5561_v38 = vpop.permute.xlu1 %5560  ;;  %8770 = vmatpush1.msra.mxu1 %v5586_v26 }
 0x87f   :  { %v4985_v10 = vpop.permute.xlu0 %4984 }
 0x880   :  { %v5008_v5 = vsel %vm16808_vm4, %v4985_v10, %v4987_v42  ;;  %6866 = vrot.lane.b32.xlu1 %v14392_v56, %s16503_s28 }
 0x881   :  { %6870 = vrot.lane.b32.xlu0 %v14394_v39, %s16503_s28  ;;  %8691 = vmatpush2.msra.mxu0 %v5008_v5 }
 0x882   :  { %v4857_v8 = vpop.permute.xlu1 %4856 }
 0x883   :  { %v4861_v63 = vpop.permute.xlu0 %4860 }
 0x884   :  { %6862 = vrot.lane.b32.xlu1 %v14276_v58, %s16503_s28  ;;  %v4871_v37 = vsel %vm186_vm2, %v4861_v63, %v4863_v2 }
 0x885   :  { %6298 = vrot.lane.b32.xlu0 %v14217_v29, %s16510_s17  ;;  %8692 = vmatprep.subr.mxu0 %v4871_v37 }
 0x886   :  { %v5439_v9 = vpop.permute.xlu1 %5438 }
 0x887   :  { %v5563_v52 = vpop.permute.xlu0 %5562 }
 0x888   :  { %6290 = vrot.lane.b32.xlu1 %v14392_v56, %s16510_s17  ;;  %v5585_v18 = vsel %vm291_vm10, %v5563_v52, %v5565_v32  ;;  %v5584_v49 = vsel %vm291_vm10, %v5561_v38, %v5563_v52  ;;  %vm16809_vm10 = vcmask 760832   ;;  %v11066_v38 = vld [vmem:[%s16743_s3 + $0x40] sm:$0xff] }
 0x889   :  { %6294 = vrot.lane.b32.xlu0 %v14394_v39, %s16510_s17  ;;  %8771 = vmatprep.subr.mxu1 %v5585_v18  ;;  %vm16810_vm13 = vmmov %vm16809_vm10  ;;  %v11070_v18 = vld [vmem:[%s16743_s3 + $0xb0] sm:$0xff] }
 0x88a   :  { %v5435_v11 = vpop.permute.xlu1 %5434  ;;  %8772 = vmatpush1.msra.mxu1 %v5584_v49  ;;  %vm16811_vm15 = vmmov %vm16809_vm10 }
 0x88b   :  { %v4859_v13 = vpop.permute.xlu0 %4858  ;;  %vm16812_vm9 = vmmov %vm16809_vm10 }
 0x88c   :  { %v4870_v19 = vsel %vm186_vm2, %v4859_v13, %v4861_v63  ;;  %6860 = vrot.lane.b32.xlu1 %v14433_v15, %s16503_s28  ;;  %vm16813_vm1 = vmmov %vm16812_vm9 }
 0x88d   :  { %6864 = vrot.lane.b32.xlu0 %v14435_v35, %s16503_s28  ;;  %8693 = vmatpush2.msra.mxu0 %v4870_v19  ;;  %vm16814_vm14 = vmmov %vm16813_vm1  ;;  %v11072_v19 = vld [vmem:[%s16743_s3 + $0xe8] sm:$0xff] }
 0x88e   :  { %v4851_v34 = vpop.permute.xlu1 %4850  ;;  %vm16815_vm4 = vmmov %vm16813_vm1 }
 0x88f   :  { %v4855_v31 = vpop.permute.xlu0 %4854 }
 0x890   :  { %6856 = vrot.lane.b32.xlu1 %v14299_v25, %s16503_s28  ;;  %v4869_v45 = vsel %vm186_vm2, %v4855_v31, %v4857_v8  ;;  %v11068_v8 = vld [vmem:[%s16743_s3 + $0x78] sm:$0xff] }
 0x891   :  { %6292 = vrot.lane.b32.xlu0 %v14245_v48, %s16510_s17  ;;  %8694 = vmatprep.subr.mxu0 %v4869_v45  ;;  %v11073_v45 = vld [vmem:[%s16743_s3 + $0xe0] sm:$0xff] }
 0x892   :  { %v5433_v28 = vpop.permute.xlu1 %5432 }
 0x893   :  { %v5437_v1 = vpop.permute.xlu0 %5436 }
 0x894   :  { %6284 = vrot.lane.b32.xlu1 %v14433_v15, %s16510_s17  ;;  %v5447_v6 = vsel %vm16809_vm10, %v5437_v1, %v5439_v9  ;;  %v5446_v33 = vsel %vm16810_vm13, %v5435_v11, %v5437_v1  ;;  %v11069_v9 = vld [vmem:[%s16743_s3 + $0x70] sm:$0xff]  ;;  %vm16816_vm10 = vmmov %vm16813_vm1  ;;  %v11071_v11 = vld [vmem:[%s16743_s3 + $0xa8] sm:$0xff] }
 0x895   :  { %6288 = vrot.lane.b32.xlu0 %v14435_v35, %s16510_s17  ;;  %8773 = vmatprep.subr.mxu1 %v5447_v6  ;;  %v11074_v6 = vld [vmem:[%s16743_s3 + $0x120] sm:$0xff] }
 0x896   :  { %v5429_v36 = vpop.permute.xlu1 %5428  ;;  %8774 = vmatpush1.msra.mxu1 %v5446_v33 }
 0x897   :  { %v4853_v43 = vpop.permute.xlu0 %4852 }
 0x898   :  { %v4868_v0 = vsel %vm186_vm2, %v4853_v43, %v4855_v31  ;;  %6734 = vrot.lane.b32.xlu1 %v14313_v62, %s16500_s26  ;;  %v11075_v43 = vld [vmem:[%s16743_s3 + $0x118] sm:$0xff] }
 0x899   :  { %6858 = vrot.lane.b32.xlu0 %v14457_v46, %s16503_s28  ;;  %8695 = vmatpush2.msra.mxu0 %v4868_v0 }
 0x89a   :  { %v4845_v57 = vpop.permute.xlu1 %4844 }
 0x89b   :  { %v4849_v55 = vpop.permute.xlu0 %4848 }
 0x89c   :  { %6730 = vrot.lane.b32.xlu1 %v14217_v29, %s16500_s26  ;;  %v4867_v23 = vsel %vm186_vm2, %v4849_v55, %v4851_v34 }
 0x89d   :  { %6286 = vrot.lane.b32.xlu0 %v14276_v58, %s16510_s17  ;;  %8696 = vmatprep.subr.mxu0 %v4867_v23 }
 0x89e   :  { %v5427_v54 = vpop.permute.xlu1 %5426 }
 0x89f   :  { %v5431_v47 = vpop.permute.xlu0 %5430 }
 0x8a0   :  { %6158 = vrot.lane.b32.xlu1 %v14313_v62, %s16511_s7  ;;  %v5445_v60 = vsel %vm16811_vm15, %v5431_v47, %v5433_v28  ;;  %v5444_v20 = vsel %vm16812_vm9, %v5429_v36, %v5431_v47 }
 0x8a1   :  { %6282 = vrot.lane.b32.xlu0 %v14457_v46, %s16510_s17  ;;  %8775 = vmatprep.subr.mxu1 %v5445_v60  ;;  %v11078_v60 = vld [vmem:[%s16743_s3 + $0x190] sm:$0xff] }
 0x8a2   :  { %v5423_v22 = vpop.permute.xlu1 %5422  ;;  %8776 = vmatpush1.msra.mxu1 %v5444_v20 }
 0x8a3   :  { %v4847_v14 = vpop.permute.xlu0 %4846 }
 0x8a4   :  { %v4866_v24 = vsel %vm186_vm2, %v4847_v14, %v4849_v55  ;;  %6728 = vrot.lane.b32.xlu1 %v14345_v30, %s16500_s26  ;;  %v11079_v14 = vld [vmem:[%s16743_s3 + $0x188] sm:$0xff] }
 0x8a5   :  { %6732 = vrot.lane.b32.xlu0 %v14347_v21, %s16500_s26  ;;  %8697 = vmatpush2.msra.mxu0 %v4866_v24 }
 0x8a6   :  { %v5421_v12 = vpop.permute.xlu1 %5420 }
 0x8a7   :  { %v4843_v51 = vpop.permute.xlu0 %4842 }
 0x8a8   :  { %6724 = vrot.lane.b32.xlu1 %v14245_v48, %s16500_s26  ;;  %v4865_v2 = vsel %vm186_vm2, %v4843_v51, %v4845_v57  ;;  %v11076_v57 = vld [vmem:[%s16743_s3 + $0x158] sm:$0xff] }
 0x8a9   :  { %6280 = vrot.lane.b32.xlu0 %v14299_v25, %s16510_s17  ;;  %8698 = vmatprep.subr.mxu0 %v4865_v2 }
 0x8aa   :  { %v7023_v42 = vpop.permute.xlu1 %7022 }
 0x8ab   :  { %v5425_v3 = vpop.permute.xlu0 %5424 }
 0x8ac   :  { %6152 = vrot.lane.b32.xlu1 %v14345_v30, %s16511_s7  ;;  %v5443_v7 = vsel %vm16813_vm1, %v5425_v3, %v5427_v54  ;;  %v5442_v27 = vsel %vm16814_vm14, %v5423_v22, %v5425_v3  ;;  %v11077_v54 = vld [vmem:[%s16743_s3 + $0x150] sm:$0xff] }
 0x8ad   :  { %6156 = vrot.lane.b32.xlu0 %v14347_v21, %s16511_s7  ;;  %8777 = vmatprep.subr.mxu1 %v5443_v7 }
 0x8ae   :  { %v7019_v32 = vpop.permute.xlu1 %7018  ;;  %8778 = vmatpush1.msra.mxu1 %v5442_v27 }
 0x8af   :  { %v4841_v40 = vpop.permute.xlu0 %4840 }
 0x8b0   :  { %v4864_v50 = vsel %vm186_vm2, %v4841_v40, %v4843_v51  ;;  %6722 = vrot.lane.b32.xlu1 %v14392_v56, %s16500_s26  ;;  %v11080_v51 = vld [vmem:[%s16743_s3 + $0x28] sm:$0xff] }
 0x8b1   :  { %6726 = vrot.lane.b32.xlu0 %v14394_v39, %s16500_s26  ;;  %8699 = vmatpush2.msra.mxu0 %v4864_v50 }
 0x8b2   :  { %v6447_v26 = vpop.permute.xlu1 %6446  ;;  %8701 = vmatmul.mubr.f32.vlgmr.msra.gmra.mxu0 %v11065_v44 }
 0x8b3   :  { %v5419_v53 = vpop.permute.xlu0 %5418  ;;  %8706 = vmatprep.mubr.f32.mxu0 %v11066_v38 }
 0x8b4   :  { %6718 = vrot.lane.b32.xlu1 %v14276_v58, %s16500_s26  ;;  %v5441_v10 = vsel %vm16815_vm4, %v5419_v53, %v5421_v12  ;;  %vm16824_vm4 = vcmask 244736  }
 0x8b5   :  { %6154 = vrot.lane.b32.xlu0 %v14217_v29, %s16511_s7  ;;  %8779 = vmatprep.subr.mxu1 %v5441_v10 }
 0x8b6   :  { %v7017_v5 = vpop.permute.xlu1 %7016  ;;  %8707 = vmatmul.mubr.f32.gmra.mxu0 %v11067_v61 }
 0x8b7   :  { %v7021_v4 = vpop.permute.xlu0 %7020  ;;  %8712 = vmatprep.mubr.f32.mxu0 %v11068_v8 }
 0x8b8   :  { %6146 = vrot.lane.b32.xlu1 %v14392_v56, %s16511_s7  ;;  %v7031_v63 = vsel %vm501_vm5, %v7021_v4, %v7023_v42  ;;  %v7030_v37 = vsel %vm501_vm5, %v7019_v32, %v7021_v4 }
 0x8b9   :  { %6150 = vrot.lane.b32.xlu0 %v14394_v39, %s16511_s7  ;;  %8862 = vmatprep.subr.mxu0 %v7031_v63 }
 0x8ba   :  { %v7013_v59 = vpop.permute.xlu1 %7012  ;;  %8863 = vmatpush1.msra.mxu0 %v7030_v37 }
 0x8bb   :  { %v5417_v16 = vpop.permute.xlu0 %5416  ;;  %8713 = vmatmul.mubr.f32.gmra.mxu0 %v11069_v9 }
 0x8bc   :  { %v5440_v52 = vsel %vm16816_vm10, %v5417_v16, %v5419_v53  ;;  %6716 = vrot.lane.b32.xlu1 %v14433_v15, %s16500_s26  ;;  %8718 = vmatprep.mubr.f32.mxu0 %v11070_v18  ;;  %vm16825_vm10 = vmmov %vm16824_vm4 }
 0x8bd   :  { %6720 = vrot.lane.b32.xlu0 %v14435_v35, %s16500_s26  ;;  %8780 = vmatpush1.msra.mxu1 %v5440_v52 }
 0x8be   :  { %v6441_v49 = vpop.permute.xlu1 %6440 }
 0x8bf   :  { %v6445_v17 = vpop.permute.xlu0 %6444  ;;  %8719 = vmatmul.mubr.f32.gmra.mxu0 %v11071_v11 }
 0x8c0   :  { %6712 = vrot.lane.b32.xlu1 %v14299_v25, %s16500_s26  ;;  %v6455_v13 = vsel %vm417_vm12, %v6445_v17, %v6447_v26  ;;  %8724 = vmatprep.mubr.f32.mxu0 %v11072_v19 }
 0x8c1   :  { %6148 = vrot.lane.b32.xlu0 %v14245_v48, %s16511_s7  ;;  %8781 = vmatprep.subr.mxu1 %v6455_v13 }
 0x8c2   :  { %v7011_v34 = vpop.permute.xlu1 %7010 }
 0x8c3   :  { %v7015_v31 = vpop.permute.xlu0 %7014  ;;  %8725 = vmatmul.mubr.f32.gmra.mxu0 %v11073_v45 }
 0x8c4   :  { %6140 = vrot.lane.b32.xlu1 %v14433_v15, %s16511_s7  ;;  %v7029_v28 = vsel %vm501_vm5, %v7015_v31, %v7017_v5  ;;  %v7028_v1 = vsel %vm501_vm5, %v7013_v59, %v7015_v31  ;;  %8730 = vmatprep.mubr.f32.mxu0 %v11074_v6 }
 0x8c5   :  { %6144 = vrot.lane.b32.xlu0 %v14435_v35, %s16511_s7  ;;  %8864 = vmatprep.subr.mxu0 %v7029_v28 }
 0x8c6   :  { %v7007_v33 = vpop.permute.xlu1 %7006  ;;  %8865 = vmatpush1.msra.mxu0 %v7028_v1 }
 0x8c7   :  { %v6443_v36 = vpop.permute.xlu0 %6442  ;;  %8731 = vmatmul.mubr.f32.gmra.mxu0 %v11075_v43 }
 0x8c8   :  { %v6454_v0 = vsel %vm417_vm12, %v6443_v36, %v6445_v17  ;;  %6590 = vrot.lane.b32.xlu1 %v14313_v62, %s16501_s2  ;;  %8736 = vmatprep.mubr.f32.mxu0 %v11076_v57 }
 0x8c9   :  { %6714 = vrot.lane.b32.xlu0 %v14457_v46, %s16500_s26  ;;  %8782 = vmatpush2.msra.mxu1 %v6454_v0  ;;  %s16917_s26 = sld [smem:[#allocation76_spill]] }
 0x8ca   :  { %v6435_v55 = vpop.permute.xlu1 %6434 }
 0x8cb   :  { %v6439_v23 = vpop.permute.xlu0 %6438  ;;  %8737 = vmatmul.mubr.f32.gmra.mxu0 %v11077_v54 }
 0x8cc   :  { %6586 = vrot.lane.b32.xlu1 %v14217_v29, %s16501_s2  ;;  %v6453_v47 = vsel %vm417_vm12, %v6439_v23, %v6441_v49  ;;  %8742 = vmatprep.mubr.f32.mxu0 %v11078_v60 }
 0x8cd   :  { %6142 = vrot.lane.b32.xlu0 %v14276_v58, %s16511_s7  ;;  %8783 = vmatprep.subr.mxu1 %v6453_v47 }
 0x8ce   :  { %v7005_v20 = vpop.permute.xlu1 %7004 }
 0x8cf   :  { %v7009_v22 = vpop.permute.xlu0 %7008  ;;  %8743 = vmatmul.mubr.f32.gmra.mxu0 %v11079_v14 }
 0x8d0   :  { %6014 = vrot.lane.b32.xlu1 %v14313_v62, %s16508_s21  ;;  %v7027_v24 = vsel %vm501_vm5, %v7009_v22, %v7011_v34  ;;  %v7026_v12 = vsel %vm501_vm5, %v7007_v33, %v7009_v22  ;;  %8926 = vmatprep.mubr.f32.mxu0 %v11080_v51 }
 0x8d1   :  { %6138 = vrot.lane.b32.xlu0 %v14457_v46, %s16511_s7  ;;  %8866 = vmatprep.subr.mxu0 %v7027_v24 }
 0x8d2   :  { %v7001_v2 = vpop.permute.xlu1 %7000  ;;  %8867 = vmatpush1.msra.mxu0 %v7026_v12 }
 0x8d3   :  { %v6437_v42 = vpop.permute.xlu0 %6436 }
 0x8d4   :  { %v6452_v3 = vsel %vm417_vm12, %v6437_v42, %v6439_v23  ;;  %6584 = vrot.lane.b32.xlu1 %v14345_v30, %s16501_s2 }
 0x8d5   :  { %6588 = vrot.lane.b32.xlu0 %v14347_v21, %s16501_s2  ;;  %8784 = vmatpush2.msra.mxu1 %v6452_v3 }
 0x8d6   :  { %v6429_v7 = vpop.permute.xlu1 %6428 }
 0x8d7   :  { %v6433_v27 = vpop.permute.xlu0 %6432 }
 0x8d8   :  { %6580 = vrot.lane.b32.xlu1 %v14245_v48, %s16501_s2  ;;  %v6451_v32 = vsel %vm417_vm12, %v6433_v27, %v6435_v55 }
 0x8d9   :  { %6136 = vrot.lane.b32.xlu0 %v14299_v25, %s16511_s7  ;;  %8785 = vmatprep.subr.mxu1 %v6451_v32  ;;  %s16910_s7 = sld [smem:[#allocation65_spill]] }
 0x8da   :  { %v6879_v40 = vpop.permute.xlu1 %6878 }
 0x8db   :  { %v7003_v50 = vpop.permute.xlu0 %7002 }
 0x8dc   :  { %6008 = vrot.lane.b32.xlu1 %v14345_v30, %s16508_s21  ;;  %v7025_v26 = vsel %vm501_vm5, %v7003_v50, %v7005_v20  ;;  %v7024_v44 = vsel %vm501_vm5, %v7001_v2, %v7003_v50  ;;  %vm16817_vm5 = vcmask 490496  }
 0x8dd   :  { %6012 = vrot.lane.b32.xlu0 %v14347_v21, %s16508_s21  ;;  %8868 = vmatprep.subr.mxu0 %v7025_v26  ;;  %vm16818_vm13 = vmmov %vm16817_vm5 }
 0x8de   :  { %v6875_v53 = vpop.permute.xlu1 %6874  ;;  %8869 = vmatpush1.msra.mxu0 %v7024_v44  ;;  %vm16819_vm15 = vmmov %vm16817_vm5 }
 0x8df   :  { %v6431_v38 = vpop.permute.xlu0 %6430  ;;  %vm16820_vm9 = vmmov %vm16817_vm5 }
 0x8e0   :  { %v6450_v10 = vsel %vm417_vm12, %v6431_v38, %v6433_v27  ;;  %6578 = vrot.lane.b32.xlu1 %v14392_v56, %s16501_s2  ;;  %vm16821_vm1 = vmmov %vm16817_vm5 }
 0x8e1   :  { %6582 = vrot.lane.b32.xlu0 %v14394_v39, %s16501_s2  ;;  %8786 = vmatpush2.msra.mxu1 %v6450_v10  ;;  %vm16822_vm14 = vmmov %vm16821_vm1 }
 0x8e2   :  { %v6303_v5 = vpop.permute.xlu1 %6302 }
 0x8e3   :  { %v6427_v61 = vpop.permute.xlu0 %6426 }
 0x8e4   :  { %6574 = vrot.lane.b32.xlu1 %v14276_v58, %s16501_s2  ;;  %v6449_v4 = vsel %vm417_vm12, %v6427_v61, %v6429_v7 }
 0x8e5   :  { %6010 = vrot.lane.b32.xlu0 %v14217_v29, %s16508_s21  ;;  %8787 = vmatprep.subr.mxu1 %v6449_v4 }
 0x8e6   :  { %v6873_v8 = vpop.permute.xlu1 %6872 }
 0x8e7   :  { %v6877_v63 = vpop.permute.xlu0 %6876 }
 0x8e8   :  { %6002 = vrot.lane.b32.xlu1 %v14392_v56, %s16508_s21  ;;  %v6887_v37 = vsel %vm480_vm3, %v6877_v63, %v6879_v40  ;;  %v6886_v59 = vsel %vm480_vm3, %v6875_v53, %v6877_v63 }
 0x8e9   :  { %6006 = vrot.lane.b32.xlu0 %v14394_v39, %s16508_s21  ;;  %8870 = vmatprep.subr.mxu0 %v6887_v37 }
 0x8ea   :  { %v6869_v16 = vpop.permute.xlu1 %6868  ;;  %8871 = vmatpush1.msra.mxu0 %v6886_v59 }
 0x8eb   :  { %v6425_v9 = vpop.permute.xlu0 %6424 }
 0x8ec   :  { %v6448_v52 = vsel %vm417_vm12, %v6425_v9, %v6427_v61  ;;  %6572 = vrot.lane.b32.xlu1 %v14433_v15, %s16501_s2 }
 0x8ed   :  { %6576 = vrot.lane.b32.xlu0 %v14435_v35, %s16501_s2  ;;  %8788 = vmatpush2.msra.mxu1 %v6448_v52 }
 0x8ee   :  { %v6297_v29 = vpop.permute.xlu1 %6296 }
 0x8ef   :  { %v6301_v18 = vpop.permute.xlu0 %6300 }
 0x8f0   :  { %6568 = vrot.lane.b32.xlu1 %v14299_v25, %s16501_s2  ;;  %v6311_v49 = vsel %vm16817_vm5, %v6301_v18, %v6303_v5  ;;  %vm16826_vm5 = vmmov %vm16821_vm1 }
 0x8f1   :  { %6004 = vrot.lane.b32.xlu0 %v14245_v48, %s16508_s21  ;;  %8789 = vmatprep.subr.mxu1 %v6311_v49 }
 0x8f2   :  { %v6867_v17 = vpop.permute.xlu1 %6866 }
 0x8f3   :  { %v6871_v11 = vpop.permute.xlu0 %6870 }
 0x8f4   :  { %5996 = vrot.lane.b32.xlu1 %v14433_v15, %s16508_s21  ;;  %v6885_v13 = vsel %vm480_vm3, %v6871_v11, %v6873_v8  ;;  %v6884_v19 = vsel %vm480_vm3, %v6869_v16, %v6871_v11 }
 0x8f5   :  { %6000 = vrot.lane.b32.xlu0 %v14435_v35, %s16508_s21  ;;  %8872 = vmatprep.subr.mxu0 %v6885_v13 }
 0x8f6   :  { %v6863_v34 = vpop.permute.xlu1 %6862  ;;  %8873 = vmatpush1.msra.mxu0 %v6884_v19 }
 0x8f7   :  { %v6299_v31 = vpop.permute.xlu0 %6298 }
 0x8f8   :  { %v6310_v45 = vsel %vm16818_vm13, %v6299_v31, %v6301_v18  ;;  %11008 = vrot.lane.b32.xlu1 %v16668_v41, %s16505_s1  ;;  %vm16827_vm13 = vcmask 498688  }
 0x8f9   :  { %6570 = vrot.lane.b32.xlu0 %v14457_v46, %s16501_s2  ;;  %8790 = vmatpush2.msra.mxu1 %v6310_v45  ;;  %s16918_s2 = sld [smem:[#allocation77_spill]] }
 0x8fa   :  { %v6291_v48 = vpop.permute.xlu1 %6290 }
 0x8fb   :  { %v6295_v28 = vpop.permute.xlu0 %6294 }
 0x8fc   :  { %7482 = vrot.lane.b32.xlu1 %v14347_v21, %s16505_s1  ;;  %v6309_v1 = vsel %vm16819_vm15, %v6295_v28, %v6297_v29  ;;  %vm16828_vm15 = vmmov %vm16824_vm4 }
 0x8fd   :  { %5998 = vrot.lane.b32.xlu0 %v14276_v58, %s16508_s21  ;;  %8791 = vmatprep.subr.mxu1 %v6309_v1 }
 0x8fe   :  { %v6861_v6 = vpop.permute.xlu1 %6860 }
 0x8ff   :  { %v6865_v33 = vpop.permute.xlu0 %6864 }
 0x900   :  { %7476 = vrot.lane.b32.xlu1 %v14394_v39, %s16505_s1  ;;  %v6883_v36 = vsel %vm480_vm3, %v6865_v33, %v6867_v17  ;;  %v6882_v43 = vsel %vm480_vm3, %v6863_v34, %v6865_v33 }
 0x901   :  { %5994 = vrot.lane.b32.xlu0 %v14457_v46, %s16508_s21  ;;  %8874 = vmatprep.subr.mxu0 %v6883_v36 }
 0x902   :  { %v6857_v0 = vpop.permute.xlu1 %6856  ;;  %8875 = vmatpush1.msra.mxu0 %v6882_v43 }
 0x903   :  { %v6293_v57 = vpop.permute.xlu0 %6292 }
 0x904   :  { %v6308_v55 = vsel %vm16820_vm9, %v6293_v57, %v6295_v28  ;;  %11013 = vrot.lane.b32.xlu1 %v16668_v41, %s16505_s1  ;;  %vm16829_vm9 = vmmov %vm16824_vm4  ;;  %v8119_v57 = vld [vmem:[%s16339_s8 + $0x38] sm:$0xff] }
 0x905   :  { %7484 = vrot.lane.b32.xlu0 %v14313_v62, %s16505_s1  ;;  %8792 = vmatpush2.msra.mxu1 %v6308_v55 }
 0x906   :  { %v6285_v58 = vpop.permute.xlu1 %6284 }
 0x907   :  { %v6289_v23 = vpop.permute.xlu0 %6288 }
 0x908   :  { %7466 = vrot.lane.b32.xlu1 %v14433_v15, %s16505_s1  ;;  %v6307_v54 = vsel %vm16821_vm1, %v6289_v23, %v6291_v48 }
 0x909   :  { %5992 = vrot.lane.b32.xlu0 %v14299_v25, %s16508_s21  ;;  %8793 = vmatprep.subr.mxu1 %v6307_v54  ;;  %s16909_s21 = sld [smem:[#allocation75_spill]] }
 0x90a   :  { %v6735_v47 = vpop.permute.xlu1 %6734 }
 0x90b   :  { %v6859_v60 = vpop.permute.xlu0 %6858 }
 0x90c   :  { %7340 = vrot.lane.b32.xlu1 %v14313_v62, %s16514_s18  ;;  %v6881_v20 = vsel %vm480_vm3, %v6859_v60, %v6861_v6  ;;  %v6880_v22 = vsel %vm480_vm3, %v6857_v0, %v6859_v60  ;;  %vm16823_vm3 = vmmov %vm16821_vm1  ;;  %v15420_v60 = vpop.f32.mrf.mxu1 }
 0x90d   :  { %7478 = vrot.lane.b32.xlu0 %v14345_v30, %s16505_s1  ;;  %8876 = vmatprep.subr.mxu0 %v6881_v20  ;;  %vm16830_vm1 = vmmov %vm16827_vm13 }
 0x90e   :  { %v6731_v14 = vpop.permute.xlu1 %6730  ;;  %8877 = vmatpush1.msra.mxu0 %v6880_v22 }
 0x90f   :  { %v6287_v24 = vpop.permute.xlu0 %6286 }
 0x910   :  { %v6306_v12 = vsel %vm16822_vm14, %v6287_v24, %v6289_v23  ;;  %7338 = vrot.lane.b32.xlu1 %v14347_v21, %s16514_s18  ;;  %vm16831_vm14 = vmmov %vm16830_vm1  ;;  %v15423_v24 = vpop.f32.mrf.mxu0 }
 0x911   :  { %7472 = vrot.lane.b32.xlu0 %v14392_v56, %s16505_s1  ;;  %8794 = vmatpush2.msra.mxu1 %v6306_v12  ;;  %16842 = vst [vmem:[#allocation26_spill] sm:$0xff] %v15423_v24  ;;  %v8115_v12 = vld [vmem:[%s16339_s8 + $0x18] sm:$0xff] }
 0x912   :  { %v6159_v25 = vpop.permute.xlu1 %6158 }
 0x913   :  { %v6283_v51 = vpop.permute.xlu0 %6282 }
 0x914   :  { %7332 = vrot.lane.b32.xlu1 %v14394_v39, %s16514_s18  ;;  %v6305_v2 = vsel %vm16823_vm3, %v6283_v51, %v6285_v58  ;;  %vm16832_vm3 = vmmov %vm16824_vm4 }
 0x915   :  { %7470 = vrot.lane.b32.xlu0 %v14435_v35, %s16505_s1  ;;  %8795 = vmatprep.subr.mxu1 %v6305_v2 }
 0x916   :  { %v6729_v42 = vpop.permute.xlu1 %6728 }
 0x917   :  { %v6733_v3 = vpop.permute.xlu0 %6732 }
 0x918   :  { %11023 = vrot.lane.b32.xlu1 %v16668_v41, %s16514_s18  ;;  %v6743_v7 = vsel %vm16824_vm4, %v6733_v3, %v6735_v47  ;;  %v6742_v27 = vsel %vm16825_vm10, %v6731_v14, %v6733_v3  ;;  %vm16833_vm4 = vmmov %vm16832_vm3  ;;  %v8117_v47 = vld [vmem:[%s16339_s8 + $0x28] sm:$0xff]  ;;  %v15433_v3 = vpop.f32.mrf.mxu0 }
 0x919   :  { %7464 = vrot.lane.b32.xlu0 %v14457_v46, %s16505_s1  ;;  %8878 = vmatprep.subr.mxu0 %v6743_v7  ;;  %vm16834_vm10 = vmmov %vm16830_vm1  ;;  %16844 = vst [vmem:[#allocation43_spill] sm:$0xff] %v15433_v3  ;;  %v8113_v7 = vld [vmem:[%s16339_s8 + $0x8] sm:$0xff] }
 0x91a   :  { %v6725_v32 = vpop.permute.xlu1 %6724  ;;  %8879 = vmatpush1.msra.mxu0 %v6742_v27 }
 0x91b   :  { %v6281_v40 = vpop.permute.xlu0 %6280 }
 0x91c   :  { %v6304_v50 = vsel %vm16826_vm5, %v6281_v40, %v6283_v51  ;;  %7322 = vrot.lane.b32.xlu1 %v14433_v15, %s16514_s18  ;;  %vm16835_vm5 = vmmov %vm16830_vm1 }
 0x91d   :  { %11018 = vrot.lane.b32.xlu0 %v16668_v41, %s16514_s18  ;;  %8796 = vmatpush2.msra.mxu1 %v6304_v50 }
 0x91e   :  { %v6153_v26 = vpop.permute.xlu1 %6152 }
 0x91f   :  { %v6157_v44 = vpop.permute.xlu0 %6156 }
 0x920   :  { %7196 = vrot.lane.b32.xlu1 %v14313_v62, %s16512_s19  ;;  %v6167_v53 = vsel %vm16827_vm13, %v6157_v44, %v6159_v25  ;;  %vm16836_vm13 = vmmov %vm16832_vm3  ;;  %v15430_v25 = vpop.f32.mrf.mxu1 }
 0x921   :  { %7334 = vrot.lane.b32.xlu0 %v14345_v30, %s16514_s18  ;;  %8797 = vmatprep.subr.mxu1 %v6167_v53 }
 0x922   :  { %v6723_v38 = vpop.permute.xlu1 %6722  ;;  %v15440_v27 = vpop.f32.mrf.mxu1 }
 0x923   :  { %v6727_v10 = vpop.permute.xlu0 %6726 }
 0x924   :  { %7194 = vrot.lane.b32.xlu1 %v14347_v21, %s16512_s19  ;;  %v6741_v5 = vsel %vm16828_vm15, %v6727_v10, %v6729_v42  ;;  %v6740_v61 = vsel %vm16829_vm9, %v6725_v32, %v6727_v10  ;;  %vm16837_vm15 = vmmov %vm16832_vm3  ;;  %v15448_v53 = vpop.f32.mrf.mxu1  ;;  %v8118_v10 = vld [vmem:[%s16339_s8 + $0x30] sm:$0xff] }
 0x925   :  { %7328 = vrot.lane.b32.xlu0 %v14392_v56, %s16514_s18  ;;  %8880 = vmatprep.subr.mxu0 %v6741_v5  ;;  %vm16838_vm9 = vmmov %vm16830_vm1 }
 0x926   :  { %v6719_v4 = vpop.permute.xlu1 %6718  ;;  %8881 = vmatpush1.msra.mxu0 %v6740_v61 }
 0x927   :  { %v6155_v8 = vpop.permute.xlu0 %6154 }
 0x928   :  { %v6166_v63 = vsel %vm16830_vm1, %v6155_v8, %v6157_v44  ;;  %7188 = vrot.lane.b32.xlu1 %v14394_v39, %s16512_s19  ;;  %v15444_v44 = vpop.f32.mrf.mxu0  ;;  %v15456_v8 = vpop.f32.mrf.mxu1 }
 0x929   :  { %7326 = vrot.lane.b32.xlu0 %v14435_v35, %s16514_s18  ;;  %8798 = vmatpush2.msra.mxu1 %v6166_v63 }
 0x92a   :  { %v6147_v37 = vpop.permute.xlu1 %6146 }
 0x92b   :  { %v6151_v59 = vpop.permute.xlu0 %6150 }
 0x92c   :  { %11033 = vrot.lane.b32.xlu1 %v16668_v41, %s16512_s19  ;;  %v6165_v16 = vsel %vm16831_vm14, %v6151_v59, %v6153_v26  ;;  %vm16839_vm14 = vcmask 252928  }
 0x92d   :  { %7320 = vrot.lane.b32.xlu0 %v14457_v46, %s16514_s18  ;;  %8799 = vmatprep.subr.mxu1 %v6165_v16 }
 0x92e   :  { %v6717_v9 = vpop.permute.xlu1 %6716 }
 0x92f   :  { %v6721_v52 = vpop.permute.xlu0 %6720 }
 0x930   :  { %7178 = vrot.lane.b32.xlu1 %v14433_v15, %s16512_s19  ;;  %v6739_v29 = vsel %vm16832_vm3, %v6721_v52, %v6723_v38  ;;  %v6738_v18 = vsel %vm16833_vm4, %v6719_v4, %v6721_v52  ;;  %vm16840_vm3 = vmmov %vm16839_vm14  ;;  %v15454_v4 = vpop.f32.mrf.mxu0  ;;  %v15464_v52 = vpop.f32.mrf.mxu1 }
 0x931   :  { %11028 = vrot.lane.b32.xlu0 %v16668_v41, %s16512_s19  ;;  %8882 = vmatprep.subr.mxu0 %v6739_v29  ;;  %vm16841_vm4 = vmmov %vm16830_vm1 }
 0x932   :  { %v6713_v49 = vpop.permute.xlu1 %6712  ;;  %8883 = vmatpush1.msra.mxu0 %v6738_v18  ;;  %v8114_v18 = vld [vmem:[%s16339_s8 + $0x10] sm:$0xff] }
 0x933   :  { %v6149_v17 = vpop.permute.xlu0 %6148 }
 0x934   :  { %v6164_v11 = vsel %vm16834_vm10, %v6149_v17, %v6151_v59  ;;  %7628 = vrot.lane.b32.xlu1 %v14313_v62, %s16516_s27  ;;  %vm16843_vm10 = vcmask 506880  }
 0x935   :  { %7190 = vrot.lane.b32.xlu0 %v14345_v30, %s16512_s19  ;;  %8800 = vmatpush2.msra.mxu1 %v6164_v11 }
 0x936   :  { %v6141_v13 = vpop.permute.xlu1 %6140 }
 0x937   :  { %v6145_v19 = vpop.permute.xlu0 %6144 }
 0x938   :  { %7626 = vrot.lane.b32.xlu1 %v14347_v21, %s16516_s27  ;;  %v6163_v34 = vsel %vm16835_vm5, %v6145_v19, %v6147_v37  ;;  %vm16845_vm5 = vmmov %vm16840_vm3  ;;  %v8116_v37 = vld [vmem:[%s16339_s8 + $0x20] sm:$0xff] }
 0x939   :  { %7184 = vrot.lane.b32.xlu0 %v14392_v56, %s16512_s19  ;;  %8801 = vmatprep.subr.mxu1 %v6163_v34 }
 0x93a   :  { %v6591_v31 = vpop.permute.xlu1 %6590 }
 0x93b   :  { %v6715_v45 = vpop.permute.xlu0 %6714 }
 0x93c   :  { %7620 = vrot.lane.b32.xlu1 %v14394_v39, %s16516_s27  ;;  %v6737_v48 = vsel %vm16836_vm13, %v6715_v45, %v6717_v9  ;;  %v6736_v28 = vsel %vm16837_vm15, %v6713_v49, %v6715_v45  ;;  %vm16846_vm13 = vmmov %vm16840_vm3  ;;  %v15462_v9 = vpop.f32.mrf.mxu0 }
 0x93d   :  { %7182 = vrot.lane.b32.xlu0 %v14435_v35, %s16512_s19  ;;  %8884 = vmatprep.subr.mxu0 %v6737_v48  ;;  %vm16847_vm15 = vmmov %vm16843_vm10 }
 0x93e   :  { %v6587_v1 = vpop.permute.xlu1 %6586  ;;  %8885 = vmatpush1.msra.mxu0 %v6736_v28 }
 0x93f   :  { %v6143_v6 = vpop.permute.xlu0 %6142 }
 0x940   :  { %v6162_v33 = vsel %vm16838_vm9, %v6143_v6, %v6145_v19  ;;  %11043 = vrot.lane.b32.xlu1 %v16668_v41, %s16516_s27  ;;  %vm16848_vm9 = vmmov %vm16843_vm10  ;;  %v15473_v19 = vpop.f32.mrf.mxu1 }
 0x941   :  { %7176 = vrot.lane.b32.xlu0 %v14457_v46, %s16512_s19  ;;  %8802 = vmatpush2.msra.mxu1 %v6162_v33  ;;  %s16921_s19 = sld [smem:[#allocation74_spill]] }
 0x942   :  { %v6015_v36 = vpop.permute.xlu1 %6014 }
 0x943   :  { %v6139_v43 = vpop.permute.xlu0 %6138 }
 0x944   :  { %7610 = vrot.lane.b32.xlu1 %v14433_v15, %s16516_s27  ;;  %v6161_v0 = vsel %vm16830_vm1, %v6139_v43, %v6141_v13  ;;  %vm16849_vm1 = vmmov %vm16840_vm3  ;;  %v15471_v13 = vpop.f32.mrf.mxu0 }
 0x945   :  { %11038 = vrot.lane.b32.xlu0 %v16668_v41, %s16516_s27  ;;  %8803 = vmatprep.subr.mxu1 %v6161_v0 }
 0x946   :  { %v6585_v55 = vpop.permute.xlu1 %6584  ;;  %v15479_v28 = vpop.f32.mrf.mxu0 }
 0x947   :  { %v6589_v58 = vpop.permute.xlu0 %6588 }
 0x948   :  { %8157 = vperm.xlu1 %10986, %v8119_v57   ;;  %v6599_v23 = vsel %vm16839_vm14, %v6589_v58, %v6591_v31  ;;  %v6598_v54 = vsel %vm16840_vm3, %v6587_v1, %v6589_v58  ;;  %vm16850_vm14 = vmmov %vm16849_vm1  ;;  %v8112_v31 = vld [vmem:[%s16339_s8] sm:$0xff]  ;;  %v15481_v1 = vpop.f32.mrf.mxu1  ;;  %s11178_s8 = smov [#allocation14]  }
 0x949   :  { %7622 = vrot.lane.b32.xlu0 %v14345_v30, %s16516_s27  ;;  %8886 = vmatprep.subr.mxu0 %v6599_v23  ;;  %vm16851_vm3 = vmmov %vm16848_vm9 }
 0x94a   :  { %v6581_v20 = vpop.permute.xlu1 %6580  ;;  %8887 = vmatpush1.msra.mxu0 %v6598_v54  ;;  %v15486_v0 = vpop.f32.mrf.mxu1 }
 0x94b   :  { %v6137_v22 = vpop.permute.xlu0 %6136 }
 0x94c   :  { %v6160_v14 = vsel %vm16841_vm4, %v6137_v22, %v6139_v43  ;;  %8147 = vperm.xlu1 %10986, %v8117_v47   ;;  %vm16852_vm4 = vmmov %vm16851_vm3  ;;  %v15484_v43 = vpop.f32.mrf.mxu0  ;;  %v15492_v47 = vpop.f32.mrf.mxu1 }
 0x94d   :  { %7616 = vrot.lane.b32.xlu0 %v14392_v56, %s16516_s27  ;;  %8804 = vmatpush2.msra.mxu1 %v6160_v14 }
 0x94e   :  { %v6009_v51 = vpop.permute.xlu1 %6008  ;;  %v15490_v54 = vpop.f32.mrf.mxu0 }
 0x94f   :  { %v6013_v2 = vpop.permute.xlu0 %6012 }
 0x950   :  { %8137 = vperm.xlu1 %10986, %v8115_v12   ;;  %v6023_v42 = vsel %vm16843_vm10, %v6013_v2, %v6015_v36  ;;  %vm16853_vm10 = vmmov %vm16849_vm1  ;;  %v15495_v12 = vpop.f32.mrf.mxu0 }
 0x951   :  { %7614 = vrot.lane.b32.xlu0 %v14435_v35, %s16516_s27  ;;  %8805 = vmatprep.subr.mxu1 %v6023_v42 }
 0x952   :  { %v6579_v32 = vpop.permute.xlu1 %6578 }
 0x953   :  { %v6583_v40 = vpop.permute.xlu0 %6582 }
 0x954   :  { %8127 = vperm.xlu1 %10986, %v8113_v7   ;;  %v6597_v50 = vsel %vm16845_vm5, %v6583_v40, %v6585_v55  ;;  %v6596_v26 = vsel %vm16846_vm13, %v6581_v20, %v6583_v40  ;;  %vm16854_vm5 = vmmov %vm16849_vm1  ;;  %v15500_v40 = vpop.f32.mrf.mxu0 }
 0x955   :  { %7608 = vrot.lane.b32.xlu0 %v14457_v46, %s16516_s27  ;;  %8888 = vmatprep.subr.mxu0 %v6597_v50  ;;  %vm16855_vm13 = vmmov %vm16851_vm3  ;;  %s16925_s27 = sld [smem:[#allocation83_spill]] }
 0x956   :  { %v6575_v38 = vpop.permute.xlu1 %6574  ;;  %8889 = vmatpush1.msra.mxu0 %v6596_v26 }
 0x957   :  { %v6011_v5 = vpop.permute.xlu0 %6010 }
 0x958   :  { %v6022_v61 = vsel %vm16847_vm15, %v6011_v5, %v6013_v2  ;;  %vm16856_vm15 = vmmov %vm16851_vm3 }
 0x959   :  { %8152 = vperm.xlu0 %10985, %v8118_v10   ;;  %8806 = vmatpush2.msra.mxu1 %v6022_v61  ;;  %v15506_v61 = vpop.f32.mrf.mxu0 }
 0x95a   :  { %v6003_v63 = vpop.permute.xlu1 %6002 }
 0x95b   :  { %v6007_v59 = vpop.permute.xlu0 %6006 }
 0x95c   :  { %v6021_v16 = vsel %vm16848_vm9, %v6007_v59, %v6009_v51  ;;  %v15497_v51 = vpop.f32.mrf.mxu1  ;;  %vm16857_vm9 = vmmov %vm16851_vm3 }
 0x95d   :  { %8142 = vperm.xlu0 %10985, %v8116_v37   ;;  %8807 = vmatprep.subr.mxu1 %v6021_v16 }
 0x95e   :  { %v6573_v29 = vpop.permute.xlu1 %6572  ;;  %v15502_v50 = vpop.f32.mrf.mxu1 }
 0x95f   :  { %v6577_v49 = vpop.permute.xlu0 %6576 }
 0x960   :  { %v6595_v17 = vsel %vm16849_vm1, %v6577_v49, %v6579_v32  ;;  %v6594_v11 = vsel %vm16850_vm14, %v6575_v38, %v6577_v49 }
 0x961   :  { %8132 = vperm.xlu0 %10985, %v8114_v18   ;;  %8890 = vmatprep.subr.mxu0 %v6595_v17 }
 0x962   :  { %v6569_v34 = vpop.permute.xlu1 %6568  ;;  %8891 = vmatpush1.msra.mxu0 %v6594_v11  ;;  %v11081_v11 = vld [vmem:[%s16743_s3 + $0x10] sm:$0xff] }
 0x963   :  { %v6005_v45 = vpop.permute.xlu0 %6004 }
 0x964   :  { %v6020_v48 = vsel %vm16851_vm3, %v6005_v45, %v6007_v59 }
 0x965   :  { %8122 = vperm.xlu0 %10985, %v8112_v31   ;;  %8808 = vmatpush2.msra.mxu1 %v6020_v48  ;;  %v11082_v31 = vld [vmem:[%s16743_s3 + $0x50] sm:$0xff] }
 0x966   :  { %v5997_v6 = vpop.permute.xlu1 %5996 }
 0x967   :  { %v6001_v33 = vpop.permute.xlu0 %6000 }
 0x968   :  { %v6019_v36 = vsel %vm16852_vm4, %v6001_v33, %v6003_v63  ;;  %v15508_v63 = vpop.f32.mrf.mxu1 }
 0x969   :  { %8809 = vmatprep.subr.mxu1 %v6019_v36 }
 0x96a   :  { %v11009_v57 = vpop.permute.xlu1 %11008  ;;  %v15513_v18 = vpop.f32.mrf.mxu1 }
 0x96b   :  { %v6571_v55 = vpop.permute.xlu0 %6570  ;;  %v11010_v7 = vunpack.i.l.bf16 %v11009_v57  ;;  %v11011_v49 = vunpack.i.h.bf16 %v11009_v57 }
 0x96c   :  { %v6593_v58 = vsel %vm16853_vm10, %v6571_v55, %v6573_v29  ;;  %v6592_v23 = vsel %vm16854_vm5, %v6569_v34, %v6571_v55  ;;  %v15511_v29 = vpop.f32.mrf.mxu0  ;;  %v15525_v36 = vpop.f32.mrf.mxu1  ;;  %v11083_v55 = vld [vmem:[%s16743_s3 + $0x48] sm:$0xff] }
 0x96d   :  { %8892 = vmatprep.subr.mxu0 %v6593_v58 }
 0x96e   :  { %v7483_v20 = vpop.permute.xlu1 %7482  ;;  %8893 = vmatpush1.msra.mxu0 %v6592_v23  ;;  %v15521_v48 = vpop.f32.mrf.mxu0  ;;  %v11084_v23 = vld [vmem:[%s16743_s3 + $0x88] sm:$0xff] }
 0x96f   :  { %v5999_v22 = vpop.permute.xlu0 %5998 }
 0x970   :  { %v6018_v14 = vsel %vm16855_vm13, %v5999_v22, %v6001_v33 }
 0x971   :  { %8810 = vmatpush2.msra.mxu1 %v6018_v14 }
 0x972   :  { %v7477_v2 = vpop.permute.xlu1 %7476 }
 0x973   :  { %v5995_v42 = vpop.permute.xlu0 %5994 }
 0x974   :  { %v6017_v32 = vsel %vm16856_vm15, %v5995_v42, %v5997_v6 }
 0x975   :  { %8811 = vmatprep.subr.mxu1 %v6017_v32 }
 0x976   :  { %v11014_v26 = vpop.permute.xlu1 %11013 }
 0x977   :  { %v7485_v38 = vpop.permute.xlu0 %7484  ;;  %v11015_v45 = vunpack.i.l.bf16 %v11014_v26  ;;  %v11016_v14 = vunpack.i.h.bf16 %v11014_v26 }
 0x978   :  { %v7495_v10 = vsel %vm165_vm8, %v7485_v38, %v11010_v7  ;;  %v7494_v5 = vsel %vm165_vm8, %v7483_v20, %v7485_v38  ;;  %v15533_v20 = vpop.f32.mrf.mxu0  ;;  %v11085_v7 = vld [vmem:[%s16743_s3 + $0x80] sm:$0xff] }
 0x979   :  { %8894 = vmatprep.subr.mxu0 %v7495_v10  ;;  %v11086_v38 = vld [vmem:[%s16743_s3 + $0xc0] sm:$0xff] }
 0x97a   :  { %v7467_v37 = vpop.permute.xlu1 %7466  ;;  %8895 = vmatpush2.msra.mxu0 %v7494_v5  ;;  %v15544_v10 = vpop.f32.mrf.mxu0 }
 0x97b   :  { %v5993_v59 = vpop.permute.xlu0 %5992  ;;  %v7489_v26 = vsel %vm165_vm8, %v7467_v37, %v11016_v14 }
 0x97c   :  { %v6016_v16 = vsel %vm16857_vm9, %v5993_v59, %v5995_v42 }
 0x97d   :  { %8812 = vmatpush2.msra.mxu1 %v6016_v16 }
 0x97e   :  { %v7341_v17 = vpop.permute.xlu1 %7340  ;;  %8814 = vmatmul.mubr.f32.vlgmr.msra.gmra.mxu1 %v11081_v11 }
 0x97f   :  { %v7479_v34 = vpop.permute.xlu0 %7478  ;;  %8819 = vmatprep.mubr.f32.mxu1 %v11082_v31  ;;  %v15556_v31 = vpop.f32.mrf.mxu0 }
 0x980   :  { %v7493_v6 = vsel %vm165_vm8, %v7479_v34, %v11011_v49  ;;  %v7492_v33 = vsel %vm165_vm8, %v7477_v2, %v7479_v34  ;;  %v15536_v2 = vpop.f32.mrf.mxu1  ;;  %v11087_v49 = vld [vmem:[%s16743_s3 + $0xb8] sm:$0xff]  ;;  %16859 = vst [vmem:[#allocation18_spill] sm:$0xff] %v15556_v31 }
 0x981   :  { %8896 = vmatprep.subr.mxu0 %v7493_v6  ;;  %v11088_v34 = vld [vmem:[%s16743_s3 + $0xf8] sm:$0xff] }
 0x982   :  { %v7339_v57 = vpop.permute.xlu1 %7338  ;;  %8820 = vmatmul.mubr.f32.gmra.mxu1 %v11083_v55  ;;  %8897 = vmatpush2.msra.mxu0 %v7492_v33  ;;  %v15548_v59 = vpop.f32.mrf.mxu1  ;;  %v11089_v55 = vld [vmem:[%s16743_s3 + $0xf0] sm:$0xff] }
 0x983   :  { %v7473_v58 = vpop.permute.xlu0 %7472  ;;  %8825 = vmatprep.mubr.f32.mxu1 %v11084_v23  ;;  %16858 = vst [vmem:[#allocation28_spill] sm:$0xff] %v15548_v59  ;;  %v11090_v23 = vld [vmem:[%s16743_s3 + $0x130] sm:$0xff] }
 0x984   :  { %v7491_v22 = vsel %vm165_vm8, %v7473_v58, %v11015_v45  ;;  %v15559_v6 = vpop.f32.mrf.mxu1 }
 0x985   :  { %8898 = vmatprep.subr.mxu0 %v7491_v22  ;;  %16860 = vst [vmem:[#allocation55_spill] sm:$0xff] %v15559_v6  ;;  %v15567_v22 = vpop.f32.mrf.mxu0 }
 0x986   :  { %v7333_v42 = vpop.permute.xlu1 %7332  ;;  %8826 = vmatmul.mubr.f32.gmra.mxu1 %v11085_v7  ;;  %16861 = vst [vmem:[#allocation30_spill] sm:$0xff] %v15567_v22  ;;  %v15569_v7 = vpop.f32.mrf.mxu1 }
 0x987   :  { %v7471_v32 = vpop.permute.xlu0 %7470  ;;  %8831 = vmatprep.mubr.f32.mxu1 %v11086_v38  ;;  %v11091_v38 = vld [vmem:[%s16743_s3 + $0x128] sm:$0xff] }
 0x988   :  { %v7490_v5 = vsel %vm165_vm8, %v7471_v32, %v7473_v58 }
 0x989   :  { %8899 = vmatpush2.msra.mxu0 %v7490_v5 }
 0x98a   :  { %v11024_v16 = vpop.permute.xlu1 %11023  ;;  %8832 = vmatmul.mubr.f32.gmra.mxu1 %v11087_v49  ;;  %8900 = vmatprep.subr.mxu0 %v7489_v26  ;;  %v7350_v26 = vsel %vm144_vm7, %v7339_v57, %v7341_v17 }
 0x98b   :  { %v7465_v11 = vpop.permute.xlu0 %7464  ;;  %8837 = vmatprep.mubr.f32.mxu1 %v11088_v34  ;;  %v15579_v34 = vpop.f32.mrf.mxu0 }
 0x98c   :  { %v7488_v45 = vsel %vm165_vm8, %v7465_v11, %v7467_v37  ;;  %v11092_v11 = vld [vmem:[%s16743_s3 + $0x168] sm:$0xff]  ;;  %16862 = vst [vmem:[#allocation49_spill] sm:$0xff] %v15579_v34 }
 0x98d   :  { %8901 = vmatpush2.msra.mxu0 %v7488_v45  ;;  %v11025_v45 = vunpack.i.l.bf16 %v11024_v16 }
 0x98e   :  { %v7323_v33 = vpop.permute.xlu1 %7322  ;;  %8838 = vmatmul.mubr.f32.gmra.mxu1 %v11089_v55 }
 0x98f   :  { %v11019_v58 = vpop.permute.xlu0 %11018  ;;  %8843 = vmatprep.mubr.f32.mxu1 %v11090_v23  ;;  %v15583_v23 = vpop.f32.mrf.mxu1 }
 0x990   :  { %v11020_v14 = vunpack.i.l.bf16 %v11019_v58  ;;  %v11021_v37 = vunpack.i.h.bf16 %v11019_v58 }
 0x992   :  { %v7197_v32 = vpop.permute.xlu1 %7196  ;;  %8844 = vmatmul.mubr.f32.gmra.mxu1 %v11091_v38  ;;  %v7351_v5 = vsel %vm144_vm7, %v7341_v17, %v11020_v14  ;;  %v11093_v17 = vld [vmem:[%s16743_s3 + $0x160] sm:$0xff] }
 0x993   :  { %v7335_v49 = vpop.permute.xlu0 %7334  ;;  %8902 = vmatprep.subr.mxu0 %v7351_v5  ;;  %8849 = vmatprep.mubr.f32.mxu1 %v11092_v11  ;;  %v11094_v38 = vld [vmem:[%s16743_s3 + $0x1a0] sm:$0xff]  ;;  %v11026_v5 = vunpack.i.h.bf16 %v11024_v16  ;;  %v11095_v11 = vld [vmem:[%s16743_s3 + $0x198] sm:$0xff] }
 0x994   :  { %v7348_v55 = vsel %vm144_vm7, %v7333_v42, %v7335_v49  ;;  %8903 = vmatpush2.msra.mxu0 %v7350_v26  ;;  %v7349_v58 = vsel %vm144_vm7, %v7335_v49, %v11021_v37  ;;  %v15591_v42 = vpop.f32.mrf.mxu0  ;;  %v15594_v26 = vpop.f32.mrf.mxu1 }
 0x995   :  { %8904 = vmatprep.subr.mxu0 %v7349_v58  ;;  %16863 = vst [vmem:[#allocation33_spill] sm:$0xff] %v15591_v42 }
 0x996   :  { %v7195_v14 = vpop.permute.xlu1 %7194  ;;  %8850 = vmatmul.mubr.f32.gmra.mxu1 %v11093_v17  ;;  %8905 = vmatpush2.msra.mxu0 %v7348_v55  ;;  %v15600_v58 = vpop.f32.mrf.mxu0 }
 0x997   :  { %v7329_v57 = vpop.permute.xlu0 %7328  ;;  %8855 = vmatprep.mubr.f32.mxu1 %v11094_v38  ;;  %16864 = vst [vmem:[#allocation44_spill] sm:$0xff] %v15600_v58  ;;  %v15604_v16 = vpop.f32.mrf.mxu1 }
 0x998   :  { %v7347_v37 = vsel %vm144_vm7, %v7329_v57, %v11025_v45  ;;  %v7345_v45 = vsel %vm144_vm7, %v7323_v33, %v11026_v5  ;;  %16865 = vst [vmem:[#allocation34_spill] sm:$0xff] %v15604_v16  ;;  %v15606_v31 = vpop.f32.mrf.mxu0 }
 0x999   :  { %8906 = vmatprep.subr.mxu0 %v7347_v37  ;;  %16866 = vst [vmem:[#allocation51_spill] sm:$0xff] %v15606_v31 }
 0x99a   :  { %v7189_v49 = vpop.permute.xlu1 %7188  ;;  %8856 = vmatmul.mubr.f32.gmra.mxu1 %v11095_v11  ;;  %v15609_v11 = vpop.f32.mrf.mxu1 }
 0x99b   :  { %v7327_v55 = vpop.permute.xlu0 %7326  ;;  %9039 = vmatprep.mubr.f32.mxu1 %v16668_v41  ;;  %v15611_v42 = vpop.f32.mrf.mxu0 }
 0x99c   :  { %v7346_v17 = vsel %vm144_vm7, %v7327_v55, %v7329_v57  ;;  %16867 = vst [vmem:[#allocation58_spill] sm:$0xff] %v15611_v42  ;;  %v15613_v55 = vpop.f32.mrf.mxu1 }
 0x99d   :  { %8907 = vmatpush2.msra.mxu0 %v7346_v17  ;;  %v15617_v31 = vpop.f32.mrf.mxu0 }
 0x99e   :  { %v11034_v38 = vpop.permute.xlu1 %11033  ;;  %8908 = vmatprep.subr.mxu0 %v7345_v45  ;;  %v7206_v45 = vsel %vm123_vm6, %v7195_v14, %v7197_v32  ;;  %v15621_v3 = vpop.f32.mrf.mxu1 }
 0x99f   :  { %v7321_v37 = vpop.permute.xlu0 %7320  ;;  %v15623_v24 = vpop.f32.mrf.mxu0  ;;  %v11036_v14 = vunpack.i.h.bf16 %v11034_v38 }
 0x9a0   :  { %v7344_v22 = vsel %vm144_vm7, %v7321_v37, %v7323_v33  ;;  %v11035_v33 = vunpack.i.l.bf16 %v11034_v38 }
 0x9a1   :  { %8909 = vmatpush2.msra.mxu0 %v7344_v22  ;;  %v15628_v42 = vpop.f32.mrf.mxu0 }
 0x9a2   :  { %v7179_v34 = vpop.permute.xlu1 %7178 }
 0x9a3   :  { %v11029_v6 = vpop.permute.xlu0 %11028 }
 0x9a4   :  { %v11030_v57 = vunpack.i.l.bf16 %v11029_v6  ;;  %v11031_v5 = vunpack.i.h.bf16 %v11029_v6 }
 0x9a6   :  { %v7207_v17 = vsel %vm123_vm6, %v7197_v32, %v11030_v57  ;;  %v7629_v59 = vpop.permute.xlu1 %7628 }
 0x9a7   :  { %v7191_v58 = vpop.permute.xlu0 %7190  ;;  %8910 = vmatprep.subr.mxu0 %v7207_v17  ;;  %v15626_v17 = vpop.f32.mrf.mxu1 }
 0x9a8   :  { %v7204_v22 = vsel %vm123_vm6, %v7189_v49, %v7191_v58  ;;  %8911 = vmatpush2.msra.mxu0 %v7206_v45  ;;  %v7205_v37 = vsel %vm123_vm6, %v7191_v58, %v11031_v5  ;;  %v7201_v58 = vsel %vm123_vm6, %v7179_v34, %v11036_v14 }
 0x9a9   :  { %8912 = vmatprep.subr.mxu0 %v7205_v37  ;;  %v15632_v5 = vpop.f32.mrf.mxu1  ;;  %v15634_v37 = vpop.f32.mrf.mxu0 }
 0x9aa   :  { %8913 = vmatpush2.msra.mxu0 %v7204_v22  ;;  %v7627_v57 = vpop.permute.xlu1 %7626 }
 0x9ab   :  { %v7185_v6 = vpop.permute.xlu0 %7184 }
 0x9ac   :  { %v7203_v32 = vsel %vm123_vm6, %v7185_v6, %v11035_v33  ;;  %v15637_v33 = vpop.f32.mrf.mxu1 }
 0x9ad   :  { %8914 = vmatprep.subr.mxu0 %v7203_v32 }
 0x9ae   :  { %v7621_v45 = vpop.permute.xlu1 %7620 }
 0x9af   :  { %v7183_v16 = vpop.permute.xlu0 %7182 }
 0x9b0   :  { %v7202_v49 = vsel %vm123_vm6, %v7183_v16, %v7185_v6  ;;  %v15641_v16 = vpop.f32.mrf.mxu0 }
 0x9b1   :  { %8915 = vmatpush2.msra.mxu0 %v7202_v49  ;;  %v15645_v49 = vpop.f32.mrf.mxu1 }
 0x9b2   :  { %8916 = vmatprep.subr.mxu0 %v7201_v58  ;;  %v11044_v14 = vpop.permute.xlu1 %11043 }
 0x9b3   :  { %v7177_v22 = vpop.permute.xlu0 %7176 }
 0x9b4   :  { %v7200_v38 = vsel %vm123_vm6, %v7177_v22, %v7179_v34  ;;  %vm9602_vm6 = vcmask 326656  }
 0x9b5   :  { %8917 = vmatpush2.msra.mxu0 %v7200_v38 }
 0x9b6   :  { %8918 = vmatprep.subr.mxu0 %v14313_v62  ;;  %v7638_v62 = vsel %vm186_vm2, %v7627_v57, %v7629_v59 }
 0x9b7   :  { %v11039_v32 = vpop.permute.xlu0 %11038  ;;  %8919 = vmatpush2.msra.mxu0 %v14347_v21  ;;  %v11045_v21 = vunpack.i.l.bf16 %v11044_v14 }
 0x9b8   :  { %v11040_v6 = vunpack.i.l.bf16 %v11039_v32  ;;  %8920 = vmatprep.subr.mxu0 %v14345_v30  ;;  %v11041_v58 = vunpack.i.h.bf16 %v11039_v32 }
 0x9b9   :  { %8921 = vmatpush2.msra.mxu0 %v14394_v39  ;;  %v15654_v39 = vpop.f32.mrf.mxu0 }
 0x9ba   :  { %8922 = vmatprep.subr.mxu0 %v14392_v56  ;;  %v7639_v34 = vsel %vm186_vm2, %v7629_v59, %v11040_v6  ;;  %v15657_v56 = vpop.f32.mrf.mxu1  ;;  %v7611_v59 = vpop.permute.xlu1 %7610 }
 0x9bb   :  { %v7623_v22 = vpop.permute.xlu0 %7622  ;;  %8923 = vmatpush2.msra.mxu0 %v14435_v35  ;;  %8999 = vmatprep.subr.mxu1 %v7639_v34  ;;  %v11096_v35 = vld [vmem:[%s16743_s3 + $0x20] sm:$0xff]  ;;  %v15666_v32 = vpop.f32.mrf.mxu0 }
 0x9bc   :  { %v7636_v38 = vsel %vm186_vm2, %v7621_v45, %v7623_v22  ;;  %8924 = vmatprep.subr.mxu0 %v14433_v15  ;;  %9000 = vmatpush1.msra.mxu1 %v7638_v62  ;;  %v7637_v30 = vsel %vm186_vm2, %v7623_v22, %v11041_v58  ;;  %v11097_v15 = vld [vmem:[%s16743_s3 + $0x60] sm:$0xff]  ;;  %v8518_v6 = vpop.f32.mrf.mxu1  ;;  %v11098_v58 = vld [vmem:[%s16743_s3 + $0x58] sm:$0xff] }
 0x9bd   :  { %8925 = vmatpush2.msra.mxu0 %v14457_v46  ;;  %9001 = vmatprep.subr.mxu1 %v7637_v30  ;;  %v11046_v46 = vunpack.i.h.bf16 %v11044_v14  ;;  %v11099_v22 = vld [vmem:[%s16743_s3 + $0x98] sm:$0xff]  ;;  %v8631_v30 = vpop.f32.mrf.mxu0 }
 0x9be   :  { %8927 = vmatmul.mubr.f32.vlgmr.msra.gmra.mxu0 %v11096_v35  ;;  %9002 = vmatpush1.msra.mxu1 %v7636_v38 }
 0x9bf   :  { %v7617_v57 = vpop.permute.xlu0 %7616  ;;  %8932 = vmatprep.mubr.f32.mxu0 %v11097_v15  ;;  %v7633_v35 = vsel %vm186_vm2, %v7611_v59, %v11046_v46  ;;  %v8520_v15 = vpop.f32.mrf.mxu1 }
 0x9c0   :  { %v7635_v45 = vsel %vm186_vm2, %v7617_v57, %v11045_v21  ;;  %v8633_v46 = vpop.f32.mrf.mxu0 }
 0x9c1   :  { %9003 = vmatprep.subr.mxu1 %v7635_v45 }
 0x9c2   :  { %8933 = vmatmul.mubr.f32.gmra.mxu0 %v11098_v58  ;;  %v11100_v58 = vld [vmem:[%s16743_s3 + $0x90] sm:$0xff] }
 0x9c3   :  { %v15671_v34 = vpop.permute.xlu1 %8157  ;;  %v7615_v62 = vpop.permute.xlu0 %7614  ;;  %8938 = vmatprep.mubr.f32.mxu0 %v11099_v22 }
 0x9c4   :  { %16868 = vst [vmem:[#allocation35_spill] sm:$0xff] %v15671_v34  ;;  %v7634_v21 = vsel %vm186_vm2, %v7615_v62, %v7617_v57  ;;  %v8293_v14 = vadd.f32 %v15525_v36, %v15671_v34  ;;  %v8295_v38 = vadd.f32 %v15536_v2, %v15671_v34  ;;  %v11101_v36 = vld [vmem:[%s16743_s3 + $0xd0] sm:$0xff] }
 0x9c5   :  { %9004 = vmatpush1.msra.mxu1 %v7634_v21 }
 0x9c6   :  { %v8406_v45 = vadd.f32 %v15533_v20, %v8293_v14  ;;  %8939 = vmatmul.mubr.f32.gmra.mxu0 %v11100_v58  ;;  %9005 = vmatprep.subr.mxu1 %v7633_v35  ;;  %v8408_v57 = vadd.f32 %v15544_v10, %v8295_v38  ;;  %v11102_v10 = vld [vmem:[%s16743_s3 + $0xc8] sm:$0xff]  ;;  %v11103_v38 = vld [vmem:[%s16743_s3 + $0x30] sm:$0xff] }
 0x9c7   :  { %v7609_v62 = vpop.permute.xlu0 %7608  ;;  %8944 = vmatprep.mubr.f32.mxu0 %v11101_v36  ;;  %v15690_v21 = vpop.permute.xlu1 %8147  ;;  %v11109_v36 = vld [vmem:[%s16743_s3 + $0xa0] sm:$0xff] }
 0x9c8   :  { %v8519_v2 = vadd.f32 %v8518_v6, %v8406_v45  ;;  %v8521_v22 = vadd.f32 %v8520_v15, %v8408_v57  ;;  %v7632_v20 = vsel %vm186_vm2, %v7609_v62, %v7611_v59  ;;  %v11104_v59 = vld [vmem:[%s16743_s3 + $0x108] sm:$0xff]  ;;  %v11105_v45 = vld [vmem:[%s16743_s3 + $0x100] sm:$0xff]  ;;  %v8281_v58 = vadd.f32 %v15497_v51, %v15690_v21  ;;  %v11108_v62 = vld [vmem:[%s16743_s3 + $0x138] sm:$0xff] }
 0x9c9   :  { %9006 = vmatpush1.msra.mxu1 %v7632_v20  ;;  %vm9335_vm2 = vcmask 253952  }
 0x9ca   :  { %v8632_v14 = vadd.f32 %v8631_v30, %v8519_v2  ;;  %v8634_v34 = vadd.f32 %v8633_v46, %v8521_v22  ;;  %8945 = vmatmul.mubr.f32.gmra.mxu0 %v11102_v10  ;;  %10847 = vmatmul.mubr.msk.f32.vlgmr.msra.gmra.mxu1 %vm417_vm12, %v11103_v38  ;;  %v8283_v30 = vadd.f32 %v15502_v50, %v15690_v21  ;;  %v11107_v50 = vld [vmem:[%s16743_s3 + $0x140] sm:$0xff] }
 0x9cb   :  { %8950 = vmatprep.mubr.f32.mxu0 %v11104_v59  ;;  %9045 = vmatprep.mubr.f32.mxu1 %v16668_v41  ;;  %v15706_v15 = vpop.permute.xlu1 %8137  ;;  %v8394_v51 = vadd.f32 %v15500_v40, %v8281_v58 }
 0x9cc   :  { %v9116_v6 = vmax.f32 %v8632_v14, 0.0  ;;  %v9117_v35 = vmax.f32 %v8634_v34, 0.0  ;;  %v11106_v34 = vld [vmem:[%s16743_s3 + $0x68] sm:$0xff]  ;;  %v8396_v57 = vadd.f32 %v15506_v61, %v8283_v30  ;;  %v8271_v2 = vadd.f32 %v15481_v1, %v15706_v15  ;;  %v11110_v61 = vld [vmem:[%s16743_s3 + $0x178] sm:$0xff] }
 0x9cd   :  { %v8269_v1 = vadd.f32 %v15473_v19, %v15706_v15 }
 0x9ce   :  { %9205 = vmatprep.subr.mxu1 %v9117_v35  ;;  %8951 = vmatmul.mubr.f32.gmra.mxu0 %v11105_v45  ;;  %v8509_v14 = vadd.f32 %v15637_v33, %v8396_v57  ;;  %v8384_v19 = vadd.f32 %v15484_v43, %v8271_v2 }
 0x9cf   :  { %10848 = vmatmul.mubr.msk.f32.gmra.mxu1 %vm417_vm12, %v11106_v34  ;;  %8956 = vmatprep.mubr.f32.mxu0 %v11107_v50  ;;  %v15738_v46 = vpop.permute.xlu1 %8127 }
 0x9d0   :  { %9206 = vmatpush1.msra.mxu1 %v9116_v6  ;;  %9051 = vmatprep.mubr.f32.mxu1 %v16668_v41  ;;  %v11111_v6 = vld [vmem:[%s16743_s3 + $0x170] sm:$0xff]  ;;  %v8257_v30 = vadd.f32 %v15440_v27, %v15738_v46  ;;  %v8622_v45 = vadd.f32 %v15641_v16, %v8509_v14  ;;  %v16870_v14 = vld [vmem:[#allocation34_spill] sm:$0xff] }
 0x9d2   :  { %8957 = vmatmul.mubr.f32.gmra.mxu0 %v11108_v62  ;;  %v8370_v62 = vadd.f32 %v15444_v44, %v8257_v30 }
 0x9d3   :  { %10849 = vmatmul.mubr.msk.f32.gmra.mxu1 %vm417_vm12, %v11109_v36  ;;  %8962 = vmatprep.mubr.f32.mxu0 %v11110_v61 }
 0x9d4   :  { %v15732_v22 = vpop.permute.xlu0 %8152  ;;  %9057 = vmatprep.mubr.f32.mxu1 %v16668_v41 }
 0x9d5   :  { %v8287_v20 = vadd.f32 %v15508_v63, %v15732_v22  ;;  %v8289_v40 = vadd.f32 %v15513_v18, %v15732_v22  ;;  %v11112_v63 = vld [vmem:[%s16743_s3 + $0xd8] sm:$0xff]  ;;  %v8507_v18 = vadd.f32 %v15632_v5, %v8394_v51 }
 0x9d6   :  { %8963 = vmatmul.mubr.f32.gmra.mxu0 %v11111_v6 }
 0x9d7   :  { %v8400_v10 = vadd.f32 %v15511_v29, %v8287_v20  ;;  %v8402_v38 = vadd.f32 %v15521_v48, %v8289_v40  ;;  %10850 = vmatmul.mubr.msk.f32.gmra.mxu1 %vm417_vm12, %v11112_v63  ;;  %v8259_v29 = vadd.f32 %v15448_v53, %v15738_v46  ;;  %v11113_v48 = vld [vmem:[%s16743_s3 + $0x1b0] sm:$0xff]  ;;  %v8382_v53 = vadd.f32 %v15479_v28, %v8269_v1  ;;  %v16869_v1 = vld [vmem:[#allocation58_spill] sm:$0xff]  ;;  %v16874_v63 = vld [vmem:[#allocation51_spill] sm:$0xff] }
 0x9d8   :  { %v15760_v33 = vpop.permute.xlu0 %8142  ;;  %8968 = vmatprep.mubr.f32.mxu0 %v11113_v48  ;;  %9063 = vmatprep.mubr.f32.mxu1 %v16668_v41  ;;  %v8483_v20 = vadd.f32 %v15569_v7, %v8370_v62  ;;  %v16876_v48 = vld [vmem:[#allocation33_spill] sm:$0xff] }
 0x9d9   :  { %v8513_v35 = vadd.f32 %v15645_v49, %v8400_v10  ;;  %v8275_v59 = vadd.f32 %v15486_v0, %v15760_v33  ;;  %v8277_v43 = vadd.f32 %v15492_v47, %v15760_v33  ;;  %v8515_v5 = vadd.f32 %v15657_v56, %v8402_v38  ;;  %v11114_v0 = vld [vmem:[%s16743_s3 + $0x1a8] sm:$0xff]  ;;  %v11115_v47 = vld [vmem:[%s16743_s3 + $0x110] sm:$0xff]  ;;  %v16871_v10 = vld [vmem:[#allocation26_spill] sm:$0xff] }
 0x9da   :  { %8969 = vmatmul.mubr.f32.gmra.mxu0 %v11114_v0  ;;  %v8372_v27 = vadd.f32 %v15454_v4, %v8259_v29  ;;  %v8497_v49 = vadd.f32 %v15613_v55, %v8384_v19  ;;  %v8495_v4 = vadd.f32 %v15609_v11, %v8382_v53  ;;  %v16872_v38 = vld [vmem:[#allocation43_spill] sm:$0xff]  ;;  %v16875_v19 = vld [vmem:[#allocation28_spill] sm:$0xff]  ;;  %v16879_v0 = vld [vmem:[#allocation30_spill] sm:$0xff] }
 0x9db   :  { %v8388_v34 = vadd.f32 %v15490_v54, %v8275_v59  ;;  %v8390_v58 = vadd.f32 %v15495_v12, %v8277_v43  ;;  %10851 = vmatmul.mubr.msk.f32.gmra.mxu1 %vm417_vm12, %v11115_v47  ;;  %v8628_v28 = vadd.f32 %v15666_v32, %v8515_v5  ;;  %v8626_v54 = vadd.f32 %v15654_v39, %v8513_v35  ;;  %v16877_v59 = vld [vmem:[#allocation55_spill] sm:$0xff] }
 0x9dc   :  { %v15787_v16 = vpop.permute.xlu0 %8132  ;;  %9069 = vmatprep.mubr.f32.mxu1 %v16668_v41  ;;  %v8620_v12 = vadd.f32 %v15634_v37, %v8507_v18 }
 0x9dd   :  { %v8501_v56 = vadd.f32 %v15621_v3, %v8388_v34  ;;  %v8263_v50 = vadd.f32 %v15456_v8, %v15787_v16  ;;  %v8265_v32 = vadd.f32 %v15464_v52, %v15787_v16  ;;  %v9113_v57 = vmax.f32 %v8628_v28, 0.0  ;;  %v11116_v3 = vld [vmem:[%s16743_s3 + $0x148] sm:$0xff]  ;;  %v16880_v28 = vld [vmem:[#allocation18_spill] sm:$0xff] }
 0x9de   :  { %v9112_v36 = vmax.f32 %v8626_v54, 0.0  ;;  %v8503_v39 = vadd.f32 %v15626_v17, %v8390_v58  ;;  %v9109_v8 = vmax.f32 %v8622_v45, 0.0  ;;  %v9108_v44 = vmax.f32 %v8620_v12, 0.0  ;;  %v16878_v45 = vld [vmem:[#allocation49_spill] sm:$0xff] }
 0x9df   :  { %v8376_v37 = vadd.f32 %v15462_v9, %v8263_v50  ;;  %v8378_v55 = vadd.f32 %v15471_v13, %v8265_v32  ;;  %10852 = vmatmul.mubr.msk.f32.gmra.mxu1 %vm417_vm12, %v11116_v3  ;;  %9207 = vmatprep.subr.mxu1 %v9113_v57  ;;  %v8614_v52 = vadd.f32 %v15623_v24, %v8501_v56  ;;  %v11118_v58 = vld [vmem:[%s16743_s3 + $0x1b8] sm:$0xff]  ;;  %v15845_v50 = vld [vmem:[%s16340_s9] sm:$0x1]  ;;  %v15850_v32 = vpop.f32.mrf.mxu0  ;;  %s15923_s9 = sld [smem:[#allocation11]] }
 0x9e0   :  { %v15808_v11 = vpop.permute.xlu0 %8122  ;;  %9208 = vmatpush1.msra.mxu1 %v9112_v36  ;;  %9075 = vmatprep.mubr.f32.mxu1 %v16668_v41  ;;  %v8616_v9 = vadd.f32 %v15628_v42, %v8503_v39  ;;  %v8610_v13 = vadd.f32 %v15617_v31, %v8497_v49  ;;  %v8485_v17 = vadd.f32 %v15583_v23, %v8372_v27 }
 0x9e1   :  { %v8489_v51 = vadd.f32 %v15594_v26, %v8376_v37  ;;  %v8251_v2 = vadd.f32 %v15420_v60, %v15808_v11  ;;  %v8253_v24 = vadd.f32 %v15430_v25, %v15808_v11  ;;  %9209 = vmatprep.subr.mxu1 %v9109_v8  ;;  %v9104_v61 = vmax.f32 %v8614_v52, 0.0  ;;  %v11117_v60 = vld [vmem:[%s16743_s3 + $0x180] sm:$0xff]  ;;  %v16873_v25 = vld [vmem:[#allocation44_spill] sm:$0xff]  ;;  %16881 = vst [vmem:[#allocation46_spill] sm:$0xff] %v15845_v50  ;;  %v15852_v57 = vpop.f32.mrf.mxu0  ;;  %s10818_s3 = sld [smem:[#allocation11 + $0x4]] }
 0x9e2   :  { %9210 = vmatpush1.msra.mxu1 %v9108_v44  ;;  %v9105_v40 = vmax.f32 %v8616_v9, 0.0  ;;  %v8608_v42 = vadd.f32 %v16869_v1, %v8495_v4  ;;  %v8491_v31 = vadd.f32 %v16870_v14, %v8378_v55  ;;  %v9101_v7 = vmax.f32 %v8610_v13, 0.0 }
 0x9e3   :  { %v8364_v23 = vadd.f32 %v16871_v10, %v8251_v2  ;;  %v8366_v26 = vadd.f32 %v16872_v38, %v8253_v24  ;;  %10853 = vmatmul.mubr.msk.f32.gmra.mxu1 %vm417_vm12, %v11117_v60  ;;  %v8602_v6 = vadd.f32 %v16873_v25, %v8489_v51  ;;  %v8598_v35 = vadd.f32 %v16876_v48, %v8485_v17  ;;  %v15854_v4 = vpop.f32.mrf.mxu0 }
 0x9e4   :  { %9211 = vmatprep.subr.mxu1 %v9105_v40  ;;  %9081 = vmatprep.mubr.f32.mxu1 %v16668_v41  ;;  %v8604_v18 = vadd.f32 %v16874_v63, %v8491_v31  ;;  %v9100_v5 = vmax.f32 %v8608_v42, 0.0  ;;  %v8596_v34 = vadd.f32 %v16878_v45, %v8483_v20 }
 0x9e5   :  { %v8477_v29 = vadd.f32 %v16875_v19, %v8364_v23  ;;  %9212 = vmatpush1.msra.mxu1 %v9104_v61  ;;  %v8479_v43 = vadd.f32 %v16877_v59, %v8366_v26  ;;  %v9096_v30 = vmax.f32 %v8602_v6, 0.0  ;;  %v9093_v54 = vmax.f32 %v8598_v35, 0.0  ;;  %v8710_v39 = vpop.f32.mrf.mxu0 }
 0x9e6   :  { %9213 = vmatprep.subr.mxu1 %v9101_v7  ;;  %v9097_v53 = vmax.f32 %v8604_v18, 0.0  ;;  %v9092_v49 = vmax.f32 %v8596_v34, 0.0  ;;  %v8711_v55 = vadd.f32 %v8710_v39, %v15738_v46 }
 0x9e7   :  { %10854 = vmatmul.mubr.msk.f32.gmra.mxu1 %vm417_vm12, %v11118_v58  ;;  %v8592_v47 = vadd.f32 %v16879_v0, %v8479_v43  ;;  %v8590_v27 = vadd.f32 %v16880_v28, %v8477_v29  ;;  %v15865_v52 = vpop.f32.mrf.mxu0 }
 0x9e8   :  { %9214 = vmatpush1.msra.mxu1 %v9100_v5  ;;  %9253 = vmatprep.mubr.f32.mxu1 %v16668_v41 }
 0x9e9   :  { %9215 = vmatprep.subr.mxu1 %v9097_v53  ;;  %v9089_v12 = vmax.f32 %v8592_v47, 0.0  ;;  %v9088_v56 = vmax.f32 %v8590_v27, 0.0  ;;  %v15867_v44 = vpop.f32.mrf.mxu0 }
 0x9ea   :  { %9216 = vmatpush1.msra.mxu1 %v9096_v30 }
 0x9eb   :  { %9217 = vmatprep.subr.mxu1 %v9093_v54  ;;  %v8720_v9 = vpop.f32.mrf.mxu0 }
 0x9ec   :  { %9218 = vmatpush1.msra.mxu1 %v9092_v49 }
 0x9ed   :  { %9219 = vmatprep.subr.mxu1 %v9089_v12  ;;  %v8722_v13 = vpop.f32.mrf.mxu0 }
 0x9ee   :  { %9220 = vmatpush1.msra.mxu1 %v9088_v56 }
 0x9ef   :  { %10855 = vmatmul.mubr.msk.f32.vlgmr.msra.gmra.mxu1 %vm312_vm11, %v15845_v50  ;;  %v8726_v51 = vpop.f32.mrf.mxu0 }
 0x9f0   :  { %9324 = vmatprep.mubr.f32.mxu1 %v16668_v41 }
 0x9f1   :  { %v8728_v24 = vpop.f32.mrf.mxu0 }
 0x9f3   :  { %v8732_v20 = vpop.f32.mrf.mxu0 }
 0x9f5   :  { %v8734_v1 = vpop.f32.mrf.mxu0 }
 0x9f7   :  { %v8738_v14 = vpop.f32.mrf.mxu0 }
 0x9f9   :  { %v8740_v10 = vpop.f32.mrf.mxu0 }
 0x9fb   :  { %v8744_v38 = vpop.f32.mrf.mxu0 }
 0x9fd   :  { %v8746_v60 = vpop.f32.mrf.mxu0 }
 0xa3e   :  { %v15856_v62 = vpop.f32.mrf.mxu1 }
 0xa3f   :  { %16882 = vst [vmem:[#allocation45_spill] sm:$0xff] %v15856_v62  ;;  %v8721_v62 = vadd.f32 %v8720_v9, %v15706_v15 }
 0xa40   :  { %v15858_v36 = vpop.f32.mrf.mxu1 }
 0xa42   :  { %v15860_v37 = vpop.f32.mrf.mxu1 }
 0xa44   :  { %v8823_v3 = vpop.f32.mrf.mxu1 }
 0xa45   :  { %v15863_v8 = vadd.f32 %v8823_v3, %v8711_v55 }
 0xa46   :  { %v15869_v17 = vpop.f32.mrf.mxu1 }
 0xa48   :  { %v15871_v2 = vpop.f32.mrf.mxu1 }
 0xa4a   :  { %v15873_v61 = vpop.f32.mrf.mxu1 }
 0xa4c   :  { %v15875_v40 = vpop.f32.mrf.mxu1 }
 0xa4e   :  { %v15877_v42 = vpop.f32.mrf.mxu1 }
 0xa50   :  { %v15879_v31 = vpop.f32.mrf.mxu1 }
 0xa52   :  { %v15881_v23 = vpop.f32.mrf.mxu1 }
 0xa54   :  { %v8847_v26 = vpop.f32.mrf.mxu1 }
 0xa56   :  { %v8851_v25 = vpop.f32.mrf.mxu1 }
 0xa58   :  { %v8853_v63 = vpop.f32.mrf.mxu1 }
 0xa5a   :  { %v8857_v29 = vpop.f32.mrf.mxu1 }
 0xa5c   :  { %v8859_v59 = vpop.f32.mrf.mxu1 }
 0xa7e   :  { %v15883_v6 = vpop.f32.mrf.mxu0 }
 0xa7f   :  { %16883 = vst [vmem:[#allocation19_spill] sm:$0xff] %v15883_v6  ;;  %v8733_v6 = vadd.f32 %v8732_v20, %v15690_v21  ;;  %v8729_v20 = vadd.f32 %v8728_v24, %v15760_v33 }
 0xa80   :  { %v15885_v7 = vpop.f32.mrf.mxu0 }
 0xa81   :  { %16884 = vst [vmem:[#allocation36_spill] sm:$0xff] %v15885_v7 }
 0xa82   :  { %v15887_v18 = vpop.f32.mrf.mxu0 }
 0xa83   :  { %16885 = vst [vmem:[#allocation59_spill] sm:$0xff] %v15887_v18  ;;  %v8709_v18 = vadd.f32 %v15854_v4, %v15738_v46  ;;  %v8715_v46 = vadd.f32 %v15865_v52, %v15787_v16  ;;  %v8846_v52 = vadd.f32 %v15881_v23, %v8733_v6  ;;  %v8834_v6 = vadd.f32 %v15873_v61, %v8721_v62 }
 0xa84   :  { %v15889_v19 = vpop.f32.mrf.mxu0 }
 0xa86   :  { %v15891_v48 = vpop.f32.mrf.mxu0 }
 0xa87   :  { %16886 = vst [vmem:[#allocation52_spill] sm:$0xff] %v15891_v48  ;;  %v8705_v48 = vadd.f32 %v15852_v57, %v15808_v11 }
 0xa88   :  { %v15893_v35 = vpop.f32.mrf.mxu0 }
 0xa89   :  { %v8818_v24 = vadd.f32 %v15858_v36, %v8705_v48 }
 0xa8a   :  { %v15895_v43 = vpop.f32.mrf.mxu0  ;;  %v15897_v5 = vpop.f32.mrf.mxu1 }
 0xa8b   :  { %16887 = vst [vmem:[#allocation60_spill] sm:$0xff] %v15897_v5 }
 0xa8c   :  { %v15899_v53 = vpop.f32.mrf.mxu0  ;;  %v15901_v30 = vpop.f32.mrf.mxu1 }
 0xa8d   :  { %16888 = vst [vmem:[#allocation17_spill] sm:$0xff] %v15901_v30  ;;  %v16894_v30 = vld [vmem:[#allocation35_spill] sm:$0xff] }
 0xa8e   :  { %v15903_v45 = vpop.f32.mrf.mxu0  ;;  %v8745_v7 = vadd.f32 %v8744_v38, %v16894_v30 }
 0xa8f   :  { %v15905_v34 = vpop.f32.mrf.mxu1 }
 0xa90   :  { %16889 = vst [vmem:[#allocation37_spill] sm:$0xff] %v15905_v34  ;;  %v8954_v58 = vpop.f32.mrf.mxu0  ;;  %v8747_v34 = vadd.f32 %v8746_v60, %v16894_v30  ;;  %v8727_v60 = vadd.f32 %v8726_v51, %v15760_v33 }
 0xa91   :  { %v15907_v0 = vpop.f32.mrf.mxu1 }
 0xa92   :  { %16890 = vst [vmem:[#allocation50_spill] sm:$0xff] %v15907_v0  ;;  %v8958_v47 = vpop.f32.mrf.mxu0  ;;  %v8735_v0 = vadd.f32 %v8734_v1, %v15690_v21  ;;  %v8739_v21 = vadd.f32 %v8738_v14, %v15732_v22  ;;  %v8858_v1 = vadd.f32 %v8857_v29, %v8745_v7  ;;  %v8860_v9 = vadd.f32 %v8859_v59, %v8747_v34 }
 0xa93   :  { %v15909_v28 = vpop.f32.mrf.mxu1  ;;  %v8822_v7 = vadd.f32 %v15860_v37, %v8709_v18  ;;  %v8959_v36 = vadd.f32 %v8958_v47, %v8846_v52 }
 0xa94   :  { %16891 = vst [vmem:[#allocation48_spill] sm:$0xff] %v15909_v28  ;;  %v8960_v27 = vpop.f32.mrf.mxu0  ;;  %v8852_v33 = vadd.f32 %v8851_v25, %v8739_v21  ;;  %v8848_v14 = vadd.f32 %v8847_v26, %v8735_v0  ;;  %v15947_v25 = vstv %s15923_s9  ;;  %v16898_v21 = vld [vmem:[#allocation45_spill] sm:$0xff]  ;;  %s16913_s9 = sld [smem:[#allocation73_spill]] }
 0xa95   :  { %v15911_v54 = vpop.f32.mrf.mxu1  ;;  %v16905_v52 = vld [vmem:[#allocation17_spill] sm:$0xff] }
 0xa96   :  { %16892 = vst [vmem:[#allocation20_spill] sm:$0xff] %v15911_v54  ;;  %v8964_v49 = vpop.f32.mrf.mxu0  ;;  %v8723_v54 = vadd.f32 %v8722_v13, %v15706_v15  ;;  %v8703_v15 = vadd.f32 %v15850_v32, %v15808_v11  ;;  %v8717_v13 = vadd.f32 %v15867_v44, %v15787_v16  ;;  %v8842_v11 = vadd.f32 %v15879_v31, %v8729_v20 }
 0xa97   :  { %v15913_v12 = vpop.f32.mrf.mxu1  ;;  %v8961_v16 = vadd.f32 %v8960_v27, %v8848_v14  ;;  %v8840_v44 = vadd.f32 %v15877_v42, %v8727_v60  ;;  %v16903_v14 = vld [vmem:[#allocation19_spill] sm:$0xff] }
 0xa98   :  { %16893 = vst [vmem:[#allocation39_spill] sm:$0xff] %v15913_v12  ;;  %v8966_v55 = vpop.f32.mrf.mxu0  ;;  %v8741_v12 = vadd.f32 %v8740_v10, %v15732_v22  ;;  %v8836_v48 = vadd.f32 %v15875_v40, %v8723_v54  ;;  %v8955_v37 = vadd.f32 %v8954_v58, %v8842_v11  ;;  %v8830_v27 = vadd.f32 %v15871_v2, %v8717_v13  ;;  %v16895_v54 = vld [vmem:[#allocation52_spill] sm:$0xff] }
 0xa99   :  { %v15915_v56 = vpop.f32.mrf.mxu1  ;;  %v8953_v34 = vadd.f32 %v15903_v45, %v8840_v44  ;;  %v8947_v40 = vadd.f32 %v15895_v43, %v8834_v6  ;;  %v16902_v13 = vld [vmem:[#allocation50_spill] sm:$0xff] }
 0xa9a   :  { %v8970_v50 = vpop.f32.mrf.mxu0  ;;  %v8854_v4 = vadd.f32 %v8853_v63, %v8741_v12  ;;  %v8965_v63 = vadd.f32 %v8964_v49, %v8852_v33  ;;  %v8949_v12 = vadd.f32 %v15899_v53, %v8836_v48  ;;  %v8943_v61 = vadd.f32 %v15893_v35, %v8830_v27  ;;  %v9396_v27 = vld [vmem:[%s16908_s0 + $0x10] sm:$0xff] }
 0xa9b   :  { %v15917_v39 = vpop.f32.mrf.mxu1  ;;  %v8971_v51 = vadd.f32 %v8970_v50, %v8858_v1  ;;  %v8937_v53 = vadd.f32 %v15889_v19, %v15863_v8  ;;  %v8816_v1 = vadd.f32 %v16898_v21, %v8703_v15  ;;  %v16904_v15 = vld [vmem:[#allocation37_spill] sm:$0xff]  ;;  %v16912_v21 = vmov 0.0  }
 0xa9c   :  { %v8972_v38 = vpop.f32.mrf.mxu0  ;;  %v8967_v10 = vadd.f32 %v8966_v55, %v8854_v4  ;;  %v16901_v4 = vld [vmem:[#allocation36_spill] sm:$0xff] }
 0xa9d   :  { %v9067_v3 = vpop.f32.mrf.mxu1  ;;  %v8973_v57 = vadd.f32 %v8972_v38, %v8860_v9  ;;  %v16899_v38 = vld [vmem:[#allocation59_spill] sm:$0xff]  ;;  %v8931_v9 = vadd.f32 %v16901_v4, %v8818_v24  ;;  %v9050_v33 = vadd.f32 %v16902_v13, %v8937_v53  ;;  %v11177_v4 = vmov 1966171168  }
 0xa9e   :  { %v9068_v42 = vadd.f32 %v9067_v3, %v8955_v37  ;;  %v16897_v3 = vld [vmem:[#allocation20_spill] sm:$0xff] }
 0xa9f   :  { %v9071_v41 = vpop.f32.mrf.mxu1  ;;  %v16896_v49 = vld [vmem:[#allocation39_spill] sm:$0xff]  ;;  %v9056_v60 = vadd.f32 %v16897_v3, %v8943_v61 }
 0xaa0   :  { %v9072_v0 = vadd.f32 %v9071_v41, %v8959_v36  ;;  %v9062_v41 = vadd.f32 %v15915_v56, %v8949_v12  ;;  %v9060_v43 = vadd.f32 %v16896_v49, %v8947_v40  ;;  %v9107_v20 = vmax.f32 %v9068_v42, 0.0  ;;  %v16907_v36 = vld [vmem:[#allocation46_spill] sm:$0xff]  ;;  %v9395_v12 = vld [vmem:[%s16908_s0 + $0x8] sm:$0xff] }
 0xaa1   :  { %v9073_v5 = vpop.f32.mrf.mxu1  ;;  %v9099_v24 = vmax.f32 %v9056_v60, 0.0  ;;  %v9583_v61 = vld [vmem:[%s16910_s7] sm:$0xff]  ;;  %v9598_v60 = vld [vmem:[%s16909_s21 + $0x8] sm:$0xff] }
 0xaa2   :  { %v9074_v18 = vadd.f32 %v9073_v5, %v8961_v16  ;;  %v9066_v5 = vadd.f32 %v15917_v39, %v8953_v34  ;;  %v9110_v55 = vmax.f32 %v9072_v0, 0.0  ;;  %v9095_v16 = vmax.f32 %v9050_v33, 0.0  ;;  %v9397_v0 = vld [vmem:[%s16908_s0 + $0x18] sm:$0xff] }
 0xaa3   :  { %v9077_v28 = vpop.f32.mrf.mxu1 }
 0xaa4   :  { %v9078_v26 = vadd.f32 %v9077_v28, %v8965_v63  ;;  %v8828_v28 = vadd.f32 %v15869_v17, %v8715_v46  ;;  %v9111_v45 = vmax.f32 %v9074_v18, 0.0  ;;  %v16900_v46 = vld [vmem:[#allocation48_spill] sm:$0xff]  ;;  %v9106_v19 = vmax.f32 %v9066_v5, 0.0  ;;  %v9394_v5 = vld [vmem:[%s16908_s0] sm:$0xff]  ;;  %s16914_s0 = sld [smem:[#allocation72_spill]] }
 0xaa5   :  { %v9079_v30 = vpop.f32.mrf.mxu1  ;;  %v9044_v63 = vadd.f32 %v16905_v52, %v8931_v9  ;;  %v9689_v9 = vunpack.c.l.s4 %v11177_v4 }
 0xaa6   :  { %v9080_v32 = vadd.f32 %v9079_v30, %v8967_v10  ;;  %v9114_v58 = vmax.f32 %v9078_v26, 0.0  ;;  %v8941_v17 = vadd.f32 %v16895_v54, %v8828_v28  ;;  %v8935_v30 = vadd.f32 %v16899_v38, %v8822_v7 }
 0xaa7   :  { %v9083_v22 = vpop.f32.mrf.mxu1  ;;  %v8929_v10 = vadd.f32 %v16903_v14, %v8816_v1  ;;  %v9102_v7 = vmax.f32 %v9060_v43, 0.0  ;;  %v9600_v43 = vld [vmem:[%s16909_s21 + $0x18] sm:$0xff] }
 0xaa8   :  { %v9084_v29 = vadd.f32 %v9083_v22, %v8971_v51  ;;  %v9115_v47 = vmax.f32 %v9080_v32, 0.0  ;;  %v9054_v8 = vadd.f32 %v16900_v46, %v8941_v17  ;;  %v9103_v51 = vmax.f32 %v9062_v41, 0.0 }
 0xaa9   :  { %v9085_v59 = vpop.f32.mrf.mxu1 }
 0xaaa   :  { %v9086_v50 = vadd.f32 %v9085_v59, %v8973_v57  ;;  %v9118_v31 = vmax.f32 %v9084_v29, 0.0  ;;  %v9048_v57 = vadd.f32 %v16904_v15, %v8935_v30  ;;  %v16906_v29 = vld [vmem:[#allocation60_spill] sm:$0xff]  ;;  %v9098_v11 = vmax.f32 %v9054_v8, 0.0  ;;  %v9486_v30 = vld [vmem:[%s16913_s9] sm:$0xff] }
 0xaab   :  { %v9042_v59 = vadd.f32 %v16906_v29, %v8929_v10  ;;  %10932 = vmatprep.mubr.msk.f32.mxu0 %vm3685_vm0, %v9486_v30  ;;  %v10857_v46 = vld [vmem:[%s16914_s0] ss:$0 sm:$0xff]  ;;  %s10803_s0 = sshll.u32 %s11178_s8, 4  ;;  %s10804_s0 = int_to_ptr.vmem [resolvable:$true] %s10803_s0 }
 0xaac   :  { %v9119_v23 = vmax.f32 %v9086_v50, 0.0  ;;  %v9094_v32 = vmax.f32 %v9048_v57, 0.0  ;;  %v9091_v50 = vmax.f32 %v9044_v63, 0.0  ;;  %s11131_s20 = scalar_lea.vmem %s10804_s0, 256  ;;  %p11136_p6 = scmp.lt.s32.totalorder %s10804_s0, %s10804_s0 }
 0xaad   :  { %v9090_v44 = vmax.f32 %v9042_v59, 0.0  ;;  %p11132_p5 = scmp.ne.s32.totalorder %s10804_s0, %s11131_s20  ;;  %p11137_p7 = scmp.lt.s32.totalorder %s11131_s20, %s11131_s20 }
 0xaae   :  { %9276 = vmatprep.subr.mxu1 %v9119_v23 }
 0xaaf   :  { %9277 = vmatpush1.msra.mxu1 %v9118_v31  ;;  %v9255_v62 = vpop.f32.mrf.mxu1  ;;  %p11138_p8 = por %p11137_p7, %p11136_p6 }
 0xab0   :  { %9278 = vmatprep.subr.mxu1 %v9115_v47  ;;  %v9256_v2 = vadd.f32 %v9255_v62, %v15947_v25  ;;  %v9601_v62 = vld [vmem:[%s16909_s21 + $0x20] sm:$0xff] }
 0xab1   :  { %9279 = vmatpush1.msra.mxu1 %v9114_v58  ;;  %v9257_v39 = vpop.f32.mrf.mxu1  ;;  %p11139_p9 = pnand %p11138_p8, %p11132_p5 }
 0xab2   :  { %9280 = vmatprep.subr.mxu1 %v9111_v45  ;;  %v9331_v35 = vmax.f32 %v9256_v2, 0.0  ;;  %v9258_v56 = vadd.f32 %v9257_v39, %v15947_v25  ;;  %v16911_v39 = vlaneseq }
 0xab3   :  { %9281 = vmatpush1.msra.mxu1 %v9110_v55  ;;  %v9599_v55 = vld [vmem:[%s16909_s21 + $0x10] sm:$0xff] }
 0xab4   :  { %9282 = vmatprep.subr.mxu1 %v9107_v20  ;;  %9336 = vst.msk [vmem:[#allocation8] sm:$0x1] %vm9335_vm2, %v9331_v35  ;;  %v9332_v22 = vmax.f32 %v9258_v56, 0.0  ;;  %9342 = vrot.lane.b32.xlu0 %v9331_v35, %s16506_s5  ;;  %v9582_v3 = vand.u32 127, %v16911_v39  ;;  %v9597_v56 = vld [vmem:[%s16909_s21] sm:$0xff]  ;;  %v16059_v14 = vshrl.u32 %v16911_v39, 7 }
 0xab5   :  { %9283 = vmatpush1.msra.mxu1 %v9106_v19  ;;  %9338 = vrot.lane.b32.xlu1 %v9331_v35, %s16515_s13  ;;  %vm16063_vm1 = vcmp.lt.s32.totalorder %v16911_v39, 32  ;;  %vm9713_vm14 = vcmp.ge.s32.totalorder %v16911_v39, 32  ;;  %vm9714_vm3 = vcmp.lt.s32.totalorder %v16911_v39, 64  ;;  %vm9721_vm10 = vcmp.ge.s32.totalorder %v16911_v39, 64 }
 0xab6   :  { %9284 = vmatprep.subr.mxu1 %v9103_v51  ;;  %9350 = vst.msk [vmem:[#allocation8 + $0x4] sm:$0x1] %vm9335_vm2, %v9332_v22  ;;  %v9487_v51 = vld [vmem:[%s16913_s9 + $0x8] sm:$0xff]  ;;  %vm9715_vm4 = vmand %vm9713_vm14, %vm9714_vm3  ;;  %vm9722_vm5 = vcmp.lt.s32.totalorder %v16911_v39, 96  ;;  %vm9729_vm15 = vcmp.ge.s32.totalorder %v16911_v39, 96  ;;  %vm9730_vm9 = vcmp.lt.s32.totalorder %v16911_v39, 128 }
 0xab7   :  { %9285 = vmatpush1.msra.mxu1 %v9102_v7  ;;  %vm9723_vm13 = vmand %vm9721_vm10, %vm9722_vm5  ;;  %v9873_v39 = vsub.s32 2, %v16059_v14  ;;  %v9877_v10 = vsub.s32 3, %v16059_v14  ;;  %s16923_s9 = sld [smem:[#allocation80_spill]] }
 0xab8   :  { %9286 = vmatprep.subr.mxu1 %v9099_v24  ;;  %9352 = vrot.lane.b32.xlu0 %v9332_v22, %s16515_s13 }
 0xab9   :  { %9287 = vmatpush1.msra.mxu1 %v9098_v11  ;;  %9346 = vrot.lane.b32.xlu1 %v9331_v35, %s16513_s4 }
 0xaba   :  { %9288 = vmatprep.subr.mxu1 %v9095_v16 }
 0xabb   :  { %9289 = vmatpush1.msra.mxu1 %v9094_v32 }
 0xabc   :  { %9290 = vmatprep.subr.mxu1 %v9091_v50  ;;  %9360 = vrot.lane.b32.xlu0 %v9332_v22, %s16513_s4 }
 0xabd   :  { %9291 = vmatpush1.msra.mxu1 %v9090_v44  ;;  %9356 = vrot.lane.b32.xlu1 %v9332_v22, %s16506_s5  ;;  %v9690_v22 = vunpack.c.0.s8 %v9689_v9 }
 0xabe   :  { %10856 = vmatmul.mubr.msk.f32.vlgmr.msra.gmra.mxu1 %vm312_vm11, %v16907_v36  ;;  %10917 = vmatprep.subr.mxu1 %v9397_v0 }
 0xabf   :  { %10918 = vmatpush3.msra.mxu1 %v9397_v0  ;;  %v9693_v15 = vsub.s32 %v9690_v22, %v16059_v14  ;;  %v9869_v22 = vsub.s32 1, %v16059_v14 }
 0xac0   :  { %10919 = vmatprep.subr.mxu1 %v9396_v27 }
 0xac1   :  { %10920 = vmatpush3.msra.mxu1 %v9396_v27 }
 0xac2   :  { %10921 = vmatprep.subr.mxu1 %v9395_v12 }
 0xac3   :  { %10922 = vmatpush3.msra.mxu1 %v9395_v12 }
 0xac4   :  { %10923 = vmatprep.subr.mxu1 %v9394_v5 }
 0xac5   :  { %10924 = vmatpush3.msra.mxu1 %v9394_v5  ;;  %v9851_v5 = vld [vmem:[%s16917_s26 + $0x8] sm:$0xff] }
 0xac6   :  { %10935 = vmatprep.subr.mxu1 %v9601_v62 }
 0xb26   :  { %v9343_v26 = vpop.permute.xlu0 %9342 }
 0xb27   :  { %9345 = vst.msk [vmem:[#allocation8 + $0x2] sm:$0x1] %vm9335_vm2, %v9343_v26  ;;  %v9339_v48 = vpop.permute.xlu1 %9338 }
 0xb28   :  { %9341 = vst.msk [vmem:[#allocation8 + $0x1] sm:$0x1] %vm9335_vm2, %v9339_v48 }
 0xb2a   :  { %v9353_v37 = vpop.permute.xlu0 %9352 }
 0xb2b   :  { %9355 = vst.msk [vmem:[#allocation8 + $0x5] sm:$0x1] %vm9335_vm2, %v9353_v37  ;;  %v9347_v18 = vpop.permute.xlu1 %9346 }
 0xb2c   :  { %9349 = vst.msk [vmem:[#allocation8 + $0x3] sm:$0x1] %vm9335_vm2, %v9347_v18 }
 0xb2e   :  { %v9361_v23 = vpop.permute.xlu0 %9360 }
 0xb2f   :  { %9363 = vst.msk [vmem:[#allocation8 + $0x7] sm:$0x1] %vm9335_vm2, %v9361_v23  ;;  %v9357_v6 = vpop.permute.xlu1 %9356 }
 0xb30   :  { %9359 = vst.msk [vmem:[#allocation8 + $0x6] sm:$0x1] %vm9335_vm2, %v9357_v6 }
 0xb37   :  { %v9392_v34 = vld [vmem:[#allocation8] sm:$0xff] }
 0xb38   :  { %10925 = vmatprep.mubr.msk.f32.mxu1 %vm417_vm12, %v9392_v34 }
 0xb7e   :  { %v9326_v31 = vpop.f32.mrf.mxu1 }
 0xb7f   :  { %v9327_v42 = vadd.f32 %v9326_v31, %v15947_v25 }
 0xb80   :  { %v9328_v47 = vpop.f32.mrf.mxu1 }
 0xb81   :  { %v9333_v28 = vmax.f32 %v9327_v42, 0.0  ;;  %v9329_v40 = vadd.f32 %v9328_v47, %v15947_v25  ;;  %v9584_v25 = vld [vmem:[%s16910_s7 + $0x8] sm:$0xff] }
 0xb83   :  { %9364 = vst.msk [vmem:[#allocation8 + $0x8] sm:$0x1] %vm9335_vm2, %v9333_v28  ;;  %v9334_v58 = vmax.f32 %v9329_v40, 0.0  ;;  %9370 = vrot.lane.b32.xlu0 %v9333_v28, %s16506_s5  ;;  %9366 = vrot.lane.b32.xlu1 %v9333_v28, %s16515_s13 }
 0xb85   :  { %9378 = vst.msk [vmem:[#allocation8 + $0xc] sm:$0x1] %vm9335_vm2, %v9334_v58 }
 0xb87   :  { %9380 = vrot.lane.b32.xlu0 %v9334_v58, %s16515_s13  ;;  %9374 = vrot.lane.b32.xlu1 %v9333_v28, %s16513_s4 }
 0xb8b   :  { %9388 = vrot.lane.b32.xlu0 %v9334_v58, %s16513_s4  ;;  %9384 = vrot.lane.b32.xlu1 %v9334_v58, %s16506_s5  ;;  %v9850_v58 = vld [vmem:[%s16917_s26] sm:$0xff] }
 0xb8f   :  { %9589 = vperm.xlu0 %10985, %v9584_v25   ;;  %9586 = vperm.xlu1 %10986, %v9583_v61   ;;  %v9891_v25 = vld [vmem:[%s16918_s2] sm:$0xff]  ;;  %v9926_v61 = vld [vmem:[%s16919_s25 + $0x18] sm:$0xff] }
 0xbf5   :  { %v9371_v41 = vpop.permute.xlu0 %9370  ;;  %v9367_v45 = vpop.permute.xlu1 %9366 }
 0xbf6   :  { %9373 = vst.msk [vmem:[#allocation8 + $0xa] sm:$0x1] %vm9335_vm2, %v9371_v41  ;;  %9369 = vst.msk [vmem:[#allocation8 + $0x9] sm:$0x1] %vm9335_vm2, %v9367_v45  ;;  %v9925_v41 = vld [vmem:[%s16919_s25 + $0x10] sm:$0xff]  ;;  %v9924_v45 = vld [vmem:[%s16919_s25 + $0x8] sm:$0xff] }
 0xbf9   :  { %v9381_v2 = vpop.permute.xlu0 %9380  ;;  %v9375_v53 = vpop.permute.xlu1 %9374 }
 0xbfa   :  { %9383 = vst.msk [vmem:[#allocation8 + $0xd] sm:$0x1] %vm9335_vm2, %v9381_v2  ;;  %9377 = vst.msk [vmem:[#allocation8 + $0xb] sm:$0x1] %vm9335_vm2, %v9375_v53  ;;  %v9923_v2 = vld [vmem:[%s16919_s25] sm:$0xff]  ;;  %v10168_v53 = vld [vmem:[%s16920_s29 + $0x38] sm:$0xff] }
 0xbfb   :  { %s16924_s25 = sld [smem:[#allocation82_spill]] }
 0xbfd   :  { %v9389_v54 = vpop.permute.xlu0 %9388  ;;  %v9385_v17 = vpop.permute.xlu1 %9384 }
 0xbfe   :  { %9391 = vst.msk [vmem:[#allocation8 + $0xf] sm:$0x1] %vm9335_vm2, %v9389_v54  ;;  %9387 = vst.msk [vmem:[#allocation8 + $0xe] sm:$0x1] %vm9335_vm2, %v9385_v17  ;;  %v10167_v54 = vld [vmem:[%s16920_s29 + $0x30] sm:$0xff]  ;;  %v10166_v17 = vld [vmem:[%s16920_s29 + $0x28] sm:$0xff] }
 0xc05   :  { %v9393_v49 = vld [vmem:[#allocation8 + $0x8] sm:$0xff] }
 0xc06   :  { %10926 = vmatmul.mubr.msk.f32.vlgmr.msra.gmra.mxu1 %vm417_vm12, %v9393_v49  ;;  %v10165_v49 = vld [vmem:[%s16920_s29 + $0x20] sm:$0xff] }
 0xc07   :  { %10936 = vmatpush3.msra.mxu1 %v9601_v62  ;;  %v9892_v62 = vld [vmem:[%s16918_s2 + $0x8] sm:$0xff] }
 0xc08   :  { %10937 = vmatprep.subr.mxu1 %v9600_v43 }
 0xc09   :  { %10938 = vmatpush3.msra.mxu1 %v9600_v43  ;;  %v10164_v43 = vld [vmem:[%s16920_s29 + $0x18] sm:$0xff] }
 0xc0a   :  { %10939 = vmatprep.subr.mxu1 %v9599_v55  ;;  %v9590_v20 = vpop.permute.xlu0 %9589  ;;  %v9587_v35 = vpop.permute.xlu1 %9586 }
 0xc0b   :  { %vm9591_vm7 = vcmp.eq.s32.totalorder %v9587_v35, %v9582_v3  ;;  %10940 = vmatpush3.msra.mxu1 %v9599_v55  ;;  %vm9592_vm8 = vcmp.eq.s32.totalorder %v9590_v20, %v9582_v3  ;;  %v10163_v55 = vld [vmem:[%s16920_s29 + $0x10] sm:$0xff]  ;;  %v10162_v3 = vld [vmem:[%s16920_s29 + $0x8] sm:$0xff]  ;;  %v9488_v20 = vld [vmem:[%s16921_s19] sm:$0xff] }
 0xc0c   :  { %v10862_v1 = vsel %vm9591_vm7, 1.0, %v16912_v21  ;;  %10941 = vmatprep.subr.mxu1 %v9598_v60  ;;  %v10863_v38 = vsel %vm9592_vm8, 1.0, %v16912_v21  ;;  %vm9731_vm7 = vmand %vm9729_vm15, %vm9730_vm9 }
 0xc0d   :  { %10942 = vmatpush3.msra.mxu1 %v9598_v60  ;;  %10945 = vmatprep.mubr.msk.f32.mxu1 %vm9602_vm6, %v10862_v1  ;;  %v10161_v60 = vld [vmem:[%s16920_s29] sm:$0xff] }
 0xc0e   :  { %10943 = vmatprep.subr.mxu1 %v9597_v56 }
 0xc0f   :  { %10944 = vmatpush3.msra.mxu1 %v9597_v56 }
 0xc10   :  { %10946 = vmatmul.mubr.msk.f32.vlgmr.msra.gmra.mxu1 %vm9602_vm6, %v10863_v38 }
 0xc11   :  { %10112 = vmatprep.mubr.f32.mxu1 %v16912_v21 }
 0xcc6   :  { %v10927_v8 = vpop.f32.mrf.mxu1 }
 0xcc7   :  { %v9483_v19 = vadd.f32 %v10927_v8, %v10857_v46 }
 0xcc8   :  { %v9477_v13 = vpop.f32.mrf.mxu1 }
 0xcc9   :  { %v9478_v33 = vadd.f32 %v10857_v46, %v9477_v13  ;;  %10928 = vmatprep.subr.mxu0 %v9483_v19 }
 0xcca   :  { %10929 = vmatpush3.msra.mxu0 %v9483_v19 }
 0xccb   :  { %10930 = vmatprep.subr.mxu0 %v9478_v33 }
 0xccc   :  { %10931 = vmatpush3.msra.mxu0 %v9478_v33 }
 0xccd   :  { %10933 = vmatmul.mubr.msk.f32.vlgmr.msra.gmra.mxu0 %vm3685_vm0, %v9487_v51  ;;  %v9865_v51 = vsub.s32 0, %v16059_v14 }
 0xcce   :  { %10023 = vmatprep.mubr.f32.mxu0 %v16912_v21 }
 0xcd0   :  { %v10947_v57 = vpop.f32.mrf.mxu1 }
 0xcd1   :  { %9772 = vst.msk [vmem:[#allocation9 + $0x2] sm:$0x1] %vm16063_vm1, %v10947_v57  ;;  %v9810_v7 = vcombine.high %v10947_v57, %v10947_v57  ;;  %v9780_v63 = vrot.slane %v10947_v57, %v9693_v15 }
 0xcd2   :  { %v9675_v52 = vpop.f32.mrf.mxu1 }
 0xcd3   :  { %v9817_v24 = vrot.slane %v9810_v7, %v9693_v15  ;;  %9686 = vst.msk [vmem:[#allocation9] sm:$0x1] %vm16063_vm1, %v9675_v52  ;;  %v9694_v29 = vrot.slane %v9675_v52, %v9693_v15  ;;  %v9733_v59 = vcombine.high %v9675_v52, %v9675_v52  ;;  %v9781_v50 = vcombine.high %v9780_v63, %v9780_v63 }
 0xcd4   :  { %v9788_v34 = vrot.slane %v9780_v63, %v9693_v15 }
 0xcd5   :  { %v9824_v11 = vrot.slane %v9817_v24, %v9693_v15  ;;  %v9695_v16 = vcombine.high %v9694_v29, %v9694_v29  ;;  %v9740_v32 = vrot.slane %v9733_v59, %v9693_v15  ;;  %v9827_v48 = vcombine.high %v9817_v24, %v9817_v24 }
 0xcd6   :  { %v9702_v18 = vrot.slane %v9694_v29, %v9693_v15  ;;  %v9795_v23 = vrot.slane %v9781_v50, %v9693_v15  ;;  %v9800_v27 = vcombine.high %v9788_v34, %v9788_v34 }
 0xcd7   :  { %9826 = vst.msk [vmem:[#allocation9 + $0x3] sm:$0x1] %vm16063_vm1, %v9824_v11  ;;  %v9709_v44 = vrot.slane %v9695_v16, %v9693_v15  ;;  %v9747_v36 = vrot.slane %v9740_v32, %v9693_v15  ;;  %v9750_v26 = vcombine.high %v9740_v32, %v9740_v32  ;;  %v9834_v6 = vrot.slane %v9827_v48, %v9693_v15 }
 0xcd8   :  { %v9717_v0 = vcombine.high %v9702_v18, %v9702_v18  ;;  %v9839_v12 = vcombine.high %v9824_v11, %v9824_v11  ;;  %v9805_v28 = vcombine.high %v9795_v23, %v9795_v23 }
 0xcd9   :  { %9710 = vrot.lane.b32.xlu1 %v9709_v44, %s16513_s4  ;;  %9749 = vst.msk [vmem:[#allocation9 + $0x1] sm:$0x1] %vm16063_vm1, %v9747_v36  ;;  %v9757_v37 = vrot.slane %v9750_v26, %v9693_v15  ;;  %v9762_v31 = vcombine.high %v9747_v36, %v9747_v36  ;;  %v9725_v42 = vcombine.high %v9709_v44, %v9709_v44 }
 0xcda   :  { %v9844_v40 = vcombine.high %v9834_v6, %v9834_v6 }
 0xcdb   :  { %9758 = vrot.lane.b32.xlu0 %v9757_v37, %s16513_s4  ;;  %v9767_v47 = vcombine.high %v9757_v37, %v9757_v37 }
 0xcdd   :  { %9796 = vrot.lane.b32.xlu1 %v9795_v23, %s16513_s4 }
 0xcdf   :  { %9835 = vrot.lane.b32.xlu0 %v9834_v6, %s16513_s4 }
 0xce1   :  { %9718 = vrot.lane.b32.xlu1 %v9717_v0, %s16506_s5 }
 0xce3   :  { %9763 = vrot.lane.b32.xlu0 %v9762_v31, %s16506_s5 }
 0xce5   :  { %9801 = vrot.lane.b32.xlu1 %v9800_v27, %s16506_s5 }
 0xce7   :  { %9840 = vrot.lane.b32.xlu0 %v9839_v12, %s16506_s5 }
 0xce9   :  { %9726 = vrot.lane.b32.xlu1 %v9725_v42, %s16515_s13 }
 0xceb   :  { %9768 = vrot.lane.b32.xlu0 %v9767_v47, %s16515_s13 }
 0xced   :  { %9806 = vrot.lane.b32.xlu1 %v9805_v28, %s16515_s13 }
 0xcef   :  { %9845 = vrot.lane.b32.xlu0 %v9844_v40, %s16515_s13 }
 0xcf1   :  { %9859 = vperm.xlu1 %10986, %v9851_v5  }
 0xcf3   :  { %9854 = vperm.xlu0 %10985, %v9850_v58  }
 0xcf5   :  { %9900 = vperm.xlu1 %10986, %v9892_v62  }
 0xcf7   :  { %9895 = vperm.xlu0 %10985, %v9891_v25   ;;  %v9919_v25 = vld [vmem:[%s16922_s16] sm:$0xff] }
 0xcf9   :  { %9944 = vperm.xlu1 %10986, %v9926_v61   ;;  %v9920_v61 = vld [vmem:[%s16922_s16 + $0x8] sm:$0xff] }
 0xcfb   :  { %9939 = vperm.xlu0 %10985, %v9925_v41   ;;  %v9921_v41 = vld [vmem:[%s16922_s16 + $0x10] sm:$0xff] }
 0xcfd   :  { %9934 = vperm.xlu1 %10986, %v9924_v45   ;;  %v9922_v45 = vld [vmem:[%s16922_s16 + $0x18] sm:$0xff]  ;;  %s10815_s16 = sld [smem:[#allocation11 + $0x1]] }
 0xcff   :  { %9929 = vperm.xlu0 %10985, %v9923_v2  }
 0xd01   :  { %10206 = vperm.xlu1 %10986, %v10168_v53  }
 0xd03   :  { %10201 = vperm.xlu0 %10985, %v10167_v54  }
 0xd05   :  { %10196 = vperm.xlu1 %10986, %v10166_v17  }
 0xd07   :  { %10191 = vperm.xlu0 %10985, %v10165_v49  }
 0xd09   :  { %10186 = vperm.xlu1 %10986, %v10164_v43  }
 0xd0b   :  { %10181 = vperm.xlu0 %10985, %v10163_v55  }
 0xd0d   :  { %10176 = vperm.xlu1 %10986, %v10162_v3  }
 0xd0f   :  { %10171 = vperm.xlu0 %10985, %v10161_v60  }
 0xd11   :  { %9492 = vperm.xlu1 %10986, %v9488_v20  }
 0xd4b   :  { %v9711_v35 = vpop.permute.xlu1 %9710 }
 0xd4c   :  { %9716 = vst.msk [vmem:[#allocation9] sm:$0x1] %vm9715_vm4, %v9711_v35 }
 0xd4d   :  { %v9759_v56 = vpop.permute.xlu0 %9758 }
 0xd4e   :  { %9761 = vst.msk [vmem:[#allocation9 + $0x1] sm:$0x1] %vm9715_vm4, %v9759_v56 }
 0xd4f   :  { %v9797_v1 = vpop.permute.xlu1 %9796 }
 0xd50   :  { %9799 = vst.msk [vmem:[#allocation9 + $0x2] sm:$0x1] %vm9715_vm4, %v9797_v1 }
 0xd51   :  { %v9836_v38 = vpop.permute.xlu0 %9835 }
 0xd52   :  { %9838 = vst.msk [vmem:[#allocation9 + $0x3] sm:$0x1] %vm9715_vm4, %v9836_v38 }
 0xd53   :  { %v9719_v30 = vpop.permute.xlu1 %9718 }
 0xd54   :  { %9724 = vst.msk [vmem:[#allocation9] sm:$0x1] %vm9723_vm13, %v9719_v30 }
 0xd55   :  { %v9764_v46 = vpop.permute.xlu0 %9763 }
 0xd56   :  { %9766 = vst.msk [vmem:[#allocation9 + $0x1] sm:$0x1] %vm9723_vm13, %v9764_v46 }
 0xd57   :  { %v9802_v8 = vpop.permute.xlu1 %9801 }
 0xd58   :  { %9804 = vst.msk [vmem:[#allocation9 + $0x2] sm:$0x1] %vm9723_vm13, %v9802_v8 }
 0xd59   :  { %v9841_v19 = vpop.permute.xlu0 %9840 }
 0xd5a   :  { %9843 = vst.msk [vmem:[#allocation9 + $0x3] sm:$0x1] %vm9723_vm13, %v9841_v19 }
 0xd5b   :  { %v9727_v4 = vpop.permute.xlu1 %9726 }
 0xd5c   :  { %9732 = vst.msk [vmem:[#allocation9] sm:$0x1] %vm9731_vm7, %v9727_v4 }
 0xd5d   :  { %v9769_v9 = vpop.permute.xlu0 %9768 }
 0xd5e   :  { %9771 = vst.msk [vmem:[#allocation9 + $0x1] sm:$0x1] %vm9731_vm7, %v9769_v9 }
 0xd5f   :  { %v9807_v13 = vpop.permute.xlu1 %9806 }
 0xd60   :  { %9809 = vst.msk [vmem:[#allocation9 + $0x2] sm:$0x1] %vm9731_vm7, %v9807_v13 }
 0xd61   :  { %v9846_v33 = vpop.permute.xlu0 %9845 }
 0xd62   :  { %9848 = vst.msk [vmem:[#allocation9 + $0x3] sm:$0x1] %vm9731_vm7, %v9846_v33 }
 0xd69   :  { %v9849_v15 = vld [vmem:[#allocation9] sm:$0xf] }
 0xd6a   :  { %v9866_v57 = vrot.slane %v9849_v15, %v9865_v51  ;;  %v9870_v7 = vrot.slane %v9849_v15, %v9869_v22  ;;  %v9874_v52 = vrot.slane %v9849_v15, %v9873_v39  ;;  %v9878_v63 = vrot.slane %v9849_v15, %v9877_v10 }
 0xd6c   :  { %v9860_v24 = vpop.permute.xlu1 %9859 }
 0xd6d   :  { %v9887_v29 = vmul.f32 %v9866_v57, %v9860_v24  ;;  %v9888_v59 = vmul.f32 %v9870_v7, %v9860_v24  ;;  %v9889_v11 = vmul.f32 %v9874_v52, %v9860_v24  ;;  %v9890_v16 = vmul.f32 %v9878_v63, %v9860_v24 }
 0xd6e   :  { %v9855_v32 = vpop.permute.xlu0 %9854 }
 0xd6f   :  { %v9883_v37 = vmul.f32 %v9866_v57, %v9855_v32  ;;  %v9884_v18 = vmul.f32 %v9870_v7, %v9855_v32  ;;  %v9885_v23 = vmul.f32 %v9874_v52, %v9855_v32  ;;  %v9886_v14 = vmul.f32 %v9878_v63, %v9855_v32 }
 0xd70   :  { %v9901_v50 = vpop.permute.xlu1 %9900 }
 0xd71   :  { %v9907_v44 = vadd.f32 %v9901_v50, %v9887_v29  ;;  %v9909_v36 = vadd.f32 %v9901_v50, %v9889_v11  ;;  %v9908_v26 = vadd.f32 %v9901_v50, %v9888_v59  ;;  %v9910_v48 = vadd.f32 %v9901_v50, %v9890_v16 }
 0xd72   :  { %v9896_v0 = vpop.permute.xlu0 %9895 }
 0xd73   :  { %v9915_v6 = vmax.f32 %v9907_v44, 0.0  ;;  %v9917_v34 = vmax.f32 %v9909_v36, 0.0  ;;  %v9916_v31 = vmax.f32 %v9908_v26, 0.0  ;;  %v9918_v27 = vmax.f32 %v9910_v48, 0.0 }
 0xd74   :  { %v9903_v12 = vadd.f32 %v9896_v0, %v9883_v37  ;;  %v9905_v42 = vadd.f32 %v9896_v0, %v9885_v23  ;;  %v9904_v47 = vadd.f32 %v9896_v0, %v9884_v18  ;;  %v9906_v28 = vadd.f32 %v9896_v0, %v9886_v14  ;;  %v9945_v1 = vpop.permute.xlu1 %9944 }
 0xd75   :  { %9987 = vmatprep.subr.mxu0 %v9916_v31  ;;  %10076 = vmatprep.subr.mxu1 %v9918_v27 }
 0xd76   :  { %v9911_v40 = vmax.f32 %v9903_v12, 0.0  ;;  %v9913_v5 = vmax.f32 %v9905_v42, 0.0  ;;  %9988 = vmatpush1.msra.mxu0 %v9915_v6  ;;  %10077 = vmatpush1.msra.mxu1 %v9917_v34  ;;  %v9912_v58 = vmax.f32 %v9904_v47, 0.0  ;;  %v9914_v62 = vmax.f32 %v9906_v28, 0.0  ;;  %v9940_v46 = vpop.permute.xlu0 %9939  ;;  %v10153_v28 = vld [vmem:[%s16923_s9] sm:$0xff] }
 0xd78   :  { %9989 = vmatprep.subr.mxu0 %v9912_v58  ;;  %10078 = vmatprep.subr.mxu1 %v9914_v62  ;;  %v9935_v15 = vpop.permute.xlu1 %9934  ;;  %v10156_v58 = vld [vmem:[%s16923_s9 + $0x18] sm:$0xff]  ;;  %v10157_v62 = vld [vmem:[%s16923_s9 + $0x20] sm:$0xff] }
 0xd79   :  { %9990 = vmatpush1.msra.mxu0 %v9911_v40  ;;  %10079 = vmatpush1.msra.mxu1 %v9913_v5  ;;  %v10154_v40 = vld [vmem:[%s16923_s9 + $0x8] sm:$0xff]  ;;  %v10155_v5 = vld [vmem:[%s16923_s9 + $0x10] sm:$0xff] }
 0xd7a   :  { %10866 = vmatmul.mubr.msk.f32.vlgmr.msra.gmra.mxu0 %vm3685_vm0, %v9919_v25  ;;  %10870 = vmatmul.mubr.msk.f32.vlgmr.msra.gmra.mxu1 %vm3685_vm0, %v9919_v25  ;;  %v9930_v59 = vpop.permute.xlu0 %9929  ;;  %v10158_v25 = vld [vmem:[%s16923_s9 + $0x28] sm:$0xff] }
 0xd7b   :  { %10029 = vmatprep.mubr.f32.mxu0 %v16912_v21  ;;  %10118 = vmatprep.mubr.f32.mxu1 %v16912_v21 }
 0xd7e   :  { %10867 = vmatmul.mubr.msk.f32.gmra.mxu0 %vm3685_vm0, %v9920_v61  ;;  %10871 = vmatmul.mubr.msk.f32.gmra.mxu1 %vm3685_vm0, %v9920_v61  ;;  %v10159_v61 = vld [vmem:[%s16923_s9 + $0x30] sm:$0xff] }
 0xd7f   :  { %10035 = vmatprep.mubr.f32.mxu0 %v16912_v21  ;;  %10124 = vmatprep.mubr.f32.mxu1 %v16912_v21 }
 0xd82   :  { %10868 = vmatmul.mubr.msk.f32.gmra.mxu0 %vm3685_vm0, %v9921_v41  ;;  %10872 = vmatmul.mubr.msk.f32.gmra.mxu1 %vm3685_vm0, %v9921_v41  ;;  %v10160_v41 = vld [vmem:[%s16923_s9 + $0x38] sm:$0xff]  ;;  %s10817_s9 = sld [smem:[#allocation11 + $0x3]] }
 0xd83   :  { %10041 = vmatprep.mubr.f32.mxu0 %v16912_v21  ;;  %10130 = vmatprep.mubr.f32.mxu1 %v16912_v21 }
 0xd86   :  { %10869 = vmatmul.mubr.msk.f32.gmra.mxu0 %vm3685_vm0, %v9922_v45  ;;  %10873 = vmatmul.mubr.msk.f32.gmra.mxu1 %vm3685_vm0, %v9922_v45 }
 0xd87   :  { %10297 = vmatprep.mubr.f32.mxu0 %v16912_v21  ;;  %10410 = vmatprep.mubr.f32.mxu1 %v16912_v21 }
 0xd8d   :  { %v16178_v2 = vpop.f32.mrf.mxu0 }
 0xd8f   :  { %v16180_v53 = vpop.f32.mrf.mxu0 }
 0xe3a   :  { %v10025_v54 = vpop.f32.mrf.mxu0  ;;  %v10114_v17 = vpop.f32.mrf.mxu1 }
 0xe3b   :  { %v10026_v37 = vadd.f32 %v10025_v54, %v9930_v59  ;;  %v10115_v18 = vadd.f32 %v10114_v17, %v9930_v59 }
 0xe3c   :  { %v10027_v49 = vpop.f32.mrf.mxu0  ;;  %v10116_v43 = vpop.f32.mrf.mxu1 }
 0xe3d   :  { %v10028_v44 = vadd.f32 %v10027_v49, %v9930_v59  ;;  %v10117_v36 = vadd.f32 %v10116_v43, %v9930_v59  ;;  %v10137_v42 = vmax.f32 %v10026_v37, 0.0  ;;  %v10139_v47 = vmax.f32 %v10115_v18, 0.0 }
 0xe3e   :  { %v10031_v55 = vpop.f32.mrf.mxu0  ;;  %v10120_v3 = vpop.f32.mrf.mxu1 }
 0xe3f   :  { %v10032_v11 = vadd.f32 %v10031_v55, %v9935_v15  ;;  %v10121_v16 = vadd.f32 %v10120_v3, %v9935_v15  ;;  %v10138_v27 = vmax.f32 %v10028_v44, 0.0  ;;  %v10140_v12 = vmax.f32 %v10117_v36, 0.0 }
 0xe40   :  { %v10033_v60 = vpop.f32.mrf.mxu0  ;;  %v10122_v20 = vpop.f32.mrf.mxu1 }
 0xe41   :  { %v10034_v52 = vadd.f32 %v10033_v60, %v9935_v15  ;;  %v10123_v63 = vadd.f32 %v10122_v20, %v9935_v15  ;;  %v10141_v0 = vmax.f32 %v10032_v11, 0.0  ;;  %v10143_v31 = vmax.f32 %v10121_v16, 0.0 }
 0xe42   :  { %v10037_v35 = vpop.f32.mrf.mxu0  ;;  %v10126_v56 = vpop.f32.mrf.mxu1 }
 0xe43   :  { %v10038_v57 = vadd.f32 %v10037_v35, %v9940_v46  ;;  %v10127_v7 = vadd.f32 %v10126_v56, %v9940_v46  ;;  %v10142_v6 = vmax.f32 %v10034_v52, 0.0  ;;  %v10144_v34 = vmax.f32 %v10123_v63, 0.0 }
 0xe44   :  { %v10039_v38 = vpop.f32.mrf.mxu0  ;;  %v10128_v30 = vpop.f32.mrf.mxu1 }
 0xe45   :  { %v10040_v51 = vadd.f32 %v10039_v38, %v9940_v46  ;;  %v10129_v22 = vadd.f32 %v10128_v30, %v9940_v46  ;;  %v10145_v23 = vmax.f32 %v10038_v57, 0.0  ;;  %v10147_v14 = vmax.f32 %v10127_v7, 0.0 }
 0xe46   :  { %v10043_v8 = vpop.f32.mrf.mxu0  ;;  %v10132_v19 = vpop.f32.mrf.mxu1 }
 0xe47   :  { %v10044_v4 = vadd.f32 %v10043_v8, %v9945_v1  ;;  %v10133_v9 = vadd.f32 %v10132_v19, %v9945_v1  ;;  %v10146_v26 = vmax.f32 %v10040_v51, 0.0  ;;  %v10148_v48 = vmax.f32 %v10129_v22, 0.0  ;;  %v10207_v51 = vpop.permute.xlu1 %10206 }
 0xe48   :  { %v10045_v13 = vpop.f32.mrf.mxu0  ;;  %v10134_v33 = vpop.f32.mrf.mxu1 }
 0xe49   :  { %v10046_v39 = vadd.f32 %v10045_v13, %v9945_v1  ;;  %v10135_v10 = vadd.f32 %v10134_v33, %v9945_v1  ;;  %v10149_v32 = vmax.f32 %v10044_v4, 0.0  ;;  %v10151_v50 = vmax.f32 %v10133_v9, 0.0 }
 0xe4b   :  { %v10150_v24 = vmax.f32 %v10046_v39, 0.0  ;;  %v10152_v29 = vmax.f32 %v10135_v10, 0.0  ;;  %v10202_v10 = vpop.permute.xlu0 %10201  ;;  %v10197_v63 = vpop.permute.xlu1 %10196 }
 0xe4d   :  { %10257 = vmatprep.subr.mxu0 %v10150_v24  ;;  %10370 = vmatprep.subr.mxu1 %v10152_v29 }
 0xe4e   :  { %10258 = vmatpush1.msra.mxu0 %v10149_v32  ;;  %10371 = vmatpush1.msra.mxu1 %v10151_v50 }
 0xe4f   :  { %10259 = vmatprep.subr.mxu0 %v10146_v26  ;;  %10372 = vmatprep.subr.mxu1 %v10148_v48  ;;  %v10192_v59 = vpop.permute.xlu0 %10191 }
 0xe50   :  { %10260 = vmatpush1.msra.mxu0 %v10145_v23  ;;  %10373 = vmatpush1.msra.mxu1 %v10147_v14 }
 0xe51   :  { %10261 = vmatprep.subr.mxu0 %v10142_v6  ;;  %10374 = vmatprep.subr.mxu1 %v10144_v34 }
 0xe52   :  { %10262 = vmatpush1.msra.mxu0 %v10141_v0  ;;  %10375 = vmatpush1.msra.mxu1 %v10143_v31  ;;  %v10187_v0 = vpop.permute.xlu1 %10186 }
 0xe53   :  { %10263 = vmatprep.subr.mxu0 %v10138_v27  ;;  %10376 = vmatprep.subr.mxu1 %v10140_v12 }
 0xe54   :  { %10264 = vmatpush1.msra.mxu0 %v10137_v42  ;;  %10377 = vmatpush1.msra.mxu1 %v10139_v47 }
 0xe55   :  { %10874 = vmatmul.mubr.msk.f32.vlgmr.msra.gmra.mxu0 %vm417_vm12, %v10153_v28  ;;  %10882 = vmatmul.mubr.msk.f32.vlgmr.msra.gmra.mxu1 %vm417_vm12, %v10153_v28 }
 0xe56   :  { %10303 = vmatprep.mubr.f32.mxu0 %v16912_v21  ;;  %10416 = vmatprep.mubr.f32.mxu1 %v16912_v21 }
 0xe59   :  { %10875 = vmatmul.mubr.msk.f32.gmra.mxu0 %vm417_vm12, %v10154_v40  ;;  %10883 = vmatmul.mubr.msk.f32.gmra.mxu1 %vm417_vm12, %v10154_v40 }
 0xe5a   :  { %10309 = vmatprep.mubr.f32.mxu0 %v16912_v21  ;;  %10422 = vmatprep.mubr.f32.mxu1 %v16912_v21 }
 0xe5d   :  { %10876 = vmatmul.mubr.msk.f32.gmra.mxu0 %vm417_vm12, %v10155_v5  ;;  %10884 = vmatmul.mubr.msk.f32.gmra.mxu1 %vm417_vm12, %v10155_v5 }
 0xe5e   :  { %10315 = vmatprep.mubr.f32.mxu0 %v16912_v21  ;;  %10428 = vmatprep.mubr.f32.mxu1 %v16912_v21 }
 0xe61   :  { %10877 = vmatmul.mubr.msk.f32.gmra.mxu0 %vm417_vm12, %v10156_v58  ;;  %10885 = vmatmul.mubr.msk.f32.gmra.mxu1 %vm417_vm12, %v10156_v58  ;;  %v10182_v58 = vpop.permute.xlu0 %10181 }
 0xe62   :  { %10321 = vmatprep.mubr.f32.mxu0 %v16912_v21  ;;  %10434 = vmatprep.mubr.f32.mxu1 %v16912_v21 }
 0xe65   :  { %10878 = vmatmul.mubr.msk.f32.gmra.mxu0 %vm417_vm12, %v10157_v62  ;;  %10886 = vmatmul.mubr.msk.f32.gmra.mxu1 %vm417_vm12, %v10157_v62 }
 0xe66   :  { %10327 = vmatprep.mubr.f32.mxu0 %v16912_v21  ;;  %10440 = vmatprep.mubr.f32.mxu1 %v16912_v21 }
 0xe69   :  { %10879 = vmatmul.mubr.msk.f32.gmra.mxu0 %vm417_vm12, %v10158_v25  ;;  %10887 = vmatmul.mubr.msk.f32.gmra.mxu1 %vm417_vm12, %v10158_v25 }
 0xe6a   :  { %10333 = vmatprep.mubr.f32.mxu0 %v16912_v21  ;;  %10446 = vmatprep.mubr.f32.mxu1 %v16912_v21 }
 0xe6d   :  { %10880 = vmatmul.mubr.msk.f32.gmra.mxu0 %vm417_vm12, %v10159_v61  ;;  %10888 = vmatmul.mubr.msk.f32.gmra.mxu1 %vm417_vm12, %v10159_v61 }
 0xe6e   :  { %10339 = vmatprep.mubr.f32.mxu0 %v16912_v21  ;;  %10452 = vmatprep.mubr.f32.mxu1 %v16912_v21 }
 0xe71   :  { %10881 = vmatmul.mubr.msk.f32.gmra.mxu0 %vm417_vm12, %v10160_v41  ;;  %10889 = vmatmul.mubr.msk.f32.gmra.mxu1 %vm417_vm12, %v10160_v41 }
 0xe72   :  { %10560 = vmatprep.mubr.f32.mxu0 %v16912_v21  ;;  %10631 = vmatprep.mubr.f32.mxu1 %v16912_v21 }
 0xf15   :  { %v16238_v45 = vpop.f32.mrf.mxu0  ;;  %v16240_v54 = vpop.f32.mrf.mxu1 }
 0xf17   :  { %v16242_v17 = vpop.f32.mrf.mxu0  ;;  %v16244_v49 = vpop.f32.mrf.mxu1 }
 0xf19   :  { %v16246_v43 = vpop.f32.mrf.mxu0  ;;  %v16248_v55 = vpop.f32.mrf.mxu1 }
 0xf1b   :  { %v16250_v3 = vpop.f32.mrf.mxu0  ;;  %v16252_v60 = vpop.f32.mrf.mxu1 }
 0xf1d   :  { %v16254_v20 = vpop.f32.mrf.mxu0  ;;  %v16256_v35 = vpop.f32.mrf.mxu1 }
 0xf1f   :  { %v16258_v21 = vpop.f32.mrf.mxu0  ;;  %v16260_v56 = vpop.f32.mrf.mxu1 }
 0xf21   :  { %v10317_v1 = vpop.f32.mrf.mxu0  ;;  %v10430_v38 = vpop.f32.mrf.mxu1 }
 0xf23   :  { %v10319_v30 = vpop.f32.mrf.mxu0  ;;  %v10432_v46 = vpop.f32.mrf.mxu1 }
 0xf25   :  { %v10323_v8 = vpop.f32.mrf.mxu0  ;;  %v10436_v19 = vpop.f32.mrf.mxu1 }
 0xf26   :  { %v10324_v62 = vadd.f32 %v10323_v8, %v10192_v59  ;;  %v10437_v25 = vadd.f32 %v10436_v19, %v10192_v59  ;;  %v10427_v8 = vadd.f32 %v16260_v56, %v10182_v58  ;;  %v10172_v56 = vpop.permute.xlu0 %10171 }
 0xf27   :  { %v10325_v4 = vpop.f32.mrf.mxu0  ;;  %v10438_v9 = vpop.f32.mrf.mxu1 }
 0xf28   :  { %v10326_v47 = vadd.f32 %v10325_v4, %v10192_v59  ;;  %v10439_v28 = vadd.f32 %v10438_v9, %v10192_v59  ;;  %v10431_v4 = vadd.f32 %v10430_v38, %v10187_v0 }
 0xf29   :  { %v10329_v13 = vpop.f32.mrf.mxu0  ;;  %v10442_v33 = vpop.f32.mrf.mxu1 }
 0xf2a   :  { %v10330_v31 = vadd.f32 %v10329_v13, %v10197_v63  ;;  %v10443_v27 = vadd.f32 %v10442_v33, %v10197_v63  ;;  %v10318_v33 = vadd.f32 %v10317_v1, %v10187_v0  ;;  %v10476_v19 = vmax.f32 %v10326_v47, 0.0 }
 0xf2b   :  { %v10331_v22 = vpop.f32.mrf.mxu0  ;;  %v10444_v39 = vpop.f32.mrf.mxu1  ;;  %v10477_v1 = vmax.f32 %v10437_v25, 0.0  ;;  %v10712_v25 = vld [vmem:[%s16925_s27 + $0x8] sm:$0xff] }
 0xf2c   :  { %v10332_v23 = vadd.f32 %v10331_v22, %v10197_v63  ;;  %v10445_v14 = vadd.f32 %v10444_v39, %v10197_v63  ;;  %v10433_v22 = vadd.f32 %v10432_v46, %v10187_v0  ;;  %v10479_v9 = vmax.f32 %v10330_v31, 0.0 }
 0xf2d   :  { %v10335_v15 = vpop.f32.mrf.mxu0  ;;  %v10448_v57 = vpop.f32.mrf.mxu1  ;;  %v10312_v46 = vadd.f32 %v16254_v20, %v10182_v58  ;;  %v10471_v20 = vmax.f32 %v10318_v33, 0.0 }
 0xf2e   :  { %v10336_v37 = vadd.f32 %v10335_v15, %v10202_v10  ;;  %v10449_v18 = vadd.f32 %v10448_v57, %v10202_v10  ;;  %v10480_v39 = vmax.f32 %v10332_v23, 0.0  ;;  %v10482_v13 = vmax.f32 %v10445_v14, 0.0 }
 0xf2f   :  { %v10337_v7 = vpop.f32.mrf.mxu0  ;;  %v10450_v52 = vpop.f32.mrf.mxu1  ;;  %v10314_v15 = vadd.f32 %v16258_v21, %v10182_v58  ;;  %v10478_v57 = vmax.f32 %v10439_v28, 0.0 }
 0xf30   :  { %v10338_v44 = vadd.f32 %v10337_v7, %v10202_v10  ;;  %v10451_v36 = vadd.f32 %v10450_v52, %v10202_v10  ;;  %v10483_v61 = vmax.f32 %v10336_v37, 0.0  ;;  %v10485_v41 = vmax.f32 %v10449_v18, 0.0 }
 0xf31   :  { %v10341_v24 = vpop.f32.mrf.mxu0  ;;  %v10454_v29 = vpop.f32.mrf.mxu1  ;;  %v10481_v10 = vmax.f32 %v10443_v27, 0.0  ;;  %v10425_v7 = vadd.f32 %v16256_v35, %v10182_v58  ;;  %v10475_v52 = vmax.f32 %v10324_v62, 0.0  ;;  %v10302_v35 = vadd.f32 %v16242_v17, %v10172_v56  ;;  %v9489_v58 = vld [vmem:[%s16921_s19 + $0x8] sm:$0xff]  ;;  %v10713_v62 = vld [vmem:[%s16925_s27 + $0x10] sm:$0xff]  ;;  %s10816_s19 = sld [smem:[#allocation11 + $0x2]] }
 0xf32   :  { %v10342_v11 = vadd.f32 %v10341_v24, %v10207_v51  ;;  %v10455_v16 = vadd.f32 %v10454_v29, %v10207_v51  ;;  %v10484_v40 = vmax.f32 %v10338_v44, 0.0  ;;  %v10486_v5 = vmax.f32 %v10451_v36, 0.0 }
 0xf33   :  { %v10343_v32 = vpop.f32.mrf.mxu0  ;;  %v10456_v50 = vpop.f32.mrf.mxu1  ;;  %v10474_v24 = vmax.f32 %v10433_v22, 0.0  ;;  %v10467_v44 = vmax.f32 %v10312_v46, 0.0  ;;  %v10492_v18 = vstv %s10815_s16 }
 0xf34   :  { %v10344_v26 = vadd.f32 %v10343_v32, %v10207_v51  ;;  %v10457_v48 = vadd.f32 %v10456_v50, %v10207_v51  ;;  %v10487_v12 = vmax.f32 %v10342_v11, 0.0  ;;  %v10489_v42 = vmax.f32 %v10455_v16, 0.0 }
 0xf35   :  { %v10320_v51 = vadd.f32 %v10319_v30, %v10187_v0  ;;  %v10177_v30 = vpop.permute.xlu1 %10176  ;;  %v10473_v11 = vmax.f32 %v10431_v4, 0.0  ;;  %v10415_v16 = vadd.f32 %v16244_v49, %v10172_v56  ;;  %v10470_v32 = vmax.f32 %v10427_v8, 0.0 }
 0xf36   :  { %v10488_v6 = vmax.f32 %v10344_v26, 0.0  ;;  %v10490_v34 = vmax.f32 %v10457_v48, 0.0  ;;  %v10308_v38 = vadd.f32 %v16250_v3, %v10177_v30  ;;  %v10421_v63 = vadd.f32 %v16252_v60, %v10177_v30 }
 0xf37   :  { %v10472_v21 = vmax.f32 %v10320_v51, 0.0  ;;  %v10306_v29 = vadd.f32 %v16246_v43, %v10177_v30  ;;  %v10419_v59 = vadd.f32 %v16248_v55, %v10177_v30  ;;  %v10468_v3 = vmax.f32 %v10314_v15, 0.0 }
 0xf38   :  { %10512 = vmatprep.subr.mxu0 %v10488_v6  ;;  %10583 = vmatprep.subr.mxu1 %v10490_v34  ;;  %v10300_v60 = vadd.f32 %v16238_v45, %v10172_v56  ;;  %v10413_v50 = vadd.f32 %v16240_v54, %v10172_v56  ;;  %v10469_v43 = vmax.f32 %v10425_v7, 0.0  ;;  %v10464_v55 = vmax.f32 %v10308_v38, 0.0  ;;  %v10491_v54 = vld [vmem:[%s16924_s25] sm:$0x1] }
 0xf39   :  { %10513 = vmatpush1.msra.mxu0 %v10487_v12  ;;  %10584 = vmatpush1.msra.mxu1 %v10489_v42  ;;  %v10466_v36 = vmax.f32 %v10421_v63, 0.0  ;;  %v10463_v26 = vmax.f32 %v10306_v29, 0.0  ;;  %v10465_v17 = vmax.f32 %v10419_v59, 0.0  ;;  %v10460_v49 = vmax.f32 %v10302_v35, 0.0 }
 0xf3a   :  { %10514 = vmatprep.subr.mxu0 %v10484_v40  ;;  %10585 = vmatprep.subr.mxu1 %v10486_v5  ;;  %v10462_v48 = vmax.f32 %v10415_v16, 0.0  ;;  %v10459_v37 = vmax.f32 %v10300_v60, 0.0  ;;  %v10461_v45 = vmax.f32 %v10413_v50, 0.0  ;;  %v10714_v5 = vld [vmem:[%s16925_s27 + $0x18] sm:$0xff]  ;;  %v10698_v46 = vstv %s10816_s19 }
 0xf3b   :  { %10515 = vmatpush1.msra.mxu0 %v10483_v61  ;;  %10586 = vmatpush1.msra.mxu1 %v10485_v41  ;;  %v10711_v61 = vld [vmem:[%s16925_s27] sm:$0xff]  ;;  %v9493_v41 = vpop.permute.xlu1 %9492  ;;  %v10703_v7 = vstv %s10817_s9  ;;  %v10708_v63 = vstv %s10818_s3 }
 0xf3c   :  { %10516 = vmatprep.subr.mxu0 %v10480_v39  ;;  %10587 = vmatprep.subr.mxu1 %v10482_v13  ;;  %v9573_v30 = vadd.f32 %v16180_v53, %v9493_v41 }
 0xf3d   :  { %10517 = vmatpush1.msra.mxu0 %v10479_v9  ;;  %10588 = vmatpush1.msra.mxu1 %v10481_v10 }
 0xf3e   :  { %10518 = vmatprep.subr.mxu0 %v10476_v19  ;;  %10589 = vmatprep.subr.mxu1 %v10478_v57 }
 0xf3f   :  { %10519 = vmatpush1.msra.mxu0 %v10475_v52  ;;  %10590 = vmatpush1.msra.mxu1 %v10477_v1  ;;  %v10699_v1 = vmul.f32 %v10698_v46, %v9573_v30 }
 0xf40   :  { %10520 = vmatprep.subr.mxu0 %v10472_v21  ;;  %10591 = vmatprep.subr.mxu1 %v10474_v24 }
 0xf41   :  { %10521 = vmatpush1.msra.mxu0 %v10471_v20  ;;  %10592 = vmatpush1.msra.mxu1 %v10473_v11 }
 0xf42   :  { %10522 = vmatprep.subr.mxu0 %v10468_v3  ;;  %10593 = vmatprep.subr.mxu1 %v10470_v32 }
 0xf43   :  { %10523 = vmatpush1.msra.mxu0 %v10467_v44  ;;  %10594 = vmatpush1.msra.mxu1 %v10469_v43 }
 0xf44   :  { %10524 = vmatprep.subr.mxu0 %v10464_v55  ;;  %10595 = vmatprep.subr.mxu1 %v10466_v36 }
 0xf45   :  { %10525 = vmatpush1.msra.mxu0 %v10463_v26  ;;  %10596 = vmatpush1.msra.mxu1 %v10465_v17 }
 0xf46   :  { %10526 = vmatprep.subr.mxu0 %v10460_v49  ;;  %10597 = vmatprep.subr.mxu1 %v10462_v48 }
 0xf47   :  { %10527 = vmatpush1.msra.mxu0 %v10459_v37  ;;  %10598 = vmatpush1.msra.mxu1 %v10461_v45 }
 0xf48   :  { %10890 = vmatmul.mubr.msk.f32.vlgmr.msra.gmra.mxu0 %vm312_vm11, %v10491_v54  ;;  %10891 = vmatmul.mubr.msk.f32.vlgmr.msra.gmra.mxu1 %vm312_vm11, %v10491_v54 }
 0xf49   :  { %10948 = vmatprep.subr.mxu0 %v10714_v5 }
 0xf4a   :  { %10949 = vmatpush3.msra.mxu0 %v10714_v5 }
 0xf4b   :  { %10950 = vmatprep.subr.mxu0 %v10713_v62 }
 0xf4c   :  { %10951 = vmatpush3.msra.mxu0 %v10713_v62 }
 0xf4d   :  { %10952 = vmatprep.subr.mxu0 %v10712_v25 }
 0xf4e   :  { %10953 = vmatpush3.msra.mxu0 %v10712_v25 }
 0xf4f   :  { %10954 = vmatprep.subr.mxu0 %v10711_v61 }
 0xf50   :  { %10955 = vmatpush3.msra.mxu0 %v10711_v61 }
0x1008   :  { %v10562_v23 = vpop.f32.mrf.mxu0  ;;  %v10633_v14 = vpop.f32.mrf.mxu1 }
0x1009   :  { %v10563_v6 = vadd.f32 %v10562_v23, %v10492_v18  ;;  %v10634_v34 = vadd.f32 %v10633_v14, %v10492_v18 }
0x100a   :  { %v10564_v0 = vpop.f32.mrf.mxu0  ;;  %v10635_v31 = vpop.f32.mrf.mxu1 }
0x100b   :  { %v10638_v27 = vmax.f32 %v10563_v6, 0.0  ;;  %v10640_v12 = vmax.f32 %v10634_v34, 0.0  ;;  %v10565_v42 = vadd.f32 %v10564_v0, %v10492_v18  ;;  %v10636_v47 = vadd.f32 %v10635_v31, %v10492_v18 }
0x100d   :  { %10642 = vst.msk [vmem:[#allocation10] sm:$0x1] %vm9335_vm2, %v10638_v27  ;;  %10670 = vst.msk [vmem:[#allocation10 + $0x8] sm:$0x1] %vm9335_vm2, %v10640_v12  ;;  %10648 = vrot.lane.b32.xlu0 %v10638_v27, %s16506_s5  ;;  %10644 = vrot.lane.b32.xlu1 %v10638_v27, %s16515_s13  ;;  %v10639_v28 = vmax.f32 %v10565_v42, 0.0  ;;  %v10641_v40 = vmax.f32 %v10636_v47, 0.0 }
0x100f   :  { %10656 = vst.msk [vmem:[#allocation10 + $0x4] sm:$0x1] %vm9335_vm2, %v10639_v28  ;;  %10684 = vst.msk [vmem:[#allocation10 + $0xc] sm:$0x1] %vm9335_vm2, %v10641_v40 }
0x1011   :  { %10672 = vrot.lane.b32.xlu0 %v10640_v12, %s16515_s13  ;;  %10652 = vrot.lane.b32.xlu1 %v10638_v27, %s16513_s4 }
0x1015   :  { %10680 = vrot.lane.b32.xlu0 %v10640_v12, %s16513_s4  ;;  %10676 = vrot.lane.b32.xlu1 %v10640_v12, %s16506_s5 }
0x1019   :  { %10658 = vrot.lane.b32.xlu0 %v10639_v28, %s16515_s13  ;;  %10662 = vrot.lane.b32.xlu1 %v10639_v28, %s16506_s5 }
0x101d   :  { %10666 = vrot.lane.b32.xlu0 %v10639_v28, %s16513_s4  ;;  %10686 = vrot.lane.b32.xlu1 %v10641_v40, %s16515_s13 }
0x1021   :  { %10690 = vrot.lane.b32.xlu0 %v10641_v40, %s16506_s5  ;;  %10694 = vrot.lane.b32.xlu1 %v10641_v40, %s16513_s4 }
0x1025   :  { %9497 = vperm.xlu0 %10985, %v9489_v58  }
0x107f   :  { %v10649_v51 = vpop.permute.xlu0 %10648  ;;  %v10645_v22 = vpop.permute.xlu1 %10644 }
0x1080   :  { %10651 = vst.msk [vmem:[#allocation10 + $0x2] sm:$0x1] %vm9335_vm2, %v10649_v51  ;;  %10647 = vst.msk [vmem:[#allocation10 + $0x1] sm:$0x1] %vm9335_vm2, %v10645_v22 }
0x1083   :  { %v10673_v39 = vpop.permute.xlu0 %10672  ;;  %v10653_v13 = vpop.permute.xlu1 %10652 }
0x1084   :  { %10675 = vst.msk [vmem:[#allocation10 + $0x9] sm:$0x1] %vm9335_vm2, %v10673_v39  ;;  %10655 = vst.msk [vmem:[#allocation10 + $0x3] sm:$0x1] %vm9335_vm2, %v10653_v13 }
0x1087   :  { %v10681_v33 = vpop.permute.xlu0 %10680  ;;  %v10677_v4 = vpop.permute.xlu1 %10676 }
0x1088   :  { %10683 = vst.msk [vmem:[#allocation10 + $0xb] sm:$0x1] %vm9335_vm2, %v10681_v33  ;;  %10679 = vst.msk [vmem:[#allocation10 + $0xa] sm:$0x1] %vm9335_vm2, %v10677_v4 }
0x108b   :  { %v10659_v9 = vpop.permute.xlu0 %10658  ;;  %v10663_v10 = vpop.permute.xlu1 %10662 }
0x108c   :  { %10661 = vst.msk [vmem:[#allocation10 + $0x5] sm:$0x1] %vm9335_vm2, %v10659_v9  ;;  %10665 = vst.msk [vmem:[#allocation10 + $0x6] sm:$0x1] %vm9335_vm2, %v10663_v10 }
0x108f   :  { %v10667_v15 = vpop.permute.xlu0 %10666  ;;  %v10687_v8 = vpop.permute.xlu1 %10686 }
0x1090   :  { %10669 = vst.msk [vmem:[#allocation10 + $0x7] sm:$0x1] %vm9335_vm2, %v10667_v15  ;;  %10689 = vst.msk [vmem:[#allocation10 + $0xd] sm:$0x1] %vm9335_vm2, %v10687_v8 }
0x1093   :  { %v10691_v19 = vpop.permute.xlu0 %10690  ;;  %v10695_v57 = vpop.permute.xlu1 %10694 }
0x1094   :  { %10693 = vst.msk [vmem:[#allocation10 + $0xe] sm:$0x1] %vm9335_vm2, %v10691_v19  ;;  %10697 = vst.msk [vmem:[#allocation10 + $0xf] sm:$0x1] %vm9335_vm2, %v10695_v57 }
0x1097   :  { %v10701_v52 = vld [vmem:[#allocation10] sm:$0xff] }
0x1098   :  { %v10704_v38 = vmul.f32 %v10703_v7, %v10701_v52 }
0x109a   :  { %v10706_v21 = vadd.f32 %v10704_v38, %v10699_v1 }
0x109b   :  { %v10702_v29 = vld [vmem:[#allocation10 + $0x8] sm:$0xff] }
0x109c   :  { %v10709_v24 = vadd.f32 %v10708_v63, %v10706_v21  ;;  %v10705_v53 = vmul.f32 %v10703_v7, %v10702_v29 }
0x109e   :  { %10956 = vmatprep.mubr.msk.f32.mxu0 %vm417_vm12, %v10709_v24 }
0x10a0   :  { %v9498_v56 = vpop.permute.xlu0 %9497 }
0x10a1   :  { %v9578_v59 = vadd.f32 %v16178_v2, %v9498_v56 }
0x10a3   :  { %v10700_v20 = vmul.f32 %v10698_v46, %v9578_v59 }
0x10a5   :  { %v10707_v11 = vadd.f32 %v10705_v53, %v10700_v20 }
0x10a7   :  { %v10710_v35 = vadd.f32 %v10708_v63, %v10707_v11 }
0x10a9   :  { %10957 = vmatmul.mubr.msk.f32.vlgmr.msra.gmra.mxu0 %vm417_vm12, %v10710_v35 }
0x1169   :  { %v10958_v16 = vpop.f32.mrf.mxu0 }
0x116a   :  { %10797 = vst.msk [vmem:[#allocation14 + $0x8] sm:$0xff] %vm9602_vm6, %v10958_v16 }
0x116b   :  { %v10787_v3 = vpop.f32.mrf.mxu0 }
0x116c   :  { %10796 = vst.msk [vmem:[#allocation14] sm:$0xff] %vm9602_vm6, %v10787_v3 }
0x116d   :  { %11142 = shalt.err (!%p11139_p9)
}
0x116e   :  { %s11179_s24 = smov 128   ;;  %s11180_s30 = smov 8  }
0x116f   :  { %s16926_s11 = sld [smem:[#allocation84_spill]] }
0x1175   :  { %10809 = dma.vmem_to_hbm [thread:$0]  %s10804_s0, 256, %s16926_s11, [#allocation12], %s11179_s24, %s11179_s24, %s11180_s30  }
0x1176   :  { %11153 = dma.done.wait [#allocation12], 256  }
0x1177   :  { %11154 = vsyncadd [#allocation12], 4294967040 }
0x1178   :  { %10813 = vsyncpa [#allocation12], 1 }
0x1179   :  { %10814 = vsyncpa [#allocation13], 1 }

</bundles_post_ra>
